<compile_context>
chip_gen: v7x
topology: tpu7x:2x2x1
jax: 0.10.0
libtpu: 0.0.40
codegen_flags: <defaults>
</compile_context>

<pallas_src>
import functools

import jax
import jax.numpy as jnp
from jax.experimental import pallas as pl
from jax.experimental.pallas import tpu as pltpu

LANE = 128


def _round_up(x, m):
    return (x + m - 1) // m * m


def _fit_tile(dim, cap, align):
    """Largest tile <= cap that divides round_up(dim, align); never full-extent
    for huge dims (worst case it returns `align`)."""
    d = _round_up(dim, align)
    if d <= cap:
        return d
    t = cap
    while t > align and d % t:
        t //= 2
    return t


def _vmem_limit(est_bytes):
    return int(min(max(est_bytes * 3 // 2 + (2 << 20), 16 << 20), 64 << 20))


# ---------------------------------------------------------------------------
# Tiled matmul + bias kernel (used only for the final fc projection)
# ---------------------------------------------------------------------------
def _matmul_bias_kernel(x_ref, w_ref, b_ref, o_ref, acc_ref):
    k = pl.program_id(2)

    @pl.when(k == 0)
    def _():
        acc_ref[...] = jnp.zeros_like(acc_ref)

    acc_ref[...] += jnp.dot(x_ref[...], w_ref[...],
                            preferred_element_type=jnp.float32)

    @pl.when(k == pl.num_programs(2) - 1)
    def _():
        o_ref[...] = (acc_ref[...] + b_ref[0:1, :]).astype(o_ref.dtype)


def matmul_bias(x, w, b, out_dtype=jnp.float32):
    """x: (M, K); w: (K, N); b: (N,) f32 -> (M, N). bf16 MXU, f32 accumulate."""
    x = x.astype(jnp.bfloat16)
    w = w.astype(jnp.bfloat16)
    M, K = x.shape
    N = w.shape[1]
    tm = _fit_tile(M, 256, 8)
    tk = _fit_tile(K, 512, 128)
    tn = _fit_tile(N, 256, 128)
    Mp, Kp, Np = _round_up(M, tm), _round_up(K, tk), _round_up(N, tn)
    if (Mp, Kp) != (M, K):
        x = jnp.pad(x, ((0, Mp - M), (0, Kp - K)))
    if (Kp, Np) != (K, N):
        w = jnp.pad(w, ((0, Kp - K), (0, Np - N)))
    # Sublane-8 bias tile (avoids masked 1-row loads in the epilogue).
    b8 = jnp.broadcast_to(
        jnp.pad(b.reshape(1, -1).astype(jnp.float32), ((0, 0), (0, Np - N))),
        (8, Np))

    grid = (Mp // tm, Np // tn, Kp // tk)
    out_bytes = jnp.dtype(out_dtype).itemsize
    est = 2 * (tm * tk * 2 + tk * tn * 2 + 8 * tn * 4 + tm * tn * out_bytes)
    est += tm * tn * 4
    cost = pl.CostEstimate(flops=2 * Mp * Np * Kp, transcendentals=0,
                           bytes_accessed=2 * Mp * Kp + 2 * Kp * Np
                           + out_bytes * Mp * Np)
    out = pl.pallas_call(
        _matmul_bias_kernel,
        out_shape=jax.ShapeDtypeStruct((Mp, Np), out_dtype),
        grid_spec=pltpu.PrefetchScalarGridSpec(
            num_scalar_prefetch=0, grid=grid,
            in_specs=[pl.BlockSpec((tm, tk), lambda i, j, k: (i, k)),
                      pl.BlockSpec((tk, tn), lambda i, j, k: (k, j)),
                      pl.BlockSpec((8, tn), lambda i, j, k: (0, j))],
            out_specs=pl.BlockSpec((tm, tn), lambda i, j, k: (i, j)),
            scratch_shapes=[pltpu.VMEM((tm, tn), jnp.float32)]),
        compiler_params=pltpu.CompilerParams(
            dimension_semantics=("parallel", "parallel", "arbitrary"),
            vmem_limit_bytes=_vmem_limit(est)),
        cost_estimate=cost,
    )(x, w, b8)
    if (Mp, Np) != (M, N):
        out = out[:M, :N]
    return out


# ---------------------------------------------------------------------------
# Recurrent kernels: fused input projection + time-blocked recurrence
# ---------------------------------------------------------------------------
def _lstm_gates(gates, c, hp):
    """PyTorch gate order i, f, g, o; 128-aligned slices (hp is a 128-mult)."""
    i_g = jax.nn.sigmoid(gates[:, 0 * hp:1 * hp])
    f_g = jax.nn.sigmoid(gates[:, 1 * hp:2 * hp])
    g_g = jnp.tanh(gates[:, 2 * hp:3 * hp])
    o_g = jax.nn.sigmoid(gates[:, 3 * hp:4 * hp])
    c_new = f_g * c + i_g * g_g
    h_new = o_g * jnp.tanh(c_new)
    return h_new, c_new


def _bilstm_kernel(lens_ref, x_ref, wih_ref, whh_ref, b_ref,
                   y_ref, hT_ref, cT_ref,
                   h_sc, c_sc, gx_sc, *, t_blk, batch, hidden_p):
    """One direction (grid axis 0) of one encoder layer over one time block.

    Packed-sequence semantics: positions t >= len keep the previous state and
    emit zeros in y (so the reverse direction effectively starts at len-1).
    The streamed x / y block for the backward direction is the time-reversed
    block (handled by the index_map); within the block we iterate in reverse.
    """
    d = pl.program_id(0)          # 0 = forward, 1 = backward
    tb = pl.program_id(1)
    nb = pl.num_programs(1)
    hp, B = hidden_p, batch

    @pl.when(tb == 0)
    def _():
        h_sc[...] = jnp.zeros_like(h_sc)
        c_sc[...] = jnp.zeros_like(c_sc)

    # Fused input projection for the whole time block (one MXU matmul,
    # M = t_blk * B) into VMEM scratch; bias folded in once per block.
    gx_sc[...] = (jnp.dot(x_ref[...], wih_ref[0],
                          preferred_element_type=jnp.float32) + b_ref[0])

    lens = lens_ref[...]                         # (B, 1) int32
    whh = whh_ref[0]                             # (hp, 4hp) bf16
    # Global time of local index 0 of the block actually streamed.
    t0 = (tb + d * (nb - 1 - 2 * tb)) * t_blk

    def step(i, carry):
        local = i + d * (t_blk - 1 - 2 * i)      # fwd: i ; bwd: t_blk-1-i
        t = t0 + local
        row = pl.multiple_of(local * B, B)
        gates = gx_sc[pl.ds(row, B), :] + jnp.dot(
            h_sc[...].astype(jnp.bfloat16), whh,
            preferred_element_type=jnp.float32)
        h_new, c_new = _lstm_gates(gates, c_sc[...], hp)
        valid = t < lens                         # (B, 1)
        h_sc[...] = jnp.where(valid, h_new, h_sc[...])
        c_sc[...] = jnp.where(valid, c_new, c_sc[...])
        # pad_packed_sequence semantics: zeros at padded positions of y.
        y_ref[pl.ds(row, B), :] = jnp.where(valid, h_new, 0.0).astype(y_ref.dtype)
        return carry

    jax.lax.fori_loop(0, t_blk, step, 0, unroll=True)

    @pl.when(tb == nb - 1)
    def _():
        hT_ref[...] = h_sc[...][None]
        cT_ref[...] = c_sc[...][None]


def bilstm_layer(x2d, lens, wih, whh, b, *, batch, t_blk, hidden_p):
    """x2d: (T*B, Din) bf16 -> y2d: (T*B, 2*Hp) bf16, hT/cT: (2, B, Hp) f32."""
    B, hp = batch, hidden_p
    TB, Din = x2d.shape
    blk = t_blk * B
    nb = TB // blk

    def t_idx(d, tb):
        return tb + d * (nb - 1 - 2 * tb)        # fwd: tb ; bwd: nb-1-tb

    est = 2 * (B * 4 + blk * Din * 2 + Din * 4 * hp * 2 + hp * 4 * hp * 2
               + 4 * hp * 4 + blk * hp * 2 + 2 * B * hp * 4)
    est += 2 * B * hp * 4 + blk * 4 * hp * 4

    kernel = functools.partial(_bilstm_kernel, t_blk=t_blk, batch=B,
                               hidden_p=hp)
    return pl.pallas_call(
        kernel,
        out_shape=(jax.ShapeDtypeStruct((TB, 2 * hp), jnp.bfloat16),
                   jax.ShapeDtypeStruct((2, B, hp), jnp.float32),
                   jax.ShapeDtypeStruct((2, B, hp), jnp.float32)),
        grid_spec=pltpu.PrefetchScalarGridSpec(
            num_scalar_prefetch=0,
            grid=(2, nb),
            in_specs=[
                pl.BlockSpec((B, 1), lambda d, tb: (0, 0)),                 # lens
                pl.BlockSpec((blk, Din), lambda d, tb: (t_idx(d, tb), 0)),  # x
                pl.BlockSpec((1, Din, 4 * hp), lambda d, tb: (d, 0, 0)),    # W_ih
                pl.BlockSpec((1, hp, 4 * hp), lambda d, tb: (d, 0, 0)),     # W_hh
                pl.BlockSpec((1, 1, 4 * hp), lambda d, tb: (d, 0, 0)),      # bias
            ],
            out_specs=(
                pl.BlockSpec((blk, hp), lambda d, tb: (t_idx(d, tb), d)),   # y
                pl.BlockSpec((1, B, hp), lambda d, tb: (d, 0, 0)),          # hT
                pl.BlockSpec((1, B, hp), lambda d, tb: (d, 0, 0)),          # cT
            ),
            scratch_shapes=[pltpu.VMEM((B, hp), jnp.float32),
                            pltpu.VMEM((B, hp), jnp.float32),
                            pltpu.VMEM((blk, 4 * hp), jnp.float32)]),
        compiler_params=pltpu.CompilerParams(
            dimension_semantics=("parallel", "arbitrary"),
            vmem_limit_bytes=_vmem_limit(est)),
    )(lens, x2d, wih, whh, b)


def _lstm_kernel(x_ref, wih_ref, whh_ref, b_ref, h0_ref, c0_ref, y_ref,
                 h_sc, c_sc, gx_sc, *, t_blk, batch, hidden_p):
    """One decoder layer over one time block (no packing -> no masking)."""
    tb = pl.program_id(0)
    hp, B = hidden_p, batch

    @pl.when(tb == 0)
    def _():
        h_sc[...] = h0_ref[...]
        c_sc[...] = c0_ref[...]

    gx_sc[...] = (jnp.dot(x_ref[...], wih_ref[...],
                          preferred_element_type=jnp.float32) + b_ref[...])
    whh = whh_ref[...]

    def step(i, carry):
        row = pl.multiple_of(i * B, B)
        gates = gx_sc[pl.ds(row, B), :] + jnp.dot(
            h_sc[...].astype(jnp.bfloat16), whh,
            preferred_element_type=jnp.float32)
        h_new, c_new = _lstm_gates(gates, c_sc[...], hp)
        h_sc[...] = h_new
        c_sc[...] = c_new
        y_ref[pl.ds(row, B), :] = h_new.astype(y_ref.dtype)
        return carry

    jax.lax.fori_loop(0, t_blk, step, 0, unroll=True)


def lstm_layer_uni(x2d, wih, whh, b, h0, c0, *, batch, t_blk, hidden_p):
    """x2d: (T*B, Din) bf16 -> y2d: (T*B, Hdp) bf16."""
    B, hp = batch, hidden_p
    TB, Din = x2d.shape
    blk = t_blk * B
    nb = TB // blk

    est = 2 * (blk * Din * 2 + Din * 4 * hp * 2 + hp * 4 * hp * 2
               + 4 * hp * 4 + 2 * B * hp * 4 + blk * hp * 2)
    est += 2 * B * hp * 4 + blk * 4 * hp * 4

    kernel = functools.partial(_lstm_kernel, t_blk=t_blk, batch=B, hidden_p=hp)
    return pl.pallas_call(
        kernel,
        out_shape=jax.ShapeDtypeStruct((TB, hp), jnp.bfloat16),
        grid_spec=pltpu.PrefetchScalarGridSpec(
            num_scalar_prefetch=0,
            grid=(nb,),
            in_specs=[
                pl.BlockSpec((blk, Din), lambda tb: (tb, 0)),       # x
                pl.BlockSpec((Din, 4 * hp), lambda tb: (0, 0)),     # W_ih
                pl.BlockSpec((hp, 4 * hp), lambda tb: (0, 0)),      # W_hh
                pl.BlockSpec((1, 4 * hp), lambda tb: (0, 0)),       # bias
                pl.BlockSpec((B, hp), lambda tb: (0, 0)),           # h0
                pl.BlockSpec((B, hp), lambda tb: (0, 0)),           # c0
            ],
            out_specs=pl.BlockSpec((blk, hp), lambda tb: (tb, 0)),
            scratch_shapes=[pltpu.VMEM((B, hp), jnp.float32),
                            pltpu.VMEM((B, hp), jnp.float32),
                            pltpu.VMEM((blk, 4 * hp), jnp.float32)]),
        compiler_params=pltpu.CompilerParams(
            dimension_semantics=("arbitrary",),
            vmem_limit_bytes=_vmem_limit(est)),
    )(x2d, wih, whh, b, h0, c0)


# ---------------------------------------------------------------------------
# Parameter init (PyTorch-shaped weights, then padded/transposed for kernels)
# ---------------------------------------------------------------------------
def _uniform(key, shape, bound):
    return jax.random.uniform(key, shape, jnp.float32, -bound, bound)


def _pad_gate_cols(m, h, hp):
    """(..., 4h) -> (..., 4hp): zero-pad each of the 4 gate blocks to hp."""
    rows = m.shape[0]
    m4 = m.reshape(rows, 4, h)
    m4 = jnp.pad(m4, ((0, 0), (0, 0), (0, hp - h)))
    return m4.reshape(rows, 4 * hp)


def _scatter_rows(m, row_idx, rows_p):
    out = jnp.zeros((rows_p, m.shape[1]), m.dtype)
    return out.at[row_idx].set(m)


def _lstm_dir_params(keys, in_dim, h, hp, row_idx, rows_p):
    """One LSTM direction: (W_ih^T, W_hh^T, bias) padded for the kernels."""
    bound = 1.0 / float(h) ** 0.5
    w_ih = _uniform(next(keys), (4 * h, in_dim), bound)   # PyTorch layout
    w_hh = _uniform(next(keys), (4 * h, h), bound)
    b_ih = _uniform(next(keys), (4 * h,), bound)
    b_hh = _uniform(next(keys), (4 * h,), bound)
    wih_t = _scatter_rows(_pad_gate_cols(w_ih.T, h, hp), row_idx, rows_p)
    whh_t = _scatter_rows(_pad_gate_cols(w_hh.T, h, hp), jnp.arange(h), hp)
    b = _pad_gate_cols((b_ih + b_hh)[None, :], h, hp)     # both biases folded
    return wih_t.astype(jnp.bfloat16), whh_t.astype(jnp.bfloat16), b


def init_params(key, vocab_size, emb_dim, hidden):
    H = hidden
    Hp = _round_up(H, LANE)
    Hd = 2 * H
    Hdp = _round_up(Hd, LANE)
    Ep = _round_up(emb_dim, LANE)
    Vp = _round_up(vocab_size, LANE)
    cfg = {"H": H, "Hp": Hp, "Hd": Hd, "Hdp": Hdp, "Ep": Ep,
           "V": vocab_size, "Vp": Vp}

    keys = iter(jax.random.split(key, 64))
    params = {}

    emb = jax.random.normal(next(keys), (vocab_size, emb_dim), jnp.float32)
    params["embedding"] = jnp.pad(
        emb, ((0, 0), (0, Ep - emb_dim))).astype(jnp.bfloat16)

    # Encoder: 2 layers, bidirectional, per-direction hidden H (padded Hp).
    enc = []
    for layer in range(2):
        if layer == 0:
            in_dim, row_idx, rows_p = emb_dim, jnp.arange(emb_dim), Ep
        else:
            in_dim = 2 * H
            row_idx = jnp.concatenate([jnp.arange(H), Hp + jnp.arange(H)])
            rows_p = 2 * Hp
        wih_f, whh_f, b_f = _lstm_dir_params(keys, in_dim, H, Hp, row_idx, rows_p)
        wih_b, whh_b, b_b = _lstm_dir_params(keys, in_dim, H, Hp, row_idx, rows_p)
        enc.append({"wih": jnp.stack([wih_f, wih_b]),      # (2, rows_p, 4Hp)
                    "whh": jnp.stack([whh_f, whh_b]),      # (2, Hp, 4Hp)
                    "b": jnp.stack([b_f, b_b])})           # (2, 1, 4Hp) f32
    params["enc"] = enc

    # Decoder: 2 layers, unidirectional, hidden 2H (padded Hdp).
    dec = []
    for layer in range(2):
        if layer == 0:
            in_dim, row_idx, rows_p = emb_dim, jnp.arange(emb_dim), Ep
        else:
            in_dim, row_idx, rows_p = Hd, jnp.arange(Hd), Hdp
        wih, whh, b = _lstm_dir_params(keys, in_dim, Hd, Hdp, row_idx, rows_p)
        dec.append({"wih": wih, "whh": whh, "b": b})
    params["dec"] = dec

    # fc: Linear(2H -> vocab), padded to (Hdp, Vp).
    bound = 1.0 / float(Hd) ** 0.5
    fc_w = _uniform(next(keys), (vocab_size, Hd), bound)
    fc_b = _uniform(next(keys), (vocab_size,), bound)
    fc_w_t = jnp.zeros((Hdp, Vp), jnp.float32).at[:Hd, :vocab_size].set(fc_w.T)
    params["fc_w_t"] = fc_w_t.astype(jnp.bfloat16)
    params["fc_b"] = jnp.pad(fc_b, (0, Vp - vocab_size))
    return params, cfg


# ---------------------------------------------------------------------------
# Forward pass (mirrors Seq2seq.forward)
# ---------------------------------------------------------------------------
def seq2seq_forward(params, src, trg, src_lens, cfg):
    H, Hp, Hd, Hdp = cfg["H"], cfg["Hp"], cfg["Hd"], cfg["Hdp"]
    Ts, B = src.shape
    Tt = trg.shape[0]

    Bp = _round_up(B, 16)                       # bf16 sublane pack
    tbs = Ts if Ts <= 16 else 16                # bounded unroll per time block
    tbt = Tt if Tt <= 16 else 16
    Tsp, Ttp = _round_up(Ts, tbs), _round_up(Tt, tbt)

    emb = params["embedding"]                   # (V, Ep) bf16
    # TODO(synk): embedding row-gather stays in XLA (jnp.take); fusing it into
    # the first recurrent kernel via scalar-prefetch/Element indexing is the
    # remaining HBM-traffic win.
    src_emb = jnp.take(emb, src, axis=0)        # (Ts, B, Ep) bf16
    trg_emb = jnp.take(emb, trg, axis=0)        # (Tt, B, Ep) bf16
    src_emb = jnp.pad(src_emb, ((0, Tsp - Ts), (0, Bp - B), (0, 0)))
    trg_emb = jnp.pad(trg_emb, ((0, Ttp - Tt), (0, Bp - B), (0, 0)))
    # Padded batch rows get len=0 -> their encoder state stays zero.
    lens = jnp.pad(src_lens.astype(jnp.int32), (0, Bp - B)).reshape(Bp, 1)

    # ---- encoder: 2-layer bidirectional LSTM over packed src ----
    layer_in = src_emb.reshape(Tsp * Bp, -1)
    enc_states = []
    for layer in range(2):
        p = params["enc"][layer]
        y, hT, cT = bilstm_layer(layer_in, lens, p["wih"], p["whh"], p["b"],
                                 batch=Bp, t_blk=tbs, hidden_p=Hp)
        enc_states.append((hT, cT))
        layer_in = y                            # (Tsp*Bp, 2Hp) bf16

    # Decoder initial states: concat fwd/bwd per encoder layer -> (B, 2H),
    # then zero-pad to the decoder's padded hidden width.
    dec_h0, dec_c0 = [], []
    for layer in range(2):
        hT, cT = enc_states[layer]
        h = jnp.concatenate([hT[0, :, :H], hT[1, :, :H]], axis=-1)
        c = jnp.concatenate([cT[0, :, :H], cT[1, :, :H]], axis=-1)
        dec_h0.append(jnp.pad(h, ((0, 0), (0, Hdp - Hd))))
        dec_c0.append(jnp.pad(c, ((0, 0), (0, Hdp - Hd))))

    # ---- decoder: 2-layer unidirectional LSTM (hidden 2H), teacher forcing ----
    layer_in = trg_emb.reshape(Ttp * Bp, -1)
    for layer in range(2):
        p = params["dec"][layer]
        layer_in = lstm_layer_uni(layer_in, p["wih"], p["whh"], p["b"],
                                  dec_h0[layer], dec_c0[layer],
                                  batch=Bp, t_blk=tbt, hidden_p=Hdp)

    # ---- fc projection to vocab (tiled matmul, padded lanes sliced back) ----
    out = matmul_bias(layer_in, params["fc_w_t"], params["fc_b"],
                      out_dtype=jnp.float32)    # (Ttp*Bp, Vp)
    out = out.reshape(Ttp, Bp, -1)[:Tt, :B, :cfg["V"]]
    return out                                  # (Tt, B, vocab)


# ---------------------------------------------------------------------------
if __name__ == "__main__":
    VOCAB, EMB, HIDDEN = 50, 16, 32
    T_SRC, T_TRG, BATCH = 8, 8, 2

    key = jax.random.PRNGKey(0)
    k_params, k_src, k_trg = jax.random.split(key, 3)

    params, cfg = init_params(k_params, VOCAB, EMB, HIDDEN)
    src = jax.random.randint(k_src, (T_SRC, BATCH), 0, VOCAB, dtype=jnp.int32)
    trg = jax.random.randint(k_trg, (T_TRG, BATCH), 0, VOCAB, dtype=jnp.int32)
    # pack_padded_sequence expects descending lengths.
    src_lens = jnp.array([T_SRC, T_SRC - 2], dtype=jnp.int32)

    fwd = jax.jit(functools.partial(seq2seq_forward, cfg=cfg))
    out = fwd(params, src, trg, src_lens)
    out = jax.block_until_ready(out)
    assert out.shape == (T_TRG, BATCH, VOCAB), out.shape
    assert bool(jnp.all(jnp.isfinite(out)))
    print("KERNEL_OK")
</pallas_src>

<mosaic_0001>
module attributes {stable_mosaic.version = 11 : i64} {
  func.func @_matmul_bias_kernel(%arg0: i32, %arg1: i32, %arg2: i32, %arg3: memref<128x128xbf16, #tpu.memory_space<vmem>>, %arg4: memref<128x128xbf16, #tpu.memory_space<vmem>>, %arg5: memref<8x128xf32, #tpu.memory_space<vmem>>, %arg6: memref<128x128xf32, #tpu.memory_space<vmem>>, %arg7: memref<128x128xf32, #tpu.memory_space<vmem>>) attributes {dimension_semantics = [#tpu.dimension_semantics<parallel>, #tpu.dimension_semantics<parallel>, #tpu.dimension_semantics<arbitrary>], iteration_bounds = array<i64: 1, 1, 1>, scalar_prefetch = 0 : i64, scratch_operands = 1 : i64, tpu.core_type = #tpu.core_type<tc>, window_params = [{transform_indices = @transform_0, window_bounds = array<i64: 128, 128>}, {transform_indices = @transform_1, window_bounds = array<i64: 128, 128>}, {transform_indices = @transform_2, window_bounds = array<i64: 8, 128>}, {transform_indices = @transform_3, window_bounds = array<i64: 128, 128>}]} {
    %c0_i32 = arith.constant 0 : i32
    %0 = arith.cmpi eq, %arg2, %c0_i32 : i32
    %1 = arith.extui %0 : i1 to i32
    %c0_i32_0 = arith.constant 0 : i32
    %2 = arith.cmpi ne, %1, %c0_i32_0 : i32
    scf.if %2 {
      %cst_10 = arith.constant 0.000000e+00 : f32
      %12 = vector.broadcast %cst_10 : f32 to vector<128x128xf32>
      %c0_11 = arith.constant 0 : index
      %c0_12 = arith.constant 0 : index
      %13 = vector.load %arg7[%c0_11, %c0_12] : memref<128x128xf32, #tpu.memory_space<vmem>>, vector<128x128xf32>
      tpu.vector_store %arg7[%c0_11, %c0_12], %12 {strides = array<i32>} : memref<128x128xf32, #tpu.memory_space<vmem>>, vector<128x128xf32>,
    } else {
    }
    %c0 = arith.constant 0 : index
    %c0_1 = arith.constant 0 : index
    %3 = vector.load %arg7[%c0, %c0_1] : memref<128x128xf32, #tpu.memory_space<vmem>>, vector<128x128xf32>
    %c0_2 = arith.constant 0 : index
    %c0_3 = arith.constant 0 : index
    %4 = vector.load %arg3[%c0_2, %c0_3] : memref<128x128xbf16, #tpu.memory_space<vmem>>, vector<128x128xbf16>
    %c0_4 = arith.constant 0 : index
    %c0_5 = arith.constant 0 : index
    %5 = vector.load %arg4[%c0_4, %c0_5] : memref<128x128xbf16, #tpu.memory_space<vmem>>, vector<128x128xbf16>
    %cst = arith.constant dense<0.000000e+00> : vector<128x128xf32>
    %6 = tpu.matmul %4, %5, %cst {dimension_numbers = #tpu.dot_dimension_numbers<[1], [0], [0], [1], [0, 0, 1, 1], [], []>} : vector<128x128xbf16>, vector<128x128xbf16>, vector<128x128xf32> -> vector<128x128xf32>
    %7 = arith.addf %3, %6 : vector<128x128xf32>
    %c0_6 = arith.constant 0 : index
    %c0_7 = arith.constant 0 : index
    %8 = vector.load %arg7[%c0_6, %c0_7] : memref<128x128xf32, #tpu.memory_space<vmem>>, vector<128x128xf32>
    tpu.vector_store %arg7[%c0_6, %c0_7], %7 {strides = array<i32>} : memref<128x128xf32, #tpu.memory_space<vmem>>, vector<128x128xf32>,
    %c0_i32_8 = arith.constant 0 : i32
    %9 = arith.cmpi eq, %arg2, %c0_i32_8 : i32
    %10 = arith.extui %9 : i1 to i32
    %c0_i32_9 = arith.constant 0 : i32
    %11 = arith.cmpi ne, %10, %c0_i32_9 : i32
    scf.if %11 {
      %c0_10 = arith.constant 0 : index
      %c0_11 = arith.constant 0 : index
      %12 = vector.load %arg7[%c0_10, %c0_11] : memref<128x128xf32, #tpu.memory_space<vmem>>, vector<128x128xf32>
      %c0_12 = arith.constant 0 : index
      %c0_13 = arith.constant 0 : index
      %13 = vector.load %arg5[%c0_12, %c0_13] : memref<8x128xf32, #tpu.memory_space<vmem>>, vector<1x128xf32>
      %14 = vector.broadcast %13 : vector<1x128xf32> to vector<128x128xf32>
      %15 = arith.addf %12, %14 : vector<128x128xf32>
      %c0_14 = arith.constant 0 : index
      %c0_15 = arith.constant 0 : index
      %16 = vector.load %arg6[%c0_14, %c0_15] : memref<128x128xf32, #tpu.memory_space<vmem>>, vector<128x128xf32>
      tpu.vector_store %arg6[%c0_14, %c0_15], %15 {strides = array<i32>} : memref<128x128xf32, #tpu.memory_space<vmem>>, vector<128x128xf32>,
    } else {
    }
    return
  }
  func.func @transform_0(%arg0: i32, %arg1: i32, %arg2: i32) -> (i32, i32) {
    %c0_i32 = arith.constant 0 : i32
    return %arg0, %arg2 : i32, i32
  }
  func.func @transform_1(%arg0: i32, %arg1: i32, %arg2: i32) -> (i32, i32) {
    %c0_i32 = arith.constant 0 : i32
    return %arg2, %arg1 : i32, i32
  }
  func.func @transform_2(%arg0: i32, %arg1: i32, %arg2: i32) -> (i32, i32) {
    %c0_i32 = arith.constant 0 : i32
    %c0_i32_0 = arith.constant 0 : i32
    return %c0_i32, %arg1 : i32, i32
  }
  func.func @transform_3(%arg0: i32, %arg1: i32, %arg2: i32) -> (i32, i32) {
    %c0_i32 = arith.constant 0 : i32
    return %arg0, %arg1 : i32, i32
  }
}

module attributes {stable_mosaic.version = 11 : i64} {
  func.func @_lstm_kernel(%arg0: i32, %arg1: memref<128x128xbf16, #tpu.memory_space<vmem>>, %arg2: memref<128x512xbf16, #tpu.memory_space<vmem>>, %arg3: memref<128x512xbf16, #tpu.memory_space<vmem>>, %arg4: memref<1x512xf32, #tpu.memory_space<vmem>>, %arg5: memref<16x128xf32, #tpu.memory_space<vmem>>, %arg6: memref<16x128xf32, #tpu.memory_space<vmem>>, %arg7: memref<128x128xbf16, #tpu.memory_space<vmem>>, %arg8: memref<16x128xf32, #tpu.memory_space<vmem>>, %arg9: memref<16x128xf32, #tpu.memory_space<vmem>>, %arg10: memref<128x512xf32, #tpu.memory_space<vmem>>) attributes {dimension_semantics = [#tpu.dimension_semantics<arbitrary>], iteration_bounds = array<i64: 1>, scalar_prefetch = 0 : i64, scratch_operands = 3 : i64, tpu.core_type = #tpu.core_type<tc>, window_params = [{transform_indices = @transform_0, window_bounds = array<i64: 128, 128>}, {pipeline_mode = #tpu.pipeline_mode<synchronous>, transform_indices = @transform_1, window_bounds = array<i64: 128, 512>}, {pipeline_mode = #tpu.pipeline_mode<synchronous>, transform_indices = @transform_2, window_bounds = array<i64: 128, 512>}, {pipeline_mode = #tpu.pipeline_mode<synchronous>, transform_indices = @transform_3, window_bounds = array<i64: 1, 512>}, {pipeline_mode = #tpu.pipeline_mode<synchronous>, transform_indices = @transform_4, window_bounds = array<i64: 16, 128>}, {pipeline_mode = #tpu.pipeline_mode<synchronous>, transform_indices = @transform_5, window_bounds = array<i64: 16, 128>}, {transform_indices = @transform_6, window_bounds = array<i64: 128, 128>}]} {
    %c0_i32 = arith.constant 0 : i32
    %0 = arith.cmpi eq, %arg0, %c0_i32 : i32
    %1 = arith.extui %0 : i1 to i32
    %c0_i32_0 = arith.constant 0 : i32
    %2 = arith.cmpi ne, %1, %c0_i32_0 : i32
    scf.if %2 {
      %c0_130 = arith.constant 0 : index
      %c0_131 = arith.constant 0 : index
      %323 = vector.load %arg5[%c0_130, %c0_131] : memref<16x128xf32, #tpu.memory_space<vmem>>, vector<16x128xf32>
      %c0_132 = arith.constant 0 : index
      %c0_133 = arith.constant 0 : index
      %324 = vector.load %arg8[%c0_132, %c0_133] : memref<16x128xf32, #tpu.memory_space<vmem>>, vector<16x128xf32>
      tpu.vector_store %arg8[%c0_132, %c0_133], %323 {strides = array<i32>} : memref<16x128xf32, #tpu.memory_space<vmem>>, vector<16x128xf32>,
      %c0_134 = arith.constant 0 : index
      %c0_135 = arith.constant 0 : index
      %325 = vector.load %arg6[%c0_134, %c0_135] : memref<16x128xf32, #tpu.memory_space<vmem>>, vector<16x128xf32>
      %c0_136 = arith.constant 0 : index
      %c0_137 = arith.constant 0 : index
      %326 = vector.load %arg9[%c0_136, %c0_137] : memref<16x128xf32, #tpu.memory_space<vmem>>, vector<16x128xf32>
      tpu.vector_store %arg9[%c0_136, %c0_137], %325 {strides = array<i32>} : memref<16x128xf32, #tpu.memory_space<vmem>>, vector<16x128xf32>,
    } else {
    }
    %c0 = arith.constant 0 : index
    %c0_1 = arith.constant 0 : index
    %3 = vector.load %arg1[%c0, %c0_1] : memref<128x128xbf16, #tpu.memory_space<vmem>>, vector<128x128xbf16>
    %c0_2 = arith.constant 0 : index
    %c0_3 = arith.constant 0 : index
    %4 = vector.load %arg2[%c0_2, %c0_3] : memref<128x512xbf16, #tpu.memory_space<vmem>>, vector<128x512xbf16>
    %cst = arith.constant dense<0.000000e+00> : vector<128x512xf32>
    %5 = tpu.matmul %3, %4, %cst {dimension_numbers = #tpu.dot_dimension_numbers<[1], [0], [0], [1], [0, 0, 1, 1], [], []>} : vector<128x128xbf16>, vector<128x512xbf16>, vector<128x512xf32> -> vector<128x512xf32>
    %c0_4 = arith.constant 0 : index
    %c0_5 = arith.constant 0 : index
    %6 = vector.load %arg4[%c0_4, %c0_5] : memref<1x512xf32, #tpu.memory_space<vmem>>, vector<1x512xf32>
    %7 = vector.broadcast %6 : vector<1x512xf32> to vector<128x512xf32>
    %8 = arith.addf %5, %7 : vector<128x512xf32>
    %c0_6 = arith.constant 0 : index
    %c0_7 = arith.constant 0 : index
    %9 = vector.load %arg10[%c0_6, %c0_7] : memref<128x512xf32, #tpu.memory_space<vmem>>, vector<128x512xf32>
    tpu.vector_store %arg10[%c0_6, %c0_7], %8 {strides = array<i32>} : memref<128x512xf32, #tpu.memory_space<vmem>>, vector<128x512xf32>,
    %c0_8 = arith.constant 0 : index
    %c0_9 = arith.constant 0 : index
    %10 = vector.load %arg3[%c0_8, %c0_9] : memref<128x512xbf16, #tpu.memory_space<vmem>>, vector<128x512xbf16>
    %c0_i32_10 = arith.constant 0 : i32
    %c16_i32 = arith.constant 16 : i32
    %11 = arith.muli %c0_i32_10, %c16_i32 : i32
    %12 = tpu.assume_multiple %11, 16 : i32
    %13 = arith.index_cast %12 : i32 to index
    %c0_11 = arith.constant 0 : index
    %14 = vector.load %arg10[%13, %c0_11] : memref<128x512xf32, #tpu.memory_space<vmem>>, vector<16x512xf32>
    %c0_12 = arith.constant 0 : index
    %c0_13 = arith.constant 0 : index
    %15 = vector.load %arg8[%c0_12, %c0_13] : memref<16x128xf32, #tpu.memory_space<vmem>>, vector<16x128xf32>
    %16 = arith.truncf %15 : vector<16x128xf32> to vector<16x128xbf16>
    %cst_14 = arith.constant dense<0.000000e+00> : vector<16x512xf32>
    %17 = tpu.matmul %16, %10, %cst_14 {dimension_numbers = #tpu.dot_dimension_numbers<[1], [0], [0], [1], [0, 0, 1, 1], [], []>} : vector<16x128xbf16>, vector<128x512xbf16>, vector<16x512xf32> -> vector<16x512xf32>
    %18 = arith.addf %14, %17 : vector<16x512xf32>
    %c0_15 = arith.constant 0 : index
    %c0_16 = arith.constant 0 : index
    %19 = vector.load %arg9[%c0_15, %c0_16] : memref<16x128xf32, #tpu.memory_space<vmem>>, vector<16x128xf32>
    %20 = vector.extract_strided_slice %18 {offsets = [0, 0], sizes = [16, 128], strides = [1, 1]} : vector<16x512xf32> to vector<16x128xf32>
    %21 = arith.negf %20 : vector<16x128xf32>
    %22 = math.exp %21 : vector<16x128xf32>
    %cst_17 = arith.constant 1.000000e+00 : f32
    %23 = vector.broadcast %cst_17 : f32 to vector<16x128xf32>
    %24 = arith.addf %23, %22 : vector<16x128xf32>
    %25 = arith.divf %23, %24 : vector<16x128xf32>
    %26 = vector.extract_strided_slice %18 {offsets = [0, 128], sizes = [16, 128], strides = [1, 1]} : vector<16x512xf32> to vector<16x128xf32>
    %27 = arith.negf %26 : vector<16x128xf32>
    %28 = math.exp %27 : vector<16x128xf32>
    %cst_18 = arith.constant 1.000000e+00 : f32
    %29 = vector.broadcast %cst_18 : f32 to vector<16x128xf32>
    %30 = arith.addf %29, %28 : vector<16x128xf32>
    %31 = arith.divf %29, %30 : vector<16x128xf32>
    %32 = vector.extract_strided_slice %18 {offsets = [0, 256], sizes = [16, 128], strides = [1, 1]} : vector<16x512xf32> to vector<16x128xf32>
    %33 = math.tanh %32 : vector<16x128xf32>
    %34 = vector.extract_strided_slice %18 {offsets = [0, 384], sizes = [16, 128], strides = [1, 1]} : vector<16x512xf32> to vector<16x128xf32>
    %35 = arith.negf %34 : vector<16x128xf32>
    %36 = math.exp %35 : vector<16x128xf32>
    %cst_19 = arith.constant 1.000000e+00 : f32
    %37 = vector.broadcast %cst_19 : f32 to vector<16x128xf32>
    %38 = arith.addf %37, %36 : vector<16x128xf32>
    %39 = arith.divf %37, %38 : vector<16x128xf32>
    %40 = arith.mulf %31, %19 : vector<16x128xf32>
    %41 = arith.mulf %25, %33 : vector<16x128xf32>
    %42 = arith.addf %40, %41 : vector<16x128xf32>
    %43 = math.tanh %42 : vector<16x128xf32>
    %44 = arith.mulf %39, %43 : vector<16x128xf32>
    %c0_20 = arith.constant 0 : index
    %c0_21 = arith.constant 0 : index
    %45 = vector.load %arg8[%c0_20, %c0_21] : memref<16x128xf32, #tpu.memory_space<vmem>>, vector<16x128xf32>
    tpu.vector_store %arg8[%c0_20, %c0_21], %44 {strides = array<i32>} : memref<16x128xf32, #tpu.memory_space<vmem>>, vector<16x128xf32>,
    %c0_22 = arith.constant 0 : index
    %c0_23 = arith.constant 0 : index
    %46 = vector.load %arg9[%c0_22, %c0_23] : memref<16x128xf32, #tpu.memory_space<vmem>>, vector<16x128xf32>
    tpu.vector_store %arg9[%c0_22, %c0_23], %42 {strides = array<i32>} : memref<16x128xf32, #tpu.memory_space<vmem>>, vector<16x128xf32>,
    %47 = arith.truncf %44 : vector<16x128xf32> to vector<16x128xbf16>
    %48 = arith.index_cast %12 : i32 to index
    %c0_24 = arith.constant 0 : index
    %49 = vector.load %arg7[%48, %c0_24] : memref<128x128xbf16, #tpu.memory_space<vmem>>, vector<16x128xbf16>
    tpu.vector_store %arg7[%48, %c0_24], %47 {strides = array<i32>} : memref<128x128xbf16, #tpu.memory_space<vmem>>, vector<16x128xbf16>,
    %c1_i32 = arith.constant 1 : i32
    %c16_i32_25 = arith.constant 16 : i32
    %50 = arith.muli %c1_i32, %c16_i32_25 : i32
    %51 = tpu.assume_multiple %50, 16 : i32
    %52 = arith.index_cast %51 : i32 to index
    %c0_26 = arith.constant 0 : index
    %53 = vector.load %arg10[%52, %c0_26] : memref<128x512xf32, #tpu.memory_space<vmem>>, vector<16x512xf32>
    %c0_27 = arith.constant 0 : index
    %c0_28 = arith.constant 0 : index
    %54 = vector.load %arg8[%c0_27, %c0_28] : memref<16x128xf32, #tpu.memory_space<vmem>>, vector<16x128xf32>
    %55 = arith.truncf %54 : vector<16x128xf32> to vector<16x128xbf16>
    %cst_29 = arith.constant dense<0.000000e+00> : vector<16x512xf32>
    %56 = tpu.matmul %55, %10, %cst_29 {dimension_numbers = #tpu.dot_dimension_numbers<[1], [0], [0], [1], [0, 0, 1, 1], [], []>} : vector<16x128xbf16>, vector<128x512xbf16>, vector<16x512xf32> -> vector<16x512xf32>
    %57 = arith.addf %53, %56 : vector<16x512xf32>
    %c0_30 = arith.constant 0 : index
    %c0_31 = arith.constant 0 : index
    %58 = vector.load %arg9[%c0_30, %c0_31] : memref<16x128xf32, #tpu.memory_space<vmem>>, vector<16x128xf32>
    %59 = vector.extract_strided_slice %57 {offsets = [0, 0], sizes = [16, 128], strides = [1, 1]} : vector<16x512xf32> to vector<16x128xf32>
    %60 = arith.negf %59 : vector<16x128xf32>
    %61 = math.exp %60 : vector<16x128xf32>
    %cst_32 = arith.constant 1.000000e+00 : f32
    %62 = vector.broadcast %cst_32 : f32 to vector<16x128xf32>
    %63 = arith.addf %62, %61 : vector<16x128xf32>
    %64 = arith.divf %62, %63 : vector<16x128xf32>
    %65 = vector.extract_strided_slice %57 {offsets = [0, 128], sizes = [16, 128], strides = [1, 1]} : vector<16x512xf32> to vector<16x128xf32>
    %66 = arith.negf %65 : vector<16x128xf32>
    %67 = math.exp %66 : vector<16x128xf32>
    %cst_33 = arith.constant 1.000000e+00 : f32
    %68 = vector.broadcast %cst_33 : f32 to vector<16x128xf32>
    %69 = arith.addf %68, %67 : vector<16x128xf32>
    %70 = arith.divf %68, %69 : vector<16x128xf32>
    %71 = vector.extract_strided_slice %57 {offsets = [0, 256], sizes = [16, 128], strides = [1, 1]} : vector<16x512xf32> to vector<16x128xf32>
    %72 = math.tanh %71 : vector<16x128xf32>
    %73 = vector.extract_strided_slice %57 {offsets = [0, 384], sizes = [16, 128], strides = [1, 1]} : vector<16x512xf32> to vector<16x128xf32>
    %74 = arith.negf %73 : vector<16x128xf32>
    %75 = math.exp %74 : vector<16x128xf32>
    %cst_34 = arith.constant 1.000000e+00 : f32
    %76 = vector.broadcast %cst_34 : f32 to vector<16x128xf32>
    %77 = arith.addf %76, %75 : vector<16x128xf32>
    %78 = arith.divf %76, %77 : vector<16x128xf32>
    %79 = arith.mulf %70, %58 : vector<16x128xf32>
    %80 = arith.mulf %64, %72 : vector<16x128xf32>
    %81 = arith.addf %79, %80 : vector<16x128xf32>
    %82 = math.tanh %81 : vector<16x128xf32>
    %83 = arith.mulf %78, %82 : vector<16x128xf32>
    %c0_35 = arith.constant 0 : index
    %c0_36 = arith.constant 0 : index
    %84 = vector.load %arg8[%c0_35, %c0_36] : memref<16x128xf32, #tpu.memory_space<vmem>>, vector<16x128xf32>
    tpu.vector_store %arg8[%c0_35, %c0_36], %83 {strides = array<i32>} : memref<16x128xf32, #tpu.memory_space<vmem>>, vector<16x128xf32>,
    %c0_37 = arith.constant 0 : index
    %c0_38 = arith.constant 0 : index
    %85 = vector.load %arg9[%c0_37, %c0_38] : memref<16x128xf32, #tpu.memory_space<vmem>>, vector<16x128xf32>
    tpu.vector_store %arg9[%c0_37, %c0_38], %81 {strides = array<i32>} : memref<16x128xf32, #tpu.memory_space<vmem>>, vector<16x128xf32>,
    %86 = arith.truncf %83 : vector<16x128xf32> to vector<16x128xbf16>
    %87 = arith.index_cast %51 : i32 to index
    %c0_39 = arith.constant 0 : index
    %88 = vector.load %arg7[%87, %c0_39] : memref<128x128xbf16, #tpu.memory_space<vmem>>, vector<16x128xbf16>
    tpu.vector_store %arg7[%87, %c0_39], %86 {strides = array<i32>} : memref<128x128xbf16, #tpu.memory_space<vmem>>, vector<16x128xbf16>,
    %c2_i32 = arith.constant 2 : i32
    %c16_i32_40 = arith.constant 16 : i32
    %89 = arith.muli %c2_i32, %c16_i32_40 : i32
    %90 = tpu.assume_multiple %89, 16 : i32
    %91 = arith.index_cast %90 : i32 to index
    %c0_41 = arith.constant 0 : index
    %92 = vector.load %arg10[%91, %c0_41] : memref<128x512xf32, #tpu.memory_space<vmem>>, vector<16x512xf32>
    %c0_42 = arith.constant 0 : index
    %c0_43 = arith.constant 0 : index
    %93 = vector.load %arg8[%c0_42, %c0_43] : memref<16x128xf32, #tpu.memory_space<vmem>>, vector<16x128xf32>
    %94 = arith.truncf %93 : vector<16x128xf32> to vector<16x128xbf16>
    %cst_44 = arith.constant dense<0.000000e+00> : vector<16x512xf32>
    %95 = tpu.matmul %94, %10, %cst_44 {dimension_numbers = #tpu.dot_dimension_numbers<[1], [0], [0], [1], [0, 0, 1, 1], [], []>} : vector<16x128xbf16>, vector<128x512xbf16>, vector<16x512xf32> -> vector<16x512xf32>
    %96 = arith.addf %92, %95 : vector<16x512xf32>
    %c0_45 = arith.constant 0 : index
    %c0_46 = arith.constant 0 : index
    %97 = vector.load %arg9[%c0_45, %c0_46] : memref<16x128xf32, #tpu.memory_space<vmem>>, vector<16x128xf32>
    %98 = vector.extract_strided_slice %96 {offsets = [0, 0], sizes = [16, 128], strides = [1, 1]} : vector<16x512xf32> to vector<16x128xf32>
    %99 = arith.negf %98 : vector<16x128xf32>
    %100 = math.exp %99 : vector<16x128xf32>
    %cst_47 = arith.constant 1.000000e+00 : f32
    %101 = vector.broadcast %cst_47 : f32 to vector<16x128xf32>
    %102 = arith.addf %101, %100 : vector<16x128xf32>
    %103 = arith.divf %101, %102 : vector<16x128xf32>
    %104 = vector.extract_strided_slice %96 {offsets = [0, 128], sizes = [16, 128], strides = [1, 1]} : vector<16x512xf32> to vector<16x128xf32>
    %105 = arith.negf %104 : vector<16x128xf32>
    %106 = math.exp %105 : vector<16x128xf32>
    %cst_48 = arith.constant 1.000000e+00 : f32
    %107 = vector.broadcast %cst_48 : f32 to vector<16x128xf32>
    %108 = arith.addf %107, %106 : vector<16x128xf32>
    %109 = arith.divf %107, %108 : vector<16x128xf32>
    %110 = vector.extract_strided_slice %96 {offsets = [0, 256], sizes = [16, 128], strides = [1, 1]} : vector<16x512xf32> to vector<16x128xf32>
    %111 = math.tanh %110 : vector<16x128xf32>
    %112 = vector.extract_strided_slice %96 {offsets = [0, 384], sizes = [16, 128], strides = [1, 1]} : vector<16x512xf32> to vector<16x128xf32>
    %113 = arith.negf %112 : vector<16x128xf32>
    %114 = math.exp %113 : vector<16x128xf32>
    %cst_49 = arith.constant 1.000000e+00 : f32
    %115 = vector.broadcast %cst_49 : f32 to vector<16x128xf32>
    %116 = arith.addf %115, %114 : vector<16x128xf32>
    %117 = arith.divf %115, %116 : vector<16x128xf32>
    %118 = arith.mulf %109, %97 : vector<16x128xf32>
    %119 = arith.mulf %103, %111 : vector<16x128xf32>
    %120 = arith.addf %118, %119 : vector<16x128xf32>
    %121 = math.tanh %120 : vector<16x128xf32>
    %122 = arith.mulf %117, %121 : vector<16x128xf32>
    %c0_50 = arith.constant 0 : index
    %c0_51 = arith.constant 0 : index
    %123 = vector.load %arg8[%c0_50, %c0_51] : memref<16x128xf32, #tpu.memory_space<vmem>>, vector<16x128xf32>
    tpu.vector_store %arg8[%c0_50, %c0_51], %122 {strides = array<i32>} : memref<16x128xf32, #tpu.memory_space<vmem>>, vector<16x128xf32>,
    %c0_52 = arith.constant 0 : index
    %c0_53 = arith.constant 0 : index
    %124 = vector.load %arg9[%c0_52, %c0_53] : memref<16x128xf32, #tpu.memory_space<vmem>>, vector<16x128xf32>
    tpu.vector_store %arg9[%c0_52, %c0_53], %120 {strides = array<i32>} : memref<16x128xf32, #tpu.memory_space<vmem>>, vector<16x128xf32>,
    %125 = arith.truncf %122 : vector<16x128xf32> to vector<16x128xbf16>
    %126 = arith.index_cast %90 : i32 to index
    %c0_54 = arith.constant 0 : index
    %127 = vector.load %arg7[%126, %c0_54] : memref<128x128xbf16, #tpu.memory_space<vmem>>, vector<16x128xbf16>
    tpu.vector_store %arg7[%126, %c0_54], %125 {strides = array<i32>} : memref<128x128xbf16, #tpu.memory_space<vmem>>, vector<16x128xbf16>,
    %c3_i32 = arith.constant 3 : i32
    %c16_i32_55 = arith.constant 16 : i32
    %128 = arith.muli %c3_i32, %c16_i32_55 : i32
    %129 = tpu.assume_multiple %128, 16 : i32
    %130 = arith.index_cast %129 : i32 to index
    %c0_56 = arith.constant 0 : index
    %131 = vector.load %arg10[%130, %c0_56] : memref<128x512xf32, #tpu.memory_space<vmem>>, vector<16x512xf32>
    %c0_57 = arith.constant 0 : index
    %c0_58 = arith.constant 0 : index
    %132 = vector.load %arg8[%c0_57, %c0_58] : memref<16x128xf32, #tpu.memory_space<vmem>>, vector<16x128xf32>
    %133 = arith.truncf %132 : vector<16x128xf32> to vector<16x128xbf16>
    %cst_59 = arith.constant dense<0.000000e+00> : vector<16x512xf32>
    %134 = tpu.matmul %133, %10, %cst_59 {dimension_numbers = #tpu.dot_dimension_numbers<[1], [0], [0], [1], [0, 0, 1, 1], [], []>} : vector<16x128xbf16>, vector<128x512xbf16>, vector<16x512xf32> -> vector<16x512xf32>
    %135 = arith.addf %131, %134 : vector<16x512xf32>
    %c0_60 = arith.constant 0 : index
    %c0_61 = arith.constant 0 : index
    %136 = vector.load %arg9[%c0_60, %c0_61] : memref<16x128xf32, #tpu.memory_space<vmem>>, vector<16x128xf32>
    %137 = vector.extract_strided_slice %135 {offsets = [0, 0], sizes = [16, 128], strides = [1, 1]} : vector<16x512xf32> to vector<16x128xf32>
    %138 = arith.negf %137 : vector<16x128xf32>
    %139 = math.exp %138 : vector<16x128xf32>
    %cst_62 = arith.constant 1.000000e+00 : f32
    %140 = vector.broadcast %cst_62 : f32 to vector<16x128xf32>
    %141 = arith.addf %140, %139 : vector<16x128xf32>
    %142 = arith.divf %140, %141 : vector<16x128xf32>
    %143 = vector.extract_strided_slice %135 {offsets = [0, 128], sizes = [16, 128], strides = [1, 1]} : vector<16x512xf32> to vector<16x128xf32>
    %144 = arith.negf %143 : vector<16x128xf32>
    %145 = math.exp %144 : vector<16x128xf32>
    %cst_63 = arith.constant 1.000000e+00 : f32
    %146 = vector.broadcast %cst_63 : f32 to vector<16x128xf32>
    %147 = arith.addf %146, %145 : vector<16x128xf32>
    %148 = arith.divf %146, %147 : vector<16x128xf32>
    %149 = vector.extract_strided_slice %135 {offsets = [0, 256], sizes = [16, 128], strides = [1, 1]} : vector<16x512xf32> to vector<16x128xf32>
    %150 = math.tanh %149 : vector<16x128xf32>
    %151 = vector.extract_strided_slice %135 {offsets = [0, 384], sizes = [16, 128], strides = [1, 1]} : vector<16x512xf32> to vector<16x128xf32>
    %152 = arith.negf %151 : vector<16x128xf32>
    %153 = math.exp %152 : vector<16x128xf32>
    %cst_64 = arith.constant 1.000000e+00 : f32
    %154 = vector.broadcast %cst_64 : f32 to vector<16x128xf32>
    %155 = arith.addf %154, %153 : vector<16x128xf32>
    %156 = arith.divf %154, %155 : vector<16x128xf32>
    %157 = arith.mulf %148, %136 : vector<16x128xf32>
    %158 = arith.mulf %142, %150 : vector<16x128xf32>
    %159 = arith.addf %157, %158 : vector<16x128xf32>
    %160 = math.tanh %159 : vector<16x128xf32>
    %161 = arith.mulf %156, %160 : vector<16x128xf32>
    %c0_65 = arith.constant 0 : index
    %c0_66 = arith.constant 0 : index
    %162 = vector.load %arg8[%c0_65, %c0_66] : memref<16x128xf32, #tpu.memory_space<vmem>>, vector<16x128xf32>
    tpu.vector_store %arg8[%c0_65, %c0_66], %161 {strides = array<i32>} : memref<16x128xf32, #tpu.memory_space<vmem>>, vector<16x128xf32>,
    %c0_67 = arith.constant 0 : index
    %c0_68 = arith.constant 0 : index
    %163 = vector.load %arg9[%c0_67, %c0_68] : memref<16x128xf32, #tpu.memory_space<vmem>>, vector<16x128xf32>
    tpu.vector_store %arg9[%c0_67, %c0_68], %159 {strides = array<i32>} : memref<16x128xf32, #tpu.memory_space<vmem>>, vector<16x128xf32>,
    %164 = arith.truncf %161 : vector<16x128xf32> to vector<16x128xbf16>
    %165 = arith.index_cast %129 : i32 to index
    %c0_69 = arith.constant 0 : index
    %166 = vector.load %arg7[%165, %c0_69] : memref<128x128xbf16, #tpu.memory_space<vmem>>, vector<16x128xbf16>
    tpu.vector_store %arg7[%165, %c0_69], %164 {strides = array<i32>} : memref<128x128xbf16, #tpu.memory_space<vmem>>, vector<16x128xbf16>,
    %c4_i32 = arith.constant 4 : i32
    %c16_i32_70 = arith.constant 16 : i32
    %167 = arith.muli %c4_i32, %c16_i32_70 : i32
    %168 = tpu.assume_multiple %167, 16 : i32
    %169 = arith.index_cast %168 : i32 to index
    %c0_71 = arith.constant 0 : index
    %170 = vector.load %arg10[%169, %c0_71] : memref<128x512xf32, #tpu.memory_space<vmem>>, vector<16x512xf32>
    %c0_72 = arith.constant 0 : index
    %c0_73 = arith.constant 0 : index
    %171 = vector.load %arg8[%c0_72, %c0_73] : memref<16x128xf32, #tpu.memory_space<vmem>>, vector<16x128xf32>
    %172 = arith.truncf %171 : vector<16x128xf32> to vector<16x128xbf16>
    %cst_74 = arith.constant dense<0.000000e+00> : vector<16x512xf32>
    %173 = tpu.matmul %172, %10, %cst_74 {dimension_numbers = #tpu.dot_dimension_numbers<[1], [0], [0], [1], [0, 0, 1, 1], [], []>} : vector<16x128xbf16>, vector<128x512xbf16>, vector<16x512xf32> -> vector<16x512xf32>
    %174 = arith.addf %170, %173 : vector<16x512xf32>
    %c0_75 = arith.constant 0 : index
    %c0_76 = arith.constant 0 : index
    %175 = vector.load %arg9[%c0_75, %c0_76] : memref<16x128xf32, #tpu.memory_space<vmem>>, vector<16x128xf32>
    %176 = vector.extract_strided_slice %174 {offsets = [0, 0], sizes = [16, 128], strides = [1, 1]} : vector<16x512xf32> to vector<16x128xf32>
    %177 = arith.negf %176 : vector<16x128xf32>
    %178 = math.exp %177 : vector<16x128xf32>
    %cst_77 = arith.constant 1.000000e+00 : f32
    %179 = vector.broadcast %cst_77 : f32 to vector<16x128xf32>
    %180 = arith.addf %179, %178 : vector<16x128xf32>
    %181 = arith.divf %179, %180 : vector<16x128xf32>
    %182 = vector.extract_strided_slice %174 {offsets = [0, 128], sizes = [16, 128], strides = [1, 1]} : vector<16x512xf32> to vector<16x128xf32>
    %183 = arith.negf %182 : vector<16x128xf32>
    %184 = math.exp %183 : vector<16x128xf32>
    %cst_78 = arith.constant 1.000000e+00 : f32
    %185 = vector.broadcast %cst_78 : f32 to vector<16x128xf32>
    %186 = arith.addf %185, %184 : vector<16x128xf32>
    %187 = arith.divf %185, %186 : vector<16x128xf32>
    %188 = vector.extract_strided_slice %174 {offsets = [0, 256], sizes = [16, 128], strides = [1, 1]} : vector<16x512xf32> to vector<16x128xf32>
    %189 = math.tanh %188 : vector<16x128xf32>
    %190 = vector.extract_strided_slice %174 {offsets = [0, 384], sizes = [16, 128], strides = [1, 1]} : vector<16x512xf32> to vector<16x128xf32>
    %191 = arith.negf %190 : vector<16x128xf32>
    %192 = math.exp %191 : vector<16x128xf32>
    %cst_79 = arith.constant 1.000000e+00 : f32
    %193 = vector.broadcast %cst_79 : f32 to vector<16x128xf32>
    %194 = arith.addf %193, %192 : vector<16x128xf32>
    %195 = arith.divf %193, %194 : vector<16x128xf32>
    %196 = arith.mulf %187, %175 : vector<16x128xf32>
    %197 = arith.mulf %181, %189 : vector<16x128xf32>
    %198 = arith.addf %196, %197 : vector<16x128xf32>
    %199 = math.tanh %198 : vector<16x128xf32>
    %200 = arith.mulf %195, %199 : vector<16x128xf32>
    %c0_80 = arith.constant 0 : index
    %c0_81 = arith.constant 0 : index
    %201 = vector.load %arg8[%c0_80, %c0_81] : memref<16x128xf32, #tpu.memory_space<vmem>>, vector<16x128xf32>
    tpu.vector_store %arg8[%c0_80, %c0_81], %200 {strides = array<i32>} : memref<16x128xf32, #tpu.memory_space<vmem>>, vector<16x128xf32>,
    %c0_82 = arith.constant 0 : index
    %c0_83 = arith.constant 0 : index
    %202 = vector.load %arg9[%c0_82, %c0_83] : memref<16x128xf32, #tpu.memory_space<vmem>>, vector<16x128xf32>
    tpu.vector_store %arg9[%c0_82, %c0_83], %198 {strides = array<i32>} : memref<16x128xf32, #tpu.memory_space<vmem>>, vector<16x128xf32>,
    %203 = arith.truncf %200 : vector<16x128xf32> to vector<16x128xbf16>
    %204 = arith.index_cast %168 : i32 to index
    %c0_84 = arith.constant 0 : index
    %205 = vector.load %arg7[%204, %c0_84] : memref<128x128xbf16, #tpu.memory_space<vmem>>, vector<16x128xbf16>
    tpu.vector_store %arg7[%204, %c0_84], %203 {strides = array<i32>} : memref<128x128xbf16, #tpu.memory_space<vmem>>, vector<16x128xbf16>,
    %c5_i32 = arith.constant 5 : i32
    %c16_i32_85 = arith.constant 16 : i32
    %206 = arith.muli %c5_i32, %c16_i32_85 : i32
    %207 = tpu.assume_multiple %206, 16 : i32
    %208 = arith.index_cast %207 : i32 to index
    %c0_86 = arith.constant 0 : index
    %209 = vector.load %arg10[%208, %c0_86] : memref<128x512xf32, #tpu.memory_space<vmem>>, vector<16x512xf32>
    %c0_87 = arith.constant 0 : index
    %c0_88 = arith.constant 0 : index
    %210 = vector.load %arg8[%c0_87, %c0_88] : memref<16x128xf32, #tpu.memory_space<vmem>>, vector<16x128xf32>
    %211 = arith.truncf %210 : vector<16x128xf32> to vector<16x128xbf16>
    %cst_89 = arith.constant dense<0.000000e+00> : vector<16x512xf32>
    %212 = tpu.matmul %211, %10, %cst_89 {dimension_numbers = #tpu.dot_dimension_numbers<[1], [0], [0], [1], [0, 0, 1, 1], [], []>} : vector<16x128xbf16>, vector<128x512xbf16>, vector<16x512xf32> -> vector<16x512xf32>
    %213 = arith.addf %209, %212 : vector<16x512xf32>
    %c0_90 = arith.constant 0 : index
    %c0_91 = arith.constant 0 : index
    %214 = vector.load %arg9[%c0_90, %c0_91] : memref<16x128xf32, #tpu.memory_space<vmem>>, vector<16x128xf32>
    %215 = vector.extract_strided_slice %213 {offsets = [0, 0], sizes = [16, 128], strides = [1, 1]} : vector<16x512xf32> to vector<16x128xf32>
    %216 = arith.negf %215 : vector<16x128xf32>
    %217 = math.exp %216 : vector<16x128xf32>
    %cst_92 = arith.constant 1.000000e+00 : f32
    %218 = vector.broadcast %cst_92 : f32 to vector<16x128xf32>
    %219 = arith.addf %218, %217 : vector<16x128xf32>
    %220 = arith.divf %218, %219 : vector<16x128xf32>
    %221 = vector.extract_strided_slice %213 {offsets = [0, 128], sizes = [16, 128], strides = [1, 1]} : vector<16x512xf32> to vector<16x128xf32>
    %222 = arith.negf %221 : vector<16x128xf32>
    %223 = math.exp %222 : vector<16x128xf32>
    %cst_93 = arith.constant 1.000000e+00 : f32
    %224 = vector.broadcast %cst_93 : f32 to vector<16x128xf32>
    %225 = arith.addf %224, %223 : vector<16x128xf32>
    %226 = arith.divf %224, %225 : vector<16x128xf32>
    %227 = vector.extract_strided_slice %213 {offsets = [0, 256], sizes = [16, 128], strides = [1, 1]} : vector<16x512xf32> to vector<16x128xf32>
    %228 = math.tanh %227 : vector<16x128xf32>
    %229 = vector.extract_strided_slice %213 {offsets = [0, 384], sizes = [16, 128], strides = [1, 1]} : vector<16x512xf32> to vector<16x128xf32>
    %230 = arith.negf %229 : vector<16x128xf32>
    %231 = math.exp %230 : vector<16x128xf32>
    %cst_94 = arith.constant 1.000000e+00 : f32
    %232 = vector.broadcast %cst_94 : f32 to vector<16x128xf32>
    %233 = arith.addf %232, %231 : vector<16x128xf32>
    %234 = arith.divf %232, %233 : vector<16x128xf32>
    %235 = arith.mulf %226, %214 : vector<16x128xf32>
    %236 = arith.mulf %220, %228 : vector<16x128xf32>
    %237 = arith.addf %235, %236 : vector<16x128xf32>
    %238 = math.tanh %237 : vector<16x128xf32>
    %239 = arith.mulf %234, %238 : vector<16x128xf32>
    %c0_95 = arith.constant 0 : index
    %c0_96 = arith.constant 0 : index
    %240 = vector.load %arg8[%c0_95, %c0_96] : memref<16x128xf32, #tpu.memory_space<vmem>>, vector<16x128xf32>
    tpu.vector_store %arg8[%c0_95, %c0_96], %239 {strides = array<i32>} : memref<16x128xf32, #tpu.memory_space<vmem>>, vector<16x128xf32>,
    %c0_97 = arith.constant 0 : index
    %c0_98 = arith.constant 0 : index
    %241 = vector.load %arg9[%c0_97, %c0_98] : memref<16x128xf32, #tpu.memory_space<vmem>>, vector<16x128xf32>
    tpu.vector_store %arg9[%c0_97, %c0_98], %237 {strides = array<i32>} : memref<16x128xf32, #tpu.memory_space<vmem>>, vector<16x128xf32>,
    %242 = arith.truncf %239 : vector<16x128xf32> to vector<16x128xbf16>
    %243 = arith.index_cast %207 : i32 to index
    %c0_99 = arith.constant 0 : index
    %244 = vector.load %arg7[%243, %c0_99] : memref<128x128xbf16, #tpu.memory_space<vmem>>, vector<16x128xbf16>
    tpu.vector_store %arg7[%243, %c0_99], %242 {strides = array<i32>} : memref<128x128xbf16, #tpu.memory_space<vmem>>, vector<16x128xbf16>,
    %c6_i32 = arith.constant 6 : i32
    %c16_i32_100 = arith.constant 16 : i32
    %245 = arith.muli %c6_i32, %c16_i32_100 : i32
    %246 = tpu.assume_multiple %245, 16 : i32
    %247 = arith.index_cast %246 : i32 to index
    %c0_101 = arith.constant 0 : index
    %248 = vector.load %arg10[%247, %c0_101] : memref<128x512xf32, #tpu.memory_space<vmem>>, vector<16x512xf32>
    %c0_102 = arith.constant 0 : index
    %c0_103 = arith.constant 0 : index
    %249 = vector.load %arg8[%c0_102, %c0_103] : memref<16x128xf32, #tpu.memory_space<vmem>>, vector<16x128xf32>
    %250 = arith.truncf %249 : vector<16x128xf32> to vector<16x128xbf16>
    %cst_104 = arith.constant dense<0.000000e+00> : vector<16x512xf32>
    %251 = tpu.matmul %250, %10, %cst_104 {dimension_numbers = #tpu.dot_dimension_numbers<[1], [0], [0], [1], [0, 0, 1, 1], [], []>} : vector<16x128xbf16>, vector<128x512xbf16>, vector<16x512xf32> -> vector<16x512xf32>
    %252 = arith.addf %248, %251 : vector<16x512xf32>
    %c0_105 = arith.constant 0 : index
    %c0_106 = arith.constant 0 : index
    %253 = vector.load %arg9[%c0_105, %c0_106] : memref<16x128xf32, #tpu.memory_space<vmem>>, vector<16x128xf32>
    %254 = vector.extract_strided_slice %252 {offsets = [0, 0], sizes = [16, 128], strides = [1, 1]} : vector<16x512xf32> to vector<16x128xf32>
    %255 = arith.negf %254 : vector<16x128xf32>
    %256 = math.exp %255 : vector<16x128xf32>
    %cst_107 = arith.constant 1.000000e+00 : f32
    %257 = vector.broadcast %cst_107 : f32 to vector<16x128xf32>
    %258 = arith.addf %257, %256 : vector<16x128xf32>
    %259 = arith.divf %257, %258 : vector<16x128xf32>
    %260 = vector.extract_strided_slice %252 {offsets = [0, 128], sizes = [16, 128], strides = [1, 1]} : vector<16x512xf32> to vector<16x128xf32>
    %261 = arith.negf %260 : vector<16x128xf32>
    %262 = math.exp %261 : vector<16x128xf32>
    %cst_108 = arith.constant 1.000000e+00 : f32
    %263 = vector.broadcast %cst_108 : f32 to vector<16x128xf32>
    %264 = arith.addf %263, %262 : vector<16x128xf32>
    %265 = arith.divf %263, %264 : vector<16x128xf32>
    %266 = vector.extract_strided_slice %252 {offsets = [0, 256], sizes = [16, 128], strides = [1, 1]} : vector<16x512xf32> to vector<16x128xf32>
    %267 = math.tanh %266 : vector<16x128xf32>
    %268 = vector.extract_strided_slice %252 {offsets = [0, 384], sizes = [16, 128], strides = [1, 1]} : vector<16x512xf32> to vector<16x128xf32>
    %269 = arith.negf %268 : vector<16x128xf32>
    %270 = math.exp %269 : vector<16x128xf32>
    %cst_109 = arith.constant 1.000000e+00 : f32
    %271 = vector.broadcast %cst_109 : f32 to vector<16x128xf32>
    %272 = arith.addf %271, %270 : vector<16x128xf32>
    %273 = arith.divf %271, %272 : vector<16x128xf32>
    %274 = arith.mulf %265, %253 : vector<16x128xf32>
    %275 = arith.mulf %259, %267 : vector<16x128xf32>
    %276 = arith.addf %274, %275 : vector<16x128xf32>
    %277 = math.tanh %276 : vector<16x128xf32>
    %278 = arith.mulf %273, %277 : vector<16x128xf32>
    %c0_110 = arith.constant 0 : index
    %c0_111 = arith.constant 0 : index
    %279 = vector.load %arg8[%c0_110, %c0_111] : memref<16x128xf32, #tpu.memory_space<vmem>>, vector<16x128xf32>
    tpu.vector_store %arg8[%c0_110, %c0_111], %278 {strides = array<i32>} : memref<16x128xf32, #tpu.memory_space<vmem>>, vector<16x128xf32>,
    %c0_112 = arith.constant 0 : index
    %c0_113 = arith.constant 0 : index
    %280 = vector.load %arg9[%c0_112, %c0_113] : memref<16x128xf32, #tpu.memory_space<vmem>>, vector<16x128xf32>
    tpu.vector_store %arg9[%c0_112, %c0_113], %276 {strides = array<i32>} : memref<16x128xf32, #tpu.memory_space<vmem>>, vector<16x128xf32>,
    %281 = arith.truncf %278 : vector<16x128xf32> to vector<16x128xbf16>
    %282 = arith.index_cast %246 : i32 to index
    %c0_114 = arith.constant 0 : index
    %283 = vector.load %arg7[%282, %c0_114] : memref<128x128xbf16, #tpu.memory_space<vmem>>, vector<16x128xbf16>
    tpu.vector_store %arg7[%282, %c0_114], %281 {strides = array<i32>} : memref<128x128xbf16, #tpu.memory_space<vmem>>, vector<16x128xbf16>,
    %c7_i32 = arith.constant 7 : i32
    %c16_i32_115 = arith.constant 16 : i32
    %284 = arith.muli %c7_i32, %c16_i32_115 : i32
    %285 = tpu.assume_multiple %284, 16 : i32
    %286 = arith.index_cast %285 : i32 to index
    %c0_116 = arith.constant 0 : index
    %287 = vector.load %arg10[%286, %c0_116] : memref<128x512xf32, #tpu.memory_space<vmem>>, vector<16x512xf32>
    %c0_117 = arith.constant 0 : index
    %c0_118 = arith.constant 0 : index
    %288 = vector.load %arg8[%c0_117, %c0_118] : memref<16x128xf32, #tpu.memory_space<vmem>>, vector<16x128xf32>
    %289 = arith.truncf %288 : vector<16x128xf32> to vector<16x128xbf16>
    %cst_119 = arith.constant dense<0.000000e+00> : vector<16x512xf32>
    %290 = tpu.matmul %289, %10, %cst_119 {dimension_numbers = #tpu.dot_dimension_numbers<[1], [0], [0], [1], [0, 0, 1, 1], [], []>} : vector<16x128xbf16>, vector<128x512xbf16>, vector<16x512xf32> -> vector<16x512xf32>
    %291 = arith.addf %287, %290 : vector<16x512xf32>
    %c0_120 = arith.constant 0 : index
    %c0_121 = arith.constant 0 : index
    %292 = vector.load %arg9[%c0_120, %c0_121] : memref<16x128xf32, #tpu.memory_space<vmem>>, vector<16x128xf32>
    %293 = vector.extract_strided_slice %291 {offsets = [0, 0], sizes = [16, 128], strides = [1, 1]} : vector<16x512xf32> to vector<16x128xf32>
    %294 = arith.negf %293 : vector<16x128xf32>
    %295 = math.exp %294 : vector<16x128xf32>
    %cst_122 = arith.constant 1.000000e+00 : f32
    %296 = vector.broadcast %cst_122 : f32 to vector<16x128xf32>
    %297 = arith.addf %296, %295 : vector<16x128xf32>
    %298 = arith.divf %296, %297 : vector<16x128xf32>
    %299 = vector.extract_strided_slice %291 {offsets = [0, 128], sizes = [16, 128], strides = [1, 1]} : vector<16x512xf32> to vector<16x128xf32>
    %300 = arith.negf %299 : vector<16x128xf32>
    %301 = math.exp %300 : vector<16x128xf32>
    %cst_123 = arith.constant 1.000000e+00 : f32
    %302 = vector.broadcast %cst_123 : f32 to vector<16x128xf32>
    %303 = arith.addf %302, %301 : vector<16x128xf32>
    %304 = arith.divf %302, %303 : vector<16x128xf32>
    %305 = vector.extract_strided_slice %291 {offsets = [0, 256], sizes = [16, 128], strides = [1, 1]} : vector<16x512xf32> to vector<16x128xf32>
    %306 = math.tanh %305 : vector<16x128xf32>
    %307 = vector.extract_strided_slice %291 {offsets = [0, 384], sizes = [16, 128], strides = [1, 1]} : vector<16x512xf32> to vector<16x128xf32>
    %308 = arith.negf %307 : vector<16x128xf32>
    %309 = math.exp %308 : vector<16x128xf32>
    %cst_124 = arith.constant 1.000000e+00 : f32
    %310 = vector.broadcast %cst_124 : f32 to vector<16x128xf32>
    %311 = arith.addf %310, %309 : vector<16x128xf32>
    %312 = arith.divf %310, %311 : vector<16x128xf32>
    %313 = arith.mulf %304, %292 : vector<16x128xf32>
    %314 = arith.mulf %298, %306 : vector<16x128xf32>
    %315 = arith.addf %313, %314 : vector<16x128xf32>
    %316 = math.tanh %315 : vector<16x128xf32>
    %317 = arith.mulf %312, %316 : vector<16x128xf32>
    %c0_125 = arith.constant 0 : index
    %c0_126 = arith.constant 0 : index
    %318 = vector.load %arg8[%c0_125, %c0_126] : memref<16x128xf32, #tpu.memory_space<vmem>>, vector<16x128xf32>
    tpu.vector_store %arg8[%c0_125, %c0_126], %317 {strides = array<i32>} : memref<16x128xf32, #tpu.memory_space<vmem>>, vector<16x128xf32>,
    %c0_127 = arith.constant 0 : index
    %c0_128 = arith.constant 0 : index
    %319 = vector.load %arg9[%c0_127, %c0_128] : memref<16x128xf32, #tpu.memory_space<vmem>>, vector<16x128xf32>
    tpu.vector_store %arg9[%c0_127, %c0_128], %315 {strides = array<i32>} : memref<16x128xf32, #tpu.memory_space<vmem>>, vector<16x128xf32>,
    %320 = arith.truncf %317 : vector<16x128xf32> to vector<16x128xbf16>
    %321 = arith.index_cast %285 : i32 to index
    %c0_129 = arith.constant 0 : index
    %322 = vector.load %arg7[%321, %c0_129] : memref<128x128xbf16, #tpu.memory_space<vmem>>, vector<16x128xbf16>
    tpu.vector_store %arg7[%321, %c0_129], %320 {strides = array<i32>} : memref<128x128xbf16, #tpu.memory_space<vmem>>, vector<16x128xbf16>,
    %c8_i32 = arith.constant 8 : i32
    return
  }
  func.func @transform_0(%arg0: i32) -> (i32, i32) {
    %c0_i32 = arith.constant 0 : i32
    %c0_i32_0 = arith.constant 0 : i32
    return %arg0, %c0_i32 : i32, i32
  }
  func.func @transform_1(%arg0: i32) -> (i32, i32) {
    %c0_i32 = arith.constant 0 : i32
    %c0_i32_0 = arith.constant 0 : i32
    %c0_i32_1 = arith.constant 0 : i32
    return %c0_i32, %c0_i32_0 : i32, i32
  }
  func.func @transform_2(%arg0: i32) -> (i32, i32) {
    %c0_i32 = arith.constant 0 : i32
    %c0_i32_0 = arith.constant 0 : i32
    %c0_i32_1 = arith.constant 0 : i32
    return %c0_i32, %c0_i32_0 : i32, i32
  }
  func.func @transform_3(%arg0: i32) -> (i32, i32) {
    %c0_i32 = arith.constant 0 : i32
    %c0_i32_0 = arith.constant 0 : i32
    %c0_i32_1 = arith.constant 0 : i32
    return %c0_i32, %c0_i32_0 : i32, i32
  }
  func.func @transform_4(%arg0: i32) -> (i32, i32) {
    %c0_i32 = arith.constant 0 : i32
    %c0_i32_0 = arith.constant 0 : i32
    %c0_i32_1 = arith.constant 0 : i32
    return %c0_i32, %c0_i32_0 : i32, i32
  }
  func.func @transform_5(%arg0: i32) -> (i32, i32) {
    %c0_i32 = arith.constant 0 : i32
    %c0_i32_0 = arith.constant 0 : i32
    %c0_i32_1 = arith.constant 0 : i32
    return %c0_i32, %c0_i32_0 : i32, i32
  }
  func.func @transform_6(%arg0: i32) -> (i32, i32) {
    %c0_i32 = arith.constant 0 : i32
    %c0_i32_0 = arith.constant 0 : i32
    return %arg0, %c0_i32 : i32, i32
  }
}

module attributes {stable_mosaic.version = 11 : i64} {
  func.func @_bilstm_kernel(%arg0: i32, %arg1: i32, %arg2: memref<16x1xi32, #tpu.memory_space<vmem>>, %arg3: memref<128x128xbf16, #tpu.memory_space<vmem>>, %arg4: memref<1x128x512xbf16, #tpu.memory_space<vmem>>, %arg5: memref<1x128x512xbf16, #tpu.memory_space<vmem>>, %arg6: memref<1x1x512xf32, #tpu.memory_space<vmem>>, %arg7: memref<128x128xbf16, #tpu.memory_space<vmem>>, %arg8: memref<1x16x128xf32, #tpu.memory_space<vmem>>, %arg9: memref<1x16x128xf32, #tpu.memory_space<vmem>>, %arg10: memref<16x128xf32, #tpu.memory_space<vmem>>, %arg11: memref<16x128xf32, #tpu.memory_space<vmem>>, %arg12: memref<128x512xf32, #tpu.memory_space<vmem>>) attributes {dimension_semantics = [#tpu.dimension_semantics<parallel>, #tpu.dimension_semantics<arbitrary>], iteration_bounds = array<i64: 2, 1>, scalar_prefetch = 0 : i64, scratch_operands = 3 : i64, tpu.core_type = #tpu.core_type<tc>, window_params = [{pipeline_mode = #tpu.pipeline_mode<synchronous>, transform_indices = @transform_0, window_bounds = array<i64: 16, 1>}, {transform_indices = @transform_1, window_bounds = array<i64: 128, 128>}, {transform_indices = @transform_2, window_bounds = array<i64: 1, 128, 512>}, {transform_indices = @transform_3, window_bounds = array<i64: 1, 128, 512>}, {transform_indices = @transform_4, window_bounds = array<i64: 1, 1, 512>}, {transform_indices = @transform_5, window_bounds = array<i64: 128, 128>}, {transform_indices = @transform_6, window_bounds = array<i64: 1, 16, 128>}, {transform_indices = @transform_7, window_bounds = array<i64: 1, 16, 128>}]} {
    %c0_i32 = arith.constant 0 : i32
    %0 = arith.cmpi eq, %arg1, %c0_i32 : i32
    %1 = arith.extui %0 : i1 to i32
    %c0_i32_0 = arith.constant 0 : i32
    %2 = arith.cmpi ne, %1, %c0_i32_0 : i32
    scf.if %2 {
      %cst_196 = arith.constant 0.000000e+00 : f32
      %487 = vector.broadcast %cst_196 : f32 to vector<16x128xf32>
      %c0_197 = arith.constant 0 : index
      %c0_198 = arith.constant 0 : index
      %488 = vector.load %arg10[%c0_197, %c0_198] : memref<16x128xf32, #tpu.memory_space<vmem>>, vector<16x128xf32>
      tpu.vector_store %arg10[%c0_197, %c0_198], %487 {strides = array<i32>} : memref<16x128xf32, #tpu.memory_space<vmem>>, vector<16x128xf32>,
      %cst_199 = arith.constant 0.000000e+00 : f32
      %489 = vector.broadcast %cst_199 : f32 to vector<16x128xf32>
      %c0_200 = arith.constant 0 : index
      %c0_201 = arith.constant 0 : index
      %490 = vector.load %arg11[%c0_200, %c0_201] : memref<16x128xf32, #tpu.memory_space<vmem>>, vector<16x128xf32>
      tpu.vector_store %arg11[%c0_200, %c0_201], %489 {strides = array<i32>} : memref<16x128xf32, #tpu.memory_space<vmem>>, vector<16x128xf32>,
    } else {
    }
    %c0 = arith.constant 0 : index
    %c0_1 = arith.constant 0 : index
    %3 = vector.load %arg3[%c0, %c0_1] : memref<128x128xbf16, #tpu.memory_space<vmem>>, vector<128x128xbf16>
    %c0_2 = arith.constant 0 : index
    %c0_3 = arith.constant 0 : index
    %c0_4 = arith.constant 0 : index
    %4 = vector.load %arg4[%c0_2, %c0_3, %c0_4] : memref<1x128x512xbf16, #tpu.memory_space<vmem>>, vector<1x128x512xbf16>
    %5 = vector.shape_cast %4 : vector<1x128x512xbf16> to vector<128x512xbf16>
    %cst = arith.constant dense<0.000000e+00> : vector<128x512xf32>
    %6 = tpu.matmul %3, %5, %cst {dimension_numbers = #tpu.dot_dimension_numbers<[1], [0], [0], [1], [0, 0, 1, 1], [], []>} : vector<128x128xbf16>, vector<128x512xbf16>, vector<128x512xf32> -> vector<128x512xf32>
    %c0_5 = arith.constant 0 : index
    %c0_6 = arith.constant 0 : index
    %c0_7 = arith.constant 0 : index
    %7 = vector.load %arg6[%c0_5, %c0_6, %c0_7] : memref<1x1x512xf32, #tpu.memory_space<vmem>>, vector<1x1x512xf32>
    %8 = vector.shape_cast %7 : vector<1x1x512xf32> to vector<1x512xf32>
    %9 = vector.broadcast %8 : vector<1x512xf32> to vector<128x512xf32>
    %10 = arith.addf %6, %9 : vector<128x512xf32>
    %c0_8 = arith.constant 0 : index
    %c0_9 = arith.constant 0 : index
    %11 = vector.load %arg12[%c0_8, %c0_9] : memref<128x512xf32, #tpu.memory_space<vmem>>, vector<128x512xf32>
    tpu.vector_store %arg12[%c0_8, %c0_9], %10 {strides = array<i32>} : memref<128x512xf32, #tpu.memory_space<vmem>>, vector<128x512xf32>,
    %c0_10 = arith.constant 0 : index
    %c0_11 = arith.constant 0 : index
    %12 = vector.load %arg2[%c0_10, %c0_11] : memref<16x1xi32, #tpu.memory_space<vmem>>, vector<16x1xi32>
    %c0_12 = arith.constant 0 : index
    %c0_13 = arith.constant 0 : index
    %c0_14 = arith.constant 0 : index
    %13 = vector.load %arg5[%c0_12, %c0_13, %c0_14] : memref<1x128x512xbf16, #tpu.memory_space<vmem>>, vector<1x128x512xbf16>
    %14 = vector.shape_cast %13 : vector<1x128x512xbf16> to vector<128x512xbf16>
    %c2_i32 = arith.constant 2 : i32
    %15 = arith.muli %c2_i32, %arg1 : i32
    %c0_i32_15 = arith.constant 0 : i32
    %16 = arith.subi %c0_i32_15, %15 : i32
    %17 = arith.muli %arg0, %16 : i32
    %18 = arith.addi %arg1, %17 : i32
    %c8_i32 = arith.constant 8 : i32
    %19 = arith.muli %18, %c8_i32 : i32
    %c0_i32_16 = arith.constant 0 : i32
    %c2_i32_17 = arith.constant 2 : i32
    %20 = arith.muli %c2_i32_17, %c0_i32_16 : i32
    %c7_i32 = arith.constant 7 : i32
    %21 = arith.subi %c7_i32, %20 : i32
    %22 = arith.muli %arg0, %21 : i32
    %23 = arith.addi %c0_i32_16, %22 : i32
    %24 = arith.addi %19, %23 : i32
    %c16_i32 = arith.constant 16 : i32
    %25 = arith.muli %23, %c16_i32 : i32
    %26 = tpu.assume_multiple %25, 16 : i32
    %27 = arith.index_cast %26 : i32 to index
    %c0_18 = arith.constant 0 : index
    %28 = vector.load %arg12[%27, %c0_18] : memref<128x512xf32, #tpu.memory_space<vmem>>, vector<16x512xf32>
    %c0_19 = arith.constant 0 : index
    %c0_20 = arith.constant 0 : index
    %29 = vector.load %arg10[%c0_19, %c0_20] : memref<16x128xf32, #tpu.memory_space<vmem>>, vector<16x128xf32>
    %30 = arith.truncf %29 : vector<16x128xf32> to vector<16x128xbf16>
    %cst_21 = arith.constant dense<0.000000e+00> : vector<16x512xf32>
    %31 = tpu.matmul %30, %14, %cst_21 {dimension_numbers = #tpu.dot_dimension_numbers<[1], [0], [0], [1], [0, 0, 1, 1], [], []>} : vector<16x128xbf16>, vector<128x512xbf16>, vector<16x512xf32> -> vector<16x512xf32>
    %32 = arith.addf %28, %31 : vector<16x512xf32>
    %c0_22 = arith.constant 0 : index
    %c0_23 = arith.constant 0 : index
    %33 = vector.load %arg11[%c0_22, %c0_23] : memref<16x128xf32, #tpu.memory_space<vmem>>, vector<16x128xf32>
    %34 = vector.extract_strided_slice %32 {offsets = [0, 0], sizes = [16, 128], strides = [1, 1]} : vector<16x512xf32> to vector<16x128xf32>
    %35 = arith.negf %34 : vector<16x128xf32>
    %36 = math.exp %35 : vector<16x128xf32>
    %cst_24 = arith.constant 1.000000e+00 : f32
    %37 = vector.broadcast %cst_24 : f32 to vector<16x128xf32>
    %38 = arith.addf %37, %36 : vector<16x128xf32>
    %39 = arith.divf %37, %38 : vector<16x128xf32>
    %40 = vector.extract_strided_slice %32 {offsets = [0, 128], sizes = [16, 128], strides = [1, 1]} : vector<16x512xf32> to vector<16x128xf32>
    %41 = arith.negf %40 : vector<16x128xf32>
    %42 = math.exp %41 : vector<16x128xf32>
    %cst_25 = arith.constant 1.000000e+00 : f32
    %43 = vector.broadcast %cst_25 : f32 to vector<16x128xf32>
    %44 = arith.addf %43, %42 : vector<16x128xf32>
    %45 = arith.divf %43, %44 : vector<16x128xf32>
    %46 = vector.extract_strided_slice %32 {offsets = [0, 256], sizes = [16, 128], strides = [1, 1]} : vector<16x512xf32> to vector<16x128xf32>
    %47 = math.tanh %46 : vector<16x128xf32>
    %48 = vector.extract_strided_slice %32 {offsets = [0, 384], sizes = [16, 128], strides = [1, 1]} : vector<16x512xf32> to vector<16x128xf32>
    %49 = arith.negf %48 : vector<16x128xf32>
    %50 = math.exp %49 : vector<16x128xf32>
    %cst_26 = arith.constant 1.000000e+00 : f32
    %51 = vector.broadcast %cst_26 : f32 to vector<16x128xf32>
    %52 = arith.addf %51, %50 : vector<16x128xf32>
    %53 = arith.divf %51, %52 : vector<16x128xf32>
    %54 = arith.mulf %45, %33 : vector<16x128xf32>
    %55 = arith.mulf %39, %47 : vector<16x128xf32>
    %56 = arith.addf %54, %55 : vector<16x128xf32>
    %57 = math.tanh %56 : vector<16x128xf32>
    %58 = arith.mulf %53, %57 : vector<16x128xf32>
    %59 = vector.broadcast %24 : i32 to vector<16x1xi32>
    %60 = arith.cmpi slt, %59, %12 : vector<16x1xi32>
    %c0_27 = arith.constant 0 : index
    %c0_28 = arith.constant 0 : index
    %61 = vector.load %arg10[%c0_27, %c0_28] : memref<16x128xf32, #tpu.memory_space<vmem>>, vector<16x128xf32>
    %62 = vector.shape_cast %60 : vector<16x1xi1> to vector<16x1xi1>
    %63 = vector.broadcast %62 : vector<16x1xi1> to vector<16x128xi1>
    %64 = arith.select %63, %58, %61 : vector<16x128xi1>, vector<16x128xf32>
    %c0_29 = arith.constant 0 : index
    %c0_30 = arith.constant 0 : index
    %65 = vector.load %arg10[%c0_29, %c0_30] : memref<16x128xf32, #tpu.memory_space<vmem>>, vector<16x128xf32>
    tpu.vector_store %arg10[%c0_29, %c0_30], %64 {strides = array<i32>} : memref<16x128xf32, #tpu.memory_space<vmem>>, vector<16x128xf32>,
    %c0_31 = arith.constant 0 : index
    %c0_32 = arith.constant 0 : index
    %66 = vector.load %arg11[%c0_31, %c0_32] : memref<16x128xf32, #tpu.memory_space<vmem>>, vector<16x128xf32>
    %67 = vector.shape_cast %60 : vector<16x1xi1> to vector<16x1xi1>
    %68 = vector.broadcast %67 : vector<16x1xi1> to vector<16x128xi1>
    %69 = arith.select %68, %56, %66 : vector<16x128xi1>, vector<16x128xf32>
    %c0_33 = arith.constant 0 : index
    %c0_34 = arith.constant 0 : index
    %70 = vector.load %arg11[%c0_33, %c0_34] : memref<16x128xf32, #tpu.memory_space<vmem>>, vector<16x128xf32>
    tpu.vector_store %arg11[%c0_33, %c0_34], %69 {strides = array<i32>} : memref<16x128xf32, #tpu.memory_space<vmem>>, vector<16x128xf32>,
    %cst_35 = arith.constant 0.000000e+00 : f32
    %71 = vector.shape_cast %60 : vector<16x1xi1> to vector<16x1xi1>
    %72 = vector.broadcast %71 : vector<16x1xi1> to vector<16x128xi1>
    %73 = vector.broadcast %cst_35 : f32 to vector<16x128xf32>
    %74 = arith.select %72, %58, %73 : vector<16x128xi1>, vector<16x128xf32>
    %75 = arith.truncf %74 : vector<16x128xf32> to vector<16x128xbf16>
    %76 = arith.index_cast %26 : i32 to index
    %c0_36 = arith.constant 0 : index
    %77 = vector.load %arg7[%76, %c0_36] : memref<128x128xbf16, #tpu.memory_space<vmem>>, vector<16x128xbf16>
    tpu.vector_store %arg7[%76, %c0_36], %75 {strides = array<i32>} : memref<128x128xbf16, #tpu.memory_space<vmem>>, vector<16x128xbf16>,
    %c1_i32 = arith.constant 1 : i32
    %c2_i32_37 = arith.constant 2 : i32
    %78 = arith.muli %c2_i32_37, %c1_i32 : i32
    %c7_i32_38 = arith.constant 7 : i32
    %79 = arith.subi %c7_i32_38, %78 : i32
    %80 = arith.muli %arg0, %79 : i32
    %81 = arith.addi %c1_i32, %80 : i32
    %82 = arith.addi %19, %81 : i32
    %c16_i32_39 = arith.constant 16 : i32
    %83 = arith.muli %81, %c16_i32_39 : i32
    %84 = tpu.assume_multiple %83, 16 : i32
    %85 = arith.index_cast %84 : i32 to index
    %c0_40 = arith.constant 0 : index
    %86 = vector.load %arg12[%85, %c0_40] : memref<128x512xf32, #tpu.memory_space<vmem>>, vector<16x512xf32>
    %c0_41 = arith.constant 0 : index
    %c0_42 = arith.constant 0 : index
    %87 = vector.load %arg10[%c0_41, %c0_42] : memref<16x128xf32, #tpu.memory_space<vmem>>, vector<16x128xf32>
    %88 = arith.truncf %87 : vector<16x128xf32> to vector<16x128xbf16>
    %cst_43 = arith.constant dense<0.000000e+00> : vector<16x512xf32>
    %89 = tpu.matmul %88, %14, %cst_43 {dimension_numbers = #tpu.dot_dimension_numbers<[1], [0], [0], [1], [0, 0, 1, 1], [], []>} : vector<16x128xbf16>, vector<128x512xbf16>, vector<16x512xf32> -> vector<16x512xf32>
    %90 = arith.addf %86, %89 : vector<16x512xf32>
    %c0_44 = arith.constant 0 : index
    %c0_45 = arith.constant 0 : index
    %91 = vector.load %arg11[%c0_44, %c0_45] : memref<16x128xf32, #tpu.memory_space<vmem>>, vector<16x128xf32>
    %92 = vector.extract_strided_slice %90 {offsets = [0, 0], sizes = [16, 128], strides = [1, 1]} : vector<16x512xf32> to vector<16x128xf32>
    %93 = arith.negf %92 : vector<16x128xf32>
    %94 = math.exp %93 : vector<16x128xf32>
    %cst_46 = arith.constant 1.000000e+00 : f32
    %95 = vector.broadcast %cst_46 : f32 to vector<16x128xf32>
    %96 = arith.addf %95, %94 : vector<16x128xf32>
    %97 = arith.divf %95, %96 : vector<16x128xf32>
    %98 = vector.extract_strided_slice %90 {offsets = [0, 128], sizes = [16, 128], strides = [1, 1]} : vector<16x512xf32> to vector<16x128xf32>
    %99 = arith.negf %98 : vector<16x128xf32>
    %100 = math.exp %99 : vector<16x128xf32>
    %cst_47 = arith.constant 1.000000e+00 : f32
    %101 = vector.broadcast %cst_47 : f32 to vector<16x128xf32>
    %102 = arith.addf %101, %100 : vector<16x128xf32>
    %103 = arith.divf %101, %102 : vector<16x128xf32>
    %104 = vector.extract_strided_slice %90 {offsets = [0, 256], sizes = [16, 128], strides = [1, 1]} : vector<16x512xf32> to vector<16x128xf32>
    %105 = math.tanh %104 : vector<16x128xf32>
    %106 = vector.extract_strided_slice %90 {offsets = [0, 384], sizes = [16, 128], strides = [1, 1]} : vector<16x512xf32> to vector<16x128xf32>
    %107 = arith.negf %106 : vector<16x128xf32>
    %108 = math.exp %107 : vector<16x128xf32>
    %cst_48 = arith.constant 1.000000e+00 : f32
    %109 = vector.broadcast %cst_48 : f32 to vector<16x128xf32>
    %110 = arith.addf %109, %108 : vector<16x128xf32>
    %111 = arith.divf %109, %110 : vector<16x128xf32>
    %112 = arith.mulf %103, %91 : vector<16x128xf32>
    %113 = arith.mulf %97, %105 : vector<16x128xf32>
    %114 = arith.addf %112, %113 : vector<16x128xf32>
    %115 = math.tanh %114 : vector<16x128xf32>
    %116 = arith.mulf %111, %115 : vector<16x128xf32>
    %117 = vector.broadcast %82 : i32 to vector<16x1xi32>
    %118 = arith.cmpi slt, %117, %12 : vector<16x1xi32>
    %c0_49 = arith.constant 0 : index
    %c0_50 = arith.constant 0 : index
    %119 = vector.load %arg10[%c0_49, %c0_50] : memref<16x128xf32, #tpu.memory_space<vmem>>, vector<16x128xf32>
    %120 = vector.shape_cast %118 : vector<16x1xi1> to vector<16x1xi1>
    %121 = vector.broadcast %120 : vector<16x1xi1> to vector<16x128xi1>
    %122 = arith.select %121, %116, %119 : vector<16x128xi1>, vector<16x128xf32>
    %c0_51 = arith.constant 0 : index
    %c0_52 = arith.constant 0 : index
    %123 = vector.load %arg10[%c0_51, %c0_52] : memref<16x128xf32, #tpu.memory_space<vmem>>, vector<16x128xf32>
    tpu.vector_store %arg10[%c0_51, %c0_52], %122 {strides = array<i32>} : memref<16x128xf32, #tpu.memory_space<vmem>>, vector<16x128xf32>,
    %c0_53 = arith.constant 0 : index
    %c0_54 = arith.constant 0 : index
    %124 = vector.load %arg11[%c0_53, %c0_54] : memref<16x128xf32, #tpu.memory_space<vmem>>, vector<16x128xf32>
    %125 = vector.shape_cast %118 : vector<16x1xi1> to vector<16x1xi1>
    %126 = vector.broadcast %125 : vector<16x1xi1> to vector<16x128xi1>
    %127 = arith.select %126, %114, %124 : vector<16x128xi1>, vector<16x128xf32>
    %c0_55 = arith.constant 0 : index
    %c0_56 = arith.constant 0 : index
    %128 = vector.load %arg11[%c0_55, %c0_56] : memref<16x128xf32, #tpu.memory_space<vmem>>, vector<16x128xf32>
    tpu.vector_store %arg11[%c0_55, %c0_56], %127 {strides = array<i32>} : memref<16x128xf32, #tpu.memory_space<vmem>>, vector<16x128xf32>,
    %cst_57 = arith.constant 0.000000e+00 : f32
    %129 = vector.shape_cast %118 : vector<16x1xi1> to vector<16x1xi1>
    %130 = vector.broadcast %129 : vector<16x1xi1> to vector<16x128xi1>
    %131 = vector.broadcast %cst_57 : f32 to vector<16x128xf32>
    %132 = arith.select %130, %116, %131 : vector<16x128xi1>, vector<16x128xf32>
    %133 = arith.truncf %132 : vector<16x128xf32> to vector<16x128xbf16>
    %134 = arith.index_cast %84 : i32 to index
    %c0_58 = arith.constant 0 : index
    %135 = vector.load %arg7[%134, %c0_58] : memref<128x128xbf16, #tpu.memory_space<vmem>>, vector<16x128xbf16>
    tpu.vector_store %arg7[%134, %c0_58], %133 {strides = array<i32>} : memref<128x128xbf16, #tpu.memory_space<vmem>>, vector<16x128xbf16>,
    %c2_i32_59 = arith.constant 2 : i32
    %c2_i32_60 = arith.constant 2 : i32
    %136 = arith.muli %c2_i32_60, %c2_i32_59 : i32
    %c7_i32_61 = arith.constant 7 : i32
    %137 = arith.subi %c7_i32_61, %136 : i32
    %138 = arith.muli %arg0, %137 : i32
    %139 = arith.addi %c2_i32_59, %138 : i32
    %140 = arith.addi %19, %139 : i32
    %c16_i32_62 = arith.constant 16 : i32
    %141 = arith.muli %139, %c16_i32_62 : i32
    %142 = tpu.assume_multiple %141, 16 : i32
    %143 = arith.index_cast %142 : i32 to index
    %c0_63 = arith.constant 0 : index
    %144 = vector.load %arg12[%143, %c0_63] : memref<128x512xf32, #tpu.memory_space<vmem>>, vector<16x512xf32>
    %c0_64 = arith.constant 0 : index
    %c0_65 = arith.constant 0 : index
    %145 = vector.load %arg10[%c0_64, %c0_65] : memref<16x128xf32, #tpu.memory_space<vmem>>, vector<16x128xf32>
    %146 = arith.truncf %145 : vector<16x128xf32> to vector<16x128xbf16>
    %cst_66 = arith.constant dense<0.000000e+00> : vector<16x512xf32>
    %147 = tpu.matmul %146, %14, %cst_66 {dimension_numbers = #tpu.dot_dimension_numbers<[1], [0], [0], [1], [0, 0, 1, 1], [], []>} : vector<16x128xbf16>, vector<128x512xbf16>, vector<16x512xf32> -> vector<16x512xf32>
    %148 = arith.addf %144, %147 : vector<16x512xf32>
    %c0_67 = arith.constant 0 : index
    %c0_68 = arith.constant 0 : index
    %149 = vector.load %arg11[%c0_67, %c0_68] : memref<16x128xf32, #tpu.memory_space<vmem>>, vector<16x128xf32>
    %150 = vector.extract_strided_slice %148 {offsets = [0, 0], sizes = [16, 128], strides = [1, 1]} : vector<16x512xf32> to vector<16x128xf32>
    %151 = arith.negf %150 : vector<16x128xf32>
    %152 = math.exp %151 : vector<16x128xf32>
    %cst_69 = arith.constant 1.000000e+00 : f32
    %153 = vector.broadcast %cst_69 : f32 to vector<16x128xf32>
    %154 = arith.addf %153, %152 : vector<16x128xf32>
    %155 = arith.divf %153, %154 : vector<16x128xf32>
    %156 = vector.extract_strided_slice %148 {offsets = [0, 128], sizes = [16, 128], strides = [1, 1]} : vector<16x512xf32> to vector<16x128xf32>
    %157 = arith.negf %156 : vector<16x128xf32>
    %158 = math.exp %157 : vector<16x128xf32>
    %cst_70 = arith.constant 1.000000e+00 : f32
    %159 = vector.broadcast %cst_70 : f32 to vector<16x128xf32>
    %160 = arith.addf %159, %158 : vector<16x128xf32>
    %161 = arith.divf %159, %160 : vector<16x128xf32>
    %162 = vector.extract_strided_slice %148 {offsets = [0, 256], sizes = [16, 128], strides = [1, 1]} : vector<16x512xf32> to vector<16x128xf32>
    %163 = math.tanh %162 : vector<16x128xf32>
    %164 = vector.extract_strided_slice %148 {offsets = [0, 384], sizes = [16, 128], strides = [1, 1]} : vector<16x512xf32> to vector<16x128xf32>
    %165 = arith.negf %164 : vector<16x128xf32>
    %166 = math.exp %165 : vector<16x128xf32>
    %cst_71 = arith.constant 1.000000e+00 : f32
    %167 = vector.broadcast %cst_71 : f32 to vector<16x128xf32>
    %168 = arith.addf %167, %166 : vector<16x128xf32>
    %169 = arith.divf %167, %168 : vector<16x128xf32>
    %170 = arith.mulf %161, %149 : vector<16x128xf32>
    %171 = arith.mulf %155, %163 : vector<16x128xf32>
    %172 = arith.addf %170, %171 : vector<16x128xf32>
    %173 = math.tanh %172 : vector<16x128xf32>
    %174 = arith.mulf %169, %173 : vector<16x128xf32>
    %175 = vector.broadcast %140 : i32 to vector<16x1xi32>
    %176 = arith.cmpi slt, %175, %12 : vector<16x1xi32>
    %c0_72 = arith.constant 0 : index
    %c0_73 = arith.constant 0 : index
    %177 = vector.load %arg10[%c0_72, %c0_73] : memref<16x128xf32, #tpu.memory_space<vmem>>, vector<16x128xf32>
    %178 = vector.shape_cast %176 : vector<16x1xi1> to vector<16x1xi1>
    %179 = vector.broadcast %178 : vector<16x1xi1> to vector<16x128xi1>
    %180 = arith.select %179, %174, %177 : vector<16x128xi1>, vector<16x128xf32>
    %c0_74 = arith.constant 0 : index
    %c0_75 = arith.constant 0 : index
    %181 = vector.load %arg10[%c0_74, %c0_75] : memref<16x128xf32, #tpu.memory_space<vmem>>, vector<16x128xf32>
    tpu.vector_store %arg10[%c0_74, %c0_75], %180 {strides = array<i32>} : memref<16x128xf32, #tpu.memory_space<vmem>>, vector<16x128xf32>,
    %c0_76 = arith.constant 0 : index
    %c0_77 = arith.constant 0 : index
    %182 = vector.load %arg11[%c0_76, %c0_77] : memref<16x128xf32, #tpu.memory_space<vmem>>, vector<16x128xf32>
    %183 = vector.shape_cast %176 : vector<16x1xi1> to vector<16x1xi1>
    %184 = vector.broadcast %183 : vector<16x1xi1> to vector<16x128xi1>
    %185 = arith.select %184, %172, %182 : vector<16x128xi1>, vector<16x128xf32>
    %c0_78 = arith.constant 0 : index
    %c0_79 = arith.constant 0 : index
    %186 = vector.load %arg11[%c0_78, %c0_79] : memref<16x128xf32, #tpu.memory_space<vmem>>, vector<16x128xf32>
    tpu.vector_store %arg11[%c0_78, %c0_79], %185 {strides = array<i32>} : memref<16x128xf32, #tpu.memory_space<vmem>>, vector<16x128xf32>,
    %cst_80 = arith.constant 0.000000e+00 : f32
    %187 = vector.shape_cast %176 : vector<16x1xi1> to vector<16x1xi1>
    %188 = vector.broadcast %187 : vector<16x1xi1> to vector<16x128xi1>
    %189 = vector.broadcast %cst_80 : f32 to vector<16x128xf32>
    %190 = arith.select %188, %174, %189 : vector<16x128xi1>, vector<16x128xf32>
    %191 = arith.truncf %190 : vector<16x128xf32> to vector<16x128xbf16>
    %192 = arith.index_cast %142 : i32 to index
    %c0_81 = arith.constant 0 : index
    %193 = vector.load %arg7[%192, %c0_81] : memref<128x128xbf16, #tpu.memory_space<vmem>>, vector<16x128xbf16>
    tpu.vector_store %arg7[%192, %c0_81], %191 {strides = array<i32>} : memref<128x128xbf16, #tpu.memory_space<vmem>>, vector<16x128xbf16>,
    %c3_i32 = arith.constant 3 : i32
    %c2_i32_82 = arith.constant 2 : i32
    %194 = arith.muli %c2_i32_82, %c3_i32 : i32
    %c7_i32_83 = arith.constant 7 : i32
    %195 = arith.subi %c7_i32_83, %194 : i32
    %196 = arith.muli %arg0, %195 : i32
    %197 = arith.addi %c3_i32, %196 : i32
    %198 = arith.addi %19, %197 : i32
    %c16_i32_84 = arith.constant 16 : i32
    %199 = arith.muli %197, %c16_i32_84 : i32
    %200 = tpu.assume_multiple %199, 16 : i32
    %201 = arith.index_cast %200 : i32 to index
    %c0_85 = arith.constant 0 : index
    %202 = vector.load %arg12[%201, %c0_85] : memref<128x512xf32, #tpu.memory_space<vmem>>, vector<16x512xf32>
    %c0_86 = arith.constant 0 : index
    %c0_87 = arith.constant 0 : index
    %203 = vector.load %arg10[%c0_86, %c0_87] : memref<16x128xf32, #tpu.memory_space<vmem>>, vector<16x128xf32>
    %204 = arith.truncf %203 : vector<16x128xf32> to vector<16x128xbf16>
    %cst_88 = arith.constant dense<0.000000e+00> : vector<16x512xf32>
    %205 = tpu.matmul %204, %14, %cst_88 {dimension_numbers = #tpu.dot_dimension_numbers<[1], [0], [0], [1], [0, 0, 1, 1], [], []>} : vector<16x128xbf16>, vector<128x512xbf16>, vector<16x512xf32> -> vector<16x512xf32>
    %206 = arith.addf %202, %205 : vector<16x512xf32>
    %c0_89 = arith.constant 0 : index
    %c0_90 = arith.constant 0 : index
    %207 = vector.load %arg11[%c0_89, %c0_90] : memref<16x128xf32, #tpu.memory_space<vmem>>, vector<16x128xf32>
    %208 = vector.extract_strided_slice %206 {offsets = [0, 0], sizes = [16, 128], strides = [1, 1]} : vector<16x512xf32> to vector<16x128xf32>
    %209 = arith.negf %208 : vector<16x128xf32>
    %210 = math.exp %209 : vector<16x128xf32>
    %cst_91 = arith.constant 1.000000e+00 : f32
    %211 = vector.broadcast %cst_91 : f32 to vector<16x128xf32>
    %212 = arith.addf %211, %210 : vector<16x128xf32>
    %213 = arith.divf %211, %212 : vector<16x128xf32>
    %214 = vector.extract_strided_slice %206 {offsets = [0, 128], sizes = [16, 128], strides = [1, 1]} : vector<16x512xf32> to vector<16x128xf32>
    %215 = arith.negf %214 : vector<16x128xf32>
    %216 = math.exp %215 : vector<16x128xf32>
    %cst_92 = arith.constant 1.000000e+00 : f32
    %217 = vector.broadcast %cst_92 : f32 to vector<16x128xf32>
    %218 = arith.addf %217, %216 : vector<16x128xf32>
    %219 = arith.divf %217, %218 : vector<16x128xf32>
    %220 = vector.extract_strided_slice %206 {offsets = [0, 256], sizes = [16, 128], strides = [1, 1]} : vector<16x512xf32> to vector<16x128xf32>
    %221 = math.tanh %220 : vector<16x128xf32>
    %222 = vector.extract_strided_slice %206 {offsets = [0, 384], sizes = [16, 128], strides = [1, 1]} : vector<16x512xf32> to vector<16x128xf32>
    %223 = arith.negf %222 : vector<16x128xf32>
    %224 = math.exp %223 : vector<16x128xf32>
    %cst_93 = arith.constant 1.000000e+00 : f32
    %225 = vector.broadcast %cst_93 : f32 to vector<16x128xf32>
    %226 = arith.addf %225, %224 : vector<16x128xf32>
    %227 = arith.divf %225, %226 : vector<16x128xf32>
    %228 = arith.mulf %219, %207 : vector<16x128xf32>
    %229 = arith.mulf %213, %221 : vector<16x128xf32>
    %230 = arith.addf %228, %229 : vector<16x128xf32>
    %231 = math.tanh %230 : vector<16x128xf32>
    %232 = arith.mulf %227, %231 : vector<16x128xf32>
    %233 = vector.broadcast %198 : i32 to vector<16x1xi32>
    %234 = arith.cmpi slt, %233, %12 : vector<16x1xi32>
    %c0_94 = arith.constant 0 : index
    %c0_95 = arith.constant 0 : index
    %235 = vector.load %arg10[%c0_94, %c0_95] : memref<16x128xf32, #tpu.memory_space<vmem>>, vector<16x128xf32>
    %236 = vector.shape_cast %234 : vector<16x1xi1> to vector<16x1xi1>
    %237 = vector.broadcast %236 : vector<16x1xi1> to vector<16x128xi1>
    %238 = arith.select %237, %232, %235 : vector<16x128xi1>, vector<16x128xf32>
    %c0_96 = arith.constant 0 : index
    %c0_97 = arith.constant 0 : index
    %239 = vector.load %arg10[%c0_96, %c0_97] : memref<16x128xf32, #tpu.memory_space<vmem>>, vector<16x128xf32>
    tpu.vector_store %arg10[%c0_96, %c0_97], %238 {strides = array<i32>} : memref<16x128xf32, #tpu.memory_space<vmem>>, vector<16x128xf32>,
    %c0_98 = arith.constant 0 : index
    %c0_99 = arith.constant 0 : index
    %240 = vector.load %arg11[%c0_98, %c0_99] : memref<16x128xf32, #tpu.memory_space<vmem>>, vector<16x128xf32>
    %241 = vector.shape_cast %234 : vector<16x1xi1> to vector<16x1xi1>
    %242 = vector.broadcast %241 : vector<16x1xi1> to vector<16x128xi1>
    %243 = arith.select %242, %230, %240 : vector<16x128xi1>, vector<16x128xf32>
    %c0_100 = arith.constant 0 : index
    %c0_101 = arith.constant 0 : index
    %244 = vector.load %arg11[%c0_100, %c0_101] : memref<16x128xf32, #tpu.memory_space<vmem>>, vector<16x128xf32>
    tpu.vector_store %arg11[%c0_100, %c0_101], %243 {strides = array<i32>} : memref<16x128xf32, #tpu.memory_space<vmem>>, vector<16x128xf32>,
    %cst_102 = arith.constant 0.000000e+00 : f32
    %245 = vector.shape_cast %234 : vector<16x1xi1> to vector<16x1xi1>
    %246 = vector.broadcast %245 : vector<16x1xi1> to vector<16x128xi1>
    %247 = vector.broadcast %cst_102 : f32 to vector<16x128xf32>
    %248 = arith.select %246, %232, %247 : vector<16x128xi1>, vector<16x128xf32>
    %249 = arith.truncf %248 : vector<16x128xf32> to vector<16x128xbf16>
    %250 = arith.index_cast %200 : i32 to index
    %c0_103 = arith.constant 0 : index
    %251 = vector.load %arg7[%250, %c0_103] : memref<128x128xbf16, #tpu.memory_space<vmem>>, vector<16x128xbf16>
    tpu.vector_store %arg7[%250, %c0_103], %249 {strides = array<i32>} : memref<128x128xbf16, #tpu.memory_space<vmem>>, vector<16x128xbf16>,
    %c4_i32 = arith.constant 4 : i32
    %c2_i32_104 = arith.constant 2 : i32
    %252 = arith.muli %c2_i32_104, %c4_i32 : i32
    %c7_i32_105 = arith.constant 7 : i32
    %253 = arith.subi %c7_i32_105, %252 : i32
    %254 = arith.muli %arg0, %253 : i32
    %255 = arith.addi %c4_i32, %254 : i32
    %256 = arith.addi %19, %255 : i32
    %c16_i32_106 = arith.constant 16 : i32
    %257 = arith.muli %255, %c16_i32_106 : i32
    %258 = tpu.assume_multiple %257, 16 : i32
    %259 = arith.index_cast %258 : i32 to index
    %c0_107 = arith.constant 0 : index
    %260 = vector.load %arg12[%259, %c0_107] : memref<128x512xf32, #tpu.memory_space<vmem>>, vector<16x512xf32>
    %c0_108 = arith.constant 0 : index
    %c0_109 = arith.constant 0 : index
    %261 = vector.load %arg10[%c0_108, %c0_109] : memref<16x128xf32, #tpu.memory_space<vmem>>, vector<16x128xf32>
    %262 = arith.truncf %261 : vector<16x128xf32> to vector<16x128xbf16>
    %cst_110 = arith.constant dense<0.000000e+00> : vector<16x512xf32>
    %263 = tpu.matmul %262, %14, %cst_110 {dimension_numbers = #tpu.dot_dimension_numbers<[1], [0], [0], [1], [0, 0, 1, 1], [], []>} : vector<16x128xbf16>, vector<128x512xbf16>, vector<16x512xf32> -> vector<16x512xf32>
    %264 = arith.addf %260, %263 : vector<16x512xf32>
    %c0_111 = arith.constant 0 : index
    %c0_112 = arith.constant 0 : index
    %265 = vector.load %arg11[%c0_111, %c0_112] : memref<16x128xf32, #tpu.memory_space<vmem>>, vector<16x128xf32>
    %266 = vector.extract_strided_slice %264 {offsets = [0, 0], sizes = [16, 128], strides = [1, 1]} : vector<16x512xf32> to vector<16x128xf32>
    %267 = arith.negf %266 : vector<16x128xf32>
    %268 = math.exp %267 : vector<16x128xf32>
    %cst_113 = arith.constant 1.000000e+00 : f32
    %269 = vector.broadcast %cst_113 : f32 to vector<16x128xf32>
    %270 = arith.addf %269, %268 : vector<16x128xf32>
    %271 = arith.divf %269, %270 : vector<16x128xf32>
    %272 = vector.extract_strided_slice %264 {offsets = [0, 128], sizes = [16, 128], strides = [1, 1]} : vector<16x512xf32> to vector<16x128xf32>
    %273 = arith.negf %272 : vector<16x128xf32>
    %274 = math.exp %273 : vector<16x128xf32>
    %cst_114 = arith.constant 1.000000e+00 : f32
    %275 = vector.broadcast %cst_114 : f32 to vector<16x128xf32>
    %276 = arith.addf %275, %274 : vector<16x128xf32>
    %277 = arith.divf %275, %276 : vector<16x128xf32>
    %278 = vector.extract_strided_slice %264 {offsets = [0, 256], sizes = [16, 128], strides = [1, 1]} : vector<16x512xf32> to vector<16x128xf32>
    %279 = math.tanh %278 : vector<16x128xf32>
    %280 = vector.extract_strided_slice %264 {offsets = [0, 384], sizes = [16, 128], strides = [1, 1]} : vector<16x512xf32> to vector<16x128xf32>
    %281 = arith.negf %280 : vector<16x128xf32>
    %282 = math.exp %281 : vector<16x128xf32>
    %cst_115 = arith.constant 1.000000e+00 : f32
    %283 = vector.broadcast %cst_115 : f32 to vector<16x128xf32>
    %284 = arith.addf %283, %282 : vector<16x128xf32>
    %285 = arith.divf %283, %284 : vector<16x128xf32>
    %286 = arith.mulf %277, %265 : vector<16x128xf32>
    %287 = arith.mulf %271, %279 : vector<16x128xf32>
    %288 = arith.addf %286, %287 : vector<16x128xf32>
    %289 = math.tanh %288 : vector<16x128xf32>
    %290 = arith.mulf %285, %289 : vector<16x128xf32>
    %291 = vector.broadcast %256 : i32 to vector<16x1xi32>
    %292 = arith.cmpi slt, %291, %12 : vector<16x1xi32>
    %c0_116 = arith.constant 0 : index
    %c0_117 = arith.constant 0 : index
    %293 = vector.load %arg10[%c0_116, %c0_117] : memref<16x128xf32, #tpu.memory_space<vmem>>, vector<16x128xf32>
    %294 = vector.shape_cast %292 : vector<16x1xi1> to vector<16x1xi1>
    %295 = vector.broadcast %294 : vector<16x1xi1> to vector<16x128xi1>
    %296 = arith.select %295, %290, %293 : vector<16x128xi1>, vector<16x128xf32>
    %c0_118 = arith.constant 0 : index
    %c0_119 = arith.constant 0 : index
    %297 = vector.load %arg10[%c0_118, %c0_119] : memref<16x128xf32, #tpu.memory_space<vmem>>, vector<16x128xf32>
    tpu.vector_store %arg10[%c0_118, %c0_119], %296 {strides = array<i32>} : memref<16x128xf32, #tpu.memory_space<vmem>>, vector<16x128xf32>,
    %c0_120 = arith.constant 0 : index
    %c0_121 = arith.constant 0 : index
    %298 = vector.load %arg11[%c0_120, %c0_121] : memref<16x128xf32, #tpu.memory_space<vmem>>, vector<16x128xf32>
    %299 = vector.shape_cast %292 : vector<16x1xi1> to vector<16x1xi1>
    %300 = vector.broadcast %299 : vector<16x1xi1> to vector<16x128xi1>
    %301 = arith.select %300, %288, %298 : vector<16x128xi1>, vector<16x128xf32>
    %c0_122 = arith.constant 0 : index
    %c0_123 = arith.constant 0 : index
    %302 = vector.load %arg11[%c0_122, %c0_123] : memref<16x128xf32, #tpu.memory_space<vmem>>, vector<16x128xf32>
    tpu.vector_store %arg11[%c0_122, %c0_123], %301 {strides = array<i32>} : memref<16x128xf32, #tpu.memory_space<vmem>>, vector<16x128xf32>,
    %cst_124 = arith.constant 0.000000e+00 : f32
    %303 = vector.shape_cast %292 : vector<16x1xi1> to vector<16x1xi1>
    %304 = vector.broadcast %303 : vector<16x1xi1> to vector<16x128xi1>
    %305 = vector.broadcast %cst_124 : f32 to vector<16x128xf32>
    %306 = arith.select %304, %290, %305 : vector<16x128xi1>, vector<16x128xf32>
    %307 = arith.truncf %306 : vector<16x128xf32> to vector<16x128xbf16>
    %308 = arith.index_cast %258 : i32 to index
    %c0_125 = arith.constant 0 : index
    %309 = vector.load %arg7[%308, %c0_125] : memref<128x128xbf16, #tpu.memory_space<vmem>>, vector<16x128xbf16>
    tpu.vector_store %arg7[%308, %c0_125], %307 {strides = array<i32>} : memref<128x128xbf16, #tpu.memory_space<vmem>>, vector<16x128xbf16>,
    %c5_i32 = arith.constant 5 : i32
    %c2_i32_126 = arith.constant 2 : i32
    %310 = arith.muli %c2_i32_126, %c5_i32 : i32
    %c7_i32_127 = arith.constant 7 : i32
    %311 = arith.subi %c7_i32_127, %310 : i32
    %312 = arith.muli %arg0, %311 : i32
    %313 = arith.addi %c5_i32, %312 : i32
    %314 = arith.addi %19, %313 : i32
    %c16_i32_128 = arith.constant 16 : i32
    %315 = arith.muli %313, %c16_i32_128 : i32
    %316 = tpu.assume_multiple %315, 16 : i32
    %317 = arith.index_cast %316 : i32 to index
    %c0_129 = arith.constant 0 : index
    %318 = vector.load %arg12[%317, %c0_129] : memref<128x512xf32, #tpu.memory_space<vmem>>, vector<16x512xf32>
    %c0_130 = arith.constant 0 : index
    %c0_131 = arith.constant 0 : index
    %319 = vector.load %arg10[%c0_130, %c0_131] : memref<16x128xf32, #tpu.memory_space<vmem>>, vector<16x128xf32>
    %320 = arith.truncf %319 : vector<16x128xf32> to vector<16x128xbf16>
    %cst_132 = arith.constant dense<0.000000e+00> : vector<16x512xf32>
    %321 = tpu.matmul %320, %14, %cst_132 {dimension_numbers = #tpu.dot_dimension_numbers<[1], [0], [0], [1], [0, 0, 1, 1], [], []>} : vector<16x128xbf16>, vector<128x512xbf16>, vector<16x512xf32> -> vector<16x512xf32>
    %322 = arith.addf %318, %321 : vector<16x512xf32>
    %c0_133 = arith.constant 0 : index
    %c0_134 = arith.constant 0 : index
    %323 = vector.load %arg11[%c0_133, %c0_134] : memref<16x128xf32, #tpu.memory_space<vmem>>, vector<16x128xf32>
    %324 = vector.extract_strided_slice %322 {offsets = [0, 0], sizes = [16, 128], strides = [1, 1]} : vector<16x512xf32> to vector<16x128xf32>
    %325 = arith.negf %324 : vector<16x128xf32>
    %326 = math.exp %325 : vector<16x128xf32>
    %cst_135 = arith.constant 1.000000e+00 : f32
    %327 = vector.broadcast %cst_135 : f32 to vector<16x128xf32>
    %328 = arith.addf %327, %326 : vector<16x128xf32>
    %329 = arith.divf %327, %328 : vector<16x128xf32>
    %330 = vector.extract_strided_slice %322 {offsets = [0, 128], sizes = [16, 128], strides = [1, 1]} : vector<16x512xf32> to vector<16x128xf32>
    %331 = arith.negf %330 : vector<16x128xf32>
    %332 = math.exp %331 : vector<16x128xf32>
    %cst_136 = arith.constant 1.000000e+00 : f32
    %333 = vector.broadcast %cst_136 : f32 to vector<16x128xf32>
    %334 = arith.addf %333, %332 : vector<16x128xf32>
    %335 = arith.divf %333, %334 : vector<16x128xf32>
    %336 = vector.extract_strided_slice %322 {offsets = [0, 256], sizes = [16, 128], strides = [1, 1]} : vector<16x512xf32> to vector<16x128xf32>
    %337 = math.tanh %336 : vector<16x128xf32>
    %338 = vector.extract_strided_slice %322 {offsets = [0, 384], sizes = [16, 128], strides = [1, 1]} : vector<16x512xf32> to vector<16x128xf32>
    %339 = arith.negf %338 : vector<16x128xf32>
    %340 = math.exp %339 : vector<16x128xf32>
    %cst_137 = arith.constant 1.000000e+00 : f32
    %341 = vector.broadcast %cst_137 : f32 to vector<16x128xf32>
    %342 = arith.addf %341, %340 : vector<16x128xf32>
    %343 = arith.divf %341, %342 : vector<16x128xf32>
    %344 = arith.mulf %335, %323 : vector<16x128xf32>
    %345 = arith.mulf %329, %337 : vector<16x128xf32>
    %346 = arith.addf %344, %345 : vector<16x128xf32>
    %347 = math.tanh %346 : vector<16x128xf32>
    %348 = arith.mulf %343, %347 : vector<16x128xf32>
    %349 = vector.broadcast %314 : i32 to vector<16x1xi32>
    %350 = arith.cmpi slt, %349, %12 : vector<16x1xi32>
    %c0_138 = arith.constant 0 : index
    %c0_139 = arith.constant 0 : index
    %351 = vector.load %arg10[%c0_138, %c0_139] : memref<16x128xf32, #tpu.memory_space<vmem>>, vector<16x128xf32>
    %352 = vector.shape_cast %350 : vector<16x1xi1> to vector<16x1xi1>
    %353 = vector.broadcast %352 : vector<16x1xi1> to vector<16x128xi1>
    %354 = arith.select %353, %348, %351 : vector<16x128xi1>, vector<16x128xf32>
    %c0_140 = arith.constant 0 : index
    %c0_141 = arith.constant 0 : index
    %355 = vector.load %arg10[%c0_140, %c0_141] : memref<16x128xf32, #tpu.memory_space<vmem>>, vector<16x128xf32>
    tpu.vector_store %arg10[%c0_140, %c0_141], %354 {strides = array<i32>} : memref<16x128xf32, #tpu.memory_space<vmem>>, vector<16x128xf32>,
    %c0_142 = arith.constant 0 : index
    %c0_143 = arith.constant 0 : index
    %356 = vector.load %arg11[%c0_142, %c0_143] : memref<16x128xf32, #tpu.memory_space<vmem>>, vector<16x128xf32>
    %357 = vector.shape_cast %350 : vector<16x1xi1> to vector<16x1xi1>
    %358 = vector.broadcast %357 : vector<16x1xi1> to vector<16x128xi1>
    %359 = arith.select %358, %346, %356 : vector<16x128xi1>, vector<16x128xf32>
    %c0_144 = arith.constant 0 : index
    %c0_145 = arith.constant 0 : index
    %360 = vector.load %arg11[%c0_144, %c0_145] : memref<16x128xf32, #tpu.memory_space<vmem>>, vector<16x128xf32>
    tpu.vector_store %arg11[%c0_144, %c0_145], %359 {strides = array<i32>} : memref<16x128xf32, #tpu.memory_space<vmem>>, vector<16x128xf32>,
    %cst_146 = arith.constant 0.000000e+00 : f32
    %361 = vector.shape_cast %350 : vector<16x1xi1> to vector<16x1xi1>
    %362 = vector.broadcast %361 : vector<16x1xi1> to vector<16x128xi1>
    %363 = vector.broadcast %cst_146 : f32 to vector<16x128xf32>
    %364 = arith.select %362, %348, %363 : vector<16x128xi1>, vector<16x128xf32>
    %365 = arith.truncf %364 : vector<16x128xf32> to vector<16x128xbf16>
    %366 = arith.index_cast %316 : i32 to index
    %c0_147 = arith.constant 0 : index
    %367 = vector.load %arg7[%366, %c0_147] : memref<128x128xbf16, #tpu.memory_space<vmem>>, vector<16x128xbf16>
    tpu.vector_store %arg7[%366, %c0_147], %365 {strides = array<i32>} : memref<128x128xbf16, #tpu.memory_space<vmem>>, vector<16x128xbf16>,
    %c6_i32 = arith.constant 6 : i32
    %c2_i32_148 = arith.constant 2 : i32
    %368 = arith.muli %c2_i32_148, %c6_i32 : i32
    %c7_i32_149 = arith.constant 7 : i32
    %369 = arith.subi %c7_i32_149, %368 : i32
    %370 = arith.muli %arg0, %369 : i32
    %371 = arith.addi %c6_i32, %370 : i32
    %372 = arith.addi %19, %371 : i32
    %c16_i32_150 = arith.constant 16 : i32
    %373 = arith.muli %371, %c16_i32_150 : i32
    %374 = tpu.assume_multiple %373, 16 : i32
    %375 = arith.index_cast %374 : i32 to index
    %c0_151 = arith.constant 0 : index
    %376 = vector.load %arg12[%375, %c0_151] : memref<128x512xf32, #tpu.memory_space<vmem>>, vector<16x512xf32>
    %c0_152 = arith.constant 0 : index
    %c0_153 = arith.constant 0 : index
    %377 = vector.load %arg10[%c0_152, %c0_153] : memref<16x128xf32, #tpu.memory_space<vmem>>, vector<16x128xf32>
    %378 = arith.truncf %377 : vector<16x128xf32> to vector<16x128xbf16>
    %cst_154 = arith.constant dense<0.000000e+00> : vector<16x512xf32>
    %379 = tpu.matmul %378, %14, %cst_154 {dimension_numbers = #tpu.dot_dimension_numbers<[1], [0], [0], [1], [0, 0, 1, 1], [], []>} : vector<16x128xbf16>, vector<128x512xbf16>, vector<16x512xf32> -> vector<16x512xf32>
    %380 = arith.addf %376, %379 : vector<16x512xf32>
    %c0_155 = arith.constant 0 : index
    %c0_156 = arith.constant 0 : index
    %381 = vector.load %arg11[%c0_155, %c0_156] : memref<16x128xf32, #tpu.memory_space<vmem>>, vector<16x128xf32>
    %382 = vector.extract_strided_slice %380 {offsets = [0, 0], sizes = [16, 128], strides = [1, 1]} : vector<16x512xf32> to vector<16x128xf32>
    %383 = arith.negf %382 : vector<16x128xf32>
    %384 = math.exp %383 : vector<16x128xf32>
    %cst_157 = arith.constant 1.000000e+00 : f32
    %385 = vector.broadcast %cst_157 : f32 to vector<16x128xf32>
    %386 = arith.addf %385, %384 : vector<16x128xf32>
    %387 = arith.divf %385, %386 : vector<16x128xf32>
    %388 = vector.extract_strided_slice %380 {offsets = [0, 128], sizes = [16, 128], strides = [1, 1]} : vector<16x512xf32> to vector<16x128xf32>
    %389 = arith.negf %388 : vector<16x128xf32>
    %390 = math.exp %389 : vector<16x128xf32>
    %cst_158 = arith.constant 1.000000e+00 : f32
    %391 = vector.broadcast %cst_158 : f32 to vector<16x128xf32>
    %392 = arith.addf %391, %390 : vector<16x128xf32>
    %393 = arith.divf %391, %392 : vector<16x128xf32>
    %394 = vector.extract_strided_slice %380 {offsets = [0, 256], sizes = [16, 128], strides = [1, 1]} : vector<16x512xf32> to vector<16x128xf32>
    %395 = math.tanh %394 : vector<16x128xf32>
    %396 = vector.extract_strided_slice %380 {offsets = [0, 384], sizes = [16, 128], strides = [1, 1]} : vector<16x512xf32> to vector<16x128xf32>
    %397 = arith.negf %396 : vector<16x128xf32>
    %398 = math.exp %397 : vector<16x128xf32>
    %cst_159 = arith.constant 1.000000e+00 : f32
    %399 = vector.broadcast %cst_159 : f32 to vector<16x128xf32>
    %400 = arith.addf %399, %398 : vector<16x128xf32>
    %401 = arith.divf %399, %400 : vector<16x128xf32>
    %402 = arith.mulf %393, %381 : vector<16x128xf32>
    %403 = arith.mulf %387, %395 : vector<16x128xf32>
    %404 = arith.addf %402, %403 : vector<16x128xf32>
    %405 = math.tanh %404 : vector<16x128xf32>
    %406 = arith.mulf %401, %405 : vector<16x128xf32>
    %407 = vector.broadcast %372 : i32 to vector<16x1xi32>
    %408 = arith.cmpi slt, %407, %12 : vector<16x1xi32>
    %c0_160 = arith.constant 0 : index
    %c0_161 = arith.constant 0 : index
    %409 = vector.load %arg10[%c0_160, %c0_161] : memref<16x128xf32, #tpu.memory_space<vmem>>, vector<16x128xf32>
    %410 = vector.shape_cast %408 : vector<16x1xi1> to vector<16x1xi1>
    %411 = vector.broadcast %410 : vector<16x1xi1> to vector<16x128xi1>
    %412 = arith.select %411, %406, %409 : vector<16x128xi1>, vector<16x128xf32>
    %c0_162 = arith.constant 0 : index
    %c0_163 = arith.constant 0 : index
    %413 = vector.load %arg10[%c0_162, %c0_163] : memref<16x128xf32, #tpu.memory_space<vmem>>, vector<16x128xf32>
    tpu.vector_store %arg10[%c0_162, %c0_163], %412 {strides = array<i32>} : memref<16x128xf32, #tpu.memory_space<vmem>>, vector<16x128xf32>,
    %c0_164 = arith.constant 0 : index
    %c0_165 = arith.constant 0 : index
    %414 = vector.load %arg11[%c0_164, %c0_165] : memref<16x128xf32, #tpu.memory_space<vmem>>, vector<16x128xf32>
    %415 = vector.shape_cast %408 : vector<16x1xi1> to vector<16x1xi1>
    %416 = vector.broadcast %415 : vector<16x1xi1> to vector<16x128xi1>
    %417 = arith.select %416, %404, %414 : vector<16x128xi1>, vector<16x128xf32>
    %c0_166 = arith.constant 0 : index
    %c0_167 = arith.constant 0 : index
    %418 = vector.load %arg11[%c0_166, %c0_167] : memref<16x128xf32, #tpu.memory_space<vmem>>, vector<16x128xf32>
    tpu.vector_store %arg11[%c0_166, %c0_167], %417 {strides = array<i32>} : memref<16x128xf32, #tpu.memory_space<vmem>>, vector<16x128xf32>,
    %cst_168 = arith.constant 0.000000e+00 : f32
    %419 = vector.shape_cast %408 : vector<16x1xi1> to vector<16x1xi1>
    %420 = vector.broadcast %419 : vector<16x1xi1> to vector<16x128xi1>
    %421 = vector.broadcast %cst_168 : f32 to vector<16x128xf32>
    %422 = arith.select %420, %406, %421 : vector<16x128xi1>, vector<16x128xf32>
    %423 = arith.truncf %422 : vector<16x128xf32> to vector<16x128xbf16>
    %424 = arith.index_cast %374 : i32 to index
    %c0_169 = arith.constant 0 : index
    %425 = vector.load %arg7[%424, %c0_169] : memref<128x128xbf16, #tpu.memory_space<vmem>>, vector<16x128xbf16>
    tpu.vector_store %arg7[%424, %c0_169], %423 {strides = array<i32>} : memref<128x128xbf16, #tpu.memory_space<vmem>>, vector<16x128xbf16>,
    %c7_i32_170 = arith.constant 7 : i32
    %c2_i32_171 = arith.constant 2 : i32
    %426 = arith.muli %c2_i32_171, %c7_i32_170 : i32
    %c7_i32_172 = arith.constant 7 : i32
    %427 = arith.subi %c7_i32_172, %426 : i32
    %428 = arith.muli %arg0, %427 : i32
    %429 = arith.addi %c7_i32_170, %428 : i32
    %430 = arith.addi %19, %429 : i32
    %c16_i32_173 = arith.constant 16 : i32
    %431 = arith.muli %429, %c16_i32_173 : i32
    %432 = tpu.assume_multiple %431, 16 : i32
    %433 = arith.index_cast %432 : i32 to index
    %c0_174 = arith.constant 0 : index
    %434 = vector.load %arg12[%433, %c0_174] : memref<128x512xf32, #tpu.memory_space<vmem>>, vector<16x512xf32>
    %c0_175 = arith.constant 0 : index
    %c0_176 = arith.constant 0 : index
    %435 = vector.load %arg10[%c0_175, %c0_176] : memref<16x128xf32, #tpu.memory_space<vmem>>, vector<16x128xf32>
    %436 = arith.truncf %435 : vector<16x128xf32> to vector<16x128xbf16>
    %cst_177 = arith.constant dense<0.000000e+00> : vector<16x512xf32>
    %437 = tpu.matmul %436, %14, %cst_177 {dimension_numbers = #tpu.dot_dimension_numbers<[1], [0], [0], [1], [0, 0, 1, 1], [], []>} : vector<16x128xbf16>, vector<128x512xbf16>, vector<16x512xf32> -> vector<16x512xf32>
    %438 = arith.addf %434, %437 : vector<16x512xf32>
    %c0_178 = arith.constant 0 : index
    %c0_179 = arith.constant 0 : index
    %439 = vector.load %arg11[%c0_178, %c0_179] : memref<16x128xf32, #tpu.memory_space<vmem>>, vector<16x128xf32>
    %440 = vector.extract_strided_slice %438 {offsets = [0, 0], sizes = [16, 128], strides = [1, 1]} : vector<16x512xf32> to vector<16x128xf32>
    %441 = arith.negf %440 : vector<16x128xf32>
    %442 = math.exp %441 : vector<16x128xf32>
    %cst_180 = arith.constant 1.000000e+00 : f32
    %443 = vector.broadcast %cst_180 : f32 to vector<16x128xf32>
    %444 = arith.addf %443, %442 : vector<16x128xf32>
    %445 = arith.divf %443, %444 : vector<16x128xf32>
    %446 = vector.extract_strided_slice %438 {offsets = [0, 128], sizes = [16, 128], strides = [1, 1]} : vector<16x512xf32> to vector<16x128xf32>
    %447 = arith.negf %446 : vector<16x128xf32>
    %448 = math.exp %447 : vector<16x128xf32>
    %cst_181 = arith.constant 1.000000e+00 : f32
    %449 = vector.broadcast %cst_181 : f32 to vector<16x128xf32>
    %450 = arith.addf %449, %448 : vector<16x128xf32>
    %451 = arith.divf %449, %450 : vector<16x128xf32>
    %452 = vector.extract_strided_slice %438 {offsets = [0, 256], sizes = [16, 128], strides = [1, 1]} : vector<16x512xf32> to vector<16x128xf32>
    %453 = math.tanh %452 : vector<16x128xf32>
    %454 = vector.extract_strided_slice %438 {offsets = [0, 384], sizes = [16, 128], strides = [1, 1]} : vector<16x512xf32> to vector<16x128xf32>
    %455 = arith.negf %454 : vector<16x128xf32>
    %456 = math.exp %455 : vector<16x128xf32>
    %cst_182 = arith.constant 1.000000e+00 : f32
    %457 = vector.broadcast %cst_182 : f32 to vector<16x128xf32>
    %458 = arith.addf %457, %456 : vector<16x128xf32>
    %459 = arith.divf %457, %458 : vector<16x128xf32>
    %460 = arith.mulf %451, %439 : vector<16x128xf32>
    %461 = arith.mulf %445, %453 : vector<16x128xf32>
    %462 = arith.addf %460, %461 : vector<16x128xf32>
    %463 = math.tanh %462 : vector<16x128xf32>
    %464 = arith.mulf %459, %463 : vector<16x128xf32>
    %465 = vector.broadcast %430 : i32 to vector<16x1xi32>
    %466 = arith.cmpi slt, %465, %12 : vector<16x1xi32>
    %c0_183 = arith.constant 0 : index
    %c0_184 = arith.constant 0 : index
    %467 = vector.load %arg10[%c0_183, %c0_184] : memref<16x128xf32, #tpu.memory_space<vmem>>, vector<16x128xf32>
    %468 = vector.shape_cast %466 : vector<16x1xi1> to vector<16x1xi1>
    %469 = vector.broadcast %468 : vector<16x1xi1> to vector<16x128xi1>
    %470 = arith.select %469, %464, %467 : vector<16x128xi1>, vector<16x128xf32>
    %c0_185 = arith.constant 0 : index
    %c0_186 = arith.constant 0 : index
    %471 = vector.load %arg10[%c0_185, %c0_186] : memref<16x128xf32, #tpu.memory_space<vmem>>, vector<16x128xf32>
    tpu.vector_store %arg10[%c0_185, %c0_186], %470 {strides = array<i32>} : memref<16x128xf32, #tpu.memory_space<vmem>>, vector<16x128xf32>,
    %c0_187 = arith.constant 0 : index
    %c0_188 = arith.constant 0 : index
    %472 = vector.load %arg11[%c0_187, %c0_188] : memref<16x128xf32, #tpu.memory_space<vmem>>, vector<16x128xf32>
    %473 = vector.shape_cast %466 : vector<16x1xi1> to vector<16x1xi1>
    %474 = vector.broadcast %473 : vector<16x1xi1> to vector<16x128xi1>
    %475 = arith.select %474, %462, %472 : vector<16x128xi1>, vector<16x128xf32>
    %c0_189 = arith.constant 0 : index
    %c0_190 = arith.constant 0 : index
    %476 = vector.load %arg11[%c0_189, %c0_190] : memref<16x128xf32, #tpu.memory_space<vmem>>, vector<16x128xf32>
    tpu.vector_store %arg11[%c0_189, %c0_190], %475 {strides = array<i32>} : memref<16x128xf32, #tpu.memory_space<vmem>>, vector<16x128xf32>,
    %cst_191 = arith.constant 0.000000e+00 : f32
    %477 = vector.shape_cast %466 : vector<16x1xi1> to vector<16x1xi1>
    %478 = vector.broadcast %477 : vector<16x1xi1> to vector<16x128xi1>
    %479 = vector.broadcast %cst_191 : f32 to vector<16x128xf32>
    %480 = arith.select %478, %464, %479 : vector<16x128xi1>, vector<16x128xf32>
    %481 = arith.truncf %480 : vector<16x128xf32> to vector<16x128xbf16>
    %482 = arith.index_cast %432 : i32 to index
    %c0_192 = arith.constant 0 : index
    %483 = vector.load %arg7[%482, %c0_192] : memref<128x128xbf16, #tpu.memory_space<vmem>>, vector<16x128xbf16>
    tpu.vector_store %arg7[%482, %c0_192], %481 {strides = array<i32>} : memref<128x128xbf16, #tpu.memory_space<vmem>>, vector<16x128xbf16>,
    %c8_i32_193 = arith.constant 8 : i32
    %c0_i32_194 = arith.constant 0 : i32
    %484 = arith.cmpi eq, %arg1, %c0_i32_194 : i32
    %485 = arith.extui %484 : i1 to i32
    %c0_i32_195 = arith.constant 0 : i32
    %486 = arith.cmpi ne, %485, %c0_i32_195 : i32
    scf.if %486 {
      %c0_196 = arith.constant 0 : index
      %c0_197 = arith.constant 0 : index
      %487 = vector.load %arg10[%c0_196, %c0_197] : memref<16x128xf32, #tpu.memory_space<vmem>>, vector<16x128xf32>
      %488 = vector.shape_cast %487 : vector<16x128xf32> to vector<1x16x128xf32>
      %c0_198 = arith.constant 0 : index
      %c0_199 = arith.constant 0 : index
      %c0_200 = arith.constant 0 : index
      %489 = vector.load %arg8[%c0_198, %c0_199, %c0_200] : memref<1x16x128xf32, #tpu.memory_space<vmem>>, vector<1x16x128xf32>
      tpu.vector_store %arg8[%c0_198, %c0_199, %c0_200], %488 {strides = array<i32>} : memref<1x16x128xf32, #tpu.memory_space<vmem>>, vector<1x16x128xf32>,
      %c0_201 = arith.constant 0 : index
      %c0_202 = arith.constant 0 : index
      %490 = vector.load %arg11[%c0_201, %c0_202] : memref<16x128xf32, #tpu.memory_space<vmem>>, vector<16x128xf32>
      %491 = vector.shape_cast %490 : vector<16x128xf32> to vector<1x16x128xf32>
      %c0_203 = arith.constant 0 : index
      %c0_204 = arith.constant 0 : index
      %c0_205 = arith.constant 0 : index
      %492 = vector.load %arg9[%c0_203, %c0_204, %c0_205] : memref<1x16x128xf32, #tpu.memory_space<vmem>>, vector<1x16x128xf32>
      tpu.vector_store %arg9[%c0_203, %c0_204, %c0_205], %491 {strides = array<i32>} : memref<1x16x128xf32, #tpu.memory_space<vmem>>, vector<1x16x128xf32>,
    } else {
    }
    return
  }
  func.func @transform_0(%arg0: i32, %arg1: i32) -> (i32, i32) {
    %c0_i32 = arith.constant 0 : i32
    %c0_i32_0 = arith.constant 0 : i32
    %c0_i32_1 = arith.constant 0 : i32
    return %c0_i32, %c0_i32_0 : i32, i32
  }
  func.func @transform_1(%arg0: i32, %arg1: i32) -> (i32, i32) {
    %c2_i32 = arith.constant 2 : i32
    %0 = arith.muli %c2_i32, %arg1 : i32
    %c0_i32 = arith.constant 0 : i32
    %1 = arith.subi %c0_i32, %0 : i32
    %2 = arith.muli %arg0, %1 : i32
    %3 = arith.addi %arg1, %2 : i32
    %c0_i32_0 = arith.constant 0 : i32
    %c0_i32_1 = arith.constant 0 : i32
    return %3, %c0_i32_0 : i32, i32
  }
  func.func @transform_2(%arg0: i32, %arg1: i32) -> (i32, i32, i32) {
    %c0_i32 = arith.constant 0 : i32
    %c0_i32_0 = arith.constant 0 : i32
    %c0_i32_1 = arith.constant 0 : i32
    return %arg0, %c0_i32, %c0_i32_0 : i32, i32, i32
  }
  func.func @transform_3(%arg0: i32, %arg1: i32) -> (i32, i32, i32) {
    %c0_i32 = arith.constant 0 : i32
    %c0_i32_0 = arith.constant 0 : i32
    %c0_i32_1 = arith.constant 0 : i32
    return %arg0, %c0_i32, %c0_i32_0 : i32, i32, i32
  }
  func.func @transform_4(%arg0: i32, %arg1: i32) -> (i32, i32, i32) {
    %c0_i32 = arith.constant 0 : i32
    %c0_i32_0 = arith.constant 0 : i32
    %c0_i32_1 = arith.constant 0 : i32
    return %arg0, %c0_i32, %c0_i32_0 : i32, i32, i32
  }
  func.func @transform_5(%arg0: i32, %arg1: i32) -> (i32, i32) {
    %c2_i32 = arith.constant 2 : i32
    %0 = arith.muli %c2_i32, %arg1 : i32
    %c0_i32 = arith.constant 0 : i32
    %1 = arith.subi %c0_i32, %0 : i32
    %2 = arith.muli %arg0, %1 : i32
    %3 = arith.addi %arg1, %2 : i32
    %c0_i32_0 = arith.constant 0 : i32
    return %3, %arg0 : i32, i32
  }
  func.func @transform_6(%arg0: i32, %arg1: i32) -> (i32, i32, i32) {
    %c0_i32 = arith.constant 0 : i32
    %c0_i32_0 = arith.constant 0 : i32
    %c0_i32_1 = arith.constant 0 : i32
    return %arg0, %c0_i32, %c0_i32_0 : i32, i32, i32
  }
  func.func @transform_7(%arg0: i32, %arg1: i32) -> (i32, i32, i32) {
    %c0_i32 = arith.constant 0 : i32
    %c0_i32_0 = arith.constant 0 : i32
    %c0_i32_1 = arith.constant 0 : i32
    return %arg0, %c0_i32, %c0_i32_0 : i32, i32, i32
  }
}

module attributes {stable_mosaic.version = 11 : i64} {
  func.func @_bilstm_kernel(%arg0: i32, %arg1: i32, %arg2: memref<16x1xi32, #tpu.memory_space<vmem>>, %arg3: memref<128x256xbf16, #tpu.memory_space<vmem>>, %arg4: memref<1x256x512xbf16, #tpu.memory_space<vmem>>, %arg5: memref<1x128x512xbf16, #tpu.memory_space<vmem>>, %arg6: memref<1x1x512xf32, #tpu.memory_space<vmem>>, %arg7: memref<128x128xbf16, #tpu.memory_space<vmem>>, %arg8: memref<1x16x128xf32, #tpu.memory_space<vmem>>, %arg9: memref<1x16x128xf32, #tpu.memory_space<vmem>>, %arg10: memref<16x128xf32, #tpu.memory_space<vmem>>, %arg11: memref<16x128xf32, #tpu.memory_space<vmem>>, %arg12: memref<128x512xf32, #tpu.memory_space<vmem>>) attributes {dimension_semantics = [#tpu.dimension_semantics<parallel>, #tpu.dimension_semantics<arbitrary>], iteration_bounds = array<i64: 2, 1>, scalar_prefetch = 0 : i64, scratch_operands = 3 : i64, tpu.core_type = #tpu.core_type<tc>, window_params = [{pipeline_mode = #tpu.pipeline_mode<synchronous>, transform_indices = @transform_0, window_bounds = array<i64: 16, 1>}, {transform_indices = @transform_1, window_bounds = array<i64: 128, 256>}, {transform_indices = @transform_2, window_bounds = array<i64: 1, 256, 512>}, {transform_indices = @transform_3, window_bounds = array<i64: 1, 128, 512>}, {transform_indices = @transform_4, window_bounds = array<i64: 1, 1, 512>}, {transform_indices = @transform_5, window_bounds = array<i64: 128, 128>}, {transform_indices = @transform_6, window_bounds = array<i64: 1, 16, 128>}, {transform_indices = @transform_7, window_bounds = array<i64: 1, 16, 128>}]} {
    %c0_i32 = arith.constant 0 : i32
    %0 = arith.cmpi eq, %arg1, %c0_i32 : i32
    %1 = arith.extui %0 : i1 to i32
    %c0_i32_0 = arith.constant 0 : i32
    %2 = arith.cmpi ne, %1, %c0_i32_0 : i32
    scf.if %2 {
      %cst_196 = arith.constant 0.000000e+00 : f32
      %487 = vector.broadcast %cst_196 : f32 to vector<16x128xf32>
      %c0_197 = arith.constant 0 : index
      %c0_198 = arith.constant 0 : index
      %488 = vector.load %arg10[%c0_197, %c0_198] : memref<16x128xf32, #tpu.memory_space<vmem>>, vector<16x128xf32>
      tpu.vector_store %arg10[%c0_197, %c0_198], %487 {strides = array<i32>} : memref<16x128xf32, #tpu.memory_space<vmem>>, vector<16x128xf32>,
      %cst_199 = arith.constant 0.000000e+00 : f32
      %489 = vector.broadcast %cst_199 : f32 to vector<16x128xf32>
      %c0_200 = arith.constant 0 : index
      %c0_201 = arith.constant 0 : index
      %490 = vector.load %arg11[%c0_200, %c0_201] : memref<16x128xf32, #tpu.memory_space<vmem>>, vector<16x128xf32>
      tpu.vector_store %arg11[%c0_200, %c0_201], %489 {strides = array<i32>} : memref<16x128xf32, #tpu.memory_space<vmem>>, vector<16x128xf32>,
    } else {
    }
    %c0 = arith.constant 0 : index
    %c0_1 = arith.constant 0 : index
    %3 = vector.load %arg3[%c0, %c0_1] : memref<128x256xbf16, #tpu.memory_space<vmem>>, vector<128x256xbf16>
    %c0_2 = arith.constant 0 : index
    %c0_3 = arith.constant 0 : index
    %c0_4 = arith.constant 0 : index
    %4 = vector.load %arg4[%c0_2, %c0_3, %c0_4] : memref<1x256x512xbf16, #tpu.memory_space<vmem>>, vector<1x256x512xbf16>
    %5 = vector.shape_cast %4 : vector<1x256x512xbf16> to vector<256x512xbf16>
    %cst = arith.constant dense<0.000000e+00> : vector<128x512xf32>
    %6 = tpu.matmul %3, %5, %cst {dimension_numbers = #tpu.dot_dimension_numbers<[1], [0], [0], [1], [0, 0, 1, 1], [], []>} : vector<128x256xbf16>, vector<256x512xbf16>, vector<128x512xf32> -> vector<128x512xf32>
    %c0_5 = arith.constant 0 : index
    %c0_6 = arith.constant 0 : index
    %c0_7 = arith.constant 0 : index
    %7 = vector.load %arg6[%c0_5, %c0_6, %c0_7] : memref<1x1x512xf32, #tpu.memory_space<vmem>>, vector<1x1x512xf32>
    %8 = vector.shape_cast %7 : vector<1x1x512xf32> to vector<1x512xf32>
    %9 = vector.broadcast %8 : vector<1x512xf32> to vector<128x512xf32>
    %10 = arith.addf %6, %9 : vector<128x512xf32>
    %c0_8 = arith.constant 0 : index
    %c0_9 = arith.constant 0 : index
    %11 = vector.load %arg12[%c0_8, %c0_9] : memref<128x512xf32, #tpu.memory_space<vmem>>, vector<128x512xf32>
    tpu.vector_store %arg12[%c0_8, %c0_9], %10 {strides = array<i32>} : memref<128x512xf32, #tpu.memory_space<vmem>>, vector<128x512xf32>,
    %c0_10 = arith.constant 0 : index
    %c0_11 = arith.constant 0 : index
    %12 = vector.load %arg2[%c0_10, %c0_11] : memref<16x1xi32, #tpu.memory_space<vmem>>, vector<16x1xi32>
    %c0_12 = arith.constant 0 : index
    %c0_13 = arith.constant 0 : index
    %c0_14 = arith.constant 0 : index
    %13 = vector.load %arg5[%c0_12, %c0_13, %c0_14] : memref<1x128x512xbf16, #tpu.memory_space<vmem>>, vector<1x128x512xbf16>
    %14 = vector.shape_cast %13 : vector<1x128x512xbf16> to vector<128x512xbf16>
    %c2_i32 = arith.constant 2 : i32
    %15 = arith.muli %c2_i32, %arg1 : i32
    %c0_i32_15 = arith.constant 0 : i32
    %16 = arith.subi %c0_i32_15, %15 : i32
    %17 = arith.muli %arg0, %16 : i32
    %18 = arith.addi %arg1, %17 : i32
    %c8_i32 = arith.constant 8 : i32
    %19 = arith.muli %18, %c8_i32 : i32
    %c0_i32_16 = arith.constant 0 : i32
    %c2_i32_17 = arith.constant 2 : i32
    %20 = arith.muli %c2_i32_17, %c0_i32_16 : i32
    %c7_i32 = arith.constant 7 : i32
    %21 = arith.subi %c7_i32, %20 : i32
    %22 = arith.muli %arg0, %21 : i32
    %23 = arith.addi %c0_i32_16, %22 : i32
    %24 = arith.addi %19, %23 : i32
    %c16_i32 = arith.constant 16 : i32
    %25 = arith.muli %23, %c16_i32 : i32
    %26 = tpu.assume_multiple %25, 16 : i32
    %27 = arith.index_cast %26 : i32 to index
    %c0_18 = arith.constant 0 : index
    %28 = vector.load %arg12[%27, %c0_18] : memref<128x512xf32, #tpu.memory_space<vmem>>, vector<16x512xf32>
    %c0_19 = arith.constant 0 : index
    %c0_20 = arith.constant 0 : index
    %29 = vector.load %arg10[%c0_19, %c0_20] : memref<16x128xf32, #tpu.memory_space<vmem>>, vector<16x128xf32>
    %30 = arith.truncf %29 : vector<16x128xf32> to vector<16x128xbf16>
    %cst_21 = arith.constant dense<0.000000e+00> : vector<16x512xf32>
    %31 = tpu.matmul %30, %14, %cst_21 {dimension_numbers = #tpu.dot_dimension_numbers<[1], [0], [0], [1], [0, 0, 1, 1], [], []>} : vector<16x128xbf16>, vector<128x512xbf16>, vector<16x512xf32> -> vector<16x512xf32>
    %32 = arith.addf %28, %31 : vector<16x512xf32>
    %c0_22 = arith.constant 0 : index
    %c0_23 = arith.constant 0 : index
    %33 = vector.load %arg11[%c0_22, %c0_23] : memref<16x128xf32, #tpu.memory_space<vmem>>, vector<16x128xf32>
    %34 = vector.extract_strided_slice %32 {offsets = [0, 0], sizes = [16, 128], strides = [1, 1]} : vector<16x512xf32> to vector<16x128xf32>
    %35 = arith.negf %34 : vector<16x128xf32>
    %36 = math.exp %35 : vector<16x128xf32>
    %cst_24 = arith.constant 1.000000e+00 : f32
    %37 = vector.broadcast %cst_24 : f32 to vector<16x128xf32>
    %38 = arith.addf %37, %36 : vector<16x128xf32>
    %39 = arith.divf %37, %38 : vector<16x128xf32>
    %40 = vector.extract_strided_slice %32 {offsets = [0, 128], sizes = [16, 128], strides = [1, 1]} : vector<16x512xf32> to vector<16x128xf32>
    %41 = arith.negf %40 : vector<16x128xf32>
    %42 = math.exp %41 : vector<16x128xf32>
    %cst_25 = arith.constant 1.000000e+00 : f32
    %43 = vector.broadcast %cst_25 : f32 to vector<16x128xf32>
    %44 = arith.addf %43, %42 : vector<16x128xf32>
    %45 = arith.divf %43, %44 : vector<16x128xf32>
    %46 = vector.extract_strided_slice %32 {offsets = [0, 256], sizes = [16, 128], strides = [1, 1]} : vector<16x512xf32> to vector<16x128xf32>
    %47 = math.tanh %46 : vector<16x128xf32>
    %48 = vector.extract_strided_slice %32 {offsets = [0, 384], sizes = [16, 128], strides = [1, 1]} : vector<16x512xf32> to vector<16x128xf32>
    %49 = arith.negf %48 : vector<16x128xf32>
    %50 = math.exp %49 : vector<16x128xf32>
    %cst_26 = arith.constant 1.000000e+00 : f32
    %51 = vector.broadcast %cst_26 : f32 to vector<16x128xf32>
    %52 = arith.addf %51, %50 : vector<16x128xf32>
    %53 = arith.divf %51, %52 : vector<16x128xf32>
    %54 = arith.mulf %45, %33 : vector<16x128xf32>
    %55 = arith.mulf %39, %47 : vector<16x128xf32>
    %56 = arith.addf %54, %55 : vector<16x128xf32>
    %57 = math.tanh %56 : vector<16x128xf32>
    %58 = arith.mulf %53, %57 : vector<16x128xf32>
    %59 = vector.broadcast %24 : i32 to vector<16x1xi32>
    %60 = arith.cmpi slt, %59, %12 : vector<16x1xi32>
    %c0_27 = arith.constant 0 : index
    %c0_28 = arith.constant 0 : index
    %61 = vector.load %arg10[%c0_27, %c0_28] : memref<16x128xf32, #tpu.memory_space<vmem>>, vector<16x128xf32>
    %62 = vector.shape_cast %60 : vector<16x1xi1> to vector<16x1xi1>
    %63 = vector.broadcast %62 : vector<16x1xi1> to vector<16x128xi1>
    %64 = arith.select %63, %58, %61 : vector<16x128xi1>, vector<16x128xf32>
    %c0_29 = arith.constant 0 : index
    %c0_30 = arith.constant 0 : index
    %65 = vector.load %arg10[%c0_29, %c0_30] : memref<16x128xf32, #tpu.memory_space<vmem>>, vector<16x128xf32>
    tpu.vector_store %arg10[%c0_29, %c0_30], %64 {strides = array<i32>} : memref<16x128xf32, #tpu.memory_space<vmem>>, vector<16x128xf32>,
    %c0_31 = arith.constant 0 : index
    %c0_32 = arith.constant 0 : index
    %66 = vector.load %arg11[%c0_31, %c0_32] : memref<16x128xf32, #tpu.memory_space<vmem>>, vector<16x128xf32>
    %67 = vector.shape_cast %60 : vector<16x1xi1> to vector<16x1xi1>
    %68 = vector.broadcast %67 : vector<16x1xi1> to vector<16x128xi1>
    %69 = arith.select %68, %56, %66 : vector<16x128xi1>, vector<16x128xf32>
    %c0_33 = arith.constant 0 : index
    %c0_34 = arith.constant 0 : index
    %70 = vector.load %arg11[%c0_33, %c0_34] : memref<16x128xf32, #tpu.memory_space<vmem>>, vector<16x128xf32>
    tpu.vector_store %arg11[%c0_33, %c0_34], %69 {strides = array<i32>} : memref<16x128xf32, #tpu.memory_space<vmem>>, vector<16x128xf32>,
    %cst_35 = arith.constant 0.000000e+00 : f32
    %71 = vector.shape_cast %60 : vector<16x1xi1> to vector<16x1xi1>
    %72 = vector.broadcast %71 : vector<16x1xi1> to vector<16x128xi1>
    %73 = vector.broadcast %cst_35 : f32 to vector<16x128xf32>
    %74 = arith.select %72, %58, %73 : vector<16x128xi1>, vector<16x128xf32>
    %75 = arith.truncf %74 : vector<16x128xf32> to vector<16x128xbf16>
    %76 = arith.index_cast %26 : i32 to index
    %c0_36 = arith.constant 0 : index
    %77 = vector.load %arg7[%76, %c0_36] : memref<128x128xbf16, #tpu.memory_space<vmem>>, vector<16x128xbf16>
    tpu.vector_store %arg7[%76, %c0_36], %75 {strides = array<i32>} : memref<128x128xbf16, #tpu.memory_space<vmem>>, vector<16x128xbf16>,
    %c1_i32 = arith.constant 1 : i32
    %c2_i32_37 = arith.constant 2 : i32
    %78 = arith.muli %c2_i32_37, %c1_i32 : i32
    %c7_i32_38 = arith.constant 7 : i32
    %79 = arith.subi %c7_i32_38, %78 : i32
    %80 = arith.muli %arg0, %79 : i32
    %81 = arith.addi %c1_i32, %80 : i32
    %82 = arith.addi %19, %81 : i32
    %c16_i32_39 = arith.constant 16 : i32
    %83 = arith.muli %81, %c16_i32_39 : i32
    %84 = tpu.assume_multiple %83, 16 : i32
    %85 = arith.index_cast %84 : i32 to index
    %c0_40 = arith.constant 0 : index
    %86 = vector.load %arg12[%85, %c0_40] : memref<128x512xf32, #tpu.memory_space<vmem>>, vector<16x512xf32>
    %c0_41 = arith.constant 0 : index
    %c0_42 = arith.constant 0 : index
    %87 = vector.load %arg10[%c0_41, %c0_42] : memref<16x128xf32, #tpu.memory_space<vmem>>, vector<16x128xf32>
    %88 = arith.truncf %87 : vector<16x128xf32> to vector<16x128xbf16>
    %cst_43 = arith.constant dense<0.000000e+00> : vector<16x512xf32>
    %89 = tpu.matmul %88, %14, %cst_43 {dimension_numbers = #tpu.dot_dimension_numbers<[1], [0], [0], [1], [0, 0, 1, 1], [], []>} : vector<16x128xbf16>, vector<128x512xbf16>, vector<16x512xf32> -> vector<16x512xf32>
    %90 = arith.addf %86, %89 : vector<16x512xf32>
    %c0_44 = arith.constant 0 : index
    %c0_45 = arith.constant 0 : index
    %91 = vector.load %arg11[%c0_44, %c0_45] : memref<16x128xf32, #tpu.memory_space<vmem>>, vector<16x128xf32>
    %92 = vector.extract_strided_slice %90 {offsets = [0, 0], sizes = [16, 128], strides = [1, 1]} : vector<16x512xf32> to vector<16x128xf32>
    %93 = arith.negf %92 : vector<16x128xf32>
    %94 = math.exp %93 : vector<16x128xf32>
    %cst_46 = arith.constant 1.000000e+00 : f32
    %95 = vector.broadcast %cst_46 : f32 to vector<16x128xf32>
    %96 = arith.addf %95, %94 : vector<16x128xf32>
    %97 = arith.divf %95, %96 : vector<16x128xf32>
    %98 = vector.extract_strided_slice %90 {offsets = [0, 128], sizes = [16, 128], strides = [1, 1]} : vector<16x512xf32> to vector<16x128xf32>
    %99 = arith.negf %98 : vector<16x128xf32>
    %100 = math.exp %99 : vector<16x128xf32>
    %cst_47 = arith.constant 1.000000e+00 : f32
    %101 = vector.broadcast %cst_47 : f32 to vector<16x128xf32>
    %102 = arith.addf %101, %100 : vector<16x128xf32>
    %103 = arith.divf %101, %102 : vector<16x128xf32>
    %104 = vector.extract_strided_slice %90 {offsets = [0, 256], sizes = [16, 128], strides = [1, 1]} : vector<16x512xf32> to vector<16x128xf32>
    %105 = math.tanh %104 : vector<16x128xf32>
    %106 = vector.extract_strided_slice %90 {offsets = [0, 384], sizes = [16, 128], strides = [1, 1]} : vector<16x512xf32> to vector<16x128xf32>
    %107 = arith.negf %106 : vector<16x128xf32>
    %108 = math.exp %107 : vector<16x128xf32>
    %cst_48 = arith.constant 1.000000e+00 : f32
    %109 = vector.broadcast %cst_48 : f32 to vector<16x128xf32>
    %110 = arith.addf %109, %108 : vector<16x128xf32>
    %111 = arith.divf %109, %110 : vector<16x128xf32>
    %112 = arith.mulf %103, %91 : vector<16x128xf32>
    %113 = arith.mulf %97, %105 : vector<16x128xf32>
    %114 = arith.addf %112, %113 : vector<16x128xf32>
    %115 = math.tanh %114 : vector<16x128xf32>
    %116 = arith.mulf %111, %115 : vector<16x128xf32>
    %117 = vector.broadcast %82 : i32 to vector<16x1xi32>
    %118 = arith.cmpi slt, %117, %12 : vector<16x1xi32>
    %c0_49 = arith.constant 0 : index
    %c0_50 = arith.constant 0 : index
    %119 = vector.load %arg10[%c0_49, %c0_50] : memref<16x128xf32, #tpu.memory_space<vmem>>, vector<16x128xf32>
    %120 = vector.shape_cast %118 : vector<16x1xi1> to vector<16x1xi1>
    %121 = vector.broadcast %120 : vector<16x1xi1> to vector<16x128xi1>
    %122 = arith.select %121, %116, %119 : vector<16x128xi1>, vector<16x128xf32>
    %c0_51 = arith.constant 0 : index
    %c0_52 = arith.constant 0 : index
    %123 = vector.load %arg10[%c0_51, %c0_52] : memref<16x128xf32, #tpu.memory_space<vmem>>, vector<16x128xf32>
    tpu.vector_store %arg10[%c0_51, %c0_52], %122 {strides = array<i32>} : memref<16x128xf32, #tpu.memory_space<vmem>>, vector<16x128xf32>,
    %c0_53 = arith.constant 0 : index
    %c0_54 = arith.constant 0 : index
    %124 = vector.load %arg11[%c0_53, %c0_54] : memref<16x128xf32, #tpu.memory_space<vmem>>, vector<16x128xf32>
    %125 = vector.shape_cast %118 : vector<16x1xi1> to vector<16x1xi1>
    %126 = vector.broadcast %125 : vector<16x1xi1> to vector<16x128xi1>
    %127 = arith.select %126, %114, %124 : vector<16x128xi1>, vector<16x128xf32>
    %c0_55 = arith.constant 0 : index
    %c0_56 = arith.constant 0 : index
    %128 = vector.load %arg11[%c0_55, %c0_56] : memref<16x128xf32, #tpu.memory_space<vmem>>, vector<16x128xf32>
    tpu.vector_store %arg11[%c0_55, %c0_56], %127 {strides = array<i32>} : memref<16x128xf32, #tpu.memory_space<vmem>>, vector<16x128xf32>,
    %cst_57 = arith.constant 0.000000e+00 : f32
    %129 = vector.shape_cast %118 : vector<16x1xi1> to vector<16x1xi1>
    %130 = vector.broadcast %129 : vector<16x1xi1> to vector<16x128xi1>
    %131 = vector.broadcast %cst_57 : f32 to vector<16x128xf32>
    %132 = arith.select %130, %116, %131 : vector<16x128xi1>, vector<16x128xf32>
    %133 = arith.truncf %132 : vector<16x128xf32> to vector<16x128xbf16>
    %134 = arith.index_cast %84 : i32 to index
    %c0_58 = arith.constant 0 : index
    %135 = vector.load %arg7[%134, %c0_58] : memref<128x128xbf16, #tpu.memory_space<vmem>>, vector<16x128xbf16>
    tpu.vector_store %arg7[%134, %c0_58], %133 {strides = array<i32>} : memref<128x128xbf16, #tpu.memory_space<vmem>>, vector<16x128xbf16>,
    %c2_i32_59 = arith.constant 2 : i32
    %c2_i32_60 = arith.constant 2 : i32
    %136 = arith.muli %c2_i32_60, %c2_i32_59 : i32
    %c7_i32_61 = arith.constant 7 : i32
    %137 = arith.subi %c7_i32_61, %136 : i32
    %138 = arith.muli %arg0, %137 : i32
    %139 = arith.addi %c2_i32_59, %138 : i32
    %140 = arith.addi %19, %139 : i32
    %c16_i32_62 = arith.constant 16 : i32
    %141 = arith.muli %139, %c16_i32_62 : i32
    %142 = tpu.assume_multiple %141, 16 : i32
    %143 = arith.index_cast %142 : i32 to index
    %c0_63 = arith.constant 0 : index
    %144 = vector.load %arg12[%143, %c0_63] : memref<128x512xf32, #tpu.memory_space<vmem>>, vector<16x512xf32>
    %c0_64 = arith.constant 0 : index
    %c0_65 = arith.constant 0 : index
    %145 = vector.load %arg10[%c0_64, %c0_65] : memref<16x128xf32, #tpu.memory_space<vmem>>, vector<16x128xf32>
    %146 = arith.truncf %145 : vector<16x128xf32> to vector<16x128xbf16>
    %cst_66 = arith.constant dense<0.000000e+00> : vector<16x512xf32>
    %147 = tpu.matmul %146, %14, %cst_66 {dimension_numbers = #tpu.dot_dimension_numbers<[1], [0], [0], [1], [0, 0, 1, 1], [], []>} : vector<16x128xbf16>, vector<128x512xbf16>, vector<16x512xf32> -> vector<16x512xf32>
    %148 = arith.addf %144, %147 : vector<16x512xf32>
    %c0_67 = arith.constant 0 : index
    %c0_68 = arith.constant 0 : index
    %149 = vector.load %arg11[%c0_67, %c0_68] : memref<16x128xf32, #tpu.memory_space<vmem>>, vector<16x128xf32>
    %150 = vector.extract_strided_slice %148 {offsets = [0, 0], sizes = [16, 128], strides = [1, 1]} : vector<16x512xf32> to vector<16x128xf32>
    %151 = arith.negf %150 : vector<16x128xf32>
    %152 = math.exp %151 : vector<16x128xf32>
    %cst_69 = arith.constant 1.000000e+00 : f32
    %153 = vector.broadcast %cst_69 : f32 to vector<16x128xf32>
    %154 = arith.addf %153, %152 : vector<16x128xf32>
    %155 = arith.divf %153, %154 : vector<16x128xf32>
    %156 = vector.extract_strided_slice %148 {offsets = [0, 128], sizes = [16, 128], strides = [1, 1]} : vector<16x512xf32> to vector<16x128xf32>
    %157 = arith.negf %156 : vector<16x128xf32>
    %158 = math.exp %157 : vector<16x128xf32>
    %cst_70 = arith.constant 1.000000e+00 : f32
    %159 = vector.broadcast %cst_70 : f32 to vector<16x128xf32>
    %160 = arith.addf %159, %158 : vector<16x128xf32>
    %161 = arith.divf %159, %160 : vector<16x128xf32>
    %162 = vector.extract_strided_slice %148 {offsets = [0, 256], sizes = [16, 128], strides = [1, 1]} : vector<16x512xf32> to vector<16x128xf32>
    %163 = math.tanh %162 : vector<16x128xf32>
    %164 = vector.extract_strided_slice %148 {offsets = [0, 384], sizes = [16, 128], strides = [1, 1]} : vector<16x512xf32> to vector<16x128xf32>
    %165 = arith.negf %164 : vector<16x128xf32>
    %166 = math.exp %165 : vector<16x128xf32>
    %cst_71 = arith.constant 1.000000e+00 : f32
    %167 = vector.broadcast %cst_71 : f32 to vector<16x128xf32>
    %168 = arith.addf %167, %166 : vector<16x128xf32>
    %169 = arith.divf %167, %168 : vector<16x128xf32>
    %170 = arith.mulf %161, %149 : vector<16x128xf32>
    %171 = arith.mulf %155, %163 : vector<16x128xf32>
    %172 = arith.addf %170, %171 : vector<16x128xf32>
    %173 = math.tanh %172 : vector<16x128xf32>
    %174 = arith.mulf %169, %173 : vector<16x128xf32>
    %175 = vector.broadcast %140 : i32 to vector<16x1xi32>
    %176 = arith.cmpi slt, %175, %12 : vector<16x1xi32>
    %c0_72 = arith.constant 0 : index
    %c0_73 = arith.constant 0 : index
    %177 = vector.load %arg10[%c0_72, %c0_73] : memref<16x128xf32, #tpu.memory_space<vmem>>, vector<16x128xf32>
    %178 = vector.shape_cast %176 : vector<16x1xi1> to vector<16x1xi1>
    %179 = vector.broadcast %178 : vector<16x1xi1> to vector<16x128xi1>
    %180 = arith.select %179, %174, %177 : vector<16x128xi1>, vector<16x128xf32>
    %c0_74 = arith.constant 0 : index
    %c0_75 = arith.constant 0 : index
    %181 = vector.load %arg10[%c0_74, %c0_75] : memref<16x128xf32, #tpu.memory_space<vmem>>, vector<16x128xf32>
    tpu.vector_store %arg10[%c0_74, %c0_75], %180 {strides = array<i32>} : memref<16x128xf32, #tpu.memory_space<vmem>>, vector<16x128xf32>,
    %c0_76 = arith.constant 0 : index
    %c0_77 = arith.constant 0 : index
    %182 = vector.load %arg11[%c0_76, %c0_77] : memref<16x128xf32, #tpu.memory_space<vmem>>, vector<16x128xf32>
    %183 = vector.shape_cast %176 : vector<16x1xi1> to vector<16x1xi1>
    %184 = vector.broadcast %183 : vector<16x1xi1> to vector<16x128xi1>
    %185 = arith.select %184, %172, %182 : vector<16x128xi1>, vector<16x128xf32>
    %c0_78 = arith.constant 0 : index
    %c0_79 = arith.constant 0 : index
    %186 = vector.load %arg11[%c0_78, %c0_79] : memref<16x128xf32, #tpu.memory_space<vmem>>, vector<16x128xf32>
    tpu.vector_store %arg11[%c0_78, %c0_79], %185 {strides = array<i32>} : memref<16x128xf32, #tpu.memory_space<vmem>>, vector<16x128xf32>,
    %cst_80 = arith.constant 0.000000e+00 : f32
    %187 = vector.shape_cast %176 : vector<16x1xi1> to vector<16x1xi1>
    %188 = vector.broadcast %187 : vector<16x1xi1> to vector<16x128xi1>
    %189 = vector.broadcast %cst_80 : f32 to vector<16x128xf32>
    %190 = arith.select %188, %174, %189 : vector<16x128xi1>, vector<16x128xf32>
    %191 = arith.truncf %190 : vector<16x128xf32> to vector<16x128xbf16>
    %192 = arith.index_cast %142 : i32 to index
    %c0_81 = arith.constant 0 : index
    %193 = vector.load %arg7[%192, %c0_81] : memref<128x128xbf16, #tpu.memory_space<vmem>>, vector<16x128xbf16>
    tpu.vector_store %arg7[%192, %c0_81], %191 {strides = array<i32>} : memref<128x128xbf16, #tpu.memory_space<vmem>>, vector<16x128xbf16>,
    %c3_i32 = arith.constant 3 : i32
    %c2_i32_82 = arith.constant 2 : i32
    %194 = arith.muli %c2_i32_82, %c3_i32 : i32
    %c7_i32_83 = arith.constant 7 : i32
    %195 = arith.subi %c7_i32_83, %194 : i32
    %196 = arith.muli %arg0, %195 : i32
    %197 = arith.addi %c3_i32, %196 : i32
    %198 = arith.addi %19, %197 : i32
    %c16_i32_84 = arith.constant 16 : i32
    %199 = arith.muli %197, %c16_i32_84 : i32
    %200 = tpu.assume_multiple %199, 16 : i32
    %201 = arith.index_cast %200 : i32 to index
    %c0_85 = arith.constant 0 : index
    %202 = vector.load %arg12[%201, %c0_85] : memref<128x512xf32, #tpu.memory_space<vmem>>, vector<16x512xf32>
    %c0_86 = arith.constant 0 : index
    %c0_87 = arith.constant 0 : index
    %203 = vector.load %arg10[%c0_86, %c0_87] : memref<16x128xf32, #tpu.memory_space<vmem>>, vector<16x128xf32>
    %204 = arith.truncf %203 : vector<16x128xf32> to vector<16x128xbf16>
    %cst_88 = arith.constant dense<0.000000e+00> : vector<16x512xf32>
    %205 = tpu.matmul %204, %14, %cst_88 {dimension_numbers = #tpu.dot_dimension_numbers<[1], [0], [0], [1], [0, 0, 1, 1], [], []>} : vector<16x128xbf16>, vector<128x512xbf16>, vector<16x512xf32> -> vector<16x512xf32>
    %206 = arith.addf %202, %205 : vector<16x512xf32>
    %c0_89 = arith.constant 0 : index
    %c0_90 = arith.constant 0 : index
    %207 = vector.load %arg11[%c0_89, %c0_90] : memref<16x128xf32, #tpu.memory_space<vmem>>, vector<16x128xf32>
    %208 = vector.extract_strided_slice %206 {offsets = [0, 0], sizes = [16, 128], strides = [1, 1]} : vector<16x512xf32> to vector<16x128xf32>
    %209 = arith.negf %208 : vector<16x128xf32>
    %210 = math.exp %209 : vector<16x128xf32>
    %cst_91 = arith.constant 1.000000e+00 : f32
    %211 = vector.broadcast %cst_91 : f32 to vector<16x128xf32>
    %212 = arith.addf %211, %210 : vector<16x128xf32>
    %213 = arith.divf %211, %212 : vector<16x128xf32>
    %214 = vector.extract_strided_slice %206 {offsets = [0, 128], sizes = [16, 128], strides = [1, 1]} : vector<16x512xf32> to vector<16x128xf32>
    %215 = arith.negf %214 : vector<16x128xf32>
    %216 = math.exp %215 : vector<16x128xf32>
    %cst_92 = arith.constant 1.000000e+00 : f32
    %217 = vector.broadcast %cst_92 : f32 to vector<16x128xf32>
    %218 = arith.addf %217, %216 : vector<16x128xf32>
    %219 = arith.divf %217, %218 : vector<16x128xf32>
    %220 = vector.extract_strided_slice %206 {offsets = [0, 256], sizes = [16, 128], strides = [1, 1]} : vector<16x512xf32> to vector<16x128xf32>
    %221 = math.tanh %220 : vector<16x128xf32>
    %222 = vector.extract_strided_slice %206 {offsets = [0, 384], sizes = [16, 128], strides = [1, 1]} : vector<16x512xf32> to vector<16x128xf32>
    %223 = arith.negf %222 : vector<16x128xf32>
    %224 = math.exp %223 : vector<16x128xf32>
    %cst_93 = arith.constant 1.000000e+00 : f32
    %225 = vector.broadcast %cst_93 : f32 to vector<16x128xf32>
    %226 = arith.addf %225, %224 : vector<16x128xf32>
    %227 = arith.divf %225, %226 : vector<16x128xf32>
    %228 = arith.mulf %219, %207 : vector<16x128xf32>
    %229 = arith.mulf %213, %221 : vector<16x128xf32>
    %230 = arith.addf %228, %229 : vector<16x128xf32>
    %231 = math.tanh %230 : vector<16x128xf32>
    %232 = arith.mulf %227, %231 : vector<16x128xf32>
    %233 = vector.broadcast %198 : i32 to vector<16x1xi32>
    %234 = arith.cmpi slt, %233, %12 : vector<16x1xi32>
    %c0_94 = arith.constant 0 : index
    %c0_95 = arith.constant 0 : index
    %235 = vector.load %arg10[%c0_94, %c0_95] : memref<16x128xf32, #tpu.memory_space<vmem>>, vector<16x128xf32>
    %236 = vector.shape_cast %234 : vector<16x1xi1> to vector<16x1xi1>
    %237 = vector.broadcast %236 : vector<16x1xi1> to vector<16x128xi1>
    %238 = arith.select %237, %232, %235 : vector<16x128xi1>, vector<16x128xf32>
    %c0_96 = arith.constant 0 : index
    %c0_97 = arith.constant 0 : index
    %239 = vector.load %arg10[%c0_96, %c0_97] : memref<16x128xf32, #tpu.memory_space<vmem>>, vector<16x128xf32>
    tpu.vector_store %arg10[%c0_96, %c0_97], %238 {strides = array<i32>} : memref<16x128xf32, #tpu.memory_space<vmem>>, vector<16x128xf32>,
    %c0_98 = arith.constant 0 : index
    %c0_99 = arith.constant 0 : index
    %240 = vector.load %arg11[%c0_98, %c0_99] : memref<16x128xf32, #tpu.memory_space<vmem>>, vector<16x128xf32>
    %241 = vector.shape_cast %234 : vector<16x1xi1> to vector<16x1xi1>
    %242 = vector.broadcast %241 : vector<16x1xi1> to vector<16x128xi1>
    %243 = arith.select %242, %230, %240 : vector<16x128xi1>, vector<16x128xf32>
    %c0_100 = arith.constant 0 : index
    %c0_101 = arith.constant 0 : index
    %244 = vector.load %arg11[%c0_100, %c0_101] : memref<16x128xf32, #tpu.memory_space<vmem>>, vector<16x128xf32>
    tpu.vector_store %arg11[%c0_100, %c0_101], %243 {strides = array<i32>} : memref<16x128xf32, #tpu.memory_space<vmem>>, vector<16x128xf32>,
    %cst_102 = arith.constant 0.000000e+00 : f32
    %245 = vector.shape_cast %234 : vector<16x1xi1> to vector<16x1xi1>
    %246 = vector.broadcast %245 : vector<16x1xi1> to vector<16x128xi1>
    %247 = vector.broadcast %cst_102 : f32 to vector<16x128xf32>
    %248 = arith.select %246, %232, %247 : vector<16x128xi1>, vector<16x128xf32>
    %249 = arith.truncf %248 : vector<16x128xf32> to vector<16x128xbf16>
    %250 = arith.index_cast %200 : i32 to index
    %c0_103 = arith.constant 0 : index
    %251 = vector.load %arg7[%250, %c0_103] : memref<128x128xbf16, #tpu.memory_space<vmem>>, vector<16x128xbf16>
    tpu.vector_store %arg7[%250, %c0_103], %249 {strides = array<i32>} : memref<128x128xbf16, #tpu.memory_space<vmem>>, vector<16x128xbf16>,
    %c4_i32 = arith.constant 4 : i32
    %c2_i32_104 = arith.constant 2 : i32
    %252 = arith.muli %c2_i32_104, %c4_i32 : i32
    %c7_i32_105 = arith.constant 7 : i32
    %253 = arith.subi %c7_i32_105, %252 : i32
    %254 = arith.muli %arg0, %253 : i32
    %255 = arith.addi %c4_i32, %254 : i32
    %256 = arith.addi %19, %255 : i32
    %c16_i32_106 = arith.constant 16 : i32
    %257 = arith.muli %255, %c16_i32_106 : i32
    %258 = tpu.assume_multiple %257, 16 : i32
    %259 = arith.index_cast %258 : i32 to index
    %c0_107 = arith.constant 0 : index
    %260 = vector.load %arg12[%259, %c0_107] : memref<128x512xf32, #tpu.memory_space<vmem>>, vector<16x512xf32>
    %c0_108 = arith.constant 0 : index
    %c0_109 = arith.constant 0 : index
    %261 = vector.load %arg10[%c0_108, %c0_109] : memref<16x128xf32, #tpu.memory_space<vmem>>, vector<16x128xf32>
    %262 = arith.truncf %261 : vector<16x128xf32> to vector<16x128xbf16>
    %cst_110 = arith.constant dense<0.000000e+00> : vector<16x512xf32>
    %263 = tpu.matmul %262, %14, %cst_110 {dimension_numbers = #tpu.dot_dimension_numbers<[1], [0], [0], [1], [0, 0, 1, 1], [], []>} : vector<16x128xbf16>, vector<128x512xbf16>, vector<16x512xf32> -> vector<16x512xf32>
    %264 = arith.addf %260, %263 : vector<16x512xf32>
    %c0_111 = arith.constant 0 : index
    %c0_112 = arith.constant 0 : index
    %265 = vector.load %arg11[%c0_111, %c0_112] : memref<16x128xf32, #tpu.memory_space<vmem>>, vector<16x128xf32>
    %266 = vector.extract_strided_slice %264 {offsets = [0, 0], sizes = [16, 128], strides = [1, 1]} : vector<16x512xf32> to vector<16x128xf32>
    %267 = arith.negf %266 : vector<16x128xf32>
    %268 = math.exp %267 : vector<16x128xf32>
    %cst_113 = arith.constant 1.000000e+00 : f32
    %269 = vector.broadcast %cst_113 : f32 to vector<16x128xf32>
    %270 = arith.addf %269, %268 : vector<16x128xf32>
    %271 = arith.divf %269, %270 : vector<16x128xf32>
    %272 = vector.extract_strided_slice %264 {offsets = [0, 128], sizes = [16, 128], strides = [1, 1]} : vector<16x512xf32> to vector<16x128xf32>
    %273 = arith.negf %272 : vector<16x128xf32>
    %274 = math.exp %273 : vector<16x128xf32>
    %cst_114 = arith.constant 1.000000e+00 : f32
    %275 = vector.broadcast %cst_114 : f32 to vector<16x128xf32>
    %276 = arith.addf %275, %274 : vector<16x128xf32>
    %277 = arith.divf %275, %276 : vector<16x128xf32>
    %278 = vector.extract_strided_slice %264 {offsets = [0, 256], sizes = [16, 128], strides = [1, 1]} : vector<16x512xf32> to vector<16x128xf32>
    %279 = math.tanh %278 : vector<16x128xf32>
    %280 = vector.extract_strided_slice %264 {offsets = [0, 384], sizes = [16, 128], strides = [1, 1]} : vector<16x512xf32> to vector<16x128xf32>
    %281 = arith.negf %280 : vector<16x128xf32>
    %282 = math.exp %281 : vector<16x128xf32>
    %cst_115 = arith.constant 1.000000e+00 : f32
    %283 = vector.broadcast %cst_115 : f32 to vector<16x128xf32>
    %284 = arith.addf %283, %282 : vector<16x128xf32>
    %285 = arith.divf %283, %284 : vector<16x128xf32>
    %286 = arith.mulf %277, %265 : vector<16x128xf32>
    %287 = arith.mulf %271, %279 : vector<16x128xf32>
    %288 = arith.addf %286, %287 : vector<16x128xf32>
    %289 = math.tanh %288 : vector<16x128xf32>
    %290 = arith.mulf %285, %289 : vector<16x128xf32>
    %291 = vector.broadcast %256 : i32 to vector<16x1xi32>
    %292 = arith.cmpi slt, %291, %12 : vector<16x1xi32>
    %c0_116 = arith.constant 0 : index
    %c0_117 = arith.constant 0 : index
    %293 = vector.load %arg10[%c0_116, %c0_117] : memref<16x128xf32, #tpu.memory_space<vmem>>, vector<16x128xf32>
    %294 = vector.shape_cast %292 : vector<16x1xi1> to vector<16x1xi1>
    %295 = vector.broadcast %294 : vector<16x1xi1> to vector<16x128xi1>
    %296 = arith.select %295, %290, %293 : vector<16x128xi1>, vector<16x128xf32>
    %c0_118 = arith.constant 0 : index
    %c0_119 = arith.constant 0 : index
    %297 = vector.load %arg10[%c0_118, %c0_119] : memref<16x128xf32, #tpu.memory_space<vmem>>, vector<16x128xf32>
    tpu.vector_store %arg10[%c0_118, %c0_119], %296 {strides = array<i32>} : memref<16x128xf32, #tpu.memory_space<vmem>>, vector<16x128xf32>,
    %c0_120 = arith.constant 0 : index
    %c0_121 = arith.constant 0 : index
    %298 = vector.load %arg11[%c0_120, %c0_121] : memref<16x128xf32, #tpu.memory_space<vmem>>, vector<16x128xf32>
    %299 = vector.shape_cast %292 : vector<16x1xi1> to vector<16x1xi1>
    %300 = vector.broadcast %299 : vector<16x1xi1> to vector<16x128xi1>
    %301 = arith.select %300, %288, %298 : vector<16x128xi1>, vector<16x128xf32>
    %c0_122 = arith.constant 0 : index
    %c0_123 = arith.constant 0 : index
    %302 = vector.load %arg11[%c0_122, %c0_123] : memref<16x128xf32, #tpu.memory_space<vmem>>, vector<16x128xf32>
    tpu.vector_store %arg11[%c0_122, %c0_123], %301 {strides = array<i32>} : memref<16x128xf32, #tpu.memory_space<vmem>>, vector<16x128xf32>,
    %cst_124 = arith.constant 0.000000e+00 : f32
    %303 = vector.shape_cast %292 : vector<16x1xi1> to vector<16x1xi1>
    %304 = vector.broadcast %303 : vector<16x1xi1> to vector<16x128xi1>
    %305 = vector.broadcast %cst_124 : f32 to vector<16x128xf32>
    %306 = arith.select %304, %290, %305 : vector<16x128xi1>, vector<16x128xf32>
    %307 = arith.truncf %306 : vector<16x128xf32> to vector<16x128xbf16>
    %308 = arith.index_cast %258 : i32 to index
    %c0_125 = arith.constant 0 : index
    %309 = vector.load %arg7[%308, %c0_125] : memref<128x128xbf16, #tpu.memory_space<vmem>>, vector<16x128xbf16>
    tpu.vector_store %arg7[%308, %c0_125], %307 {strides = array<i32>} : memref<128x128xbf16, #tpu.memory_space<vmem>>, vector<16x128xbf16>,
    %c5_i32 = arith.constant 5 : i32
    %c2_i32_126 = arith.constant 2 : i32
    %310 = arith.muli %c2_i32_126, %c5_i32 : i32
    %c7_i32_127 = arith.constant 7 : i32
    %311 = arith.subi %c7_i32_127, %310 : i32
    %312 = arith.muli %arg0, %311 : i32
    %313 = arith.addi %c5_i32, %312 : i32
    %314 = arith.addi %19, %313 : i32
    %c16_i32_128 = arith.constant 16 : i32
    %315 = arith.muli %313, %c16_i32_128 : i32
    %316 = tpu.assume_multiple %315, 16 : i32
    %317 = arith.index_cast %316 : i32 to index
    %c0_129 = arith.constant 0 : index
    %318 = vector.load %arg12[%317, %c0_129] : memref<128x512xf32, #tpu.memory_space<vmem>>, vector<16x512xf32>
    %c0_130 = arith.constant 0 : index
    %c0_131 = arith.constant 0 : index
    %319 = vector.load %arg10[%c0_130, %c0_131] : memref<16x128xf32, #tpu.memory_space<vmem>>, vector<16x128xf32>
    %320 = arith.truncf %319 : vector<16x128xf32> to vector<16x128xbf16>
    %cst_132 = arith.constant dense<0.000000e+00> : vector<16x512xf32>
    %321 = tpu.matmul %320, %14, %cst_132 {dimension_numbers = #tpu.dot_dimension_numbers<[1], [0], [0], [1], [0, 0, 1, 1], [], []>} : vector<16x128xbf16>, vector<128x512xbf16>, vector<16x512xf32> -> vector<16x512xf32>
    %322 = arith.addf %318, %321 : vector<16x512xf32>
    %c0_133 = arith.constant 0 : index
    %c0_134 = arith.constant 0 : index
    %323 = vector.load %arg11[%c0_133, %c0_134] : memref<16x128xf32, #tpu.memory_space<vmem>>, vector<16x128xf32>
    %324 = vector.extract_strided_slice %322 {offsets = [0, 0], sizes = [16, 128], strides = [1, 1]} : vector<16x512xf32> to vector<16x128xf32>
    %325 = arith.negf %324 : vector<16x128xf32>
    %326 = math.exp %325 : vector<16x128xf32>
    %cst_135 = arith.constant 1.000000e+00 : f32
    %327 = vector.broadcast %cst_135 : f32 to vector<16x128xf32>
    %328 = arith.addf %327, %326 : vector<16x128xf32>
    %329 = arith.divf %327, %328 : vector<16x128xf32>
    %330 = vector.extract_strided_slice %322 {offsets = [0, 128], sizes = [16, 128], strides = [1, 1]} : vector<16x512xf32> to vector<16x128xf32>
    %331 = arith.negf %330 : vector<16x128xf32>
    %332 = math.exp %331 : vector<16x128xf32>
    %cst_136 = arith.constant 1.000000e+00 : f32
    %333 = vector.broadcast %cst_136 : f32 to vector<16x128xf32>
    %334 = arith.addf %333, %332 : vector<16x128xf32>
    %335 = arith.divf %333, %334 : vector<16x128xf32>
    %336 = vector.extract_strided_slice %322 {offsets = [0, 256], sizes = [16, 128], strides = [1, 1]} : vector<16x512xf32> to vector<16x128xf32>
    %337 = math.tanh %336 : vector<16x128xf32>
    %338 = vector.extract_strided_slice %322 {offsets = [0, 384], sizes = [16, 128], strides = [1, 1]} : vector<16x512xf32> to vector<16x128xf32>
    %339 = arith.negf %338 : vector<16x128xf32>
    %340 = math.exp %339 : vector<16x128xf32>
    %cst_137 = arith.constant 1.000000e+00 : f32
    %341 = vector.broadcast %cst_137 : f32 to vector<16x128xf32>
    %342 = arith.addf %341, %340 : vector<16x128xf32>
    %343 = arith.divf %341, %342 : vector<16x128xf32>
    %344 = arith.mulf %335, %323 : vector<16x128xf32>
    %345 = arith.mulf %329, %337 : vector<16x128xf32>
    %346 = arith.addf %344, %345 : vector<16x128xf32>
    %347 = math.tanh %346 : vector<16x128xf32>
    %348 = arith.mulf %343, %347 : vector<16x128xf32>
    %349 = vector.broadcast %314 : i32 to vector<16x1xi32>
    %350 = arith.cmpi slt, %349, %12 : vector<16x1xi32>
    %c0_138 = arith.constant 0 : index
    %c0_139 = arith.constant 0 : index
    %351 = vector.load %arg10[%c0_138, %c0_139] : memref<16x128xf32, #tpu.memory_space<vmem>>, vector<16x128xf32>
    %352 = vector.shape_cast %350 : vector<16x1xi1> to vector<16x1xi1>
    %353 = vector.broadcast %352 : vector<16x1xi1> to vector<16x128xi1>
    %354 = arith.select %353, %348, %351 : vector<16x128xi1>, vector<16x128xf32>
    %c0_140 = arith.constant 0 : index
    %c0_141 = arith.constant 0 : index
    %355 = vector.load %arg10[%c0_140, %c0_141] : memref<16x128xf32, #tpu.memory_space<vmem>>, vector<16x128xf32>
    tpu.vector_store %arg10[%c0_140, %c0_141], %354 {strides = array<i32>} : memref<16x128xf32, #tpu.memory_space<vmem>>, vector<16x128xf32>,
    %c0_142 = arith.constant 0 : index
    %c0_143 = arith.constant 0 : index
    %356 = vector.load %arg11[%c0_142, %c0_143] : memref<16x128xf32, #tpu.memory_space<vmem>>, vector<16x128xf32>
    %357 = vector.shape_cast %350 : vector<16x1xi1> to vector<16x1xi1>
    %358 = vector.broadcast %357 : vector<16x1xi1> to vector<16x128xi1>
    %359 = arith.select %358, %346, %356 : vector<16x128xi1>, vector<16x128xf32>
    %c0_144 = arith.constant 0 : index
    %c0_145 = arith.constant 0 : index
    %360 = vector.load %arg11[%c0_144, %c0_145] : memref<16x128xf32, #tpu.memory_space<vmem>>, vector<16x128xf32>
    tpu.vector_store %arg11[%c0_144, %c0_145], %359 {strides = array<i32>} : memref<16x128xf32, #tpu.memory_space<vmem>>, vector<16x128xf32>,
    %cst_146 = arith.constant 0.000000e+00 : f32
    %361 = vector.shape_cast %350 : vector<16x1xi1> to vector<16x1xi1>
    %362 = vector.broadcast %361 : vector<16x1xi1> to vector<16x128xi1>
    %363 = vector.broadcast %cst_146 : f32 to vector<16x128xf32>
    %364 = arith.select %362, %348, %363 : vector<16x128xi1>, vector<16x128xf32>
    %365 = arith.truncf %364 : vector<16x128xf32> to vector<16x128xbf16>
    %366 = arith.index_cast %316 : i32 to index
    %c0_147 = arith.constant 0 : index
    %367 = vector.load %arg7[%366, %c0_147] : memref<128x128xbf16, #tpu.memory_space<vmem>>, vector<16x128xbf16>
    tpu.vector_store %arg7[%366, %c0_147], %365 {strides = array<i32>} : memref<128x128xbf16, #tpu.memory_space<vmem>>, vector<16x128xbf16>,
    %c6_i32 = arith.constant 6 : i32
    %c2_i32_148 = arith.constant 2 : i32
    %368 = arith.muli %c2_i32_148, %c6_i32 : i32
    %c7_i32_149 = arith.constant 7 : i32
    %369 = arith.subi %c7_i32_149, %368 : i32
    %370 = arith.muli %arg0, %369 : i32
    %371 = arith.addi %c6_i32, %370 : i32
    %372 = arith.addi %19, %371 : i32
    %c16_i32_150 = arith.constant 16 : i32
    %373 = arith.muli %371, %c16_i32_150 : i32
    %374 = tpu.assume_multiple %373, 16 : i32
    %375 = arith.index_cast %374 : i32 to index
    %c0_151 = arith.constant 0 : index
    %376 = vector.load %arg12[%375, %c0_151] : memref<128x512xf32, #tpu.memory_space<vmem>>, vector<16x512xf32>
    %c0_152 = arith.constant 0 : index
    %c0_153 = arith.constant 0 : index
    %377 = vector.load %arg10[%c0_152, %c0_153] : memref<16x128xf32, #tpu.memory_space<vmem>>, vector<16x128xf32>
    %378 = arith.truncf %377 : vector<16x128xf32> to vector<16x128xbf16>
    %cst_154 = arith.constant dense<0.000000e+00> : vector<16x512xf32>
    %379 = tpu.matmul %378, %14, %cst_154 {dimension_numbers = #tpu.dot_dimension_numbers<[1], [0], [0], [1], [0, 0, 1, 1], [], []>} : vector<16x128xbf16>, vector<128x512xbf16>, vector<16x512xf32> -> vector<16x512xf32>
    %380 = arith.addf %376, %379 : vector<16x512xf32>
    %c0_155 = arith.constant 0 : index
    %c0_156 = arith.constant 0 : index
    %381 = vector.load %arg11[%c0_155, %c0_156] : memref<16x128xf32, #tpu.memory_space<vmem>>, vector<16x128xf32>
    %382 = vector.extract_strided_slice %380 {offsets = [0, 0], sizes = [16, 128], strides = [1, 1]} : vector<16x512xf32> to vector<16x128xf32>
    %383 = arith.negf %382 : vector<16x128xf32>
    %384 = math.exp %383 : vector<16x128xf32>
    %cst_157 = arith.constant 1.000000e+00 : f32
    %385 = vector.broadcast %cst_157 : f32 to vector<16x128xf32>
    %386 = arith.addf %385, %384 : vector<16x128xf32>
    %387 = arith.divf %385, %386 : vector<16x128xf32>
    %388 = vector.extract_strided_slice %380 {offsets = [0, 128], sizes = [16, 128], strides = [1, 1]} : vector<16x512xf32> to vector<16x128xf32>
    %389 = arith.negf %388 : vector<16x128xf32>
    %390 = math.exp %389 : vector<16x128xf32>
    %cst_158 = arith.constant 1.000000e+00 : f32
    %391 = vector.broadcast %cst_158 : f32 to vector<16x128xf32>
    %392 = arith.addf %391, %390 : vector<16x128xf32>
    %393 = arith.divf %391, %392 : vector<16x128xf32>
    %394 = vector.extract_strided_slice %380 {offsets = [0, 256], sizes = [16, 128], strides = [1, 1]} : vector<16x512xf32> to vector<16x128xf32>
    %395 = math.tanh %394 : vector<16x128xf32>
    %396 = vector.extract_strided_slice %380 {offsets = [0, 384], sizes = [16, 128], strides = [1, 1]} : vector<16x512xf32> to vector<16x128xf32>
    %397 = arith.negf %396 : vector<16x128xf32>
    %398 = math.exp %397 : vector<16x128xf32>
    %cst_159 = arith.constant 1.000000e+00 : f32
    %399 = vector.broadcast %cst_159 : f32 to vector<16x128xf32>
    %400 = arith.addf %399, %398 : vector<16x128xf32>
    %401 = arith.divf %399, %400 : vector<16x128xf32>
    %402 = arith.mulf %393, %381 : vector<16x128xf32>
    %403 = arith.mulf %387, %395 : vector<16x128xf32>
    %404 = arith.addf %402, %403 : vector<16x128xf32>
    %405 = math.tanh %404 : vector<16x128xf32>
    %406 = arith.mulf %401, %405 : vector<16x128xf32>
    %407 = vector.broadcast %372 : i32 to vector<16x1xi32>
    %408 = arith.cmpi slt, %407, %12 : vector<16x1xi32>
    %c0_160 = arith.constant 0 : index
    %c0_161 = arith.constant 0 : index
    %409 = vector.load %arg10[%c0_160, %c0_161] : memref<16x128xf32, #tpu.memory_space<vmem>>, vector<16x128xf32>
    %410 = vector.shape_cast %408 : vector<16x1xi1> to vector<16x1xi1>
    %411 = vector.broadcast %410 : vector<16x1xi1> to vector<16x128xi1>
    %412 = arith.select %411, %406, %409 : vector<16x128xi1>, vector<16x128xf32>
    %c0_162 = arith.constant 0 : index
    %c0_163 = arith.constant 0 : index
    %413 = vector.load %arg10[%c0_162, %c0_163] : memref<16x128xf32, #tpu.memory_space<vmem>>, vector<16x128xf32>
    tpu.vector_store %arg10[%c0_162, %c0_163], %412 {strides = array<i32>} : memref<16x128xf32, #tpu.memory_space<vmem>>, vector<16x128xf32>,
    %c0_164 = arith.constant 0 : index
    %c0_165 = arith.constant 0 : index
    %414 = vector.load %arg11[%c0_164, %c0_165] : memref<16x128xf32, #tpu.memory_space<vmem>>, vector<16x128xf32>
    %415 = vector.shape_cast %408 : vector<16x1xi1> to vector<16x1xi1>
    %416 = vector.broadcast %415 : vector<16x1xi1> to vector<16x128xi1>
    %417 = arith.select %416, %404, %414 : vector<16x128xi1>, vector<16x128xf32>
    %c0_166 = arith.constant 0 : index
    %c0_167 = arith.constant 0 : index
    %418 = vector.load %arg11[%c0_166, %c0_167] : memref<16x128xf32, #tpu.memory_space<vmem>>, vector<16x128xf32>
    tpu.vector_store %arg11[%c0_166, %c0_167], %417 {strides = array<i32>} : memref<16x128xf32, #tpu.memory_space<vmem>>, vector<16x128xf32>,
    %cst_168 = arith.constant 0.000000e+00 : f32
    %419 = vector.shape_cast %408 : vector<16x1xi1> to vector<16x1xi1>
    %420 = vector.broadcast %419 : vector<16x1xi1> to vector<16x128xi1>
    %421 = vector.broadcast %cst_168 : f32 to vector<16x128xf32>
    %422 = arith.select %420, %406, %421 : vector<16x128xi1>, vector<16x128xf32>
    %423 = arith.truncf %422 : vector<16x128xf32> to vector<16x128xbf16>
    %424 = arith.index_cast %374 : i32 to index
    %c0_169 = arith.constant 0 : index
    %425 = vector.load %arg7[%424, %c0_169] : memref<128x128xbf16, #tpu.memory_space<vmem>>, vector<16x128xbf16>
    tpu.vector_store %arg7[%424, %c0_169], %423 {strides = array<i32>} : memref<128x128xbf16, #tpu.memory_space<vmem>>, vector<16x128xbf16>,
    %c7_i32_170 = arith.constant 7 : i32
    %c2_i32_171 = arith.constant 2 : i32
    %426 = arith.muli %c2_i32_171, %c7_i32_170 : i32
    %c7_i32_172 = arith.constant 7 : i32
    %427 = arith.subi %c7_i32_172, %426 : i32
    %428 = arith.muli %arg0, %427 : i32
    %429 = arith.addi %c7_i32_170, %428 : i32
    %430 = arith.addi %19, %429 : i32
    %c16_i32_173 = arith.constant 16 : i32
    %431 = arith.muli %429, %c16_i32_173 : i32
    %432 = tpu.assume_multiple %431, 16 : i32
    %433 = arith.index_cast %432 : i32 to index
    %c0_174 = arith.constant 0 : index
    %434 = vector.load %arg12[%433, %c0_174] : memref<128x512xf32, #tpu.memory_space<vmem>>, vector<16x512xf32>
    %c0_175 = arith.constant 0 : index
    %c0_176 = arith.constant 0 : index
    %435 = vector.load %arg10[%c0_175, %c0_176] : memref<16x128xf32, #tpu.memory_space<vmem>>, vector<16x128xf32>
    %436 = arith.truncf %435 : vector<16x128xf32> to vector<16x128xbf16>
    %cst_177 = arith.constant dense<0.000000e+00> : vector<16x512xf32>
    %437 = tpu.matmul %436, %14, %cst_177 {dimension_numbers = #tpu.dot_dimension_numbers<[1], [0], [0], [1], [0, 0, 1, 1], [], []>} : vector<16x128xbf16>, vector<128x512xbf16>, vector<16x512xf32> -> vector<16x512xf32>
    %438 = arith.addf %434, %437 : vector<16x512xf32>
    %c0_178 = arith.constant 0 : index
    %c0_179 = arith.constant 0 : index
    %439 = vector.load %arg11[%c0_178, %c0_179] : memref<16x128xf32, #tpu.memory_space<vmem>>, vector<16x128xf32>
    %440 = vector.extract_strided_slice %438 {offsets = [0, 0], sizes = [16, 128], strides = [1, 1]} : vector<16x512xf32> to vector<16x128xf32>
    %441 = arith.negf %440 : vector<16x128xf32>
    %442 = math.exp %441 : vector<16x128xf32>
    %cst_180 = arith.constant 1.000000e+00 : f32
    %443 = vector.broadcast %cst_180 : f32 to vector<16x128xf32>
    %444 = arith.addf %443, %442 : vector<16x128xf32>
    %445 = arith.divf %443, %444 : vector<16x128xf32>
    %446 = vector.extract_strided_slice %438 {offsets = [0, 128], sizes = [16, 128], strides = [1, 1]} : vector<16x512xf32> to vector<16x128xf32>
    %447 = arith.negf %446 : vector<16x128xf32>
    %448 = math.exp %447 : vector<16x128xf32>
    %cst_181 = arith.constant 1.000000e+00 : f32
    %449 = vector.broadcast %cst_181 : f32 to vector<16x128xf32>
    %450 = arith.addf %449, %448 : vector<16x128xf32>
    %451 = arith.divf %449, %450 : vector<16x128xf32>
    %452 = vector.extract_strided_slice %438 {offsets = [0, 256], sizes = [16, 128], strides = [1, 1]} : vector<16x512xf32> to vector<16x128xf32>
    %453 = math.tanh %452 : vector<16x128xf32>
    %454 = vector.extract_strided_slice %438 {offsets = [0, 384], sizes = [16, 128], strides = [1, 1]} : vector<16x512xf32> to vector<16x128xf32>
    %455 = arith.negf %454 : vector<16x128xf32>
    %456 = math.exp %455 : vector<16x128xf32>
    %cst_182 = arith.constant 1.000000e+00 : f32
    %457 = vector.broadcast %cst_182 : f32 to vector<16x128xf32>
    %458 = arith.addf %457, %456 : vector<16x128xf32>
    %459 = arith.divf %457, %458 : vector<16x128xf32>
    %460 = arith.mulf %451, %439 : vector<16x128xf32>
    %461 = arith.mulf %445, %453 : vector<16x128xf32>
    %462 = arith.addf %460, %461 : vector<16x128xf32>
    %463 = math.tanh %462 : vector<16x128xf32>
    %464 = arith.mulf %459, %463 : vector<16x128xf32>
    %465 = vector.broadcast %430 : i32 to vector<16x1xi32>
    %466 = arith.cmpi slt, %465, %12 : vector<16x1xi32>
    %c0_183 = arith.constant 0 : index
    %c0_184 = arith.constant 0 : index
    %467 = vector.load %arg10[%c0_183, %c0_184] : memref<16x128xf32, #tpu.memory_space<vmem>>, vector<16x128xf32>
    %468 = vector.shape_cast %466 : vector<16x1xi1> to vector<16x1xi1>
    %469 = vector.broadcast %468 : vector<16x1xi1> to vector<16x128xi1>
    %470 = arith.select %469, %464, %467 : vector<16x128xi1>, vector<16x128xf32>
    %c0_185 = arith.constant 0 : index
    %c0_186 = arith.constant 0 : index
    %471 = vector.load %arg10[%c0_185, %c0_186] : memref<16x128xf32, #tpu.memory_space<vmem>>, vector<16x128xf32>
    tpu.vector_store %arg10[%c0_185, %c0_186], %470 {strides = array<i32>} : memref<16x128xf32, #tpu.memory_space<vmem>>, vector<16x128xf32>,
    %c0_187 = arith.constant 0 : index
    %c0_188 = arith.constant 0 : index
    %472 = vector.load %arg11[%c0_187, %c0_188] : memref<16x128xf32, #tpu.memory_space<vmem>>, vector<16x128xf32>
    %473 = vector.shape_cast %466 : vector<16x1xi1> to vector<16x1xi1>
    %474 = vector.broadcast %473 : vector<16x1xi1> to vector<16x128xi1>
    %475 = arith.select %474, %462, %472 : vector<16x128xi1>, vector<16x128xf32>
    %c0_189 = arith.constant 0 : index
    %c0_190 = arith.constant 0 : index
    %476 = vector.load %arg11[%c0_189, %c0_190] : memref<16x128xf32, #tpu.memory_space<vmem>>, vector<16x128xf32>
    tpu.vector_store %arg11[%c0_189, %c0_190], %475 {strides = array<i32>} : memref<16x128xf32, #tpu.memory_space<vmem>>, vector<16x128xf32>,
    %cst_191 = arith.constant 0.000000e+00 : f32
    %477 = vector.shape_cast %466 : vector<16x1xi1> to vector<16x1xi1>
    %478 = vector.broadcast %477 : vector<16x1xi1> to vector<16x128xi1>
    %479 = vector.broadcast %cst_191 : f32 to vector<16x128xf32>
    %480 = arith.select %478, %464, %479 : vector<16x128xi1>, vector<16x128xf32>
    %481 = arith.truncf %480 : vector<16x128xf32> to vector<16x128xbf16>
    %482 = arith.index_cast %432 : i32 to index
    %c0_192 = arith.constant 0 : index
    %483 = vector.load %arg7[%482, %c0_192] : memref<128x128xbf16, #tpu.memory_space<vmem>>, vector<16x128xbf16>
    tpu.vector_store %arg7[%482, %c0_192], %481 {strides = array<i32>} : memref<128x128xbf16, #tpu.memory_space<vmem>>, vector<16x128xbf16>,
    %c8_i32_193 = arith.constant 8 : i32
    %c0_i32_194 = arith.constant 0 : i32
    %484 = arith.cmpi eq, %arg1, %c0_i32_194 : i32
    %485 = arith.extui %484 : i1 to i32
    %c0_i32_195 = arith.constant 0 : i32
    %486 = arith.cmpi ne, %485, %c0_i32_195 : i32
    scf.if %486 {
      %c0_196 = arith.constant 0 : index
      %c0_197 = arith.constant 0 : index
      %487 = vector.load %arg10[%c0_196, %c0_197] : memref<16x128xf32, #tpu.memory_space<vmem>>, vector<16x128xf32>
      %488 = vector.shape_cast %487 : vector<16x128xf32> to vector<1x16x128xf32>
      %c0_198 = arith.constant 0 : index
      %c0_199 = arith.constant 0 : index
      %c0_200 = arith.constant 0 : index
      %489 = vector.load %arg8[%c0_198, %c0_199, %c0_200] : memref<1x16x128xf32, #tpu.memory_space<vmem>>, vector<1x16x128xf32>
      tpu.vector_store %arg8[%c0_198, %c0_199, %c0_200], %488 {strides = array<i32>} : memref<1x16x128xf32, #tpu.memory_space<vmem>>, vector<1x16x128xf32>,
      %c0_201 = arith.constant 0 : index
      %c0_202 = arith.constant 0 : index
      %490 = vector.load %arg11[%c0_201, %c0_202] : memref<16x128xf32, #tpu.memory_space<vmem>>, vector<16x128xf32>
      %491 = vector.shape_cast %490 : vector<16x128xf32> to vector<1x16x128xf32>
      %c0_203 = arith.constant 0 : index
      %c0_204 = arith.constant 0 : index
      %c0_205 = arith.constant 0 : index
      %492 = vector.load %arg9[%c0_203, %c0_204, %c0_205] : memref<1x16x128xf32, #tpu.memory_space<vmem>>, vector<1x16x128xf32>
      tpu.vector_store %arg9[%c0_203, %c0_204, %c0_205], %491 {strides = array<i32>} : memref<1x16x128xf32, #tpu.memory_space<vmem>>, vector<1x16x128xf32>,
    } else {
    }
    return
  }
  func.func @transform_0(%arg0: i32, %arg1: i32) -> (i32, i32) {
    %c0_i32 = arith.constant 0 : i32
    %c0_i32_0 = arith.constant 0 : i32
    %c0_i32_1 = arith.constant 0 : i32
    return %c0_i32, %c0_i32_0 : i32, i32
  }
  func.func @transform_1(%arg0: i32, %arg1: i32) -> (i32, i32) {
    %c2_i32 = arith.constant 2 : i32
    %0 = arith.muli %c2_i32, %arg1 : i32
    %c0_i32 = arith.constant 0 : i32
    %1 = arith.subi %c0_i32, %0 : i32
    %2 = arith.muli %arg0, %1 : i32
    %3 = arith.addi %arg1, %2 : i32
    %c0_i32_0 = arith.constant 0 : i32
    %c0_i32_1 = arith.constant 0 : i32
    return %3, %c0_i32_0 : i32, i32
  }
  func.func @transform_2(%arg0: i32, %arg1: i32) -> (i32, i32, i32) {
    %c0_i32 = arith.constant 0 : i32
    %c0_i32_0 = arith.constant 0 : i32
    %c0_i32_1 = arith.constant 0 : i32
    return %arg0, %c0_i32, %c0_i32_0 : i32, i32, i32
  }
  func.func @transform_3(%arg0: i32, %arg1: i32) -> (i32, i32, i32) {
    %c0_i32 = arith.constant 0 : i32
    %c0_i32_0 = arith.constant 0 : i32
    %c0_i32_1 = arith.constant 0 : i32
    return %arg0, %c0_i32, %c0_i32_0 : i32, i32, i32
  }
  func.func @transform_4(%arg0: i32, %arg1: i32) -> (i32, i32, i32) {
    %c0_i32 = arith.constant 0 : i32
    %c0_i32_0 = arith.constant 0 : i32
    %c0_i32_1 = arith.constant 0 : i32
    return %arg0, %c0_i32, %c0_i32_0 : i32, i32, i32
  }
  func.func @transform_5(%arg0: i32, %arg1: i32) -> (i32, i32) {
    %c2_i32 = arith.constant 2 : i32
    %0 = arith.muli %c2_i32, %arg1 : i32
    %c0_i32 = arith.constant 0 : i32
    %1 = arith.subi %c0_i32, %0 : i32
    %2 = arith.muli %arg0, %1 : i32
    %3 = arith.addi %arg1, %2 : i32
    %c0_i32_0 = arith.constant 0 : i32
    return %3, %arg0 : i32, i32
  }
  func.func @transform_6(%arg0: i32, %arg1: i32) -> (i32, i32, i32) {
    %c0_i32 = arith.constant 0 : i32
    %c0_i32_0 = arith.constant 0 : i32
    %c0_i32_1 = arith.constant 0 : i32
    return %arg0, %c0_i32, %c0_i32_0 : i32, i32, i32
  }
  func.func @transform_7(%arg0: i32, %arg1: i32) -> (i32, i32, i32) {
    %c0_i32 = arith.constant 0 : i32
    %c0_i32_0 = arith.constant 0 : i32
    %c0_i32_1 = arith.constant 0 : i32
    return %arg0, %c0_i32, %c0_i32_0 : i32, i32, i32
  }
}

</mosaic_0001>

<bundles_post_ra>
// kernel: seq2seq_forward.9
= control target key start
LH: loop header
LB: loop body
LE: loop exit
PB: predicated region body
PF: predicated region fallthrough
CT: control target
= control target key end

     0   :  { %s584_s1 = inlined_call_operand.vmem [shape: bf16[128,128], index: 1, kind: input, shape index: {}]   ;;  %s585_s0 = inlined_call_operand.vmem [shape: bf16[128,128], index: 0, kind: input, shape index: {}]   ;;  %s586_s2 = inlined_call_operand.vmem [shape: f32[8,128], index: 2, kind: input, shape index: {}]   ;;  %s587_s3 = inlined_call_operand.vmem [shape: f32[128,128], index: 3, kind: output, shape index: {}]  }
   0x1   :  { %v449_v0 = vld [vmem:[%s584_s1] sm:$0xff]   ;;  %v450_v1 = vld [vmem:[%s584_s1 + $0x8] sm:$0xff]   ;;  %v451_v2 = vld [vmem:[%s584_s1 + $0x10] sm:$0xff]  }
   0x2   :  { %401 = vmatprep.subr.bf16.mxu0 %v449_v0  ;;  %433 = vmatprep.subr.bf16.mxu1 %v449_v0  ;;  %v452_v3 = vld [vmem:[%s584_s1 + $0x18] sm:$0xff]   ;;  %v457_v4 = vld [vmem:[%s585_s0] sm:$0xff]   ;;  %v454_v7 = vld [vmem:[%s584_s1 + $0x28] sm:$0xff]  }
   0x3   :  { %402 = vmatpush3.bf16.msra.mxu0 %v449_v0  ;;  %441 = vmatpush3.bf16.msra.mxu1 %v449_v0  ;;  %v458_v5 = vld [vmem:[%s585_s0 + $0x20] sm:$0xff]   ;;  %v455_v8 = vld [vmem:[%s584_s1 + $0x30] sm:$0xff]   ;;  %v456_v9 = vld [vmem:[%s584_s1 + $0x38] sm:$0xff]  }
   0x4   :  { %403 = vmatprep.subr.bf16.mxu0 %v450_v1  ;;  %434 = vmatprep.subr.bf16.mxu1 %v450_v1  ;;  %v453_v6 = vld [vmem:[%s584_s1 + $0x20] sm:$0xff]   ;;  %v459_v10 = vld [vmem:[%s585_s0 + $0x8] sm:$0xff]   ;;  %v461_v12 = vld [vmem:[%s585_s0 + $0x10] sm:$0xff]  }
   0x5   :  { %417 = vmatprep.mubr.bf16.mxu0 %v457_v4  ;;  %425 = vmatprep.mubr.bf16.mxu1 %v458_v5  ;;  %v460_v11 = vld [vmem:[%s585_s0 + $0x28] sm:$0xff]   ;;  %v462_v13 = vld [vmem:[%s585_s0 + $0x30] sm:$0xff]   ;;  %v463_v14 = vld [vmem:[%s585_s0 + $0x18] sm:$0xff]  }
   0x6   :  { %v464_v15 = vld [vmem:[%s585_s0 + $0x38] sm:$0xff]   ;;  %v384_v16 = vld [vmem:[%s586_s2] ss:$0 sm:$0xff] }
   0x7   :  { %404 = vmatpush3.bf16.msra.mxu0 %v450_v1  ;;  %442 = vmatpush3.bf16.msra.mxu1 %v450_v1 }
   0x8   :  { %405 = vmatprep.subr.bf16.mxu0 %v451_v2  ;;  %435 = vmatprep.subr.bf16.mxu1 %v451_v2 }
   0xb   :  { %406 = vmatpush3.bf16.msra.mxu0 %v451_v2  ;;  %443 = vmatpush3.bf16.msra.mxu1 %v451_v2 }
   0xc   :  { %407 = vmatprep.subr.bf16.mxu0 %v452_v3  ;;  %436 = vmatprep.subr.bf16.mxu1 %v452_v3 }
   0xf   :  { %408 = vmatpush3.bf16.msra.mxu0 %v452_v3  ;;  %444 = vmatpush3.bf16.msra.mxu1 %v452_v3 }
  0x10   :  { %409 = vmatprep.subr.bf16.mxu0 %v453_v6  ;;  %437 = vmatprep.subr.bf16.mxu1 %v453_v6 }
  0x13   :  { %410 = vmatpush3.bf16.msra.mxu0 %v453_v6  ;;  %445 = vmatpush3.bf16.msra.mxu1 %v453_v6 }
  0x14   :  { %411 = vmatprep.subr.bf16.mxu0 %v454_v7  ;;  %438 = vmatprep.subr.bf16.mxu1 %v454_v7 }
  0x17   :  { %412 = vmatpush3.bf16.msra.mxu0 %v454_v7  ;;  %446 = vmatpush3.bf16.msra.mxu1 %v454_v7 }
  0x18   :  { %413 = vmatprep.subr.bf16.mxu0 %v455_v8  ;;  %439 = vmatprep.subr.bf16.mxu1 %v455_v8 }
  0x1b   :  { %414 = vmatpush3.bf16.msra.mxu0 %v455_v8  ;;  %447 = vmatpush3.bf16.msra.mxu1 %v455_v8 }
  0x1c   :  { %415 = vmatprep.subr.bf16.mxu0 %v456_v9  ;;  %440 = vmatprep.subr.bf16.mxu1 %v456_v9 }
  0x1f   :  { %416 = vmatpush3.bf16.msra.mxu0 %v456_v9  ;;  %448 = vmatpush3.bf16.msra.mxu1 %v456_v9 }
  0x22   :  { %418 = vmatmul.mubr.bf16.vlgmr.msra.gmra.mrb[0].mxu0 %v459_v10  ;;  %426 = vmatmul.mubr.bf16.vlgmr.msra.gmra.mrb[0].mxu1 %v460_v11 }
  0x23   :  { %421 = vmatprep.mubr.bf16.mxu0 %v461_v12  ;;  %429 = vmatprep.mubr.bf16.mxu1 %v462_v13 }
  0x2a   :  { %422 = vmatmul.mubr.bf16.gmra.mrb[4].mxu0 %v463_v14  ;;  %430 = vmatmul.mubr.bf16.gmra.mrb[4].mxu1 %v464_v15 }
  0xf5   :  { %v419_v17 = vpop.f32.mrb[0].mxu0  ;;  %v427_v18 = vpop.f32.mrb[0].mxu1 }
  0xf6   :  { %v334_v19 = vadd.f32 %v419_v17, %v384_v16  ;;  %v342_v20 = vadd.f32 %v427_v18, %v384_v16  ;;  %v213_v21 = vpop.f32.mrb[1].mxu0  ;;  %v245_v22 = vpop.f32.mrb[1].mxu1 }
  0xf7   :  { %v332_v23 = vadd.f32 %v384_v16, %v213_v21  ;;  %v340_v24 = vadd.f32 %v384_v16, %v245_v22  ;;  %v420_v25 = vpop.f32.mrb[2].mxu0  ;;  %v428_v26 = vpop.f32.mrb[2].mxu1 }
  0xf8   :  { %350 = vst [vmem:[%s587_s3 + $0x10] sm:$0xff] %v334_v19  ;;  %358 = vst [vmem:[%s587_s3 + $0x50] sm:$0xff] %v342_v20  ;;  %v335_v27 = vadd.f32 %v420_v25, %v384_v16  ;;  %v343_v28 = vadd.f32 %v428_v26, %v384_v16  ;;  %v216_v29 = vpop.f32.mrb[3].mxu0  ;;  %v248_v30 = vpop.f32.mrb[3].mxu1 }
  0xf9   :  { %348 = vst [vmem:[%s587_s3] sm:$0xff] %v332_v23  ;;  %356 = vst [vmem:[%s587_s3 + $0x40] sm:$0xff] %v340_v24  ;;  %v333_v31 = vadd.f32 %v384_v16, %v216_v29  ;;  %v341_v32 = vadd.f32 %v384_v16, %v248_v30 }
  0xfa   :  { %351 = vst [vmem:[%s587_s3 + $0x18] sm:$0xff] %v335_v27  ;;  %359 = vst [vmem:[%s587_s3 + $0x58] sm:$0xff] %v343_v28 }
  0xfb   :  { %349 = vst [vmem:[%s587_s3 + $0x8] sm:$0xff] %v333_v31  ;;  %357 = vst [vmem:[%s587_s3 + $0x48] sm:$0xff] %v341_v32 }
  0xfd   :  { %v423_v33 = vpop.f32.mrb[4].mxu0  ;;  %v431_v34 = vpop.f32.mrb[4].mxu1 }
  0xfe   :  { %v338_v35 = vadd.f32 %v423_v33, %v384_v16  ;;  %v346_v36 = vadd.f32 %v431_v34, %v384_v16  ;;  %v229_v37 = vpop.f32.mrb[5].mxu0  ;;  %v261_v38 = vpop.f32.mrb[5].mxu1 }
  0xff   :  { %v336_v39 = vadd.f32 %v384_v16, %v229_v37  ;;  %v344_v40 = vadd.f32 %v384_v16, %v261_v38  ;;  %v424_v41 = vpop.f32.mrb[6].mxu0  ;;  %v432_v42 = vpop.f32.mrb[6].mxu1 }
 0x100   :  { %354 = vst [vmem:[%s587_s3 + $0x30] sm:$0xff] %v338_v35  ;;  %362 = vst [vmem:[%s587_s3 + $0x70] sm:$0xff] %v346_v36  ;;  %v339_v43 = vadd.f32 %v424_v41, %v384_v16  ;;  %v347_v44 = vadd.f32 %v432_v42, %v384_v16  ;;  %v232_v45 = vpop.f32.mrb[7].mxu0  ;;  %v264_v46 = vpop.f32.mrb[7].mxu1 }
 0x101   :  { %352 = vst [vmem:[%s587_s3 + $0x20] sm:$0xff] %v336_v39  ;;  %360 = vst [vmem:[%s587_s3 + $0x60] sm:$0xff] %v344_v40  ;;  %v337_v47 = vadd.f32 %v384_v16, %v232_v45  ;;  %v345_v48 = vadd.f32 %v384_v16, %v264_v46 }
 0x102   :  { %355 = vst [vmem:[%s587_s3 + $0x38] sm:$0xff] %v339_v43  ;;  %363 = vst [vmem:[%s587_s3 + $0x78] sm:$0xff] %v347_v44 }
 0x103   :  { %353 = vst [vmem:[%s587_s3 + $0x28] sm:$0xff] %v337_v47  ;;  %361 = vst [vmem:[%s587_s3 + $0x68] sm:$0xff] %v345_v48 }

// kernel: seq2seq_forward.7
= control target key start
LH: loop header
LB: loop body
LE: loop exit
PB: predicated region body
PF: predicated region fallthrough
CT: control target
= control target key end

     0   :  { %v2924_v1 = vmov 0   ;;  %s3855_s1 = inlined_call_operand.vmem [shape: bf16[128,512], index: 1, kind: input, shape index: {}]   ;;  %s3856_s0 = inlined_call_operand.vmem [shape: bf16[128,128], index: 0, kind: input, shape index: {}]   ;;  %s3857_s2 = inlined_call_operand.vmem [shape: bf16[128,512], index: 2, kind: input, shape index: {}]   ;;  %s3858_s4 = inlined_call_operand.vmem [shape: f32[16,128], index: 4, kind: input, shape index: {}]   ;;  %s3859_s3 = inlined_call_operand.vmem [shape: f32[1,512], index: 3, kind: input, shape index: {}]   ;;  %s3860_s5 = inlined_call_operand.vmem [shape: f32[16,128], index: 5, kind: input, shape index: {}]   ;;  %s3861_s6 = inlined_call_operand.vmem [shape: bf16[128,128], index: 6, kind: output, shape index: {}]  }
   0x1   :  { %v2532_v0 = vld [vmem:[%s3855_s1 + $0x4] ss:$16 sps:$4 sm:$0xff]   ;;  %346 = vmatprep.mubr.bf16.mxu0 %v2924_v1  ;;  %459 = vmatprep.mubr.bf16.mxu1 %v2924_v1  ;;  %v2534_v2 = vld [vmem:[%s3855_s1 + $0xc] ss:$16 sps:$4 sm:$0xff]   ;;  %v2536_v3 = vld [vmem:[%s3855_s1] ss:$16 sps:$4 sm:$0xff]  }
   0x2   :  { %314 = vmatprep.subr.bf16.mxu0 %v2532_v0  ;;  %v2537_v4 = vld [vmem:[%s3855_s1 + $0x8] ss:$16 sps:$4 sm:$0xff]   ;;  %427 = vmatprep.subr.bf16.mxu1 %v2534_v2  ;;  %v2538_v5 = vld [vmem:[%s3855_s1 + $0x24] ss:$16 sps:$4 sm:$0xff]   ;;  %v2540_v6 = vld [vmem:[%s3855_s1 + $0x2c] ss:$16 sps:$4 sm:$0xff]  }
   0x3   :  { %315 = vmatpush1.bf16.msra.mxu0 %v2536_v3  ;;  %428 = vmatpush1.bf16.msra.mxu1 %v2537_v4  ;;  %v2542_v7 = vld [vmem:[%s3855_s1 + $0x20] ss:$16 sps:$4 sm:$0xff]   ;;  %v2543_v8 = vld [vmem:[%s3855_s1 + $0x28] ss:$16 sps:$4 sm:$0xff]   ;;  %v2544_v9 = vld [vmem:[%s3855_s1 + $0x44] ss:$16 sps:$4 sm:$0xff]  }
   0x4   :  { %316 = vmatprep.subr.bf16.mxu0 %v2538_v5  ;;  %429 = vmatprep.subr.bf16.mxu1 %v2540_v6  ;;  %v2546_v10 = vld [vmem:[%s3855_s1 + $0x4c] ss:$16 sps:$4 sm:$0xff]   ;;  %v2548_v11 = vld [vmem:[%s3855_s1 + $0x40] ss:$16 sps:$4 sm:$0xff]   ;;  %v2549_v12 = vld [vmem:[%s3855_s1 + $0x48] ss:$16 sps:$4 sm:$0xff]  }
   0x5   :  { %v2550_v13 = vld [vmem:[%s3855_s1 + $0x64] ss:$16 sps:$4 sm:$0xff]   ;;  %v2552_v14 = vld [vmem:[%s3855_s1 + $0x6c] ss:$16 sps:$4 sm:$0xff]   ;;  %v2554_v15 = vld [vmem:[%s3855_s1 + $0x60] ss:$16 sps:$4 sm:$0xff]  }
   0x6   :  { %v2555_v16 = vld [vmem:[%s3855_s1 + $0x68] ss:$16 sps:$4 sm:$0xff]   ;;  %v2556_v17 = vld [vmem:[%s3855_s1 + $0x84] ss:$16 sps:$4 sm:$0xff]   ;;  %v2558_v18 = vld [vmem:[%s3855_s1 + $0x8c] ss:$16 sps:$4 sm:$0xff]  }
   0x7   :  { %317 = vmatpush1.bf16.msra.mxu0 %v2542_v7  ;;  %430 = vmatpush1.bf16.msra.mxu1 %v2543_v8  ;;  %v2560_v19 = vld [vmem:[%s3855_s1 + $0x80] ss:$16 sps:$4 sm:$0xff]   ;;  %v2561_v20 = vld [vmem:[%s3855_s1 + $0x88] ss:$16 sps:$4 sm:$0xff]   ;;  %v2562_v21 = vld [vmem:[%s3855_s1 + $0xa4] ss:$16 sps:$4 sm:$0xff]  }
   0x8   :  { %318 = vmatprep.subr.bf16.mxu0 %v2544_v9  ;;  %431 = vmatprep.subr.bf16.mxu1 %v2546_v10  ;;  %v2564_v22 = vld [vmem:[%s3855_s1 + $0xac] ss:$16 sps:$4 sm:$0xff]   ;;  %v2566_v23 = vld [vmem:[%s3855_s1 + $0xa0] ss:$16 sps:$4 sm:$0xff]   ;;  %v2567_v24 = vld [vmem:[%s3855_s1 + $0xa8] ss:$16 sps:$4 sm:$0xff]  }
   0x9   :  { %v2568_v25 = vld [vmem:[%s3855_s1 + $0xc4] ss:$16 sps:$4 sm:$0xff]   ;;  %v2570_v26 = vld [vmem:[%s3855_s1 + $0xcc] ss:$16 sps:$4 sm:$0xff]   ;;  %v2572_v27 = vld [vmem:[%s3855_s1 + $0xc0] ss:$16 sps:$4 sm:$0xff]  }
   0xa   :  { %v2573_v28 = vld [vmem:[%s3855_s1 + $0xc8] ss:$16 sps:$4 sm:$0xff]   ;;  %v2574_v29 = vld [vmem:[%s3855_s1 + $0xe4] ss:$16 sps:$4 sm:$0xff]   ;;  %v2576_v30 = vld [vmem:[%s3855_s1 + $0xec] ss:$16 sps:$4 sm:$0xff]  }
   0xb   :  { %319 = vmatpush1.bf16.msra.mxu0 %v2548_v11  ;;  %432 = vmatpush1.bf16.msra.mxu1 %v2549_v12  ;;  %v2578_v31 = vld [vmem:[%s3855_s1 + $0xe0] ss:$16 sps:$4 sm:$0xff]   ;;  %v2579_v32 = vld [vmem:[%s3855_s1 + $0xe8] ss:$16 sps:$4 sm:$0xff]   ;;  %v3061_v33 = vld [vmem:[%s3857_s2 + $0x4] ss:$16 sps:$4 sm:$0xff]  }
   0xc   :  { %320 = vmatprep.subr.bf16.mxu0 %v2550_v13  ;;  %433 = vmatprep.subr.bf16.mxu1 %v2552_v14  ;;  %v3066_v34 = vld [vmem:[%s3857_s2 + $0xc] ss:$16 sps:$4 sm:$0xff]   ;;  %v2580_v35 = vld [vmem:[%s3856_s0] sm:$0xff]   ;;  %v3086_v38 = vld [vmem:[%s3857_s2 + $0x8] ss:$16 sps:$4 sm:$0xff]   ;;  %v86_v13 = vlaneseq }
   0xd   :  { %v3074_v36 = vld [vmem:[%s3857_s2] ss:$16 sps:$4 sm:$0xff]   ;;  %v3080_v37 = vld [vmem:[%s3857_s2 + $0x24] ss:$16 sps:$4 sm:$0xff]   ;;  %v3091_v39 = vld [vmem:[%s3857_s2 + $0x2c] ss:$16 sps:$4 sm:$0xff]  }
   0xe   :  { %v3098_v40 = vld [vmem:[%s3857_s2 + $0x20] ss:$16 sps:$4 sm:$0xff]   ;;  %v3105_v41 = vld [vmem:[%s3857_s2 + $0x44] ss:$16 sps:$4 sm:$0xff]   ;;  %v3111_v42 = vld [vmem:[%s3857_s2 + $0x28] ss:$16 sps:$4 sm:$0xff]  }
   0xf   :  { %321 = vmatpush1.bf16.msra.mxu0 %v2554_v15  ;;  %434 = vmatpush1.bf16.msra.mxu1 %v2555_v16  ;;  %v2584_v43 = vld [vmem:[%s3856_s0 + $0x8] sm:$0xff]   ;;  %v3121_v44 = vld [vmem:[%s3857_s2 + $0x40] ss:$16 sps:$4 sm:$0xff]   ;;  %v3126_v45 = vld [vmem:[%s3857_s2 + $0x64] ss:$16 sps:$4 sm:$0xff]   ;;  %v87_v14 = vshrl.u32 %v86_v13, 7 }
  0x10   :  { %322 = vmatprep.subr.bf16.mxu0 %v2556_v17  ;;  %435 = vmatprep.subr.bf16.mxu1 %v2558_v18  ;;  %v3132_v46 = vld [vmem:[%s3857_s2 + $0x4c] ss:$16 sps:$4 sm:$0xff]   ;;  %v3138_v47 = vld [vmem:[%s3857_s2 + $0x48] ss:$16 sps:$4 sm:$0xff]   ;;  %v3151_v49 = vld [vmem:[%s3857_s2 + $0x60] ss:$16 sps:$4 sm:$0xff]  }
  0x11   :  { %v3143_v48 = vld [vmem:[%s3857_s2 + $0x6c] ss:$16 sps:$4 sm:$0xff]   ;;  %v3157_v50 = vld [vmem:[%s3857_s2 + $0x84] ss:$16 sps:$4 sm:$0xff]   ;;  %v3164_v51 = vld [vmem:[%s3857_s2 + $0x68] ss:$16 sps:$4 sm:$0xff]  }
  0x12   :  { %v2590_v52 = vld [vmem:[%s3856_s0 + $0x10] sm:$0xff]   ;;  %v3179_v54 = vld [vmem:[%s3857_s2 + $0x8c] ss:$16 sps:$4 sm:$0xff]   ;;  %v3191_v56 = vld [vmem:[%s3857_s2 + $0x88] ss:$16 sps:$4 sm:$0xff]   ;;  %v88_v15 = vsub.s32 0, %v87_v14 }
  0x13   :  { %323 = vmatpush1.bf16.msra.mxu0 %v2560_v19  ;;  %436 = vmatpush1.bf16.msra.mxu1 %v2561_v20  ;;  %v3173_v53 = vld [vmem:[%s3857_s2 + $0x80] ss:$16 sps:$4 sm:$0xff]   ;;  %v3185_v55 = vld [vmem:[%s3857_s2 + $0xa4] ss:$16 sps:$4 sm:$0xff]   ;;  %v3196_v57 = vld [vmem:[%s3857_s2 + $0xac] ss:$16 sps:$4 sm:$0xff]  }
  0x14   :  { %324 = vmatprep.subr.bf16.mxu0 %v2562_v21  ;;  %437 = vmatprep.subr.bf16.mxu1 %v2564_v22  ;;  %v3204_v58 = vld [vmem:[%s3857_s2 + $0xa0] ss:$16 sps:$4 sm:$0xff]   ;;  %v3211_v59 = vld [vmem:[%s3857_s2 + $0xc4] ss:$16 sps:$4 sm:$0xff]   ;;  %v3217_v60 = vld [vmem:[%s3857_s2 + $0xa8] ss:$16 sps:$4 sm:$0xff]  }
  0x15   :  { %v2597_v61 = vld [vmem:[%s3856_s0 + $0x18] sm:$0xff]   ;;  %v3227_v62 = vld [vmem:[%s3857_s2 + $0xc0] ss:$16 sps:$4 sm:$0xff]   ;;  %v3239_v0 = vld [vmem:[%s3857_s2 + $0xe4] ss:$16 sps:$4 sm:$0xff]   ;;  %v92_v17 = vsub.s32 1, %v87_v14 }
  0x16   :  { %v3232_v63 = vld [vmem:[%s3857_s2 + $0xcc] ss:$16 sps:$4 sm:$0xff]   ;;  %v3244_v2 = vld [vmem:[%s3857_s2 + $0xc8] ss:$16 sps:$4 sm:$0xff]   ;;  %v3258_v4 = vld [vmem:[%s3857_s2 + $0xe0] ss:$16 sps:$4 sm:$0xff]  }
  0x17   :  { %325 = vmatpush1.bf16.msra.mxu0 %v2566_v23  ;;  %438 = vmatpush1.bf16.msra.mxu1 %v2567_v24  ;;  %v3249_v3 = vld [vmem:[%s3857_s2 + $0xec] ss:$16 sps:$4 sm:$0xff]   ;;  %v3265_v5 = vld [vmem:[%s3857_s2 + $0xe8] ss:$16 sps:$4 sm:$0xff]   ;;  %v2604_v6 = vld [vmem:[%s3856_s0 + $0x20] sm:$0xff]   ;;  %v100_v22 = vsub.s32 3, %v87_v14 }
  0x18   :  { %326 = vmatprep.subr.bf16.mxu0 %v2568_v25  ;;  %439 = vmatprep.subr.bf16.mxu1 %v2570_v26  ;;  %v2611_v7 = vld [vmem:[%s3856_s0 + $0x28] sm:$0xff]   ;;  %v2618_v8 = vld [vmem:[%s3856_s0 + $0x30] sm:$0xff]   ;;  %v2626_v9 = vld [vmem:[%s3856_s0 + $0x38] sm:$0xff]  }
  0x19   :  { %v28_v10 = vld [vmem:[%s3858_s4] sm:$0xff]  ;;  %v29_v11 = vld [vmem:[%s3858_s4 + $0x8] sm:$0xff] }
  0x1a   :  { %v649_v12 = vpack.c.bf16 %v29_v11, %v28_v10  ;;  %v84_v16 = vld [vmem:[%s3859_s3] sm:$0xf] }
  0x1b   :  { %327 = vmatpush1.bf16.msra.mxu0 %v2572_v27  ;;  %440 = vmatpush1.bf16.msra.mxu1 %v2573_v28  ;;  %v3335_v18 = vrot.slane %v84_v16, %v88_v15  ;;  %v3337_v19 = vrot.slane %v84_v16, %v92_v17 }
  0x1c   :  { %328 = vmatprep.subr.bf16.mxu0 %v2574_v29  ;;  %441 = vmatprep.subr.bf16.mxu1 %v2576_v30  ;;  %v96_v30 = vsub.s32 2, %v87_v14 }
  0x1f   :  { %329 = vmatpush1.bf16.msra.mxu0 %v2578_v31  ;;  %442 = vmatpush1.bf16.msra.mxu1 %v2579_v32 }
  0x20   :  { %810 = vmatprep.subr.bf16.mxu0 %v3061_v33  ;;  %853 = vmatprep.subr.bf16.mxu1 %v3066_v34 }
  0x22   :  { %347 = vmatmul.mubr.bf16.vlgmr.msra.gmra.mrb[0].mxu0 %v2580_v35  ;;  %460 = vmatmul.mubr.bf16.vlgmr.msra.gmra.mrb[0].mxu1 %v2580_v35 }
  0x23   :  { %811 = vmatpush1.bf16.msra.mxu0 %v3074_v36  ;;  %356 = vmatprep.mubr.bf16.mxu0 %v2924_v1 }
  0x24   :  { %469 = vmatprep.mubr.bf16.mxu1 %v2924_v1  ;;  %812 = vmatprep.subr.bf16.mxu0 %v3080_v37 }
  0x25   :  { %854 = vmatpush1.bf16.msra.mxu1 %v3086_v38 }
  0x26   :  { %855 = vmatprep.subr.bf16.mxu1 %v3091_v39 }
  0x27   :  { %813 = vmatpush1.bf16.msra.mxu0 %v3098_v40 }
  0x28   :  { %814 = vmatprep.subr.bf16.mxu0 %v3105_v41 }
  0x29   :  { %856 = vmatpush1.bf16.msra.mxu1 %v3111_v42 }
  0x2a   :  { %357 = vmatmul.mubr.bf16.gmra.mrb[4].mxu0 %v2584_v43  ;;  %470 = vmatmul.mubr.bf16.gmra.mrb[4].mxu1 %v2584_v43 }
  0x2b   :  { %366 = vmatprep.mubr.bf16.mxu0 %v2924_v1  ;;  %479 = vmatprep.mubr.bf16.mxu1 %v2924_v1 }
  0x2c   :  { %815 = vmatpush1.bf16.msra.mxu0 %v3121_v44  ;;  %857 = vmatprep.subr.bf16.mxu1 %v3132_v46 }
  0x2d   :  { %816 = vmatprep.subr.bf16.mxu0 %v3126_v45  ;;  %858 = vmatpush1.bf16.msra.mxu1 %v3138_v47 }
  0x2e   :  { %859 = vmatprep.subr.bf16.mxu1 %v3143_v48 }
  0x30   :  { %817 = vmatpush1.bf16.msra.mxu0 %v3151_v49 }
  0x31   :  { %818 = vmatprep.subr.bf16.mxu0 %v3157_v50  ;;  %860 = vmatpush1.bf16.msra.mxu1 %v3164_v51 }
  0x32   :  { %367 = vmatmul.mubr.bf16.gmra.mrb[8].mxu0 %v2590_v52  ;;  %480 = vmatmul.mubr.bf16.gmra.mrb[8].mxu1 %v2590_v52  ;;  %v3342_v52 = vrot.slane %v84_v16, %v100_v22 }
  0x33   :  { %376 = vmatprep.mubr.bf16.mxu0 %v2924_v1  ;;  %489 = vmatprep.mubr.bf16.mxu1 %v2924_v1 }
  0x34   :  { %819 = vmatpush1.bf16.msra.mxu0 %v3173_v53  ;;  %861 = vmatprep.subr.bf16.mxu1 %v3179_v54 }
  0x35   :  { %820 = vmatprep.subr.bf16.mxu0 %v3185_v55  ;;  %862 = vmatpush1.bf16.msra.mxu1 %v3191_v56 }
  0x36   :  { %863 = vmatprep.subr.bf16.mxu1 %v3196_v57 }
  0x38   :  { %821 = vmatpush1.bf16.msra.mxu0 %v3204_v58 }
  0x39   :  { %822 = vmatprep.subr.bf16.mxu0 %v3211_v59  ;;  %864 = vmatpush1.bf16.msra.mxu1 %v3217_v60 }
  0x3a   :  { %377 = vmatmul.mubr.bf16.gmra.mrb[12].mxu0 %v2597_v61  ;;  %490 = vmatmul.mubr.bf16.gmra.mrb[12].mxu1 %v2597_v61 }
  0x3b   :  { %386 = vmatprep.mubr.bf16.mxu0 %v2924_v1  ;;  %499 = vmatprep.mubr.bf16.mxu1 %v2924_v1 }
  0x3c   :  { %823 = vmatpush1.bf16.msra.mxu0 %v3227_v62  ;;  %865 = vmatprep.subr.bf16.mxu1 %v3232_v63 }
  0x3d   :  { %824 = vmatprep.subr.bf16.mxu0 %v3239_v0  ;;  %866 = vmatpush1.bf16.msra.mxu1 %v3244_v2 }
  0x3e   :  { %867 = vmatprep.subr.bf16.mxu1 %v3249_v3 }
  0x40   :  { %825 = vmatpush1.bf16.msra.mxu0 %v3258_v4 }
  0x41   :  { %868 = vmatpush1.bf16.msra.mxu1 %v3265_v5  ;;  %982 = vmatprep.subr.bf16.mxu0 %v3061_v33 }
  0x42   :  { %387 = vmatmul.mubr.bf16.gmra.mrb[16].mxu0 %v2604_v6  ;;  %500 = vmatmul.mubr.bf16.gmra.mrb[16].mxu1 %v2604_v6 }
  0x43   :  { %396 = vmatprep.mubr.bf16.mxu0 %v2924_v1  ;;  %509 = vmatprep.mubr.bf16.mxu1 %v2924_v1 }
  0x44   :  { %1025 = vmatprep.subr.bf16.mxu1 %v3066_v34 }
  0x4a   :  { %397 = vmatmul.mubr.bf16.gmra.mrb[20].mxu0 %v2611_v7  ;;  %510 = vmatmul.mubr.bf16.gmra.mrb[20].mxu1 %v2611_v7 }
  0x4b   :  { %406 = vmatprep.mubr.bf16.mxu0 %v2924_v1  ;;  %519 = vmatprep.mubr.bf16.mxu1 %v2924_v1 }
  0x52   :  { %407 = vmatmul.mubr.bf16.gmra.mrb[24].mxu0 %v2618_v8  ;;  %520 = vmatmul.mubr.bf16.gmra.mrb[24].mxu1 %v2618_v8  ;;  %v3345_v8 = vrot.slane %v84_v16, %v96_v30 }
  0x53   :  { %416 = vmatprep.mubr.bf16.mxu0 %v2924_v1  ;;  %529 = vmatprep.mubr.bf16.mxu1 %v2924_v1 }
  0x5a   :  { %417 = vmatmul.mubr.bf16.gmra.mrb[28].mxu0 %v2626_v9  ;;  %530 = vmatmul.mubr.bf16.gmra.mrb[28].mxu1 %v2626_v9 }
  0x5b   :  { %842 = vmatprep.mubr.bf16.mxu0 %v2924_v1  ;;  %885 = vmatprep.mubr.bf16.mxu1 %v2924_v1 }
  0x62   :  { %843 = vmatmul.mubr.bf16.vlgmr.msra.gmra.mrb[0].mxu0 %v649_v12  ;;  %886 = vmatmul.mubr.bf16.vlgmr.msra.gmra.mrb[0].mxu1 %v649_v12 }
  0x63   :  { %983 = vmatpush1.bf16.msra.mxu0 %v3074_v36  ;;  %1026 = vmatpush1.bf16.msra.mxu1 %v3086_v38 }
  0x64   :  { %984 = vmatprep.subr.bf16.mxu0 %v3080_v37  ;;  %1027 = vmatprep.subr.bf16.mxu1 %v3091_v39 }
  0x65   :  { %1014 = vmatprep.mubr.bf16.mxu0 %v2924_v1  ;;  %1057 = vmatprep.mubr.bf16.mxu1 %v2924_v1 }
  0x67   :  { %985 = vmatpush1.bf16.msra.mxu0 %v3098_v40  ;;  %1028 = vmatpush1.bf16.msra.mxu1 %v3111_v42 }
  0x68   :  { %986 = vmatprep.subr.bf16.mxu0 %v3105_v41  ;;  %1029 = vmatprep.subr.bf16.mxu1 %v3132_v46 }
  0x6b   :  { %987 = vmatpush1.bf16.msra.mxu0 %v3121_v44  ;;  %1030 = vmatpush1.bf16.msra.mxu1 %v3138_v47 }
  0x6c   :  { %988 = vmatprep.subr.bf16.mxu0 %v3126_v45  ;;  %1031 = vmatprep.subr.bf16.mxu1 %v3143_v48 }
  0x6f   :  { %989 = vmatpush1.bf16.msra.mxu0 %v3151_v49  ;;  %1032 = vmatpush1.bf16.msra.mxu1 %v3164_v51 }
  0x70   :  { %990 = vmatprep.subr.bf16.mxu0 %v3157_v50  ;;  %1033 = vmatprep.subr.bf16.mxu1 %v3179_v54 }
  0x73   :  { %991 = vmatpush1.bf16.msra.mxu0 %v3173_v53  ;;  %1034 = vmatpush1.bf16.msra.mxu1 %v3191_v56 }
  0x74   :  { %992 = vmatprep.subr.bf16.mxu0 %v3185_v55  ;;  %1035 = vmatprep.subr.bf16.mxu1 %v3196_v57 }
  0x77   :  { %993 = vmatpush1.bf16.msra.mxu0 %v3204_v58  ;;  %1036 = vmatpush1.bf16.msra.mxu1 %v3217_v60 }
  0x78   :  { %994 = vmatprep.subr.bf16.mxu0 %v3211_v59  ;;  %1037 = vmatprep.subr.bf16.mxu1 %v3232_v63 }
  0x7b   :  { %995 = vmatpush1.bf16.msra.mxu0 %v3227_v62  ;;  %1038 = vmatpush1.bf16.msra.mxu1 %v3244_v2 }
  0x7c   :  { %996 = vmatprep.subr.bf16.mxu0 %v3239_v0  ;;  %1039 = vmatprep.subr.bf16.mxu1 %v3249_v3 }
  0x7f   :  { %997 = vmatpush1.bf16.msra.mxu0 %v3258_v4  ;;  %1040 = vmatpush1.bf16.msra.mxu1 %v3265_v5 }
  0x80   :  { %1155 = vmatprep.subr.bf16.mxu0 %v3061_v33  ;;  %1198 = vmatprep.subr.bf16.mxu1 %v3066_v34 }
 0x135   :  { %v844_v20 = vpop.f32.mrb[0].mxu0  ;;  %v887_v21 = vpop.f32.mrb[0].mxu1 }
 0x136   :  { %v2403_v23 = vadd.f32 %v844_v20, %v3335_v18  ;;  %v846_v24 = vpop.f32.mrb[1].mxu0  ;;  %v889_v25 = vpop.f32.mrb[1].mxu1  ;;  %v2435_v10 = vadd.f32 %v887_v21, %v3345_v8 }
 0x137   :  { %v2404_v26 = vadd.f32 %v846_v24, %v3337_v19  ;;  %v848_v27 = vpop.f32.mrb[2].mxu0  ;;  %v891_v28 = vpop.f32.mrb[2].mxu1  ;;  %v2436_v9 = vadd.f32 %v889_v25, %v3342_v52 }
 0x138   :  { %v2262_v29 = vmul.f32 -1.442695, %v2403_v23  ;;  %v2405_v31 = vadd.f32 %v848_v27, %v3335_v18  ;;  %v850_v32 = vpop.f32.mrb[3].mxu0  ;;  %v893_v35 = vpop.f32.mrb[3].mxu1  ;;  %v2437_v13 = vadd.f32 %v891_v28, %v3345_v8  ;;  %v32_v28 = vld [vmem:[%s3860_s5] sm:$0xff] }
 0x139   :  { %v2264_v43 = vmul.f32 -1.442695, %v2404_v26  ;;  %v2406_v61 = vadd.f32 %v850_v32, %v3337_v19  ;;  %v2266_v11 = vmul.f32 -1.442695, %v2436_v9  ;;  %v2438_v12 = vadd.f32 %v893_v35, %v3342_v52 }
 0x13a   :  { %2636 = vpow2.f32 %v2262_v29  ;;  %v2263_v6 = vmul.f32 -1.442695, %v2405_v31 }
 0x13b   :  { %2638 = vpow2.f32 %v2264_v43  ;;  %v2265_v7 = vmul.f32 -1.442695, %v2406_v61  ;;  %v2267_v20 = vmul.f32 -1.442695, %v2438_v12 }
 0x13c   :  { %2640 = vpow2.f32 %v2263_v6  ;;  %v33_v6 = vld [vmem:[%s3860_s5 + $0x8] sm:$0xff] }
 0x13d   :  { %2642 = vpow2.f32 %v2265_v7 }
 0x13e   :  { %2644 = vtanh.f32 %v2435_v10 }
 0x13f   :  { %2646 = vpow2.f32 %v2266_v11 }
 0x140   :  { %2648 = vtanh.f32 %v2437_v13 }
 0x144   :  { %v2637_v14 = vpop.eup %2636 }
 0x145   :  { %v2639_v15 = vpop.eup %2638  ;;  %v912_v17 = vadd.f32 1.0, %v2637_v14 }
 0x146   :  { %v924_v22 = vadd.f32 1.0, %v2639_v15  ;;  %v2641_v16 = vpop.eup %2640 }
 0x147   :  { %2650 = vrcp.f32 %v912_v17  ;;  %v913_v23 = vadd.f32 1.0, %v2641_v16  ;;  %v2643_v24 = vpop.eup %2642 }
 0x148   :  { %2652 = vrcp.f32 %v924_v22  ;;  %v925_v21 = vadd.f32 1.0, %v2643_v24  ;;  %v2645_v25 = vpop.eup %2644 }
 0x149   :  { %2654 = vpow2.f32 %v2267_v20  ;;  %v2647_v26 = vpop.eup %2646 }
 0x14a   :  { %2656 = vrcp.f32 %v913_v23  ;;  %v2649_v27 = vpop.eup %2648  ;;  %v938_v61 = vadd.f32 1.0, %v2647_v26 }
 0x14b   :  { %2658 = vrcp.f32 %v925_v21 }
 0x14c   :  { %2660 = vrcp.f32 %v938_v61 }
 0x151   :  { %v2651_v29 = vpop.eup %2650 }
 0x152   :  { %v2653_v30 = vpop.eup %2652  ;;  %v946_v31 = vmul.f32 %v2651_v29, %v2645_v25 }
 0x153   :  { %v2655_v32 = vpop.eup %2654  ;;  %v944_v35 = vmul.f32 %v2653_v30, %v32_v28 }
 0x154   :  { %v2657_v43 = vpop.eup %2656  ;;  %v939_v11 = vadd.f32 1.0, %v2655_v32 }
 0x155   :  { %v3357_v7 = vadd.f32 %v946_v31, %v944_v35  ;;  %v947_v9 = vmul.f32 %v2657_v43, %v2649_v27  ;;  %v2659_v10 = vpop.eup %2658 }
 0x156   :  { %v945_v12 = vmul.f32 %v2659_v10, %v33_v6  ;;  %v2661_v14 = vpop.eup %2660 }
 0x157   :  { %2662 = vtanh.f32 %v3357_v7 }
 0x158   :  { %v3360_v13 = vadd.f32 %v947_v9, %v945_v12  ;;  %2664 = vrcp.f32 %v939_v11 }
 0x15a   :  { %2666 = vtanh.f32 %v3360_v13 }
 0x161   :  { %v2663_v15 = vpop.eup %2662 }
 0x162   :  { %v2665_v17 = vpop.eup %2664  ;;  %v952_v22 = vmul.f32 %v2663_v15, %v2661_v14 }
 0x164   :  { %v2667_v20 = vpop.eup %2666 }
 0x165   :  { %v953_v16 = vmul.f32 %v2667_v20, %v2665_v17 }
 0x167   :  { %v2359_v23 = vpack.c.bf16 %v953_v16, %v952_v22 }
 0x169   :  { %2360 = vst [vmem:[%s3861_s6] sm:$0xff] %v2359_v23   ;;  %1015 = vmatmul.mubr.bf16.vlgmr.msra.gmra.mrb[4].mxu0 %v2359_v23  ;;  %1058 = vmatmul.mubr.bf16.vlgmr.msra.gmra.mrb[4].mxu1 %v2359_v23 }
 0x16a   :  { %1156 = vmatpush1.bf16.msra.mxu0 %v3074_v36  ;;  %1199 = vmatpush1.bf16.msra.mxu1 %v3086_v38 }
 0x16b   :  { %1157 = vmatprep.subr.bf16.mxu0 %v3080_v37  ;;  %1200 = vmatprep.subr.bf16.mxu1 %v3091_v39 }
 0x16c   :  { %1187 = vmatprep.mubr.bf16.mxu0 %v2924_v1  ;;  %1230 = vmatprep.mubr.bf16.mxu1 %v2924_v1 }
 0x16e   :  { %1158 = vmatpush1.bf16.msra.mxu0 %v3098_v40  ;;  %1201 = vmatpush1.bf16.msra.mxu1 %v3111_v42 }
 0x16f   :  { %1159 = vmatprep.subr.bf16.mxu0 %v3105_v41  ;;  %1202 = vmatprep.subr.bf16.mxu1 %v3132_v46 }
 0x172   :  { %1160 = vmatpush1.bf16.msra.mxu0 %v3121_v44  ;;  %1203 = vmatpush1.bf16.msra.mxu1 %v3138_v47 }
 0x173   :  { %1161 = vmatprep.subr.bf16.mxu0 %v3126_v45  ;;  %1204 = vmatprep.subr.bf16.mxu1 %v3143_v48 }
 0x176   :  { %1162 = vmatpush1.bf16.msra.mxu0 %v3151_v49  ;;  %1205 = vmatpush1.bf16.msra.mxu1 %v3164_v51 }
 0x177   :  { %1163 = vmatprep.subr.bf16.mxu0 %v3157_v50  ;;  %1206 = vmatprep.subr.bf16.mxu1 %v3179_v54 }
 0x17a   :  { %1164 = vmatpush1.bf16.msra.mxu0 %v3173_v53  ;;  %1207 = vmatpush1.bf16.msra.mxu1 %v3191_v56 }
 0x17b   :  { %1165 = vmatprep.subr.bf16.mxu0 %v3185_v55  ;;  %1208 = vmatprep.subr.bf16.mxu1 %v3196_v57 }
 0x17e   :  { %1166 = vmatpush1.bf16.msra.mxu0 %v3204_v58  ;;  %1209 = vmatpush1.bf16.msra.mxu1 %v3217_v60 }
 0x17f   :  { %1167 = vmatprep.subr.bf16.mxu0 %v3211_v59  ;;  %1210 = vmatprep.subr.bf16.mxu1 %v3232_v63 }
 0x182   :  { %1168 = vmatpush1.bf16.msra.mxu0 %v3227_v62  ;;  %1211 = vmatpush1.bf16.msra.mxu1 %v3244_v2 }
 0x183   :  { %1169 = vmatprep.subr.bf16.mxu0 %v3239_v0  ;;  %1212 = vmatprep.subr.bf16.mxu1 %v3249_v3 }
 0x186   :  { %1170 = vmatpush1.bf16.msra.mxu0 %v3258_v4  ;;  %1213 = vmatpush1.bf16.msra.mxu1 %v3265_v5 }
 0x187   :  { %1328 = vmatprep.subr.bf16.mxu0 %v3061_v33  ;;  %1371 = vmatprep.subr.bf16.mxu1 %v3066_v34 }
 0x23c   :  { %v1016_v24 = vpop.f32.mrb[4].mxu0  ;;  %v1059_v21 = vpop.f32.mrb[4].mxu1 }
 0x23d   :  { %v2407_v25 = vadd.f32 %v1016_v24, %v3335_v18  ;;  %v1018_v26 = vpop.f32.mrb[5].mxu0  ;;  %v1061_v27 = vpop.f32.mrb[5].mxu1  ;;  %v2439_v12 = vadd.f32 %v1059_v21, %v3345_v8 }
 0x23e   :  { %v2408_v28 = vadd.f32 %v1018_v26, %v3337_v19  ;;  %v1020_v29 = vpop.f32.mrb[6].mxu0  ;;  %v1063_v30 = vpop.f32.mrb[6].mxu1  ;;  %v2440_v11 = vadd.f32 %v1061_v27, %v3342_v52 }
 0x23f   :  { %v2270_v31 = vmul.f32 -1.442695, %v2407_v25  ;;  %v2409_v32 = vadd.f32 %v1020_v29, %v3335_v18  ;;  %v1022_v35 = vpop.f32.mrb[7].mxu0  ;;  %v1065_v43 = vpop.f32.mrb[7].mxu1  ;;  %v2441_v17 = vadd.f32 %v1063_v30, %v3345_v8 }
 0x240   :  { %v2272_v61 = vmul.f32 -1.442695, %v2408_v28  ;;  %v2410_v6 = vadd.f32 %v1022_v35, %v3337_v19  ;;  %v2274_v14 = vmul.f32 -1.442695, %v2440_v11  ;;  %v2442_v15 = vadd.f32 %v1065_v43, %v3342_v52 }
 0x241   :  { %2668 = vpow2.f32 %v2270_v31  ;;  %v2271_v9 = vmul.f32 -1.442695, %v2409_v32 }
 0x242   :  { %2670 = vpow2.f32 %v2272_v61  ;;  %v2273_v10 = vmul.f32 -1.442695, %v2410_v6  ;;  %v2275_v23 = vmul.f32 -1.442695, %v2442_v15 }
 0x243   :  { %2672 = vpow2.f32 %v2271_v9 }
 0x244   :  { %2674 = vpow2.f32 %v2273_v10 }
 0x245   :  { %2676 = vtanh.f32 %v2439_v12 }
 0x246   :  { %2678 = vpow2.f32 %v2274_v14 }
 0x247   :  { %2680 = vtanh.f32 %v2441_v17 }
 0x24b   :  { %v2669_v20 = vpop.eup %2668 }
 0x24c   :  { %v2671_v22 = vpop.eup %2670  ;;  %v1084_v16 = vadd.f32 1.0, %v2669_v20 }
 0x24d   :  { %v1096_v24 = vadd.f32 1.0, %v2671_v22  ;;  %v2673_v25 = vpop.eup %2672 }
 0x24e   :  { %2682 = vrcp.f32 %v1084_v16  ;;  %v1085_v26 = vadd.f32 1.0, %v2673_v25  ;;  %v2675_v27 = vpop.eup %2674 }
 0x24f   :  { %2684 = vrcp.f32 %v1096_v24  ;;  %v1097_v21 = vadd.f32 1.0, %v2675_v27  ;;  %v2677_v28 = vpop.eup %2676 }
 0x250   :  { %2686 = vpow2.f32 %v2275_v23  ;;  %v2679_v29 = vpop.eup %2678 }
 0x251   :  { %2688 = vrcp.f32 %v1085_v26  ;;  %v2681_v30 = vpop.eup %2680  ;;  %v1110_v9 = vadd.f32 1.0, %v2679_v29 }
 0x252   :  { %2690 = vrcp.f32 %v1097_v21 }
 0x253   :  { %2692 = vrcp.f32 %v1110_v9 }
 0x258   :  { %v2683_v31 = vpop.eup %2682 }
 0x259   :  { %v2685_v32 = vpop.eup %2684  ;;  %v1118_v35 = vmul.f32 %v2683_v31, %v2677_v28 }
 0x25a   :  { %v2687_v43 = vpop.eup %2686  ;;  %v1116_v61 = vmul.f32 %v2685_v32, %v3357_v7 }
 0x25b   :  { %v2689_v6 = vpop.eup %2688  ;;  %v1111_v14 = vadd.f32 1.0, %v2687_v43 }
 0x25c   :  { %v3409_v10 = vadd.f32 %v1118_v35, %v1116_v61  ;;  %v1119_v11 = vmul.f32 %v2689_v6, %v2681_v30  ;;  %v2691_v12 = vpop.eup %2690 }
 0x25d   :  { %v1117_v15 = vmul.f32 %v2691_v12, %v3360_v13  ;;  %v2693_v20 = vpop.eup %2692 }
 0x25e   :  { %2694 = vtanh.f32 %v3409_v10 }
 0x25f   :  { %v3413_v17 = vadd.f32 %v1119_v11, %v1117_v15  ;;  %2696 = vrcp.f32 %v1111_v14 }
 0x261   :  { %2698 = vtanh.f32 %v3413_v17 }
 0x268   :  { %v2695_v22 = vpop.eup %2694 }
 0x269   :  { %v2697_v7 = vpop.eup %2696  ;;  %v1124_v23 = vmul.f32 %v2695_v22, %v2693_v20 }
 0x26b   :  { %v2699_v16 = vpop.eup %2698 }
 0x26c   :  { %v1125_v24 = vmul.f32 %v2699_v16, %v2697_v7 }
 0x26e   :  { %v2364_v25 = vpack.c.bf16 %v1125_v24, %v1124_v23 }
 0x270   :  { %2396 = vst [vmem:[%s3861_s6 + $0x8] sm:$0xff] %v2364_v25   ;;  %1188 = vmatmul.mubr.bf16.vlgmr.msra.gmra.mrb[8].mxu0 %v2364_v25  ;;  %1231 = vmatmul.mubr.bf16.vlgmr.msra.gmra.mrb[8].mxu1 %v2364_v25 }
 0x271   :  { %1329 = vmatpush1.bf16.msra.mxu0 %v3074_v36  ;;  %1372 = vmatpush1.bf16.msra.mxu1 %v3086_v38 }
 0x272   :  { %1330 = vmatprep.subr.bf16.mxu0 %v3080_v37  ;;  %1373 = vmatprep.subr.bf16.mxu1 %v3091_v39 }
 0x273   :  { %1360 = vmatprep.mubr.bf16.mxu0 %v2924_v1  ;;  %1403 = vmatprep.mubr.bf16.mxu1 %v2924_v1 }
 0x275   :  { %1331 = vmatpush1.bf16.msra.mxu0 %v3098_v40  ;;  %1374 = vmatpush1.bf16.msra.mxu1 %v3111_v42 }
 0x276   :  { %1332 = vmatprep.subr.bf16.mxu0 %v3105_v41  ;;  %1375 = vmatprep.subr.bf16.mxu1 %v3132_v46 }
 0x279   :  { %1333 = vmatpush1.bf16.msra.mxu0 %v3121_v44  ;;  %1376 = vmatpush1.bf16.msra.mxu1 %v3138_v47 }
 0x27a   :  { %1334 = vmatprep.subr.bf16.mxu0 %v3126_v45  ;;  %1377 = vmatprep.subr.bf16.mxu1 %v3143_v48 }
 0x27d   :  { %1335 = vmatpush1.bf16.msra.mxu0 %v3151_v49  ;;  %1378 = vmatpush1.bf16.msra.mxu1 %v3164_v51 }
 0x27e   :  { %1336 = vmatprep.subr.bf16.mxu0 %v3157_v50  ;;  %1379 = vmatprep.subr.bf16.mxu1 %v3179_v54 }
 0x281   :  { %1337 = vmatpush1.bf16.msra.mxu0 %v3173_v53  ;;  %1380 = vmatpush1.bf16.msra.mxu1 %v3191_v56 }
 0x282   :  { %1338 = vmatprep.subr.bf16.mxu0 %v3185_v55  ;;  %1381 = vmatprep.subr.bf16.mxu1 %v3196_v57 }
 0x285   :  { %1339 = vmatpush1.bf16.msra.mxu0 %v3204_v58  ;;  %1382 = vmatpush1.bf16.msra.mxu1 %v3217_v60 }
 0x286   :  { %1340 = vmatprep.subr.bf16.mxu0 %v3211_v59  ;;  %1383 = vmatprep.subr.bf16.mxu1 %v3232_v63 }
 0x289   :  { %1341 = vmatpush1.bf16.msra.mxu0 %v3227_v62  ;;  %1384 = vmatpush1.bf16.msra.mxu1 %v3244_v2 }
 0x28a   :  { %1342 = vmatprep.subr.bf16.mxu0 %v3239_v0  ;;  %1385 = vmatprep.subr.bf16.mxu1 %v3249_v3 }
 0x28d   :  { %1343 = vmatpush1.bf16.msra.mxu0 %v3258_v4  ;;  %1386 = vmatpush1.bf16.msra.mxu1 %v3265_v5 }
 0x28e   :  { %1501 = vmatprep.subr.bf16.mxu0 %v3061_v33  ;;  %1544 = vmatprep.subr.bf16.mxu1 %v3066_v34 }
 0x343   :  { %v1189_v13 = vpop.f32.mrb[8].mxu0  ;;  %v1232_v26 = vpop.f32.mrb[8].mxu1 }
 0x344   :  { %v2411_v27 = vadd.f32 %v1189_v13, %v3335_v18  ;;  %v1191_v21 = vpop.f32.mrb[9].mxu0  ;;  %v1234_v28 = vpop.f32.mrb[9].mxu1  ;;  %v2443_v12 = vadd.f32 %v1232_v26, %v3345_v8 }
 0x345   :  { %v2412_v29 = vadd.f32 %v1191_v21, %v3337_v19  ;;  %v1193_v30 = vpop.f32.mrb[10].mxu0  ;;  %v1236_v31 = vpop.f32.mrb[10].mxu1  ;;  %v2444_v11 = vadd.f32 %v1234_v28, %v3342_v52 }
 0x346   :  { %v2280_v32 = vmul.f32 -1.442695, %v2411_v27  ;;  %v2413_v35 = vadd.f32 %v1193_v30, %v3335_v18  ;;  %v1195_v43 = vpop.f32.mrb[11].mxu0  ;;  %v1238_v61 = vpop.f32.mrb[11].mxu1  ;;  %v2445_v20 = vadd.f32 %v1236_v31, %v3345_v8 }
 0x347   :  { %v2282_v6 = vmul.f32 -1.442695, %v2412_v29  ;;  %v2414_v33 = vadd.f32 %v1195_v43, %v3337_v19  ;;  %v2284_v14 = vmul.f32 -1.442695, %v2444_v11  ;;  %v2446_v15 = vadd.f32 %v1238_v61, %v3342_v52 }
 0x348   :  { %2700 = vpow2.f32 %v2280_v32  ;;  %v2281_v34 = vmul.f32 -1.442695, %v2413_v35 }
 0x349   :  { %2702 = vpow2.f32 %v2282_v6  ;;  %v2283_v9 = vmul.f32 -1.442695, %v2414_v33  ;;  %v2285_v23 = vmul.f32 -1.442695, %v2446_v15 }
 0x34a   :  { %2704 = vpow2.f32 %v2281_v34 }
 0x34b   :  { %2706 = vpow2.f32 %v2283_v9 }
 0x34c   :  { %2708 = vtanh.f32 %v2443_v12 }
 0x34d   :  { %2710 = vpow2.f32 %v2284_v14 }
 0x34e   :  { %2712 = vtanh.f32 %v2445_v20 }
 0x352   :  { %v2701_v22 = vpop.eup %2700 }
 0x353   :  { %v2703_v7 = vpop.eup %2702  ;;  %v1257_v16 = vadd.f32 1.0, %v2701_v22 }
 0x354   :  { %v1269_v24 = vadd.f32 1.0, %v2703_v7  ;;  %v2705_v25 = vpop.eup %2704 }
 0x355   :  { %2714 = vrcp.f32 %v1257_v16  ;;  %v1258_v13 = vadd.f32 1.0, %v2705_v25  ;;  %v2707_v27 = vpop.eup %2706 }
 0x356   :  { %2716 = vrcp.f32 %v1269_v24  ;;  %v1270_v26 = vadd.f32 1.0, %v2707_v27  ;;  %v2709_v21 = vpop.eup %2708 }
 0x357   :  { %2718 = vpow2.f32 %v2285_v23  ;;  %v2711_v28 = vpop.eup %2710 }
 0x358   :  { %2720 = vrcp.f32 %v1258_v13  ;;  %v2713_v29 = vpop.eup %2712  ;;  %v1283_v6 = vadd.f32 1.0, %v2711_v28 }
 0x359   :  { %2722 = vrcp.f32 %v1270_v26 }
 0x35a   :  { %2724 = vrcp.f32 %v1283_v6 }
 0x35f   :  { %v2715_v30 = vpop.eup %2714 }
 0x360   :  { %v2717_v31 = vpop.eup %2716  ;;  %v1291_v32 = vmul.f32 %v2715_v30, %v2709_v21 }
 0x361   :  { %v2719_v35 = vpop.eup %2718  ;;  %v1289_v43 = vmul.f32 %v2717_v31, %v3409_v10 }
 0x362   :  { %v2721_v61 = vpop.eup %2720  ;;  %v1284_v11 = vadd.f32 1.0, %v2719_v35 }
 0x363   :  { %v3462_v33 = vadd.f32 %v1291_v32, %v1289_v43  ;;  %v1292_v34 = vmul.f32 %v2721_v61, %v2713_v29  ;;  %v2723_v9 = vpop.eup %2722 }
 0x364   :  { %v1290_v12 = vmul.f32 %v2723_v9, %v3413_v17  ;;  %v2725_v15 = vpop.eup %2724 }
 0x365   :  { %2726 = vtanh.f32 %v3462_v33 }
 0x366   :  { %v3466_v14 = vadd.f32 %v1292_v34, %v1290_v12  ;;  %2728 = vrcp.f32 %v1284_v11 }
 0x368   :  { %2730 = vtanh.f32 %v3466_v14 }
 0x36f   :  { %v2727_v20 = vpop.eup %2726 }
 0x370   :  { %v2729_v10 = vpop.eup %2728  ;;  %v1297_v7 = vmul.f32 %v2727_v20, %v2725_v15 }
 0x372   :  { %v2731_v22 = vpop.eup %2730 }
 0x373   :  { %v1298_v16 = vmul.f32 %v2731_v22, %v2729_v10 }
 0x375   :  { %v2369_v23 = vpack.c.bf16 %v1298_v16, %v1297_v7 }
 0x377   :  { %2397 = vst [vmem:[%s3861_s6 + $0x10] sm:$0xff] %v2369_v23   ;;  %1361 = vmatmul.mubr.bf16.vlgmr.msra.gmra.mrb[12].mxu0 %v2369_v23  ;;  %1404 = vmatmul.mubr.bf16.vlgmr.msra.gmra.mrb[12].mxu1 %v2369_v23 }
 0x378   :  { %1502 = vmatpush1.bf16.msra.mxu0 %v3074_v36  ;;  %1545 = vmatpush1.bf16.msra.mxu1 %v3086_v38  ;;  %v3507_v36 = vld [vmem:[%s3857_s2 + $0x4] ss:$16 sps:$4 sm:$0xff]  }
 0x379   :  { %1503 = vmatprep.subr.bf16.mxu0 %v3080_v37  ;;  %1546 = vmatprep.subr.bf16.mxu1 %v3091_v39  ;;  %v3513_v37 = vld [vmem:[%s3857_s2 + $0xc] ss:$16 sps:$4 sm:$0xff]  }
 0x37a   :  { %1533 = vmatprep.mubr.bf16.mxu0 %v2924_v1  ;;  %1576 = vmatprep.mubr.bf16.mxu1 %v2924_v1 }
 0x37c   :  { %1504 = vmatpush1.bf16.msra.mxu0 %v3098_v40  ;;  %1547 = vmatpush1.bf16.msra.mxu1 %v3111_v42 }
 0x37d   :  { %1505 = vmatprep.subr.bf16.mxu0 %v3105_v41  ;;  %1548 = vmatprep.subr.bf16.mxu1 %v3132_v46 }
 0x380   :  { %1506 = vmatpush1.bf16.msra.mxu0 %v3121_v44  ;;  %1549 = vmatpush1.bf16.msra.mxu1 %v3138_v47 }
 0x381   :  { %1507 = vmatprep.subr.bf16.mxu0 %v3126_v45  ;;  %1550 = vmatprep.subr.bf16.mxu1 %v3143_v48 }
 0x384   :  { %1508 = vmatpush1.bf16.msra.mxu0 %v3151_v49  ;;  %1551 = vmatpush1.bf16.msra.mxu1 %v3164_v51 }
 0x385   :  { %1509 = vmatprep.subr.bf16.mxu0 %v3157_v50  ;;  %1552 = vmatprep.subr.bf16.mxu1 %v3179_v54 }
 0x388   :  { %1510 = vmatpush1.bf16.msra.mxu0 %v3173_v53  ;;  %1553 = vmatpush1.bf16.msra.mxu1 %v3191_v56 }
 0x389   :  { %1511 = vmatprep.subr.bf16.mxu0 %v3185_v55  ;;  %1554 = vmatprep.subr.bf16.mxu1 %v3196_v57 }
 0x38c   :  { %1512 = vmatpush1.bf16.msra.mxu0 %v3204_v58  ;;  %1555 = vmatpush1.bf16.msra.mxu1 %v3217_v60 }
 0x38d   :  { %1513 = vmatprep.subr.bf16.mxu0 %v3211_v59  ;;  %1556 = vmatprep.subr.bf16.mxu1 %v3232_v63 }
 0x390   :  { %1514 = vmatpush1.bf16.msra.mxu0 %v3227_v62  ;;  %1557 = vmatpush1.bf16.msra.mxu1 %v3244_v2 }
 0x391   :  { %1515 = vmatprep.subr.bf16.mxu0 %v3239_v0  ;;  %1558 = vmatprep.subr.bf16.mxu1 %v3249_v3 }
 0x394   :  { %1516 = vmatpush1.bf16.msra.mxu0 %v3258_v4  ;;  %1559 = vmatpush1.bf16.msra.mxu1 %v3265_v5 }
 0x395   :  { %1674 = vmatprep.subr.bf16.mxu0 %v3507_v36  ;;  %1717 = vmatprep.subr.bf16.mxu1 %v3513_v37 }
 0x44a   :  { %v1362_v38 = vpop.f32.mrb[12].mxu0  ;;  %v1405_v39 = vpop.f32.mrb[12].mxu1 }
 0x44b   :  { %v2415_v40 = vadd.f32 %v1362_v38, %v3335_v18  ;;  %v1364_v41 = vpop.f32.mrb[13].mxu0  ;;  %v1407_v42 = vpop.f32.mrb[13].mxu1  ;;  %v2447_v57 = vadd.f32 %v1405_v39, %v3345_v8  ;;  %v3544_v39 = vld [vmem:[%s3857_s2 + $0x8] ss:$16 sps:$4 sm:$0xff]  }
 0x44c   :  { %v2416_v44 = vadd.f32 %v1364_v41, %v3337_v19  ;;  %v1366_v45 = vpop.f32.mrb[14].mxu0  ;;  %v1409_v46 = vpop.f32.mrb[14].mxu1  ;;  %v2448_v56 = vadd.f32 %v1407_v42, %v3342_v52  ;;  %v3556_v41 = vld [vmem:[%s3857_s2 + $0x2c] ss:$16 sps:$4 sm:$0xff]   ;;  %v3564_v42 = vld [vmem:[%s3857_s2 + $0x20] ss:$16 sps:$4 sm:$0xff]  }
 0x44d   :  { %v2290_v47 = vmul.f32 -1.442695, %v2415_v40  ;;  %v2417_v48 = vadd.f32 %v1366_v45, %v3335_v18  ;;  %v1368_v49 = vpop.f32.mrb[15].mxu0  ;;  %v1411_v50 = vpop.f32.mrb[15].mxu1  ;;  %v2449_v60 = vadd.f32 %v1409_v46, %v3345_v8  ;;  %v3550_v40 = vld [vmem:[%s3857_s2 + $0x24] ss:$16 sps:$4 sm:$0xff]  }
 0x44e   :  { %v2292_v51 = vmul.f32 -1.442695, %v2416_v44  ;;  %v2418_v53 = vadd.f32 %v1368_v49, %v3337_v19  ;;  %v2294_v58 = vmul.f32 -1.442695, %v2448_v56  ;;  %v2450_v59 = vadd.f32 %v1411_v50, %v3342_v52  ;;  %v3570_v44 = vld [vmem:[%s3857_s2 + $0x28] ss:$16 sps:$4 sm:$0xff]  }
 0x44f   :  { %2732 = vpow2.f32 %v2290_v47  ;;  %v2291_v54 = vmul.f32 -1.442695, %v2417_v48  ;;  %v3576_v45 = vld [vmem:[%s3857_s2 + $0x44] ss:$16 sps:$4 sm:$0xff]   ;;  %v3582_v46 = vld [vmem:[%s3857_s2 + $0x4c] ss:$16 sps:$4 sm:$0xff]  }
 0x450   :  { %2734 = vpow2.f32 %v2292_v51  ;;  %v2293_v55 = vmul.f32 -1.442695, %v2418_v53  ;;  %v2295_v17 = vmul.f32 -1.442695, %v2450_v59  ;;  %v3588_v47 = vld [vmem:[%s3857_s2 + $0x40] ss:$16 sps:$4 sm:$0xff]  }
 0x451   :  { %2736 = vpow2.f32 %v2291_v54  ;;  %v3594_v48 = vld [vmem:[%s3857_s2 + $0x48] ss:$16 sps:$4 sm:$0xff]   ;;  %v3600_v49 = vld [vmem:[%s3857_s2 + $0x64] ss:$16 sps:$4 sm:$0xff]   ;;  %v3606_v50 = vld [vmem:[%s3857_s2 + $0x6c] ss:$16 sps:$4 sm:$0xff]  }
 0x452   :  { %2738 = vpow2.f32 %v2293_v55  ;;  %v3612_v51 = vld [vmem:[%s3857_s2 + $0x60] ss:$16 sps:$4 sm:$0xff]   ;;  %v3618_v53 = vld [vmem:[%s3857_s2 + $0x68] ss:$16 sps:$4 sm:$0xff]   ;;  %v3624_v54 = vld [vmem:[%s3857_s2 + $0x84] ss:$16 sps:$4 sm:$0xff]  }
 0x453   :  { %2740 = vtanh.f32 %v2447_v57  ;;  %v3630_v55 = vld [vmem:[%s3857_s2 + $0x8c] ss:$16 sps:$4 sm:$0xff]   ;;  %v3636_v56 = vld [vmem:[%s3857_s2 + $0x80] ss:$16 sps:$4 sm:$0xff]   ;;  %v3642_v57 = vld [vmem:[%s3857_s2 + $0x88] ss:$16 sps:$4 sm:$0xff]  }
 0x454   :  { %2742 = vpow2.f32 %v2294_v58  ;;  %v3648_v58 = vld [vmem:[%s3857_s2 + $0xa4] ss:$16 sps:$4 sm:$0xff]   ;;  %v3654_v59 = vld [vmem:[%s3857_s2 + $0xac] ss:$16 sps:$4 sm:$0xff]  }
 0x455   :  { %2744 = vtanh.f32 %v2449_v60  ;;  %v3660_v60 = vld [vmem:[%s3857_s2 + $0xa0] ss:$16 sps:$4 sm:$0xff]  }
 0x459   :  { %v2733_v62 = vpop.eup %2732 }
 0x45a   :  { %v2735_v63 = vpop.eup %2734  ;;  %v1430_v0 = vadd.f32 1.0, %v2733_v62  ;;  %v3666_v62 = vld [vmem:[%s3857_s2 + $0xa8] ss:$16 sps:$4 sm:$0xff]  }
 0x45b   :  { %v1442_v24 = vadd.f32 1.0, %v2735_v63  ;;  %v2737_v25 = vpop.eup %2736  ;;  %v3672_v63 = vld [vmem:[%s3857_s2 + $0xc4] ss:$16 sps:$4 sm:$0xff]  }
 0x45c   :  { %2746 = vrcp.f32 %v1430_v0  ;;  %v1431_v13 = vadd.f32 1.0, %v2737_v25  ;;  %v2739_v27 = vpop.eup %2738  ;;  %v3678_v0 = vld [vmem:[%s3857_s2 + $0xcc] ss:$16 sps:$4 sm:$0xff]  }
 0x45d   :  { %2748 = vrcp.f32 %v1442_v24  ;;  %v1443_v26 = vadd.f32 1.0, %v2739_v27  ;;  %v2741_v21 = vpop.eup %2740  ;;  %v3691_v24 = vld [vmem:[%s3857_s2 + $0xe4] ss:$16 sps:$4 sm:$0xff]  }
 0x45e   :  { %2750 = vpow2.f32 %v2295_v17  ;;  %v2743_v28 = vpop.eup %2742  ;;  %v3684_v17 = vld [vmem:[%s3857_s2 + $0xc0] ss:$16 sps:$4 sm:$0xff]  }
 0x45f   :  { %2752 = vrcp.f32 %v1431_v13  ;;  %v2745_v29 = vpop.eup %2744  ;;  %v1456_v6 = vadd.f32 1.0, %v2743_v28 }
 0x460   :  { %2754 = vrcp.f32 %v1443_v26 }
 0x461   :  { %2756 = vrcp.f32 %v1456_v6 }
 0x466   :  { %v2747_v30 = vpop.eup %2746 }
 0x467   :  { %v2749_v31 = vpop.eup %2748  ;;  %v1464_v32 = vmul.f32 %v2747_v30, %v2741_v21 }
 0x468   :  { %v2751_v35 = vpop.eup %2750  ;;  %v1462_v43 = vmul.f32 %v2749_v31, %v3462_v33 }
 0x469   :  { %v2753_v61 = vpop.eup %2752  ;;  %v1457_v12 = vadd.f32 1.0, %v2751_v35 }
 0x46a   :  { %v3525_v34 = vadd.f32 %v1464_v32, %v1462_v43  ;;  %v1465_v9 = vmul.f32 %v2753_v61, %v2745_v29  ;;  %v2755_v11 = vpop.eup %2754 }
 0x46b   :  { %v1463_v15 = vmul.f32 %v2755_v11, %v3466_v14  ;;  %v2757_v10 = vpop.eup %2756  ;;  %v3538_v14 = vld [vmem:[%s3857_s2] ss:$16 sps:$4 sm:$0xff]  }
 0x46c   :  { %2758 = vtanh.f32 %v3525_v34 }
 0x46d   :  { %v3529_v20 = vadd.f32 %v1465_v9, %v1463_v15  ;;  %2760 = vrcp.f32 %v1457_v12 }
 0x46f   :  { %2762 = vtanh.f32 %v3529_v20 }
 0x476   :  { %v2759_v22 = vpop.eup %2758 }
 0x477   :  { %v2761_v33 = vpop.eup %2760  ;;  %v1470_v16 = vmul.f32 %v2759_v22, %v2757_v10 }
 0x479   :  { %v2763_v7 = vpop.eup %2762 }
 0x47a   :  { %v1471_v23 = vmul.f32 %v2763_v7, %v2761_v33 }
 0x47c   :  { %v2374_v38 = vpack.c.bf16 %v1471_v23, %v1470_v16 }
 0x47e   :  { %2398 = vst [vmem:[%s3861_s6 + $0x18] sm:$0xff] %v2374_v38   ;;  %1534 = vmatmul.mubr.bf16.vlgmr.msra.gmra.mrb[16].mxu0 %v2374_v38  ;;  %1577 = vmatmul.mubr.bf16.vlgmr.msra.gmra.mrb[16].mxu1 %v2374_v38 }
 0x47f   :  { %1675 = vmatpush1.bf16.msra.mxu0 %v3538_v14  ;;  %1718 = vmatpush1.bf16.msra.mxu1 %v3544_v39 }
 0x480   :  { %1676 = vmatprep.subr.bf16.mxu0 %v3550_v40  ;;  %1719 = vmatprep.subr.bf16.mxu1 %v3556_v41 }
 0x481   :  { %1706 = vmatprep.mubr.bf16.mxu0 %v2924_v1  ;;  %1749 = vmatprep.mubr.bf16.mxu1 %v2924_v1 }
 0x483   :  { %1677 = vmatpush1.bf16.msra.mxu0 %v3564_v42  ;;  %1720 = vmatpush1.bf16.msra.mxu1 %v3570_v44 }
 0x484   :  { %1678 = vmatprep.subr.bf16.mxu0 %v3576_v45  ;;  %1721 = vmatprep.subr.bf16.mxu1 %v3582_v46 }
 0x487   :  { %1679 = vmatpush1.bf16.msra.mxu0 %v3588_v47  ;;  %1722 = vmatpush1.bf16.msra.mxu1 %v3594_v48 }
 0x488   :  { %1680 = vmatprep.subr.bf16.mxu0 %v3600_v49  ;;  %1723 = vmatprep.subr.bf16.mxu1 %v3606_v50 }
 0x48b   :  { %1681 = vmatpush1.bf16.msra.mxu0 %v3612_v51  ;;  %1724 = vmatpush1.bf16.msra.mxu1 %v3618_v53 }
 0x48c   :  { %1682 = vmatprep.subr.bf16.mxu0 %v3624_v54  ;;  %1725 = vmatprep.subr.bf16.mxu1 %v3630_v55 }
 0x48f   :  { %1683 = vmatpush1.bf16.msra.mxu0 %v3636_v56  ;;  %1726 = vmatpush1.bf16.msra.mxu1 %v3642_v57 }
 0x490   :  { %1684 = vmatprep.subr.bf16.mxu0 %v3648_v58  ;;  %1727 = vmatprep.subr.bf16.mxu1 %v3654_v59 }
 0x493   :  { %1685 = vmatpush1.bf16.msra.mxu0 %v3660_v60  ;;  %1728 = vmatpush1.bf16.msra.mxu1 %v3666_v62 }
 0x494   :  { %1686 = vmatprep.subr.bf16.mxu0 %v3672_v63  ;;  %1729 = vmatprep.subr.bf16.mxu1 %v3678_v0 }
 0x497   :  { %1687 = vmatpush1.bf16.msra.mxu0 %v3684_v17  ;;  %1730 = vmatpush1.bf16.msra.mxu1 %v3244_v2 }
 0x498   :  { %1688 = vmatprep.subr.bf16.mxu0 %v3691_v24  ;;  %1731 = vmatprep.subr.bf16.mxu1 %v3249_v3 }
 0x49b   :  { %1689 = vmatpush1.bf16.msra.mxu0 %v3258_v4  ;;  %1732 = vmatpush1.bf16.msra.mxu1 %v3265_v5 }
 0x49c   :  { %1847 = vmatprep.subr.bf16.mxu0 %v3507_v36  ;;  %1890 = vmatprep.subr.bf16.mxu1 %v3513_v37 }
 0x551   :  { %v1535_v25 = vpop.f32.mrb[16].mxu0  ;;  %v1578_v13 = vpop.f32.mrb[16].mxu1 }
 0x552   :  { %v2419_v2 = vadd.f32 %v1535_v25, %v3335_v18  ;;  %v1537_v27 = vpop.f32.mrb[17].mxu0  ;;  %v1580_v26 = vpop.f32.mrb[17].mxu1  ;;  %v2451_v6 = vadd.f32 %v1578_v13, %v3345_v8 }
 0x553   :  { %v2420_v21 = vadd.f32 %v1537_v27, %v3337_v19  ;;  %v1539_v28 = vpop.f32.mrb[18].mxu0  ;;  %v1582_v29 = vpop.f32.mrb[18].mxu1  ;;  %v2452_v61 = vadd.f32 %v1580_v26, %v3342_v52 }
 0x554   :  { %v2300_v30 = vmul.f32 -1.442695, %v2419_v2  ;;  %v2421_v3 = vadd.f32 %v1539_v28, %v3335_v18  ;;  %v1541_v4 = vpop.f32.mrb[19].mxu0  ;;  %v1584_v31 = vpop.f32.mrb[19].mxu1  ;;  %v2453_v12 = vadd.f32 %v1582_v29, %v3345_v8 }
 0x555   :  { %v2302_v5 = vmul.f32 -1.442695, %v2420_v21  ;;  %v2422_v32 = vadd.f32 %v1541_v4, %v3337_v19  ;;  %v2304_v9 = vmul.f32 -1.442695, %v2452_v61  ;;  %v2454_v11 = vadd.f32 %v1584_v31, %v3342_v52 }
 0x556   :  { %2764 = vpow2.f32 %v2300_v30  ;;  %v2301_v35 = vmul.f32 -1.442695, %v2421_v3 }
 0x557   :  { %2766 = vpow2.f32 %v2302_v5  ;;  %v2303_v43 = vmul.f32 -1.442695, %v2422_v32  ;;  %v2305_v33 = vmul.f32 -1.442695, %v2454_v11 }
 0x558   :  { %2768 = vpow2.f32 %v2301_v35 }
 0x559   :  { %2770 = vpow2.f32 %v2303_v43 }
 0x55a   :  { %2772 = vtanh.f32 %v2451_v6 }
 0x55b   :  { %2774 = vpow2.f32 %v2304_v9 }
 0x55c   :  { %2776 = vtanh.f32 %v2453_v12 }
 0x560   :  { %v2765_v15 = vpop.eup %2764 }
 0x561   :  { %v2767_v10 = vpop.eup %2766  ;;  %v1603_v22 = vadd.f32 1.0, %v2765_v15 }
 0x562   :  { %v1615_v7 = vadd.f32 1.0, %v2767_v10  ;;  %v2769_v16 = vpop.eup %2768 }
 0x563   :  { %2778 = vrcp.f32 %v1603_v22  ;;  %v1604_v23 = vadd.f32 1.0, %v2769_v16  ;;  %v2771_v38 = vpop.eup %2770  ;;  %v3755_v22 = vld [vmem:[%s3857_s2 + $0xec] ss:$16 sps:$4 sm:$0xff]  }
 0x564   :  { %2780 = vrcp.f32 %v1615_v7  ;;  %v1616_v25 = vadd.f32 1.0, %v2771_v38  ;;  %v2773_v13 = vpop.eup %2772  ;;  %v3767_v7 = vld [vmem:[%s3857_s2 + $0xe8] ss:$16 sps:$4 sm:$0xff]  }
 0x565   :  { %2782 = vpow2.f32 %v2305_v33  ;;  %v2775_v2 = vpop.eup %2774  ;;  %v3761_v33 = vld [vmem:[%s3857_s2 + $0xe0] ss:$16 sps:$4 sm:$0xff]  }
 0x566   :  { %2784 = vrcp.f32 %v1604_v23  ;;  %v2777_v27 = vpop.eup %2776  ;;  %v1629_v4 = vadd.f32 1.0, %v2775_v2 }
 0x567   :  { %2786 = vrcp.f32 %v1616_v25 }
 0x568   :  { %2788 = vrcp.f32 %v1629_v4 }
 0x56d   :  { %v2779_v26 = vpop.eup %2778 }
 0x56e   :  { %v2781_v21 = vpop.eup %2780  ;;  %v1637_v28 = vmul.f32 %v2779_v26, %v2773_v13 }
 0x56f   :  { %v2783_v29 = vpop.eup %2782  ;;  %v1635_v30 = vmul.f32 %v2781_v21, %v3525_v34 }
 0x570   :  { %v2785_v3 = vpop.eup %2784  ;;  %v1630_v35 = vadd.f32 1.0, %v2783_v29 }
 0x571   :  { %v3708_v31 = vadd.f32 %v1637_v28, %v1635_v30  ;;  %v1638_v5 = vmul.f32 %v2785_v3, %v2777_v27  ;;  %v2787_v32 = vpop.eup %2786 }
 0x572   :  { %v1636_v43 = vmul.f32 %v2787_v32, %v3529_v20  ;;  %v2789_v6 = vpop.eup %2788  ;;  %v3748_v20 = vld [vmem:[%s3857_s2 + $0xc8] ss:$16 sps:$4 sm:$0xff]  }
 0x573   :  { %2790 = vtanh.f32 %v3708_v31 }
 0x574   :  { %v3712_v61 = vadd.f32 %v1638_v5, %v1636_v43  ;;  %2792 = vrcp.f32 %v1630_v35 }
 0x576   :  { %2794 = vtanh.f32 %v3712_v61 }
 0x57d   :  { %v2791_v9 = vpop.eup %2790 }
 0x57e   :  { %v2793_v34 = vpop.eup %2792  ;;  %v1643_v12 = vmul.f32 %v2791_v9, %v2789_v6 }
 0x580   :  { %v2795_v11 = vpop.eup %2794 }
 0x581   :  { %v1644_v15 = vmul.f32 %v2795_v11, %v2793_v34 }
 0x583   :  { %v2379_v10 = vpack.c.bf16 %v1644_v15, %v1643_v12 }
 0x585   :  { %2399 = vst [vmem:[%s3861_s6 + $0x20] sm:$0xff] %v2379_v10   ;;  %1707 = vmatmul.mubr.bf16.vlgmr.msra.gmra.mrb[20].mxu0 %v2379_v10  ;;  %1750 = vmatmul.mubr.bf16.vlgmr.msra.gmra.mrb[20].mxu1 %v2379_v10 }
 0x586   :  { %1848 = vmatpush1.bf16.msra.mxu0 %v3538_v14  ;;  %1891 = vmatpush1.bf16.msra.mxu1 %v3544_v39 }
 0x587   :  { %1849 = vmatprep.subr.bf16.mxu0 %v3550_v40  ;;  %1892 = vmatprep.subr.bf16.mxu1 %v3556_v41 }
 0x588   :  { %1879 = vmatprep.mubr.bf16.mxu0 %v2924_v1  ;;  %1922 = vmatprep.mubr.bf16.mxu1 %v2924_v1 }
 0x58a   :  { %1850 = vmatpush1.bf16.msra.mxu0 %v3564_v42  ;;  %1893 = vmatpush1.bf16.msra.mxu1 %v3570_v44 }
 0x58b   :  { %1851 = vmatprep.subr.bf16.mxu0 %v3576_v45  ;;  %1894 = vmatprep.subr.bf16.mxu1 %v3582_v46 }
 0x58e   :  { %1852 = vmatpush1.bf16.msra.mxu0 %v3588_v47  ;;  %1895 = vmatpush1.bf16.msra.mxu1 %v3594_v48 }
 0x58f   :  { %1853 = vmatprep.subr.bf16.mxu0 %v3600_v49  ;;  %1896 = vmatprep.subr.bf16.mxu1 %v3606_v50 }
 0x592   :  { %1854 = vmatpush1.bf16.msra.mxu0 %v3612_v51  ;;  %1897 = vmatpush1.bf16.msra.mxu1 %v3618_v53 }
 0x593   :  { %1855 = vmatprep.subr.bf16.mxu0 %v3624_v54  ;;  %1898 = vmatprep.subr.bf16.mxu1 %v3630_v55 }
 0x596   :  { %1856 = vmatpush1.bf16.msra.mxu0 %v3636_v56  ;;  %1899 = vmatpush1.bf16.msra.mxu1 %v3642_v57 }
 0x597   :  { %1857 = vmatprep.subr.bf16.mxu0 %v3648_v58  ;;  %1900 = vmatprep.subr.bf16.mxu1 %v3654_v59 }
 0x59a   :  { %1858 = vmatpush1.bf16.msra.mxu0 %v3660_v60  ;;  %1901 = vmatpush1.bf16.msra.mxu1 %v3666_v62 }
 0x59b   :  { %1859 = vmatprep.subr.bf16.mxu0 %v3672_v63  ;;  %1902 = vmatprep.subr.bf16.mxu1 %v3678_v0 }
 0x59e   :  { %1860 = vmatpush1.bf16.msra.mxu0 %v3684_v17  ;;  %1903 = vmatpush1.bf16.msra.mxu1 %v3748_v20 }
 0x59f   :  { %1861 = vmatprep.subr.bf16.mxu0 %v3691_v24  ;;  %1904 = vmatprep.subr.bf16.mxu1 %v3755_v22 }
 0x5a2   :  { %1862 = vmatpush1.bf16.msra.mxu0 %v3761_v33  ;;  %1905 = vmatpush1.bf16.msra.mxu1 %v3767_v7 }
 0x5a3   :  { %2020 = vmatprep.subr.bf16.mxu0 %v3507_v36  ;;  %2063 = vmatprep.subr.bf16.mxu1 %v3513_v37 }
 0x658   :  { %v1708_v16 = vpop.f32.mrb[20].mxu0  ;;  %v1751_v23 = vpop.f32.mrb[20].mxu1 }
 0x659   :  { %v2423_v38 = vadd.f32 %v1708_v16, %v3335_v18  ;;  %v1710_v25 = vpop.f32.mrb[21].mxu0  ;;  %v1753_v13 = vpop.f32.mrb[21].mxu1  ;;  %v2455_v32 = vadd.f32 %v1751_v23, %v3345_v8 }
 0x65a   :  { %v2424_v2 = vadd.f32 %v1710_v25, %v3337_v19  ;;  %v1712_v27 = vpop.f32.mrb[22].mxu0  ;;  %v1755_v26 = vpop.f32.mrb[22].mxu1  ;;  %v2456_v5 = vadd.f32 %v1753_v13, %v3342_v52 }
 0x65b   :  { %v2310_v21 = vmul.f32 -1.442695, %v2423_v38  ;;  %v2425_v28 = vadd.f32 %v1712_v27, %v3335_v18  ;;  %v1714_v29 = vpop.f32.mrb[23].mxu0  ;;  %v1757_v30 = vpop.f32.mrb[23].mxu1  ;;  %v2457_v6 = vadd.f32 %v1755_v26, %v3345_v8 }
 0x65c   :  { %v2312_v3 = vmul.f32 -1.442695, %v2424_v2  ;;  %v2426_v36 = vadd.f32 %v1714_v29, %v3337_v19  ;;  %v2314_v35 = vmul.f32 -1.442695, %v2456_v5  ;;  %v2458_v43 = vadd.f32 %v1757_v30, %v3342_v52 }
 0x65d   :  { %2796 = vpow2.f32 %v2310_v21  ;;  %v2311_v37 = vmul.f32 -1.442695, %v2425_v28 }
 0x65e   :  { %2798 = vpow2.f32 %v2312_v3  ;;  %v2313_v4 = vmul.f32 -1.442695, %v2426_v36  ;;  %v2315_v12 = vmul.f32 -1.442695, %v2458_v43 }
 0x65f   :  { %2800 = vpow2.f32 %v2311_v37 }
 0x660   :  { %2802 = vpow2.f32 %v2313_v4 }
 0x661   :  { %2804 = vtanh.f32 %v2455_v32 }
 0x662   :  { %2806 = vpow2.f32 %v2314_v35 }
 0x663   :  { %2808 = vtanh.f32 %v2457_v6 }
 0x667   :  { %v2797_v9 = vpop.eup %2796 }
 0x668   :  { %v2799_v34 = vpop.eup %2798  ;;  %v1776_v11 = vadd.f32 1.0, %v2797_v9 }
 0x669   :  { %v1788_v15 = vadd.f32 1.0, %v2799_v34  ;;  %v2801_v10 = vpop.eup %2800 }
 0x66a   :  { %2810 = vrcp.f32 %v1776_v11  ;;  %v1777_v16 = vadd.f32 1.0, %v2801_v10  ;;  %v2803_v38 = vpop.eup %2802 }
 0x66b   :  { %2812 = vrcp.f32 %v1788_v15  ;;  %v1789_v23 = vadd.f32 1.0, %v2803_v38  ;;  %v2805_v25 = vpop.eup %2804 }
 0x66c   :  { %2814 = vpow2.f32 %v2315_v12  ;;  %v2807_v13 = vpop.eup %2806 }
 0x66d   :  { %2816 = vrcp.f32 %v1777_v16  ;;  %v2809_v2 = vpop.eup %2808  ;;  %v1802_v3 = vadd.f32 1.0, %v2807_v13 }
 0x66e   :  { %2818 = vrcp.f32 %v1789_v23 }
 0x66f   :  { %2820 = vrcp.f32 %v1802_v3 }
 0x674   :  { %v2811_v27 = vpop.eup %2810 }
 0x675   :  { %v2813_v26 = vpop.eup %2812  ;;  %v1810_v21 = vmul.f32 %v2811_v27, %v2805_v25 }
 0x676   :  { %v2815_v28 = vpop.eup %2814  ;;  %v1808_v29 = vmul.f32 %v2813_v26, %v3708_v31 }
 0x677   :  { %v2817_v30 = vpop.eup %2816  ;;  %v1803_v5 = vadd.f32 1.0, %v2815_v28 }
 0x678   :  { %v3781_v36 = vadd.f32 %v1810_v21, %v1808_v29  ;;  %v1811_v37 = vmul.f32 %v2817_v30, %v2809_v2  ;;  %v2819_v4 = vpop.eup %2818 }
 0x679   :  { %v1809_v32 = vmul.f32 %v2819_v4, %v3712_v61  ;;  %v2821_v43 = vpop.eup %2820 }
 0x67a   :  { %2822 = vtanh.f32 %v3781_v36 }
 0x67b   :  { %v3785_v35 = vadd.f32 %v1811_v37, %v1809_v32  ;;  %2824 = vrcp.f32 %v1803_v5 }
 0x67d   :  { %2826 = vtanh.f32 %v3785_v35 }
 0x684   :  { %v2823_v6 = vpop.eup %2822 }
 0x685   :  { %v2825_v31 = vpop.eup %2824  ;;  %v1816_v34 = vmul.f32 %v2823_v6, %v2821_v43 }
 0x687   :  { %v2827_v9 = vpop.eup %2826 }
 0x688   :  { %v1817_v11 = vmul.f32 %v2827_v9, %v2825_v31 }
 0x68a   :  { %v2384_v12 = vpack.c.bf16 %v1817_v11, %v1816_v34 }
 0x68c   :  { %2400 = vst [vmem:[%s3861_s6 + $0x28] sm:$0xff] %v2384_v12   ;;  %1880 = vmatmul.mubr.bf16.vlgmr.msra.gmra.mrb[24].mxu0 %v2384_v12  ;;  %1923 = vmatmul.mubr.bf16.vlgmr.msra.gmra.mrb[24].mxu1 %v2384_v12 }
 0x68d   :  { %2021 = vmatpush1.bf16.msra.mxu0 %v3538_v14  ;;  %2064 = vmatpush1.bf16.msra.mxu1 %v3544_v39 }
 0x68e   :  { %2022 = vmatprep.subr.bf16.mxu0 %v3550_v40  ;;  %2065 = vmatprep.subr.bf16.mxu1 %v3556_v41 }
 0x68f   :  { %2052 = vmatprep.mubr.bf16.mxu0 %v2924_v1  ;;  %2095 = vmatprep.mubr.bf16.mxu1 %v2924_v1 }
 0x691   :  { %2023 = vmatpush1.bf16.msra.mxu0 %v3564_v42  ;;  %2066 = vmatpush1.bf16.msra.mxu1 %v3570_v44 }
 0x692   :  { %2024 = vmatprep.subr.bf16.mxu0 %v3576_v45  ;;  %2067 = vmatprep.subr.bf16.mxu1 %v3582_v46 }
 0x695   :  { %2025 = vmatpush1.bf16.msra.mxu0 %v3588_v47  ;;  %2068 = vmatpush1.bf16.msra.mxu1 %v3594_v48 }
 0x696   :  { %2026 = vmatprep.subr.bf16.mxu0 %v3600_v49  ;;  %2069 = vmatprep.subr.bf16.mxu1 %v3606_v50 }
 0x699   :  { %2027 = vmatpush1.bf16.msra.mxu0 %v3612_v51  ;;  %2070 = vmatpush1.bf16.msra.mxu1 %v3618_v53 }
 0x69a   :  { %2028 = vmatprep.subr.bf16.mxu0 %v3624_v54  ;;  %2071 = vmatprep.subr.bf16.mxu1 %v3630_v55 }
 0x69d   :  { %2029 = vmatpush1.bf16.msra.mxu0 %v3636_v56  ;;  %2072 = vmatpush1.bf16.msra.mxu1 %v3642_v57 }
 0x69e   :  { %2030 = vmatprep.subr.bf16.mxu0 %v3648_v58  ;;  %2073 = vmatprep.subr.bf16.mxu1 %v3654_v59 }
 0x6a1   :  { %2031 = vmatpush1.bf16.msra.mxu0 %v3660_v60  ;;  %2074 = vmatpush1.bf16.msra.mxu1 %v3666_v62 }
 0x6a2   :  { %2032 = vmatprep.subr.bf16.mxu0 %v3672_v63  ;;  %2075 = vmatprep.subr.bf16.mxu1 %v3678_v0 }
 0x6a5   :  { %2033 = vmatpush1.bf16.msra.mxu0 %v3684_v17  ;;  %2076 = vmatpush1.bf16.msra.mxu1 %v3748_v20 }
 0x6a6   :  { %2034 = vmatprep.subr.bf16.mxu0 %v3691_v24  ;;  %2077 = vmatprep.subr.bf16.mxu1 %v3755_v22 }
 0x6a9   :  { %2035 = vmatpush1.bf16.msra.mxu0 %v3761_v33  ;;  %2078 = vmatpush1.bf16.msra.mxu1 %v3767_v7 }
 0x75f   :  { %v1881_v1 = vpop.f32.mrb[24].mxu0  ;;  %v1924_v14 = vpop.f32.mrb[24].mxu1 }
 0x760   :  { %v2427_v39 = vadd.f32 %v1881_v1, %v3335_v18  ;;  %v1883_v40 = vpop.f32.mrb[25].mxu0  ;;  %v1926_v41 = vpop.f32.mrb[25].mxu1  ;;  %v2459_v56 = vadd.f32 %v1924_v14, %v3345_v8 }
 0x761   :  { %v2428_v42 = vadd.f32 %v1883_v40, %v3337_v19  ;;  %v1885_v44 = vpop.f32.mrb[26].mxu0  ;;  %v1928_v45 = vpop.f32.mrb[26].mxu1  ;;  %v2460_v55 = vadd.f32 %v1926_v41, %v3342_v52 }
 0x762   :  { %v2320_v46 = vmul.f32 -1.442695, %v2427_v39  ;;  %v2429_v47 = vadd.f32 %v1885_v44, %v3335_v18  ;;  %v1887_v48 = vpop.f32.mrb[27].mxu0  ;;  %v1930_v49 = vpop.f32.mrb[27].mxu1  ;;  %v2461_v59 = vadd.f32 %v1928_v45, %v3345_v8 }
 0x763   :  { %v2322_v50 = vmul.f32 -1.442695, %v2428_v42  ;;  %v2430_v51 = vadd.f32 %v1887_v48, %v3337_v19  ;;  %v2324_v57 = vmul.f32 -1.442695, %v2460_v55  ;;  %v2462_v58 = vadd.f32 %v1930_v49, %v3342_v52 }
 0x764   :  { %2828 = vpow2.f32 %v2320_v46  ;;  %v2321_v53 = vmul.f32 -1.442695, %v2429_v47 }
 0x765   :  { %2830 = vpow2.f32 %v2322_v50  ;;  %v2323_v54 = vmul.f32 -1.442695, %v2430_v51  ;;  %v2325_v0 = vmul.f32 -1.442695, %v2462_v58 }
 0x766   :  { %2832 = vpow2.f32 %v2321_v53 }
 0x767   :  { %2834 = vpow2.f32 %v2323_v54 }
 0x768   :  { %2836 = vtanh.f32 %v2459_v56 }
 0x769   :  { %2838 = vpow2.f32 %v2324_v57 }
 0x76a   :  { %2840 = vtanh.f32 %v2461_v59 }
 0x76e   :  { %v2829_v60 = vpop.eup %2828 }
 0x76f   :  { %v2831_v62 = vpop.eup %2830  ;;  %v1949_v63 = vadd.f32 1.0, %v2829_v60 }
 0x770   :  { %v1961_v17 = vadd.f32 1.0, %v2831_v62  ;;  %v2833_v24 = vpop.eup %2832 }
 0x771   :  { %2842 = vrcp.f32 %v1949_v63  ;;  %v1950_v61 = vadd.f32 1.0, %v2833_v24  ;;  %v2835_v20 = vpop.eup %2834 }
 0x772   :  { %2844 = vrcp.f32 %v1961_v17  ;;  %v1962_v22 = vadd.f32 1.0, %v2835_v20  ;;  %v2837_v33 = vpop.eup %2836 }
 0x773   :  { %2846 = vpow2.f32 %v2325_v0  ;;  %v2839_v7 = vpop.eup %2838 }
 0x774   :  { %2848 = vrcp.f32 %v1950_v61  ;;  %v2841_v15 = vpop.eup %2840  ;;  %v1975_v2 = vadd.f32 1.0, %v2839_v7 }
 0x775   :  { %2850 = vrcp.f32 %v1962_v22 }
 0x776   :  { %2852 = vrcp.f32 %v1975_v2 }
 0x77b   :  { %v2843_v10 = vpop.eup %2842 }
 0x77c   :  { %v2845_v16 = vpop.eup %2844  ;;  %v1983_v38 = vmul.f32 %v2843_v10, %v2837_v33 }
 0x77d   :  { %v2847_v23 = vpop.eup %2846  ;;  %v1981_v25 = vmul.f32 %v2845_v16, %v3781_v36 }
 0x77e   :  { %v2849_v13 = vpop.eup %2848  ;;  %v1976_v28 = vadd.f32 1.0, %v2847_v23 }
 0x77f   :  { %v3832_v27 = vadd.f32 %v1983_v38, %v1981_v25  ;;  %v1984_v26 = vmul.f32 %v2849_v13, %v2841_v15  ;;  %v2851_v21 = vpop.eup %2850 }
 0x780   :  { %v1982_v29 = vmul.f32 %v2851_v21, %v3785_v35  ;;  %v2853_v3 = vpop.eup %2852 }
 0x781   :  { %2854 = vtanh.f32 %v3832_v27 }
 0x782   :  { %v3836_v30 = vadd.f32 %v1984_v26, %v1982_v29  ;;  %2856 = vrcp.f32 %v1976_v28 }
 0x784   :  { %2858 = vtanh.f32 %v3836_v30 }
 0x78b   :  { %v2855_v37 = vpop.eup %2854 }
 0x78c   :  { %v2857_v36 = vpop.eup %2856  ;;  %v1989_v5 = vmul.f32 %v2855_v37, %v2853_v3 }
 0x78e   :  { %v2859_v4 = vpop.eup %2858 }
 0x78f   :  { %v1990_v32 = vmul.f32 %v2859_v4, %v2857_v36 }
 0x791   :  { %v2389_v43 = vpack.c.bf16 %v1990_v32, %v1989_v5 }
 0x793   :  { %2401 = vst [vmem:[%s3861_s6 + $0x30] sm:$0xff] %v2389_v43   ;;  %2053 = vmatmul.mubr.bf16.vlgmr.msra.gmra.mrb[28].mxu0 %v2389_v43  ;;  %2096 = vmatmul.mubr.bf16.vlgmr.msra.gmra.mrb[28].mxu1 %v2389_v43 }
 0x866   :  { %v2054_v35 = vpop.f32.mrb[28].mxu0  ;;  %v2097_v6 = vpop.f32.mrb[28].mxu1 }
 0x867   :  { %v2431_v31 = vadd.f32 %v2054_v35, %v3335_v18  ;;  %v2056_v9 = vpop.f32.mrb[29].mxu0  ;;  %v2099_v34 = vpop.f32.mrb[29].mxu1  ;;  %v2463_v48 = vadd.f32 %v2097_v6, %v3345_v8 }
 0x868   :  { %v2432_v11 = vadd.f32 %v2056_v9, %v3337_v19  ;;  %v2058_v12 = vpop.f32.mrb[30].mxu0  ;;  %v2101_v1 = vpop.f32.mrb[30].mxu1  ;;  %v2464_v47 = vadd.f32 %v2099_v34, %v3342_v52 }
 0x869   :  { %v2330_v14 = vmul.f32 -1.442695, %v2431_v31  ;;  %v2433_v39 = vadd.f32 %v2058_v12, %v3335_v18  ;;  %v2060_v40 = vpop.f32.mrb[31].mxu0  ;;  %v2103_v41 = vpop.f32.mrb[31].mxu1  ;;  %v2465_v18 = vadd.f32 %v2101_v1, %v3345_v8 }
 0x86a   :  { %v2332_v42 = vmul.f32 -1.442695, %v2432_v11  ;;  %v2434_v44 = vadd.f32 %v2060_v40, %v3337_v19  ;;  %v2334_v49 = vmul.f32 -1.442695, %v2464_v47  ;;  %v2466_v50 = vadd.f32 %v2103_v41, %v3342_v52 }
 0x86b   :  { %2860 = vpow2.f32 %v2330_v14  ;;  %v2331_v45 = vmul.f32 -1.442695, %v2433_v39 }
 0x86c   :  { %2862 = vpow2.f32 %v2332_v42  ;;  %v2333_v46 = vmul.f32 -1.442695, %v2434_v44  ;;  %v2335_v19 = vmul.f32 -1.442695, %v2466_v50 }
 0x86d   :  { %2864 = vpow2.f32 %v2331_v45 }
 0x86e   :  { %2866 = vpow2.f32 %v2333_v46 }
 0x86f   :  { %2868 = vtanh.f32 %v2463_v48 }
 0x870   :  { %2870 = vpow2.f32 %v2334_v49 }
 0x871   :  { %2872 = vtanh.f32 %v2465_v18 }
 0x875   :  { %v2861_v51 = vpop.eup %2860 }
 0x876   :  { %v2863_v53 = vpop.eup %2862  ;;  %v2122_v54 = vadd.f32 1.0, %v2861_v51 }
 0x877   :  { %v2134_v55 = vadd.f32 1.0, %v2863_v53  ;;  %v2865_v56 = vpop.eup %2864 }
 0x878   :  { %2874 = vrcp.f32 %v2122_v54  ;;  %v2123_v57 = vadd.f32 1.0, %v2865_v56  ;;  %v2867_v58 = vpop.eup %2866 }
 0x879   :  { %2876 = vrcp.f32 %v2134_v55  ;;  %v2135_v59 = vadd.f32 1.0, %v2867_v58  ;;  %v2869_v52 = vpop.eup %2868 }
 0x87a   :  { %2878 = vpow2.f32 %v2335_v19  ;;  %v2871_v60 = vpop.eup %2870 }
 0x87b   :  { %2880 = vrcp.f32 %v2123_v57  ;;  %v2873_v8 = vpop.eup %2872  ;;  %v2148_v17 = vadd.f32 1.0, %v2871_v60 }
 0x87c   :  { %2882 = vrcp.f32 %v2135_v59 }
 0x87d   :  { %2884 = vrcp.f32 %v2148_v17 }
 0x882   :  { %v2875_v62 = vpop.eup %2874 }
 0x883   :  { %v2877_v63 = vpop.eup %2876  ;;  %v2156_v0 = vmul.f32 %v2875_v62, %v2869_v52 }
 0x884   :  { %v2879_v24 = vpop.eup %2878  ;;  %v2154_v61 = vmul.f32 %v2877_v63, %v3832_v27 }
 0x885   :  { %v2881_v20 = vpop.eup %2880  ;;  %v2149_v15 = vadd.f32 1.0, %v2879_v24 }
 0x886   :  { %v2158_v22 = vadd.f32 %v2156_v0, %v2154_v61  ;;  %v2157_v33 = vmul.f32 %v2881_v20, %v2873_v8  ;;  %v2883_v7 = vpop.eup %2882 }
 0x887   :  { %v2155_v10 = vmul.f32 %v2883_v7, %v3836_v30  ;;  %v2885_v38 = vpop.eup %2884 }
 0x888   :  { %2886 = vtanh.f32 %v2158_v22 }
 0x889   :  { %v2159_v16 = vadd.f32 %v2157_v33, %v2155_v10  ;;  %2888 = vrcp.f32 %v2149_v15 }
 0x88b   :  { %2890 = vtanh.f32 %v2159_v16 }
 0x892   :  { %v2887_v23 = vpop.eup %2886 }
 0x893   :  { %v2162_v25 = vmul.f32 %v2887_v23, %v2885_v38  ;;  %v2889_v13 = vpop.eup %2888 }
 0x895   :  { %v2891_v2 = vpop.eup %2890 }
 0x896   :  { %v2163_v26 = vmul.f32 %v2891_v2, %v2889_v13 }
 0x898   :  { %v2394_v21 = vpack.c.bf16 %v2163_v26, %v2162_v25 }
 0x89a   :  { %2402 = vst [vmem:[%s3861_s6 + $0x38] sm:$0xff] %v2394_v21  }

// kernel: seq2seq_forward.5
= control target key start
LH: loop header
LB: loop body
LE: loop exit
PB: predicated region body
PF: predicated region fallthrough
CT: control target
= control target key end

     0   :  { %s5376_s0 = inlined_call_operand.vmem [shape: s32[16,1], index: 0, kind: input, shape index: {}]   ;;  %s5377_s1 = inlined_call_operand.vmem [shape: bf16[128,128], index: 1, kind: input, shape index: {}]   ;;  %s5378_s2 = inlined_call_operand.hbm [shape: bf16[2,128,512], index: 2, kind: input, shape index: {}]   ;;  %s5379_s3 = inlined_call_operand.hbm [shape: bf16[2,128,512], index: 3, kind: input, shape index: {}]   ;;  %s5380_s4 = inlined_call_operand.vmem [shape: f32[2,1,512], index: 4, kind: input, shape index: {}]   ;;  %s5381_s5 = inlined_call_operand.vmem [shape: bf16[128,256], index: 5, kind: output, shape index: {0}]   ;;  %s5382_s6 = inlined_call_operand.vmem [shape: f32[2,16,128], index: 6, kind: output, shape index: {1}]   ;;  %s5383_s7 = inlined_call_operand.vmem [shape: f32[2,16,128], index: 7, kind: output, shape index: {2}]  }
   0x1   :  { %5386 = sst [smem:[#allocation12_spill]] %s5378_s2 }
   0x2   :  { %13 = vsyncpa [#allocation6], 0 }
   0x3   :  { %15 = vsyncpa [#allocation6 + $0x1], 0 }
   0x4   :  { %16 = vsyncpa [#allocation8], 0 }
   0x5   :  { %18 = vsyncpa [#allocation8 + $0x1], 0  ;;  %s4111_s24 = smov 0   ;;  %s4113_s25 = smov 0  }
   0x6   :  { %s4115_s26 = smov 0   ;;  %s4117_s27 = smov 0  }
   0x7   :  { %s4119_s28 = smov 0   ;;  %s4121_s29 = smov 0  }
   0x8 LB: > { %s3177_s30 = sadd.s32 4294967295, %s4063_s29   ;;  %s36_s8 = sadd.s32 1, %s4059_s28  ;;  %s4063_s29 = sphi %s4121_s29, %s24_s29   ;;  %s4059_s28 = sphi %s4119_s28, %s5404_s28   ;;  %s4055_s27 = sphi %s4117_s27, %s5403_s27   ;;  %s4051_s26 = sphi %s4115_s26, %s5402_s26   ;;  %s4047_s25 = sphi %s4113_s25, %s5401_s25   ;;  %s4043_s24 = sphi %s4111_s24, %s5400_s24  }
   0x9   : > { %p38_p0 = scmp.ge.s32.totalorder %s36_s8, 2  ;;  %s98_s9 = sadd.s32 1, %s4051_s26 }
   0xa   : > { %p105_p1 = scmp.ne.s32.totalorder %s4051_s26, %s4047_s25  ;;  %p106_p2 = scmp.eq.s32.totalorder %s4063_s29, 0 }
   0xb   : > { %s5406_s8 = smov (%p38_p0, %s36_s8), 0  ;;  %p111_p4 = scmp.ne.s32.totalorder %s4047_s25, %s4043_s24 }
   0xc   : > { %p4147_p3 = por %p106_p2, %p105_p1  ;;  %s95_s11 = ssub.s32 %s4059_s28, %s5406_s8 }
   0xd   : > { %p112_p5 = scmp.eq.s32.totalorder %s3177_s30, 0  ;;  %p96_p6 = scmp.eq.s32.totalorder %s95_s11, 0 }
   0xe   : > { %p197_p7 = scmp.eq.s32.totalorder %s3177_s30, 1  ;;  %p3470_p10 = scmp.lt.s32.totalorder %s4063_s29, 2 }
   0xf   : > { %p4154_p8 = por %p112_p5, %p111_p4  ;;  %s4167_s15 = sand.u32 1, %s4051_s26  }
  0x10   : > { %s4159_s13 = scalar_select %p96_p6, %s4051_s26, %s98_s9  }
  0x11   : > { %s5388_s12 = scalar_select %p4154_p8, 1, 0 }
  0x12   : > { %p4161_p9 = por %p197_p7, %p105_p1  ;;  %s3368_s16 = sshll.u32 %s4059_s28, 12 }
  0x13   : > { %s3182_s17 = sshll.u32 %s4167_s15, 8  ;;  %s5390_s2 = sld [smem:[#allocation12_spill]] }
  0x14   : > { %s5389_s14 = scalar_select %p4161_p9, 1, 0 }
  0x15   : > { %s299_s21 = scalar_lea.vmem [#allocation5], %s3182_s17  ;;  %p4182_p11 = pnand %p3470_p10, %p4147_p3 }
  0x16   : > { %s306_s22 = sshll.u32 %s299_s21, 4  ;;  %s296_s24 = scalar_lea.sflag [#allocation6], %s4167_s15  ;;  %s4186_s22 = int_to_ptr.vmem [resolvable:$true] %s306_s22 }
  0x17   : > { %p3951_p13 = pneg %p4182_p11 }
  0x19   : > { %s4176_s20 = scalar_lea.hbm %s5390_s2, %s3368_s16  ;;  %s3954_s10 = scalar_lea.hbm %s5390_s2, 8192 }
  0x1a   : > { %s3949_s30 = scalar_lea.hbm %s4176_s20, 4096  ;;  %p3955_p2 = scmp.lt.u32.totalorder %s4176_s20, %s5390_s2 }
  0x1b   : > { %p3950_p12 = scmp.ne.s32.totalorder %s4176_s20, %s3949_s30  ;;  %p3956_p3 = scmp.lt.u32.totalorder %s3954_s10, %s3949_s30 }
  0x1c   : > { %p3958_p5 = scmp.lt.u32.totalorder %s3949_s30, %s4176_s20 }
  0x1d   : > { %p3952_p0 = pnand %p3951_p13, %p3950_p12  ;;  %p3957_p4 = por %p3956_p3, %p3955_p2 }
  0x1f   : > { %p3953_p1 = pneg %p3952_p0  ;;  %p3959_p6 = por %p3958_p5, %p3957_p4 }
  0x21   : > { %p3960_p7 = pnand %p3959_p6, %p3953_p1 }
  0x23   : > { %3963 = shalt.err (!%p3960_p7)
}
  0x24   : > { %s3964_s21 = scalar_lea.vmem %s4186_s22, 4096  ;;  %s4065_s9 = smov [#allocation5]  }
  0x25   : > { %p3965_p10 = scmp.ne.s32.totalorder %s4186_s22, %s3964_s21  ;;  %s3969_s11 = sshll.u32 %s4065_s9, 4  ;;  %s3970_s11 = int_to_ptr.vmem [resolvable:$false] %s3969_s11 }
  0x26   : > { %s3971_s18 = scalar_lea.vmem %s3970_s11, 8192  ;;  %p3972_p9 = scmp.lt.s32.totalorder %s4186_s22, %s3970_s11 }
  0x27   : > { %p3967_p12 = pnand %p3965_p10, %p3951_p13  ;;  %p3973_p2 = scmp.lt.s32.totalorder %s3971_s18, %s3964_s21 }
  0x29   : > { %p3968_p0 = pneg %p3967_p12  ;;  %p3974_p3 = por %p3973_p2, %p3972_p9 }
  0x2b   : > { %p3975_p4 = pnand %p3974_p3, %p3968_p0 }
  0x2d   : > { %3978 = shalt.err (!%p3975_p4)
}
  0x2e   : > { %s5384_s30 = smov 256   ;;  %s4067_s10 = smov 16  }
  0x2f   : > { %3466 = dma.hbm_to_vmem [thread:$0]  (!%p4182_p11), %s4176_s20, 4096, %s4186_s22, %s296_s24, %s5384_s30, %s5384_s30, %s4067_s10  }
  0x30   : > { %p3188_p9 = scmp.ge.s32.totalorder %s4063_s29, 1  ;;  %p342_p1 = scmp.lt.s32.totalorder %s4063_s29, 3 }
  0x31   : > { %s4230_s11 = scalar_lea.hbm %s5379_s3, %s3368_s16  ;;  %s320_s18 = scalar_lea.vmem [#allocation7], %s3182_s17 }
  0x32   : > { %p4221_p5 = pnand %p3188_p9, %p342_p1  ;;  %s327_s2 = sshll.u32 %s320_s18, 4  ;;  %s4234_s2 = int_to_ptr.vmem [resolvable:$true] %s327_s2 }
  0x33   : > { %s317_s20 = scalar_lea.sflag [#allocation8], %s4167_s15  ;;  %s3979_s22 = scalar_lea.hbm %s4230_s11, 4096 }
  0x34   : > { %p3980_p6 = scmp.ne.s32.totalorder %s4230_s11, %s3979_s22  ;;  %s3984_s16 = scalar_lea.hbm %s5379_s3, 8192 }
  0x35   : > { %p3985_p12 = scmp.lt.u32.totalorder %s4230_s11, %s5379_s3  ;;  %p3986_p0 = scmp.lt.u32.totalorder %s3984_s16, %s3979_s22 }
  0x36   : > { %p3982_p7 = pnand %p3980_p6, %p3951_p13  ;;  %p3988_p3 = scmp.lt.u32.totalorder %s3979_s22, %s4230_s11 }
  0x37   : > { %p3987_p2 = por %p3986_p0, %p3985_p12 }
  0x38   : > { %p3983_p10 = pneg %p3982_p7 }
  0x39   : > { %p3989_p4 = por %p3988_p3, %p3987_p2 }
  0x3b   : > { %p3990_p9 = pnand %p3989_p4, %p3983_p10 }
  0x3d   : > { %3993 = shalt.err (!%p3990_p9)
}
  0x3e   : > { %s3994_s17 = scalar_lea.vmem %s4234_s2, 4096  ;;  %s4068_s18 = smov [#allocation7]  }
  0x3f   : > { %p3995_p1 = scmp.ne.s32.totalorder %s4234_s2, %s3994_s17  ;;  %s3999_s24 = sshll.u32 %s4068_s18, 4  ;;  %s4000_s24 = int_to_ptr.vmem [resolvable:$false] %s3999_s24 }
  0x40   : > { %s4001_s30 = scalar_lea.vmem %s4000_s24, 8192  ;;  %p4002_p8 = scmp.lt.s32.totalorder %s4234_s2, %s4000_s24 }
  0x41   : > { %p3997_p6 = pnand %p3995_p1, %p3951_p13  ;;  %p4003_p12 = scmp.lt.s32.totalorder %s4001_s30, %s3994_s17 }
  0x43   : > { %p3998_p7 = pneg %p3997_p6  ;;  %p4004_p0 = por %p4003_p12, %p4002_p8 }
  0x45   : > { %p4005_p2 = pnand %p4004_p0, %p3998_p7 }
  0x47   : > { %4008 = shalt.err (!%p4005_p2)
}
  0x48   : > { %s5393_s22 = smov 256   ;;  %346 = sbr.rel (%p4221_p5) target bundleno = 2314 (0x90a), region = 40 }
  0x49   : > { %3469 = dma.hbm_to_vmem [thread:$0]  (!%p4182_p11), %s4230_s11, 4096, %s4234_s2, %s317_s20, %s5393_s22, %s5393_s22, %s4067_s10  }
  0x4a   : > { %s4268_s21 = sand.u32 (!%p4221_p5), 1, %s4047_s25   ;;  %p5394_p8 = scmp.ne.s32.totalorder (!%p4221_p5), %s5388_s12, 0 }
  0x4b   : > { %s3189_s16 = sshll.u32 (!%p4221_p5), %s4268_s21, 8  ;;  %s349_s9 = scalar_lea.sflag (!%p4221_p5), [#allocation6], %s4268_s21 }
  0x4c   : > { %s4272_s23 = scalar_lea.vmem (!%p4221_p5), [#allocation5], %s3189_s16 }
  0x4f   : > { %4034 = dma.done.wait (%p5394_p8), %s349_s9, 4096  }
  0x50   : > { %4036 = vsyncadd (%p5394_p8), %s349_s9, 4294963200  ;;  %s358_s2 = scalar_lea.sflag [#allocation8], %s4268_s21  ;;  %s4279_s15 = scalar_lea.vmem [#allocation7], %s3189_s16 }
  0x51   : > { %4038 = dma.done.wait (%p5394_p8), %s358_s2, 4096  }
  0x52   : > { %4040 = vsyncadd (%p5394_p8), %s358_s2, 4294963200  ;;  %v4069_v0 = vmov 0   ;;  %v3525_v1 = vld [vmem:[%s4272_s23 + $0x4] ss:$16 sps:$4 sm:$0xff]   ;;  %v3527_v2 = vld [vmem:[%s4272_s23 + $0xc] ss:$16 sps:$4 sm:$0xff]  }
  0x53   : > { %771 = vmatprep.mubr.bf16.mxu0 %v4069_v0  ;;  %884 = vmatprep.mubr.bf16.mxu1 %v4069_v0  ;;  %v3529_v3 = vld [vmem:[%s4272_s23] ss:$16 sps:$4 sm:$0xff]   ;;  %v3530_v4 = vld [vmem:[%s4272_s23 + $0x8] ss:$16 sps:$4 sm:$0xff]   ;;  %v3531_v5 = vld [vmem:[%s4272_s23 + $0x24] ss:$16 sps:$4 sm:$0xff]  }
  0x54   : > { %3523 = vset.pattern.permute.xlu0 %v4069_v0  ;;  %3524 = vset.pattern.permute.xlu1 %v4069_v0  ;;  %v3533_v6 = vld [vmem:[%s4272_s23 + $0x2c] ss:$16 sps:$4 sm:$0xff]   ;;  %v3535_v7 = vld [vmem:[%s4272_s23 + $0x20] ss:$16 sps:$4 sm:$0xff]   ;;  %v3536_v8 = vld [vmem:[%s4272_s23 + $0x28] ss:$16 sps:$4 sm:$0xff]  }
  0x55   : > { %739 = vmatprep.subr.bf16.mxu0 %v3525_v1  ;;  %852 = vmatprep.subr.bf16.mxu1 %v3527_v2  ;;  %v3537_v9 = vld [vmem:[%s4272_s23 + $0x44] ss:$16 sps:$4 sm:$0xff]   ;;  %v3539_v10 = vld [vmem:[%s4272_s23 + $0x4c] ss:$16 sps:$4 sm:$0xff]   ;;  %v3541_v11 = vld [vmem:[%s4272_s23 + $0x40] ss:$16 sps:$4 sm:$0xff]  }
  0x56   : > { %740 = vmatpush1.bf16.msra.mxu0 %v3529_v3  ;;  %853 = vmatpush1.bf16.msra.mxu1 %v3530_v4  ;;  %v3542_v12 = vld [vmem:[%s4272_s23 + $0x48] ss:$16 sps:$4 sm:$0xff]   ;;  %v3543_v13 = vld [vmem:[%s4272_s23 + $0x64] ss:$16 sps:$4 sm:$0xff]   ;;  %v3545_v14 = vld [vmem:[%s4272_s23 + $0x6c] ss:$16 sps:$4 sm:$0xff]  }
  0x57   : > { %741 = vmatprep.subr.bf16.mxu0 %v3531_v5  ;;  %854 = vmatprep.subr.bf16.mxu1 %v3533_v6  ;;  %v3547_v15 = vld [vmem:[%s4272_s23 + $0x60] ss:$16 sps:$4 sm:$0xff]   ;;  %v3548_v16 = vld [vmem:[%s4272_s23 + $0x68] ss:$16 sps:$4 sm:$0xff]   ;;  %v3549_v17 = vld [vmem:[%s4272_s23 + $0x84] ss:$16 sps:$4 sm:$0xff]  }
  0x58   : > { %v3551_v18 = vld [vmem:[%s4272_s23 + $0x8c] ss:$16 sps:$4 sm:$0xff]   ;;  %v3553_v19 = vld [vmem:[%s4272_s23 + $0x80] ss:$16 sps:$4 sm:$0xff]   ;;  %v3554_v20 = vld [vmem:[%s4272_s23 + $0x88] ss:$16 sps:$4 sm:$0xff]  }
  0x59   : > { %v3555_v21 = vld [vmem:[%s4272_s23 + $0xa4] ss:$16 sps:$4 sm:$0xff]   ;;  %v3557_v22 = vld [vmem:[%s4272_s23 + $0xac] ss:$16 sps:$4 sm:$0xff]   ;;  %v3559_v23 = vld [vmem:[%s4272_s23 + $0xa0] ss:$16 sps:$4 sm:$0xff]  }
  0x5a   : > { %742 = vmatpush1.bf16.msra.mxu0 %v3535_v7  ;;  %855 = vmatpush1.bf16.msra.mxu1 %v3536_v8  ;;  %v3560_v24 = vld [vmem:[%s4272_s23 + $0xa8] ss:$16 sps:$4 sm:$0xff]   ;;  %v3561_v25 = vld [vmem:[%s4272_s23 + $0xc4] ss:$16 sps:$4 sm:$0xff]   ;;  %v3563_v26 = vld [vmem:[%s4272_s23 + $0xcc] ss:$16 sps:$4 sm:$0xff]  }
  0x5b   : > { %743 = vmatprep.subr.bf16.mxu0 %v3537_v9  ;;  %856 = vmatprep.subr.bf16.mxu1 %v3539_v10  ;;  %v3565_v27 = vld [vmem:[%s4272_s23 + $0xc0] ss:$16 sps:$4 sm:$0xff]   ;;  %v3566_v28 = vld [vmem:[%s4272_s23 + $0xc8] ss:$16 sps:$4 sm:$0xff]   ;;  %v3567_v29 = vld [vmem:[%s4272_s23 + $0xe4] ss:$16 sps:$4 sm:$0xff]  }
  0x5c   : > { %v3569_v30 = vld [vmem:[%s4272_s23 + $0xec] ss:$16 sps:$4 sm:$0xff]   ;;  %v3571_v31 = vld [vmem:[%s4272_s23 + $0xe0] ss:$16 sps:$4 sm:$0xff]   ;;  %v3572_v32 = vld [vmem:[%s4272_s23 + $0xe8] ss:$16 sps:$4 sm:$0xff]  }
  0x5d   : > { %v4322_v33 = vld [vmem:[%s4279_s15 + $0x4] ss:$16 sps:$4 sm:$0xff]   ;;  %v4325_v34 = vld [vmem:[%s4279_s15 + $0xc] ss:$16 sps:$4 sm:$0xff]   ;;  %v4331_v36 = vld [vmem:[%s4279_s15] ss:$16 sps:$4 sm:$0xff]  }
  0x5e   : > { %744 = vmatpush1.bf16.msra.mxu0 %v3541_v11  ;;  %857 = vmatpush1.bf16.msra.mxu1 %v3542_v12  ;;  %v3573_v35 = vld [vmem:[%s5377_s1] sm:$0xff]   ;;  %v4339_v38 = vld [vmem:[%s4279_s15 + $0x8] ss:$16 sps:$4 sm:$0xff]   ;;  %v4342_v39 = vld [vmem:[%s4279_s15 + $0x2c] ss:$16 sps:$4 sm:$0xff]   ;;  %s1068_s20 = smul.u32 7, %s4055_s27 }
  0x5f   : > { %745 = vmatprep.subr.bf16.mxu0 %v3543_v13  ;;  %858 = vmatprep.subr.bf16.mxu1 %v3545_v14  ;;  %v4335_v37 = vld [vmem:[%s4279_s15 + $0x24] ss:$16 sps:$4 sm:$0xff]   ;;  %v4347_v40 = vld [vmem:[%s4279_s15 + $0x20] ss:$16 sps:$4 sm:$0xff]   ;;  %v4356_v42 = vld [vmem:[%s4279_s15 + $0x28] ss:$16 sps:$4 sm:$0xff]  }
  0x60   : > { %v4352_v41 = vld [vmem:[%s4279_s15 + $0x44] ss:$16 sps:$4 sm:$0xff]   ;;  %v3577_v43 = vld [vmem:[%s5377_s1 + $0x8] sm:$0xff]   ;;  %v4364_v44 = vld [vmem:[%s4279_s15 + $0x40] ss:$16 sps:$4 sm:$0xff]   ;;  %v1391_v54 = vstv %s1068_s20  ;;  %s1629_s22 = smul.u32 3, %s4055_s27 }
  0x61   : > { %v4367_v45 = vld [vmem:[%s4279_s15 + $0x64] ss:$16 sps:$4 sm:$0xff]   ;;  %v4371_v46 = vld [vmem:[%s4279_s15 + $0x4c] ss:$16 sps:$4 sm:$0xff]   ;;  %v4375_v47 = vld [vmem:[%s4279_s15 + $0x48] ss:$16 sps:$4 sm:$0xff]  }
  0x62   : > { %746 = vmatpush1.bf16.msra.mxu0 %v3547_v15  ;;  %859 = vmatpush1.bf16.msra.mxu1 %v3548_v16  ;;  %v4378_v48 = vld [vmem:[%s4279_s15 + $0x6c] ss:$16 sps:$4 sm:$0xff]   ;;  %v4385_v49 = vld [vmem:[%s4279_s15 + $0x60] ss:$16 sps:$4 sm:$0xff]   ;;  %v4389_v50 = vld [vmem:[%s4279_s15 + $0x84] ss:$16 sps:$4 sm:$0xff]  }
  0x63   : > { %747 = vmatprep.subr.bf16.mxu0 %v3549_v17  ;;  %860 = vmatprep.subr.bf16.mxu1 %v3551_v18  ;;  %v4394_v51 = vld [vmem:[%s4279_s15 + $0x68] ss:$16 sps:$4 sm:$0xff]   ;;  %v3581_v52 = vld [vmem:[%s5377_s1 + $0x10] sm:$0xff]   ;;  %v4405_v55 = vld [vmem:[%s4279_s15 + $0x8c] ss:$16 sps:$4 sm:$0xff]   ;;  %s4458_s12 = sadd.s32 2, %s1629_s22 }
  0x64   : > { %v4401_v53 = vld [vmem:[%s4279_s15 + $0x80] ss:$16 sps:$4 sm:$0xff]   ;;  %v4409_v56 = vld [vmem:[%s4279_s15 + $0xa4] ss:$16 sps:$4 sm:$0xff]   ;;  %v4413_v57 = vld [vmem:[%s4279_s15 + $0x88] ss:$16 sps:$4 sm:$0xff]   ;;  %v1793_v9 = vstv %s4458_s12 }
  0x65   : > { %v4418_v58 = vld [vmem:[%s5376_s0] sm:$0xff]  ;;  %v4421_v59 = vld [vmem:[%s4279_s15 + $0xac] ss:$16 sps:$4 sm:$0xff]   ;;  %v4439_v63 = vld [vmem:[%s4279_s15 + $0xa8] ss:$16 sps:$4 sm:$0xff]   ;;  %s1830_s10 = sadd.s32 3, %s4055_s27 }
  0x66   : > { %748 = vmatpush1.bf16.msra.mxu0 %v3553_v19  ;;  %861 = vmatpush1.bf16.msra.mxu1 %v3554_v20  ;;  %vm1392_vm0 = vcmp.lt.s32.totalorder %v1391_v54, %v4418_v58  ;;  %v4429_v61 = vld [vmem:[%s4279_s15 + $0xa0] ss:$16 sps:$4 sm:$0xff]   ;;  %v4435_v62 = vld [vmem:[%s4279_s15 + $0xc4] ss:$16 sps:$4 sm:$0xff]   ;;  %v4444_v1 = vld [vmem:[%s5376_s0 + $0x8] sm:$0xff]  ;;  %vm1794_vm2 = vcmp.lt.s32.totalorder %v1793_v9, %v4418_v58  ;;  %v4493_v13 = vstv %s1830_s10  ;;  %s2030_s20 = ssub.s32 4, %s4055_s27 }
  0x67   : > { %749 = vmatprep.subr.bf16.mxu0 %v3555_v21  ;;  %862 = vmatprep.subr.bf16.mxu1 %v3557_v22  ;;  %v1394_v60 = vsel %vm1392_vm0, 1, %v4069_v0  ;;  %v3588_v2 = vld [vmem:[%s5377_s1 + $0x18] sm:$0xff]   ;;  %v4452_v3 = vld [vmem:[%s4279_s15 + $0xc0] ss:$16 sps:$4 sm:$0xff]   ;;  %vm1393_vm1 = vcmp.lt.s32.totalorder %v1391_v54, %v4444_v1  ;;  %v4463_v5 = vld [vmem:[%s4279_s15 + $0xe4] ss:$16 sps:$4 sm:$0xff]   ;;  %vm1994_vm3 = vcmp.lt.s32.totalorder %v4493_v13, %v4418_v58  ;;  %v4507_v15 = vstv %s2030_s20 }
  0x68   : > { %1397 = vperm.xlu0 %3523, %v1394_v60   ;;  %v4455_v4 = vld [vmem:[%s4279_s15 + $0xcc] ss:$16 sps:$4 sm:$0xff]   ;;  %v4466_v6 = vld [vmem:[%s4279_s15 + $0xc8] ss:$16 sps:$4 sm:$0xff]   ;;  %v1395_v8 = vsel %vm1393_vm1, 1, %v4069_v0  ;;  %v3595_v12 = vld [vmem:[%s5377_s1 + $0x20] sm:$0xff]   ;;  %vm2194_vm4 = vcmp.lt.s32.totalorder %v4507_v15, %v4418_v58  ;;  %vm4612_vm10 = vcmp.lt.s32.totalorder %v1793_v9, %v4444_v1  ;;  %vm1995_vm11 = vcmp.lt.s32.totalorder %v4493_v13, %v4444_v1 }
  0x69   : > { %v4469_v7 = vld [vmem:[%s4279_s15 + $0xec] ss:$16 sps:$4 sm:$0xff]   ;;  %v4477_v10 = vld [vmem:[%s4279_s15 + $0xe0] ss:$16 sps:$4 sm:$0xff]   ;;  %v4484_v11 = vld [vmem:[%s4279_s15 + $0xe8] ss:$16 sps:$4 sm:$0xff]   ;;  %vm2195_vm12 = vcmp.lt.s32.totalorder %v4507_v15, %v4444_v1 }
  0x6a   : > { %750 = vmatpush1.bf16.msra.mxu0 %v3559_v23  ;;  %863 = vmatpush1.bf16.msra.mxu1 %v3560_v24  ;;  %s2230_s17 = smul.u32 4294967293, %s4055_s27  ;;  %v1796_v14 = vsel %vm1794_vm2, 1, %v4069_v0  ;;  %v1996_v16 = vsel %vm1994_vm3, 1, %v4069_v0  ;;  %v3602_v17 = vld [vmem:[%s5377_s1 + $0x28] sm:$0xff]   ;;  %v2196_v19 = vsel %vm2194_vm4, 1, %v4069_v0  ;;  %v3609_v22 = vld [vmem:[%s5377_s1 + $0x30] sm:$0xff]  }
  0x6b   : > { %751 = vmatprep.subr.bf16.mxu0 %v3561_v25  ;;  %864 = vmatprep.subr.bf16.mxu1 %v3563_v26  ;;  %s2431_s24 = smul.u32 4294967291, %s4055_s27  ;;  %v3619_v26 = vld [vmem:[%s5377_s1 + $0x38] sm:$0xff]   ;;  %p433_p11 = scmp.lt.s32.totalorder %s4055_s27, 1 }
  0x6c   : > { %1400 = vperm.xlu0 %3523, %v1395_v8   ;;  %s4509_s18 = sadd.s32 5, %s2230_s17  ;;  %s2632_s9 = smul.u32 4294967289, %s4055_s27 }
  0x6d   : > { %v2394_v18 = vstv %s4509_s18  ;;  %s4520_s16 = sadd.s32 6, %s2431_s24  ;;  %s1428_s2 = smul.u32 5, %s4055_s27 }
  0x6e   : > { %752 = vmatpush1.bf16.msra.mxu0 %v3565_v27  ;;  %865 = vmatpush1.bf16.msra.mxu1 %v3566_v28  ;;  %vm2395_vm5 = vcmp.lt.s32.totalorder %v2394_v18, %v4418_v58  ;;  %v2595_v20 = vstv %s4520_s16  ;;  %s4530_s23 = sadd.s32 7, %s2632_s9  ;;  %v4070_v27 = vmov 0.0|0.0   ;;  %v511_v28 = vlaneseq  ;;  %s1070_s12 = smul.u32 112, %s4055_s27 }
  0x6f   : > { %753 = vmatprep.subr.bf16.mxu0 %v3567_v29  ;;  %866 = vmatprep.subr.bf16.mxu1 %v3569_v30  ;;  %v2397_v21 = vsel %vm2395_vm5, 1, %v4069_v0  ;;  %vm2596_vm6 = vcmp.lt.s32.totalorder %v2595_v20, %v4418_v58  ;;  %v2796_v23 = vstv %s4530_s23  ;;  %s4588_s17 = scalar_select %p433_p11, %s4055_s27, 1  ;;  %vm2396_vm13 = vcmp.lt.s32.totalorder %v2394_v18, %v4444_v1 }
  0x70   : > { %1799 = vperm.xlu0 %3523, %v1796_v14   ;;  %v2598_v24 = vsel %vm2596_vm6, 1, %v4069_v0  ;;  %vm2797_vm7 = vcmp.lt.s32.totalorder %v2796_v23, %v4418_v58  ;;  %v512_v29 = vshrl.u32 %v511_v28, 7  ;;  %s1429_s10 = sadd.s32 1, %s1428_s2  ;;  %vm4651_vm14 = vcmp.lt.s32.totalorder %v2595_v20, %v4444_v1  ;;  %s4709_s18 = sshra.s32 %s1070_s12, 3 }
  0x71   : > { %v2799_v25 = vsel %vm2797_vm7, 1, %v4069_v0  ;;  %s3192_s24 = sshll.u32 %s4588_s17, 2  ;;  %vm2798_vm15 = vcmp.lt.s32.totalorder %v2796_v23, %v4444_v1  ;;  %s3372_s16 = sshll.u32 %s4709_s18, 5 }
  0x72   : > { %754 = vmatpush1.bf16.msra.mxu0 %v3571_v31  ;;  %867 = vmatpush1.bf16.msra.mxu1 %v3572_v32  ;;  %s436_s9 = scalar_lea.vmem %s5380_s4, %s3192_s24  ;;  %v513_v30 = vsub.s32 0, %v512_v29  ;;  %v521_v31 = vsub.s32 2, %v512_v29  ;;  %s1075_s23 = scalar_lea.vmem [#allocation4], %s3372_s16 }
  0x73   : > { %1247 = vmatprep.subr.bf16.mxu0 %v4322_v33  ;;  %1290 = vmatprep.subr.bf16.mxu1 %v4325_v34  ;;  %v509_v32 = vld [vmem:[%s436_s9] sm:$0xf]  ;;  %s3191_s19 = sshll.u32 %s4268_s21, 6  ;;  %s3279_s11 = sshll.u32 %s4709_s18, 2 }
  0x74   : > { %1999 = vperm.xlu0 %3523, %v1996_v16   ;;  %s4730_s21 = scalar_lea.vmem [#allocation9], %s3191_s19  ;;  %s3448_s30 = smul.u32 80, %s4055_s27 }
  0x75   : > { %772 = vmatmul.mubr.bf16.vlgmr.msra.gmra.mrb[0].mxu0 %v3573_v35  ;;  %885 = vmatmul.mubr.bf16.vlgmr.msra.gmra.mrb[0].mxu1 %v3573_v35  ;;  %v517_v35 = vsub.s32 1, %v512_v29  ;;  %s1425_s24 = scalar_lea.vmem %s4730_s21, %s3279_s11 [#allocation9]  ;;  %s3449_s16 = smul.u32 48, %s4055_s27 }
  0x76   : > { %1248 = vmatpush1.bf16.msra.mxu0 %v4331_v36  ;;  %781 = vmatprep.mubr.bf16.mxu0 %v4069_v0  ;;  %s4817_s22 = sadd.s32 16, %s3448_s30  ;;  %p5399_p13 = scmp.ne.s32.totalorder %s5389_s14, 0 }
  0x77   : > { %894 = vmatprep.mubr.bf16.mxu1 %v4069_v0  ;;  %1249 = vmatprep.subr.bf16.mxu0 %v4335_v37  ;;  %s1432_s9 = sshra.s32 %s4817_s22, 3 }
  0x78   : > { %1291 = vmatpush1.bf16.msra.mxu1 %v4339_v38  ;;  %2199 = vperm.xlu0 %3523, %v2196_v19   ;;  %v1797_v19 = vsel %vm4612_vm10, 1, %v4069_v0  ;;  %s3377_s2 = sshll.u32 %s1432_s9, 5  ;;  %s3291_s12 = sshll.u32 %s1432_s9, 2 }
  0x79   : > { %1292 = vmatprep.subr.bf16.mxu1 %v4342_v39  ;;  %s1626_s18 = scalar_lea.vmem %s4730_s21, %s3291_s12 [#allocation9]  ;;  %s3385_s9 = sshll.u32 %s4055_s27, 4 }
  0x7a   : > { %1250 = vmatpush1.bf16.msra.mxu0 %v4347_v40 }
  0x7b   : > { %1251 = vmatprep.subr.bf16.mxu0 %v4352_v41 }
  0x7c   : > { %1293 = vmatpush1.bf16.msra.mxu1 %v4356_v42  ;;  %2400 = vperm.xlu0 %3523, %v2397_v21  }
  0x7d   : > { %782 = vmatmul.mubr.bf16.gmra.mrb[4].mxu0 %v3577_v43  ;;  %895 = vmatmul.mubr.bf16.gmra.mrb[4].mxu1 %v3577_v43 }
  0x7e   : > { %791 = vmatprep.mubr.bf16.mxu0 %v4069_v0  ;;  %904 = vmatprep.mubr.bf16.mxu1 %v4069_v0 }
  0x7f   : > { %1252 = vmatpush1.bf16.msra.mxu0 %v4364_v44  ;;  %1294 = vmatprep.subr.bf16.mxu1 %v4371_v46 }
  0x80   : > { %1253 = vmatprep.subr.bf16.mxu0 %v4367_v45  ;;  %1295 = vmatpush1.bf16.msra.mxu1 %v4375_v47 }
  0x81   : > { %1296 = vmatprep.subr.bf16.mxu1 %v4378_v48  ;;  %2601 = vperm.xlu0 %3523, %v2598_v24   ;;  %v1997_v24 = vsel %vm1995_vm11, 1, %v4069_v0 }
  0x83   : > { %1254 = vmatpush1.bf16.msra.mxu0 %v4385_v49 }
  0x84   : > { %1255 = vmatprep.subr.bf16.mxu0 %v4389_v50  ;;  %1297 = vmatpush1.bf16.msra.mxu1 %v4394_v51 }
  0x85   : > { %792 = vmatmul.mubr.bf16.gmra.mrb[8].mxu0 %v3581_v52  ;;  %905 = vmatmul.mubr.bf16.gmra.mrb[8].mxu1 %v3581_v52 }
  0x86   : > { %801 = vmatprep.mubr.bf16.mxu0 %v4069_v0  ;;  %914 = vmatprep.mubr.bf16.mxu1 %v4069_v0 }
  0x87   : > { %1256 = vmatpush1.bf16.msra.mxu0 %v4401_v53  ;;  %1298 = vmatprep.subr.bf16.mxu1 %v4405_v55 }
  0x88   : > { %1257 = vmatprep.subr.bf16.mxu0 %v4409_v56  ;;  %1299 = vmatpush1.bf16.msra.mxu1 %v4413_v57 }
  0x89   : > { %1300 = vmatprep.subr.bf16.mxu1 %v4421_v59  ;;  %2802 = vperm.xlu0 %3523, %v2799_v25  }
  0x8b   : > { %1258 = vmatpush1.bf16.msra.mxu0 %v4429_v61 }
  0x8c   : > { %1259 = vmatprep.subr.bf16.mxu0 %v4435_v62  ;;  %1301 = vmatpush1.bf16.msra.mxu1 %v4439_v63 }
  0x8d   : > { %802 = vmatmul.mubr.bf16.gmra.mrb[12].mxu0 %v3588_v2  ;;  %915 = vmatmul.mubr.bf16.gmra.mrb[12].mxu1 %v3588_v2 }
  0x8e   : > { %811 = vmatprep.mubr.bf16.mxu0 %v4069_v0  ;;  %924 = vmatprep.mubr.bf16.mxu1 %v4069_v0 }
  0x8f   : > { %1260 = vmatpush1.bf16.msra.mxu0 %v4452_v3  ;;  %1302 = vmatprep.subr.bf16.mxu1 %v4455_v4 }
  0x90   : > { %1261 = vmatprep.subr.bf16.mxu0 %v4463_v5  ;;  %1303 = vmatpush1.bf16.msra.mxu1 %v4466_v6 }
  0x91   : > { %1304 = vmatprep.subr.bf16.mxu1 %v4469_v7 }
  0x93   : > { %1262 = vmatpush1.bf16.msra.mxu0 %v4477_v10 }
  0x94   : > { %1305 = vmatpush1.bf16.msra.mxu1 %v4484_v11  ;;  %1448 = vmatprep.subr.bf16.mxu0 %v4322_v33 }
  0x95   : > { %812 = vmatmul.mubr.bf16.gmra.mrb[16].mxu0 %v3595_v12  ;;  %925 = vmatmul.mubr.bf16.gmra.mrb[16].mxu1 %v3595_v12 }
  0x96   : > { %821 = vmatprep.mubr.bf16.mxu0 %v4069_v0  ;;  %934 = vmatprep.mubr.bf16.mxu1 %v4069_v0 }
  0x97   : > { %1491 = vmatprep.subr.bf16.mxu1 %v4325_v34 }
  0x9d   : > { %822 = vmatmul.mubr.bf16.gmra.mrb[20].mxu0 %v3602_v17  ;;  %935 = vmatmul.mubr.bf16.gmra.mrb[20].mxu1 %v3602_v17 }
  0x9e   : > { %831 = vmatprep.mubr.bf16.mxu0 %v4069_v0  ;;  %944 = vmatprep.mubr.bf16.mxu1 %v4069_v0 }
  0xa5   : > { %832 = vmatmul.mubr.bf16.gmra.mrb[24].mxu0 %v3609_v22  ;;  %945 = vmatmul.mubr.bf16.gmra.mrb[24].mxu1 %v3609_v22 }
  0xa6   : > { %841 = vmatprep.mubr.bf16.mxu0 %v4069_v0  ;;  %954 = vmatprep.mubr.bf16.mxu1 %v4069_v0 }
  0xad   : > { %842 = vmatmul.mubr.bf16.gmra.mrb[28].mxu0 %v3619_v26  ;;  %955 = vmatmul.mubr.bf16.gmra.mrb[28].mxu1 %v3619_v26 }
  0xae   : > { %1279 = vmatprep.mubr.bf16.mxu0 %v4069_v0  ;;  %1322 = vmatprep.mubr.bf16.mxu1 %v4069_v0 }
  0xb5   : > { %1280 = vmatmul.mubr.bf16.vlgmr.msra.gmra.mrb[32].mxu0 %v4070_v27  ;;  %1323 = vmatmul.mubr.bf16.vlgmr.msra.gmra.mrb[32].mxu1 %v4070_v27 }
  0xb6   : > { %1449 = vmatpush1.bf16.msra.mxu0 %v4331_v36  ;;  %1492 = vmatpush1.bf16.msra.mxu1 %v4339_v38  ;;  %v525_v36 = vsub.s32 3, %v512_v29  ;;  %v4601_v38 = vrot.slane %v509_v32, %v517_v35 }
  0xb7   : > { %1450 = vmatprep.subr.bf16.mxu0 %v4335_v37  ;;  %1493 = vmatprep.subr.bf16.mxu1 %v4342_v39  ;;  %v4597_v37 = vrot.slane %v509_v32, %v521_v31 }
  0xb8   : > { %1480 = vmatprep.mubr.bf16.mxu0 %v4069_v0  ;;  %1523 = vmatprep.mubr.bf16.mxu1 %v4069_v0  ;;  %v4603_v39 = vrot.slane %v509_v32, %v525_v36 }
  0xba   : > { %1451 = vmatpush1.bf16.msra.mxu0 %v4347_v40  ;;  %1494 = vmatpush1.bf16.msra.mxu1 %v4356_v42 }
  0xbb   : > { %1452 = vmatprep.subr.bf16.mxu0 %v4352_v41  ;;  %1495 = vmatprep.subr.bf16.mxu1 %v4371_v46 }
  0xbe   : > { %1453 = vmatpush1.bf16.msra.mxu0 %v4364_v44  ;;  %1496 = vmatpush1.bf16.msra.mxu1 %v4375_v47 }
  0xbf   : > { %1454 = vmatprep.subr.bf16.mxu0 %v4367_v45  ;;  %1497 = vmatprep.subr.bf16.mxu1 %v4378_v48 }
  0xc2   : > { %1455 = vmatpush1.bf16.msra.mxu0 %v4385_v49  ;;  %1498 = vmatpush1.bf16.msra.mxu1 %v4394_v51 }
  0xc3   : > { %1456 = vmatprep.subr.bf16.mxu0 %v4389_v50  ;;  %1499 = vmatprep.subr.bf16.mxu1 %v4405_v55 }
  0xc6   : > { %1457 = vmatpush1.bf16.msra.mxu0 %v4401_v53  ;;  %1500 = vmatpush1.bf16.msra.mxu1 %v4413_v57 }
  0xc7   : > { %1458 = vmatprep.subr.bf16.mxu0 %v4409_v56  ;;  %1501 = vmatprep.subr.bf16.mxu1 %v4421_v59 }
  0xca   : > { %1459 = vmatpush1.bf16.msra.mxu0 %v4429_v61  ;;  %1502 = vmatpush1.bf16.msra.mxu1 %v4439_v63 }
  0xcb   : > { %1460 = vmatprep.subr.bf16.mxu0 %v4435_v62  ;;  %1503 = vmatprep.subr.bf16.mxu1 %v4455_v4 }
  0xce   : > { %1461 = vmatpush1.bf16.msra.mxu0 %v4452_v3  ;;  %1504 = vmatpush1.bf16.msra.mxu1 %v4466_v6 }
  0xcf   : > { %1462 = vmatprep.subr.bf16.mxu0 %v4463_v5  ;;  %1505 = vmatprep.subr.bf16.mxu1 %v4469_v7 }
  0xd2   : > { %1463 = vmatpush1.bf16.msra.mxu0 %v4477_v10  ;;  %1506 = vmatpush1.bf16.msra.mxu1 %v4484_v11 }
  0xd3   : > { %1649 = vmatprep.subr.bf16.mxu0 %v4322_v33  ;;  %1692 = vmatprep.subr.bf16.mxu1 %v4325_v34  ;;  %v1592_v33 = vstv %s1429_s10  ;;  %v4595_v34 = vrot.slane %v509_v32, %v513_v30  ;;  %s4822_s10 = scalar_lea.vmem [#allocation4], %s3377_s2  ;;  %s5023_s2 = sadd.s32 48, %s3385_s9 }
  0xd4   : > { %vm1593_vm8 = vcmp.lt.s32.totalorder %v1592_v33, %v4418_v58  ;;  %vm1594_vm9 = vcmp.lt.s32.totalorder %v1592_v33, %v4444_v1  ;;  %s3450_s9 = smul.u32 4294967248, %s4055_s27 }
  0xd5   : > { %v1595_v40 = vsel %vm1593_vm8, 1, %v4069_v0  ;;  %v1596_v43 = vsel %vm1594_vm9, 1, %v4069_v0 }
  0xd6   : > { %1598 = vperm.xlu1 %3524, %v1595_v40  }
  0xda   : > { %1601 = vperm.xlu1 %3524, %v1596_v43  }
  0xde   : > { %1802 = vperm.xlu1 %3524, %v1797_v19  }
  0xe2   : > { %2002 = vperm.xlu1 %3524, %v1997_v24  }
 0x148   : > { %v773_v41 = vpop.f32.mrb[0].mxu0  ;;  %v886_v42 = vpop.f32.mrb[0].mxu1 }
 0x149   : > { %v774_v44 = vadd.f32 %v773_v41, %v4595_v34  ;;  %v887_v45 = vadd.f32 %v886_v42, %v4597_v37  ;;  %v775_v46 = vpop.f32.mrb[1].mxu0  ;;  %v888_v47 = vpop.f32.mrb[1].mxu1  ;;  %v2197_v42 = vsel %vm2195_vm12, 1, %v4069_v0 }
 0x14a   : > { %v776_v54 = vadd.f32 %v775_v46, %v4601_v38  ;;  %v889_v58 = vadd.f32 %v888_v47, %v4603_v39  ;;  %v777_v60 = vpop.f32.mrb[2].mxu0  ;;  %v890_v2 = vpop.f32.mrb[2].mxu1  ;;  %2202 = vperm.xlu1 %3524, %v2197_v42  }
 0x14b   : > { %965 = vst [vmem:[#allocation4] sm:$0xff] %v774_v44  ;;  %967 = vst [vmem:[#allocation4 + $0x10] sm:$0xff] %v887_v45  ;;  %v778_v8 = vadd.f32 %v777_v60, %v4595_v34  ;;  %v891_v12 = vadd.f32 %v890_v2, %v4597_v37  ;;  %v779_v14 = vpop.f32.mrb[3].mxu0  ;;  %v892_v16 = vpop.f32.mrb[3].mxu1  ;;  %v2398_v45 = vsel %vm2396_vm13, 1, %v4069_v0 }
 0x14c   : > { %966 = vst [vmem:[#allocation4 + $0x8] sm:$0xff] %v776_v54  ;;  %968 = vst [vmem:[#allocation4 + $0x18] sm:$0xff] %v889_v58  ;;  %v780_v9 = vadd.f32 %v779_v14, %v4601_v38  ;;  %v893_v17 = vadd.f32 %v892_v16, %v4603_v39 }
 0x14d   : > { %969 = vst [vmem:[#allocation4 + $0x20] sm:$0xff] %v778_v8  ;;  %971 = vst [vmem:[#allocation4 + $0x30] sm:$0xff] %v891_v12 }
 0x14e   : > { %970 = vst [vmem:[#allocation4 + $0x28] sm:$0xff] %v780_v9  ;;  %972 = vst [vmem:[#allocation4 + $0x38] sm:$0xff] %v893_v17  ;;  %2403 = vperm.xlu1 %3524, %v2398_v45   ;;  %v2599_v17 = vsel %vm4651_vm14, 1, %v4069_v0 }
 0x150   : > { %v783_v21 = vpop.f32.mrb[4].mxu0  ;;  %v896_v22 = vpop.f32.mrb[4].mxu1 }
 0x151   : > { %v784_v25 = vadd.f32 %v783_v21, %v4595_v34  ;;  %v897_v26 = vadd.f32 %v896_v22, %v4597_v37  ;;  %v785_v27 = vpop.f32.mrb[5].mxu0  ;;  %v898_v28 = vpop.f32.mrb[5].mxu1  ;;  %v2800_v22 = vsel %vm2798_vm15, 1, %v4069_v0 }
 0x152   : > { %v786_v29 = vadd.f32 %v785_v27, %v4601_v38  ;;  %v899_v13 = vadd.f32 %v898_v28, %v4603_v39  ;;  %v787_v30 = vpop.f32.mrb[6].mxu0  ;;  %v900_v31 = vpop.f32.mrb[6].mxu1  ;;  %2604 = vperm.xlu1 %3524, %v2599_v17  }
 0x153   : > { %973 = vst [vmem:[#allocation4 + $0x40] sm:$0xff] %v784_v25  ;;  %975 = vst [vmem:[#allocation4 + $0x50] sm:$0xff] %v897_v26  ;;  %v788_v32 = vadd.f32 %v787_v30, %v4595_v34  ;;  %v901_v35 = vadd.f32 %v900_v31, %v4597_v37  ;;  %v789_v36 = vpop.f32.mrb[7].mxu0  ;;  %v902_v33 = vpop.f32.mrb[7].mxu1 }
 0x154   : > { %974 = vst [vmem:[#allocation4 + $0x48] sm:$0xff] %v786_v29  ;;  %976 = vst [vmem:[#allocation4 + $0x58] sm:$0xff] %v899_v13  ;;  %v790_v40 = vadd.f32 %v789_v36, %v4601_v38  ;;  %v903_v41 = vadd.f32 %v902_v33, %v4603_v39 }
 0x155   : > { %977 = vst [vmem:[#allocation4 + $0x60] sm:$0xff] %v788_v32  ;;  %979 = vst [vmem:[#allocation4 + $0x70] sm:$0xff] %v901_v35 }
 0x156   : > { %978 = vst [vmem:[#allocation4 + $0x68] sm:$0xff] %v790_v40  ;;  %980 = vst [vmem:[#allocation4 + $0x78] sm:$0xff] %v903_v41  ;;  %2805 = vperm.xlu1 %3524, %v2800_v22  }
 0x158   : > { %v793_v43 = vpop.f32.mrb[8].mxu0  ;;  %v906_v44 = vpop.f32.mrb[8].mxu1 }
 0x159   : > { %v794_v46 = vadd.f32 %v793_v43, %v4595_v34  ;;  %v907_v47 = vadd.f32 %v906_v44, %v4597_v37  ;;  %v795_v52 = vpop.f32.mrb[9].mxu0  ;;  %v908_v54 = vpop.f32.mrb[9].mxu1 }
 0x15a   : > { %v796_v18 = vadd.f32 %v795_v52, %v4601_v38  ;;  %v909_v58 = vadd.f32 %v908_v54, %v4603_v39  ;;  %v797_v60 = vpop.f32.mrb[10].mxu0  ;;  %v910_v2 = vpop.f32.mrb[10].mxu1 }
 0x15b   : > { %981 = vst [vmem:[#allocation4 + $0x80] sm:$0xff] %v794_v46  ;;  %983 = vst [vmem:[#allocation4 + $0x90] sm:$0xff] %v907_v47  ;;  %v798_v8 = vadd.f32 %v797_v60, %v4595_v34  ;;  %v911_v12 = vadd.f32 %v910_v2, %v4597_v37  ;;  %v799_v14 = vpop.f32.mrb[11].mxu0  ;;  %v912_v16 = vpop.f32.mrb[11].mxu1 }
 0x15c   : > { %982 = vst [vmem:[#allocation4 + $0x88] sm:$0xff] %v796_v18  ;;  %984 = vst [vmem:[#allocation4 + $0x98] sm:$0xff] %v909_v58  ;;  %v800_v20 = vadd.f32 %v799_v14, %v4601_v38  ;;  %v913_v9 = vadd.f32 %v912_v16, %v4603_v39 }
 0x15d   : > { %985 = vst [vmem:[#allocation4 + $0xa0] sm:$0xff] %v798_v8  ;;  %987 = vst [vmem:[#allocation4 + $0xb0] sm:$0xff] %v911_v12 }
 0x15e   : > { %986 = vst [vmem:[#allocation4 + $0xa8] sm:$0xff] %v800_v20  ;;  %988 = vst [vmem:[#allocation4 + $0xb8] sm:$0xff] %v913_v9 }
 0x160   : > { %v803_v19 = vpop.f32.mrb[12].mxu0  ;;  %v916_v21 = vpop.f32.mrb[12].mxu1 }
 0x161   : > { %v804_v24 = vadd.f32 %v803_v19, %v4595_v34  ;;  %v917_v25 = vadd.f32 %v916_v21, %v4597_v37  ;;  %v805_v26 = vpop.f32.mrb[13].mxu0  ;;  %v918_v27 = vpop.f32.mrb[13].mxu1 }
 0x162   : > { %v806_v28 = vadd.f32 %v805_v26, %v4601_v38  ;;  %v919_v29 = vadd.f32 %v918_v27, %v4603_v39  ;;  %v807_v13 = vpop.f32.mrb[14].mxu0  ;;  %v920_v30 = vpop.f32.mrb[14].mxu1 }
 0x163   : > { %989 = vst [vmem:[#allocation4 + $0xc0] sm:$0xff] %v804_v24  ;;  %991 = vst [vmem:[#allocation4 + $0xd0] sm:$0xff] %v917_v25  ;;  %v808_v1 = vadd.f32 %v807_v13, %v4595_v34  ;;  %v921_v23 = vadd.f32 %v920_v30, %v4597_v37  ;;  %v809_v31 = vpop.f32.mrb[15].mxu0  ;;  %v922_v32 = vpop.f32.mrb[15].mxu1 }
 0x164   : > { %990 = vst [vmem:[#allocation4 + $0xc8] sm:$0xff] %v806_v28  ;;  %992 = vst [vmem:[#allocation4 + $0xd8] sm:$0xff] %v919_v29  ;;  %v810_v35 = vadd.f32 %v809_v31, %v4601_v38  ;;  %v923_v36 = vadd.f32 %v922_v32, %v4603_v39 }
 0x165   : > { %993 = vst [vmem:[#allocation4 + $0xe0] sm:$0xff] %v808_v1  ;;  %995 = vst [vmem:[#allocation4 + $0xf0] sm:$0xff] %v921_v23 }
 0x166   : > { %994 = vst [vmem:[#allocation4 + $0xe8] sm:$0xff] %v810_v35  ;;  %996 = vst [vmem:[#allocation4 + $0xf8] sm:$0xff] %v923_v36 }
 0x168   : > { %v813_v33 = vpop.f32.mrb[16].mxu0  ;;  %v926_v40 = vpop.f32.mrb[16].mxu1 }
 0x169   : > { %v814_v41 = vadd.f32 %v813_v33, %v4595_v34  ;;  %v927_v42 = vadd.f32 %v926_v40, %v4597_v37  ;;  %v815_v43 = vpop.f32.mrb[17].mxu0  ;;  %v928_v44 = vpop.f32.mrb[17].mxu1 }
 0x16a   : > { %v816_v45 = vadd.f32 %v815_v43, %v4601_v38  ;;  %v929_v46 = vadd.f32 %v928_v44, %v4603_v39  ;;  %v817_v47 = vpop.f32.mrb[18].mxu0  ;;  %v930_v52 = vpop.f32.mrb[18].mxu1 }
 0x16b   : > { %997 = vst [vmem:[#allocation4 + $0x100] sm:$0xff] %v814_v41  ;;  %999 = vst [vmem:[#allocation4 + $0x110] sm:$0xff] %v927_v42  ;;  %v818_v54 = vadd.f32 %v817_v47, %v4595_v34  ;;  %v931_v15 = vadd.f32 %v930_v52, %v4597_v37  ;;  %v819_v18 = vpop.f32.mrb[19].mxu0  ;;  %v932_v58 = vpop.f32.mrb[19].mxu1 }
 0x16c   : > { %998 = vst [vmem:[#allocation4 + $0x108] sm:$0xff] %v816_v45  ;;  %1000 = vst [vmem:[#allocation4 + $0x118] sm:$0xff] %v929_v46  ;;  %v820_v60 = vadd.f32 %v819_v18, %v4601_v38  ;;  %v933_v2 = vadd.f32 %v932_v58, %v4603_v39 }
 0x16d   : > { %1001 = vst [vmem:[#allocation4 + $0x120] sm:$0xff] %v818_v54  ;;  %1003 = vst [vmem:[#allocation4 + $0x130] sm:$0xff] %v931_v15 }
 0x16e   : > { %1002 = vst [vmem:[#allocation4 + $0x128] sm:$0xff] %v820_v60  ;;  %1004 = vst [vmem:[#allocation4 + $0x138] sm:$0xff] %v933_v2 }
 0x170   : > { %v823_v8 = vpop.f32.mrb[20].mxu0  ;;  %v936_v12 = vpop.f32.mrb[20].mxu1 }
 0x171   : > { %v824_v14 = vadd.f32 %v823_v8, %v4595_v34  ;;  %v937_v16 = vadd.f32 %v936_v12, %v4597_v37  ;;  %v825_v20 = vpop.f32.mrb[21].mxu0  ;;  %v938_v9 = vpop.f32.mrb[21].mxu1 }
 0x172   : > { %v826_v17 = vadd.f32 %v825_v20, %v4601_v38  ;;  %v939_v19 = vadd.f32 %v938_v9, %v4603_v39  ;;  %v827_v21 = vpop.f32.mrb[22].mxu0  ;;  %v940_v22 = vpop.f32.mrb[22].mxu1 }
 0x173   : > { %1005 = vst [vmem:[#allocation4 + $0x140] sm:$0xff] %v824_v14  ;;  %1007 = vst [vmem:[#allocation4 + $0x150] sm:$0xff] %v937_v16  ;;  %v828_v24 = vadd.f32 %v827_v21, %v4595_v34  ;;  %v941_v25 = vadd.f32 %v940_v22, %v4597_v37  ;;  %v829_v26 = vpop.f32.mrb[23].mxu0  ;;  %v942_v27 = vpop.f32.mrb[23].mxu1 }
 0x174   : > { %1006 = vst [vmem:[#allocation4 + $0x148] sm:$0xff] %v826_v17  ;;  %1008 = vst [vmem:[#allocation4 + $0x158] sm:$0xff] %v939_v19  ;;  %v830_v28 = vadd.f32 %v829_v26, %v4601_v38  ;;  %v943_v29 = vadd.f32 %v942_v27, %v4603_v39 }
 0x175   : > { %1009 = vst [vmem:[#allocation4 + $0x160] sm:$0xff] %v828_v24  ;;  %1011 = vst [vmem:[#allocation4 + $0x170] sm:$0xff] %v941_v25 }
 0x176   : > { %1010 = vst [vmem:[#allocation4 + $0x168] sm:$0xff] %v830_v28  ;;  %1012 = vst [vmem:[#allocation4 + $0x178] sm:$0xff] %v943_v29 }
 0x178   : > { %v833_v13 = vpop.f32.mrb[24].mxu0  ;;  %v946_v30 = vpop.f32.mrb[24].mxu1 }
 0x179   : > { %v834_v1 = vadd.f32 %v833_v13, %v4595_v34  ;;  %v947_v23 = vadd.f32 %v946_v30, %v4597_v37  ;;  %v835_v31 = vpop.f32.mrb[25].mxu0  ;;  %v948_v32 = vpop.f32.mrb[25].mxu1 }
 0x17a   : > { %v836_v35 = vadd.f32 %v835_v31, %v4601_v38  ;;  %v949_v36 = vadd.f32 %v948_v32, %v4603_v39  ;;  %v837_v33 = vpop.f32.mrb[26].mxu0  ;;  %v950_v40 = vpop.f32.mrb[26].mxu1 }
 0x17b   : > { %1013 = vst [vmem:[#allocation4 + $0x180] sm:$0xff] %v834_v1  ;;  %1015 = vst [vmem:[#allocation4 + $0x190] sm:$0xff] %v947_v23  ;;  %v838_v41 = vadd.f32 %v837_v33, %v4595_v34  ;;  %v951_v42 = vadd.f32 %v950_v40, %v4597_v37  ;;  %v839_v43 = vpop.f32.mrb[27].mxu0  ;;  %v952_v44 = vpop.f32.mrb[27].mxu1 }
 0x17c   : > { %1014 = vst [vmem:[#allocation4 + $0x188] sm:$0xff] %v836_v35  ;;  %1016 = vst [vmem:[#allocation4 + $0x198] sm:$0xff] %v949_v36  ;;  %v840_v45 = vadd.f32 %v839_v43, %v4601_v38  ;;  %v953_v46 = vadd.f32 %v952_v44, %v4603_v39 }
 0x17d   : > { %1017 = vst [vmem:[#allocation4 + $0x1a0] sm:$0xff] %v838_v41  ;;  %1019 = vst [vmem:[#allocation4 + $0x1b0] sm:$0xff] %v951_v42 }
 0x17e   : > { %1018 = vst [vmem:[#allocation4 + $0x1a8] sm:$0xff] %v840_v45  ;;  %1020 = vst [vmem:[#allocation4 + $0x1b8] sm:$0xff] %v953_v46 }
 0x180   : > { %v843_v47 = vpop.f32.mrb[28].mxu0  ;;  %v956_v52 = vpop.f32.mrb[28].mxu1 }
 0x181   : > { %v844_v54 = vadd.f32 %v843_v47, %v4595_v34  ;;  %v957_v15 = vadd.f32 %v956_v52, %v4597_v37  ;;  %v845_v18 = vpop.f32.mrb[29].mxu0  ;;  %v958_v58 = vpop.f32.mrb[29].mxu1 }
 0x182   : > { %v846_v60 = vadd.f32 %v845_v18, %v4601_v38  ;;  %v959_v2 = vadd.f32 %v958_v58, %v4603_v39  ;;  %v847_v8 = vpop.f32.mrb[30].mxu0  ;;  %v960_v12 = vpop.f32.mrb[30].mxu1 }
 0x183   : > { %1021 = vst [vmem:[#allocation4 + $0x1c0] sm:$0xff] %v844_v54  ;;  %1023 = vst [vmem:[#allocation4 + $0x1d0] sm:$0xff] %v957_v15  ;;  %v848_v14 = vadd.f32 %v847_v8, %v4595_v34  ;;  %v961_v16 = vadd.f32 %v960_v12, %v4597_v37  ;;  %v849_v20 = vpop.f32.mrb[31].mxu0  ;;  %v962_v9 = vpop.f32.mrb[31].mxu1 }
 0x184   : > { %1022 = vst [vmem:[#allocation4 + $0x1c8] sm:$0xff] %v846_v60  ;;  %1024 = vst [vmem:[#allocation4 + $0x1d8] sm:$0xff] %v959_v2  ;;  %v850_v17 = vadd.f32 %v849_v20, %v4601_v38  ;;  %v963_v19 = vadd.f32 %v962_v9, %v4603_v39 }
 0x185   : > { %1025 = vst [vmem:[#allocation4 + $0x1e0] sm:$0xff] %v848_v14  ;;  %1027 = vst [vmem:[#allocation4 + $0x1f0] sm:$0xff] %v961_v16 }
 0x186   : > { %1026 = vst [vmem:[#allocation4 + $0x1e8] sm:$0xff] %v850_v17  ;;  %1028 = vst [vmem:[#allocation4 + $0x1f8] sm:$0xff] %v963_v19 }
 0x188   : > { %v1281_v21 = vpop.f32.mrb[32].mxu0  ;;  %v1324_v34 = vpop.f32.mrb[32].mxu1 }
 0x189   : > { %v1283_v22 = vpop.f32.mrb[33].mxu0  ;;  %v1326_v37 = vpop.f32.mrb[33].mxu1 }
 0x18a   : > { %v1285_v24 = vpop.f32.mrb[34].mxu0  ;;  %v1328_v25 = vpop.f32.mrb[34].mxu1 }
 0x18b   : > { %v1287_v26 = vpop.f32.mrb[35].mxu0  ;;  %v1330_v27 = vpop.f32.mrb[35].mxu1 }
 0x18d   : > { %v1076_v38 = vld [vmem:[%s1075_s23] sm:$0xff]  ;;  %v1077_v28 = vld [vmem:[%s1075_s23 + $0x8] sm:$0xff]  ;;  %v1079_v33 = vld [vmem:[%s1075_s23 + $0x18] sm:$0xff] }
 0x18e   : > { %v1080_v39 = vld [vmem:[%s1075_s23 + $0x20] sm:$0xff]  ;;  %v1333_v29 = vadd.f32 %v1281_v21, %v1076_v38  ;;  %v1334_v13 = vadd.f32 %v1283_v22, %v1077_v28  ;;  %v1081_v1 = vld [vmem:[%s1075_s23 + $0x28] sm:$0xff]  ;;  %v1083_v40 = vld [vmem:[%s1075_s23 + $0x38] sm:$0xff]  ;;  %v1336_v42 = vadd.f32 %v1326_v37, %v1079_v33 }
 0x18f   : > { %v1337_v30 = vadd.f32 %v1285_v24, %v1080_v39  ;;  %v1338_v23 = vadd.f32 %v1287_v26, %v1081_v1  ;;  %v1078_v41 = vld [vmem:[%s1075_s23 + $0x10] sm:$0xff]  ;;  %v1340_v44 = vadd.f32 %v1330_v27, %v1083_v40  ;;  %v4718_v39 = vpop.permute.xlu0 %1397 }
 0x190   : > { %v3271_v31 = vmul.f32 -1.442695, %v1333_v29  ;;  %v3273_v32 = vmul.f32 -1.442695, %v1334_v13  ;;  %v1082_v43 = vld [vmem:[%s1075_s23 + $0x30] sm:$0xff]  ;;  %v1335_v45 = vadd.f32 %v1324_v34, %v1078_v41  ;;  %vm1402_vm0 = vcmp.eq.s32.totalorder %v4718_v39, 1 }
 0x191   : > { %v3272_v35 = vmul.f32 -1.442695, %v1337_v30  ;;  %v3274_v36 = vmul.f32 -1.442695, %v1338_v23  ;;  %v3275_v46 = vmul.f32 -1.442695, %v1336_v42  ;;  %v1339_v47 = vadd.f32 %v1328_v25, %v1082_v43 }
 0x192   : > { %3629 = vpow2.f32 %v3271_v31  ;;  %v3276_v52 = vmul.f32 -1.442695, %v1340_v44  ;;  %v4744_v41 = vld [vmem:[%s4279_s15] ss:$16 sps:$4 sm:$0xff]   ;;  %v4748_v42 = vld [vmem:[%s4279_s15 + $0x8] ss:$16 sps:$4 sm:$0xff]  }
 0x193   : > { %3631 = vpow2.f32 %v3273_v32  ;;  %v4727_v32 = vpop.permute.xlu0 %1400  ;;  %v4752_v43 = vld [vmem:[%s4279_s15 + $0x24] ss:$16 sps:$4 sm:$0xff]   ;;  %v4756_v44 = vld [vmem:[%s4279_s15 + $0x2c] ss:$16 sps:$4 sm:$0xff]   ;;  %s4951_s23 = sadd.s32 32, %s3449_s16 }
 0x194   : > { %3633 = vpow2.f32 %v3272_v35  ;;  %vm1403_vm1 = vcmp.eq.s32.totalorder %v4727_v32, 1  ;;  %s1633_s19 = sshra.s32 %s4951_s23, 3 }
 0x195   : > { %3635 = vpow2.f32 %v3274_v36  ;;  %vm3453_vm2 = vmpackc.low %vm1403_vm1, %vm1402_vm0  ;;  %s3382_s11 = sshll.u32 %s1633_s19, 5  ;;  %s3303_s30 = sshll.u32 %s1633_s19, 2 }
 0x196   : > { %3637 = vtanh.f32 %v1335_v45  ;;  %v4762_v45 = vld [vmem:[%s4279_s15 + $0x20] ss:$16 sps:$4 sm:$0xff]   ;;  %s1827_s22 = scalar_lea.vmem %s4730_s21, %s3303_s30 [#allocation9]  ;;  %s5096_s19 = sshll.u32 %s2030_s20, 4 }
 0x197   : > { %3639 = vpow2.f32 %v3275_v46  ;;  %v4766_v46 = vld [vmem:[%s4279_s15 + $0x28] ss:$16 sps:$4 sm:$0xff]  }
 0x198   : > { %3641 = vtanh.f32 %v1339_v47  ;;  %v4770_v47 = vld [vmem:[%s4279_s15 + $0x44] ss:$16 sps:$4 sm:$0xff]  }
 0x199   : > { %3643 = vpow2.f32 %v3276_v52  ;;  %v4774_v52 = vld [vmem:[%s4279_s15 + $0x4c] ss:$16 sps:$4 sm:$0xff]  }
 0x19c   : > { %v3630_v54 = vpop.eup %3629 }
 0x19d   : > { %v3632_v15 = vpop.eup %3631  ;;  %v1349_v18 = vadd.f32 1.0, %v3630_v54  ;;  %v4778_v54 = vld [vmem:[%s4279_s15 + $0x40] ss:$16 sps:$4 sm:$0xff]  }
 0x19e   : > { %v3634_v58 = vpop.eup %3633  ;;  %v1361_v60 = vadd.f32 1.0, %v3632_v15  ;;  %v4782_v15 = vld [vmem:[%s4279_s15 + $0x48] ss:$16 sps:$4 sm:$0xff]  }
 0x19f   : > { %v3636_v2 = vpop.eup %3635  ;;  %3645 = vrcp.f32 %v1349_v18  ;;  %v1350_v8 = vadd.f32 1.0, %v3634_v58  ;;  %v4786_v18 = vld [vmem:[%s4279_s15 + $0x64] ss:$16 sps:$4 sm:$0xff]  }
 0x1a0   : > { %3647 = vrcp.f32 %v1361_v60  ;;  %v1362_v12 = vadd.f32 1.0, %v3636_v2  ;;  %v3638_v14 = vpop.eup %3637 }
 0x1a1   : > { %3649 = vrcp.f32 %v1350_v8  ;;  %v3640_v16 = vpop.eup %3639  ;;  %v1440_v8 = vld [vmem:[%s4822_s10 + $0x18] sm:$0xff] }
 0x1a2   : > { %3651 = vrcp.f32 %v1362_v12  ;;  %v3642_v20 = vpop.eup %3641  ;;  %v1375_v21 = vadd.f32 1.0, %v3640_v16 }
 0x1a3   : > { %v3644_v9 = vpop.eup %3643 }
 0x1a4   : > { %v1376_v25 = vadd.f32 1.0, %v3644_v9  ;;  %3653 = vrcp.f32 %v1375_v21 }
 0x1a9   : > { %v3646_v17 = vpop.eup %3645 }
 0x1aa   : > { %v3648_v19 = vpop.eup %3647  ;;  %v1383_v34 = vmul.f32 %v3646_v17, %v3638_v14  ;;  %v1439_v14 = vld [vmem:[%s4822_s10 + $0x10] sm:$0xff] }
 0x1ab   : > { %v3650_v22 = vpop.eup %3649  ;;  %v1381_v37 = vmul.f32 0.0, %v3648_v19  ;;  %v1443_v17 = vld [vmem:[%s4822_s10 + $0x30] sm:$0xff] }
 0x1ac   : > { %v3652_v24 = vpop.eup %3651  ;;  %v1384_v26 = vmul.f32 %v3650_v22, %v3642_v20  ;;  %v1444_v20 = vld [vmem:[%s4822_s10 + $0x38] sm:$0xff] }
 0x1ad   : > { %v4712_v27 = vadd.f32 %v1383_v34, %v1381_v37  ;;  %v1382_v38 = vmul.f32 0.0, %v3652_v24 }
 0x1ae   : > { %v3654_v29 = vpop.eup %3653 }
 0x1af   : > { %3655 = vtanh.f32 %v4712_v27  ;;  %v4715_v28 = vadd.f32 %v1384_v26, %v1382_v38 }
 0x1b0   : > { %3657 = vrcp.f32 %v1376_v25 }
 0x1b1   : > { %3659 = vtanh.f32 %v4715_v28 }
 0x1b9   : > { %v3656_v13 = vpop.eup %3655 }
 0x1ba   : > { %v3658_v30 = vpop.eup %3657  ;;  %v1389_v1 = vmul.f32 %v3656_v13, %v3654_v29 }
 0x1bb   : > { %v3660_v23 = vpop.eup %3659 }
 0x1bc   : > { %v4725_v31 = vsel %vm1402_vm0, %v1389_v1, 0.0  ;;  %v1390_v35 = vmul.f32 %v3660_v23, %v3658_v30 }
 0x1be   : > { %v4735_v36 = vsel %vm1403_vm1, %v1390_v35, 0.0  ;;  %v3454_v33 = vpack.c.bf16 %v1390_v35, %v1389_v1 }
 0x1bf   : > { %v3411_v40 = vpack.c.bf16 %v4735_v36, %v4725_v31 }
 0x1c0   : > { %3455 = vmatmul.mubr.msk.bf16.vlgmr.msra.gmra.mrb[36].mxu0 %vm3453_vm2, %v3454_v33  ;;  %3458 = vmatmul.mubr.msk.bf16.vlgmr.msra.gmra.mrb[36].mxu1 %vm3453_vm2, %v3454_v33  ;;  %v1599_v33 = vpop.permute.xlu1 %1598 }
 0x1c1   : > { %3412 = vst [vmem:[%s1425_s24] sm:$0xff] %v3411_v40   ;;  %1650 = vmatpush1.bf16.msra.mxu0 %v4744_v41  ;;  %1693 = vmatpush1.bf16.msra.mxu1 %v4748_v42  ;;  %vm1603_vm3 = vcmp.eq.s32.totalorder %v1599_v33, 1  ;;  %s4956_s24 = scalar_lea.vmem [#allocation4], %s3382_s11  ;;  %s2033_s11 = sshra.s32 %s5096_s19, 3 }
 0x1c2   : > { %1651 = vmatprep.subr.bf16.mxu0 %v4752_v43  ;;  %1694 = vmatprep.subr.bf16.mxu1 %v4756_v44  ;;  %s3327_s20 = sshll.u32 %s2033_s11, 2  ;;  %s3451_s19 = smul.u32 4294967216, %s4055_s27 }
 0x1c3   : > { %1681 = vmatprep.mubr.bf16.mxu0 %v4069_v0  ;;  %1724 = vmatprep.mubr.bf16.mxu1 %v4069_v0 }
 0x1c5   : > { %1652 = vmatpush1.bf16.msra.mxu0 %v4762_v45  ;;  %1695 = vmatpush1.bf16.msra.mxu1 %v4766_v46 }
 0x1c6   : > { %1653 = vmatprep.subr.bf16.mxu0 %v4770_v47  ;;  %1696 = vmatprep.subr.bf16.mxu1 %v4774_v52 }
 0x1c9   : > { %1654 = vmatpush1.bf16.msra.mxu0 %v4778_v54  ;;  %1697 = vmatpush1.bf16.msra.mxu1 %v4782_v15 }
 0x1ca   : > { %1655 = vmatprep.subr.bf16.mxu0 %v4786_v18  ;;  %1698 = vmatprep.subr.bf16.mxu1 %v4378_v48  ;;  %v4809_v48 = vld [vmem:[%s4279_s15 + $0x4] ss:$16 sps:$4 sm:$0xff]  }
 0x1cd   : > { %1656 = vmatpush1.bf16.msra.mxu0 %v4385_v49  ;;  %1699 = vmatpush1.bf16.msra.mxu1 %v4394_v51  ;;  %v4813_v49 = vld [vmem:[%s4279_s15 + $0xc] ss:$16 sps:$4 sm:$0xff]  }
 0x1ce   : > { %1657 = vmatprep.subr.bf16.mxu0 %v4389_v50  ;;  %1700 = vmatprep.subr.bf16.mxu1 %v4405_v55  ;;  %v1437_v50 = vld [vmem:[%s4822_s10] sm:$0xff] }
 0x1d1   : > { %1658 = vmatpush1.bf16.msra.mxu0 %v4401_v53  ;;  %1701 = vmatpush1.bf16.msra.mxu1 %v4413_v57 }
 0x1d2   : > { %1659 = vmatprep.subr.bf16.mxu0 %v4409_v56  ;;  %1702 = vmatprep.subr.bf16.mxu1 %v4421_v59  ;;  %v1438_v56 = vld [vmem:[%s4822_s10 + $0x8] sm:$0xff] }
 0x1d5   : > { %1660 = vmatpush1.bf16.msra.mxu0 %v4429_v61  ;;  %1703 = vmatpush1.bf16.msra.mxu1 %v4439_v63 }
 0x1d6   : > { %1661 = vmatprep.subr.bf16.mxu0 %v4435_v62  ;;  %1704 = vmatprep.subr.bf16.mxu1 %v4455_v4  ;;  %v1441_v62 = vld [vmem:[%s4822_s10 + $0x20] sm:$0xff] }
 0x1d9   : > { %1662 = vmatpush1.bf16.msra.mxu0 %v4452_v3  ;;  %1705 = vmatpush1.bf16.msra.mxu1 %v4466_v6  ;;  %v1442_v6 = vld [vmem:[%s4822_s10 + $0x28] sm:$0xff]  ;;  %s1833_s10 = sshra.s32 %s5023_s2, 3  ;;  %s5191_s2 = sadd.s32 80, %s3450_s9 }
 0x1da   : > { %1663 = vmatprep.subr.bf16.mxu0 %v4463_v5  ;;  %1706 = vmatprep.subr.bf16.mxu1 %v4469_v7  ;;  %s3387_s12 = sshll.u32 %s1833_s10, 5  ;;  %s3315_s16 = sshll.u32 %s1833_s10, 2 }
 0x1db   : > { %s2027_s23 = scalar_lea.vmem %s4730_s21, %s3315_s16 [#allocation9]  ;;  %s2234_s10 = sshra.s32 %s5191_s2, 3 }
 0x1dc   : > { %s3339_s16 = sshll.u32 %s2234_s10, 2  ;;  %s3452_s9 = smul.u32 4294967184, %s4055_s27 }
 0x1dd   : > { %1664 = vmatpush1.bf16.msra.mxu0 %v4477_v10  ;;  %1707 = vmatpush1.bf16.msra.mxu1 %v4484_v11 }
 0x1de   : > { %1849 = vmatprep.subr.bf16.mxu0 %v4809_v48  ;;  %1892 = vmatprep.subr.bf16.mxu1 %v4813_v49  ;;  %s5299_s2 = sadd.s32 112, %s3452_s9 }
 0x293   : > { %v1482_v51 = vpop.f32.mrb[36].mxu0  ;;  %v1525_v53 = vpop.f32.mrb[36].mxu1 }
 0x294   : > { %v1534_v55 = vadd.f32 %v1482_v51, %v1437_v50  ;;  %v1484_v57 = vpop.f32.mrb[37].mxu0  ;;  %v1527_v59 = vpop.f32.mrb[37].mxu1  ;;  %v1536_v16 = vadd.f32 %v1525_v53, %v1439_v14  ;;  %v1410_v50 = vsel %vm1402_vm0, %v4712_v27, 0.0 }
 0x295   : > { %v1535_v61 = vadd.f32 %v1484_v57, %v1438_v56  ;;  %v1486_v63 = vpop.f32.mrb[38].mxu0  ;;  %v1529_v3 = vpop.f32.mrb[38].mxu1  ;;  %v1537_v12 = vadd.f32 %v1527_v59, %v1440_v8 }
 0x296   : > { %v3283_v4 = vmul.f32 -1.442695, %v1534_v55  ;;  %v1538_v5 = vadd.f32 %v1486_v63, %v1441_v62  ;;  %v1488_v7 = vpop.f32.mrb[39].mxu0  ;;  %v1531_v10 = vpop.f32.mrb[39].mxu1  ;;  %v1540_v21 = vadd.f32 %v1529_v3, %v1443_v17  ;;  %v1411_v63 = vsel %vm1403_vm1, %v4715_v28, 0.0 }
 0x297   : > { %v3285_v11 = vmul.f32 -1.442695, %v1535_v61  ;;  %v1539_v58 = vadd.f32 %v1488_v7, %v1442_v6  ;;  %v3287_v9 = vmul.f32 -1.442695, %v1537_v12  ;;  %v1541_v19 = vadd.f32 %v1531_v10, %v1444_v20  ;;  %v1602_v27 = vpop.permute.xlu1 %1601  ;;  %v4881_v20 = vld [vmem:[%s4279_s15 + $0x68] ss:$16 sps:$4 sm:$0xff]  }
 0x298   : > { %3661 = vpow2.f32 %v3283_v4  ;;  %v3284_v60 = vmul.f32 -1.442695, %v1538_v5  ;;  %vm1604_vm4 = vcmp.eq.s32.totalorder %v1602_v27, 1  ;;  %v4889_v17 = vld [vmem:[%s4279_s15 + $0x8c] ss:$16 sps:$4 sm:$0xff]  }
 0x299   : > { %3663 = vpow2.f32 %v3285_v11  ;;  %v3286_v2 = vmul.f32 -1.442695, %v1539_v58  ;;  %v3288_v24 = vmul.f32 -1.442695, %v1541_v19  ;;  %v4893_v19 = vld [vmem:[%s4279_s15 + $0x80] ss:$16 sps:$4 sm:$0xff]  }
 0x29a   : > { %3665 = vpow2.f32 %v3284_v60 }
 0x29b   : > { %3667 = vpow2.f32 %v3286_v2 }
 0x29c   : > { %3669 = vtanh.f32 %v1536_v16 }
 0x29d   : > { %3671 = vpow2.f32 %v3287_v9  ;;  %v4885_v9 = vld [vmem:[%s4279_s15 + $0x84] ss:$16 sps:$4 sm:$0xff]  }
 0x29e   : > { %3673 = vtanh.f32 %v1540_v21  ;;  %v4897_v21 = vld [vmem:[%s4279_s15 + $0x88] ss:$16 sps:$4 sm:$0xff]  }
 0x2a2   : > { %v3662_v34 = vpop.eup %3661 }
 0x2a3   : > { %v3664_v22 = vpop.eup %3663  ;;  %v1550_v37 = vadd.f32 1.0, %v3662_v34  ;;  %v4901_v34 = vld [vmem:[%s4279_s15 + $0xa4] ss:$16 sps:$4 sm:$0xff]  }
 0x2a4   : > { %v1562_v25 = vadd.f32 1.0, %v3664_v22  ;;  %v3666_v26 = vpop.eup %3665  ;;  %v4905_v22 = vld [vmem:[%s4279_s15 + $0xac] ss:$16 sps:$4 sm:$0xff]  }
 0x2a5   : > { %3675 = vrcp.f32 %v1550_v37  ;;  %v1551_v38 = vadd.f32 1.0, %v3666_v26  ;;  %v3668_v29 = vpop.eup %3667  ;;  %v4909_v37 = vld [vmem:[%s4279_s15 + $0xa0] ss:$16 sps:$4 sm:$0xff]   ;;  %v4921_v26 = vld [vmem:[%s4279_s15 + $0xcc] ss:$16 sps:$4 sm:$0xff]  }
 0x2a6   : > { %3677 = vrcp.f32 %v1562_v25  ;;  %v1563_v13 = vadd.f32 1.0, %v3668_v29  ;;  %v3670_v30 = vpop.eup %3669  ;;  %v4917_v25 = vld [vmem:[%s4279_s15 + $0xc4] ss:$16 sps:$4 sm:$0xff]   ;;  %v4929_v29 = vld [vmem:[%s4279_s15 + $0xc8] ss:$16 sps:$4 sm:$0xff]  }
 0x2a7   : > { %3679 = vpow2.f32 %v3288_v24  ;;  %v3672_v1 = vpop.eup %3671  ;;  %v4913_v24 = vld [vmem:[%s4279_s15 + $0xa8] ss:$16 sps:$4 sm:$0xff]  }
 0x2a8   : > { %3681 = vrcp.f32 %v1551_v38  ;;  %v3674_v23 = vpop.eup %3673  ;;  %v1576_v51 = vadd.f32 1.0, %v3672_v1  ;;  %v4925_v38 = vld [vmem:[%s4279_s15 + $0xc0] ss:$16 sps:$4 sm:$0xff]  }
 0x2a9   : > { %3683 = vrcp.f32 %v1563_v13  ;;  %v4933_v13 = vld [vmem:[%s4279_s15 + $0xe4] ss:$16 sps:$4 sm:$0xff]   ;;  %v4941_v1 = vld [vmem:[%s4279_s15 + $0xe0] ss:$16 sps:$4 sm:$0xff]  }
 0x2aa   : > { %3685 = vrcp.f32 %v1576_v51  ;;  %v1639_v51 = vld [vmem:[%s4956_s24 + $0x8] sm:$0xff] }
 0x2af   : > { %v3676_v35 = vpop.eup %3675 }
 0x2b0   : > { %v3678_v40 = vpop.eup %3677  ;;  %v1584_v53 = vmul.f32 %v3676_v35, %v3670_v30  ;;  %v4937_v30 = vld [vmem:[%s4279_s15 + $0xec] ss:$16 sps:$4 sm:$0xff]   ;;  %v1638_v35 = vld [vmem:[%s4956_s24] sm:$0xff] }
 0x2b1   : > { %v3680_v55 = vpop.eup %3679  ;;  %v1582_v56 = vmul.f32 %v3678_v40, %v1410_v50 }
 0x2b2   : > { %v3682_v57 = vpop.eup %3681  ;;  %v1577_v3 = vadd.f32 1.0, %v3680_v55 }
 0x2b3   : > { %v1586_v59 = vadd.f32 %v1584_v53, %v1582_v56  ;;  %v1585_v61 = vmul.f32 %v3682_v57, %v3674_v23  ;;  %v3684_v62 = vpop.eup %3683  ;;  %v4945_v23 = vld [vmem:[%s4279_s15 + $0xe8] ss:$16 sps:$4 sm:$0xff]   ;;  %v1642_v57 = vld [vmem:[%s4956_s24 + $0x20] sm:$0xff] }
 0x2b4   : > { %v1583_v4 = vmul.f32 %v3684_v62, %v1411_v63  ;;  %v3686_v7 = vpop.eup %3685 }
 0x2b5   : > { %3687 = vtanh.f32 %v1586_v59  ;;  %v4839_v39 = vsel %vm1603_vm3, %v1586_v59, %v1410_v50 }
 0x2b6   : > { %v1587_v5 = vadd.f32 %v1585_v61, %v1583_v4  ;;  %3689 = vrcp.f32 %v1577_v3  ;;  %v1643_v3 = vld [vmem:[%s4956_s24 + $0x28] sm:$0xff] }
 0x2b8   : > { %3691 = vtanh.f32 %v1587_v5  ;;  %v4842_v6 = vsel %vm1604_vm4, %v1587_v5, %v1411_v63 }
 0x2bf   : > { %v3688_v32 = vpop.eup %3687 }
 0x2c0   : > { %v1590_v28 = vmul.f32 %v3688_v32, %v3686_v7  ;;  %v3690_v10 = vpop.eup %3689 }
 0x2c2   : > { %v3692_v11 = vpop.eup %3691  ;;  %v4848_v60 = vsel %vm1603_vm3, %v1590_v28, %v4725_v31  ;;  %v1615_v2 = vsel %vm1603_vm3, %v1590_v28, 0.0  ;;  %v4873_v31 = vld [vmem:[%s4279_s15 + $0x6c] ss:$16 sps:$4 sm:$0xff]  }
 0x2c3   : > { %v1591_v58 = vmul.f32 %v3692_v11, %v3690_v10  ;;  %v1641_v10 = vld [vmem:[%s4956_s24 + $0x18] sm:$0xff] }
 0x2c5   : > { %v4854_v8 = vsel %vm1604_vm4, %v1591_v58, %v4735_v36  ;;  %v1616_v12 = vsel %vm1604_vm4, %v1591_v58, 0.0  ;;  %v4877_v36 = vld [vmem:[%s4279_s15 + $0x60] ss:$16 sps:$4 sm:$0xff]  }
 0x2c6   : > { %v3416_v14 = vpack.c.bf16 %v1616_v12, %v1615_v2  ;;  %v1648_v16 = vpack.c.bf16 %v4854_v8, %v4848_v60  ;;  %v1640_v58 = vld [vmem:[%s4956_s24 + $0x10] sm:$0xff]  ;;  %v1645_v12 = vld [vmem:[%s4956_s24 + $0x38] sm:$0xff] }
 0x2c8   : > { %3417 = vst [vmem:[%s1626_s18] sm:$0xff] %v3416_v14   ;;  %1682 = vmatmul.mubr.bf16.vlgmr.msra.gmra.mrb[40].mxu0 %v1648_v16  ;;  %1725 = vmatmul.mubr.bf16.vlgmr.msra.gmra.mrb[40].mxu1 %v1648_v16  ;;  %v1644_v16 = vld [vmem:[%s4956_s24 + $0x30] sm:$0xff]  ;;  %s5028_s18 = scalar_lea.vmem [#allocation4], %s3387_s12  ;;  %s3390_s24 = sshll.u32 %s2033_s11, 5 }
 0x2c9   : > { %1850 = vmatpush1.bf16.msra.mxu0 %v4744_v41  ;;  %1893 = vmatpush1.bf16.msra.mxu1 %v4748_v42  ;;  %s2037_s30 = scalar_lea.vmem [#allocation4], %s3390_s24  ;;  %s3395_s12 = sshll.u32 %s2234_s10, 5 }
 0x2ca   : > { %1851 = vmatprep.subr.bf16.mxu0 %v4752_v43  ;;  %1894 = vmatprep.subr.bf16.mxu1 %v4756_v44  ;;  %s5261_s11 = sadd.s32 96, %s3451_s19  ;;  %s2636_s10 = sshra.s32 %s5299_s2, 3 }
 0x2cb   : > { %1881 = vmatprep.mubr.bf16.mxu0 %v4069_v0  ;;  %1924 = vmatprep.mubr.bf16.mxu1 %v4069_v0  ;;  %s2435_s24 = sshra.s32 %s5261_s11, 3 }
 0x2cd   : > { %1852 = vmatpush1.bf16.msra.mxu0 %v4762_v45  ;;  %1895 = vmatpush1.bf16.msra.mxu1 %v4766_v46 }
 0x2ce   : > { %1853 = vmatprep.subr.bf16.mxu0 %v4770_v47  ;;  %1896 = vmatprep.subr.bf16.mxu1 %v4774_v52 }
 0x2d1   : > { %1854 = vmatpush1.bf16.msra.mxu0 %v4778_v54  ;;  %1897 = vmatpush1.bf16.msra.mxu1 %v4782_v15 }
 0x2d2   : > { %1855 = vmatprep.subr.bf16.mxu0 %v4786_v18  ;;  %1898 = vmatprep.subr.bf16.mxu1 %v4873_v31 }
 0x2d5   : > { %1856 = vmatpush1.bf16.msra.mxu0 %v4877_v36  ;;  %1899 = vmatpush1.bf16.msra.mxu1 %v4881_v20 }
 0x2d6   : > { %1857 = vmatprep.subr.bf16.mxu0 %v4885_v9  ;;  %1900 = vmatprep.subr.bf16.mxu1 %v4889_v17 }
 0x2d9   : > { %1858 = vmatpush1.bf16.msra.mxu0 %v4893_v19  ;;  %1901 = vmatpush1.bf16.msra.mxu1 %v4897_v21 }
 0x2da   : > { %1859 = vmatprep.subr.bf16.mxu0 %v4901_v34  ;;  %1902 = vmatprep.subr.bf16.mxu1 %v4905_v22 }
 0x2dd   : > { %1860 = vmatpush1.bf16.msra.mxu0 %v4909_v37  ;;  %1903 = vmatpush1.bf16.msra.mxu1 %v4913_v24 }
 0x2de   : > { %1861 = vmatprep.subr.bf16.mxu0 %v4917_v25  ;;  %1904 = vmatprep.subr.bf16.mxu1 %v4921_v26 }
 0x2e1   : > { %1862 = vmatpush1.bf16.msra.mxu0 %v4925_v38  ;;  %1905 = vmatpush1.bf16.msra.mxu1 %v4929_v29 }
 0x2e2   : > { %1863 = vmatprep.subr.bf16.mxu0 %v4933_v13  ;;  %1906 = vmatprep.subr.bf16.mxu1 %v4937_v30 }
 0x2e5   : > { %1864 = vmatpush1.bf16.msra.mxu0 %v4941_v1  ;;  %1907 = vmatpush1.bf16.msra.mxu1 %v4945_v23 }
 0x2e6   : > { %2049 = vmatprep.subr.bf16.mxu0 %v4809_v48  ;;  %2092 = vmatprep.subr.bf16.mxu1 %v4813_v49 }
 0x39b   : > { %v1683_v33 = vpop.f32.mrb[40].mxu0  ;;  %v1726_v40 = vpop.f32.mrb[40].mxu1 }
 0x39c   : > { %v1735_v50 = vadd.f32 %v1683_v33, %v1638_v35  ;;  %v1685_v53 = vpop.f32.mrb[41].mxu0  ;;  %v1728_v55 = vpop.f32.mrb[41].mxu1  ;;  %v1737_v2 = vadd.f32 %v1726_v40, %v1640_v58 }
 0x39d   : > { %v1736_v56 = vadd.f32 %v1685_v53, %v1639_v51  ;;  %v1687_v59 = vpop.f32.mrb[42].mxu0  ;;  %v1730_v61 = vpop.f32.mrb[42].mxu1  ;;  %v1738_v11 = vadd.f32 %v1728_v55, %v1641_v10 }
 0x39e   : > { %v3295_v62 = vmul.f32 -1.442695, %v1735_v50  ;;  %v1739_v63 = vadd.f32 %v1687_v59, %v1642_v57  ;;  %v1689_v27 = vpop.f32.mrb[43].mxu0  ;;  %v1732_v4 = vpop.f32.mrb[43].mxu1  ;;  %v1741_v33 = vadd.f32 %v1730_v61, %v1644_v16 }
 0x39f   : > { %v3297_v5 = vmul.f32 -1.442695, %v1736_v56  ;;  %v1740_v7 = vadd.f32 %v1689_v27, %v1643_v3  ;;  %v3299_v14 = vmul.f32 -1.442695, %v1738_v11  ;;  %v1742_v35 = vadd.f32 %v1732_v4, %v1645_v12  ;;  %v1800_v11 = vpop.permute.xlu0 %1799 }
 0x3a0   : > { %3693 = vpow2.f32 %v3295_v62  ;;  %v3296_v32 = vmul.f32 -1.442695, %v1739_v63  ;;  %vm1804_vm5 = vcmp.eq.s32.totalorder %v1800_v11, 1 }
 0x3a1   : > { %3695 = vpow2.f32 %v3297_v5  ;;  %v3298_v28 = vmul.f32 -1.442695, %v1740_v7  ;;  %v3300_v56 = vmul.f32 -1.442695, %v1742_v35 }
 0x3a2   : > { %3697 = vpow2.f32 %v3296_v32 }
 0x3a3   : > { %3699 = vpow2.f32 %v3298_v28 }
 0x3a4   : > { %3701 = vtanh.f32 %v1737_v2 }
 0x3a5   : > { %3703 = vpow2.f32 %v3299_v14 }
 0x3a6   : > { %3705 = vtanh.f32 %v1741_v33  ;;  %v1803_v33 = vpop.permute.xlu1 %1802 }
 0x3a7   : > { %vm1805_vm6 = vcmp.eq.s32.totalorder %v1803_v33, 1 }
 0x3aa   : > { %v3694_v50 = vpop.eup %3693 }
 0x3ab   : > { %v3696_v51 = vpop.eup %3695  ;;  %v1751_v53 = vadd.f32 1.0, %v3694_v50 }
 0x3ac   : > { %v1763_v57 = vadd.f32 1.0, %v3696_v51  ;;  %v3698_v59 = vpop.eup %3697 }
 0x3ad   : > { %3707 = vrcp.f32 %v1751_v53  ;;  %v1752_v55 = vadd.f32 1.0, %v3698_v59  ;;  %v3700_v62 = vpop.eup %3699 }
 0x3ae   : > { %3709 = vrcp.f32 %v1763_v57  ;;  %v1764_v40 = vadd.f32 1.0, %v3700_v62  ;;  %v3702_v63 = vpop.eup %3701 }
 0x3af   : > { %3711 = vpow2.f32 %v3300_v56  ;;  %v3704_v3 = vpop.eup %3703 }
 0x3b0   : > { %3713 = vrcp.f32 %v1752_v55  ;;  %v3706_v61 = vpop.eup %3705  ;;  %v1777_v7 = vadd.f32 1.0, %v3704_v3 }
 0x3b1   : > { %3715 = vrcp.f32 %v1764_v40 }
 0x3b2   : > { %3717 = vrcp.f32 %v1777_v7 }
 0x3b7   : > { %v3708_v27 = vpop.eup %3707 }
 0x3b8   : > { %v3710_v4 = vpop.eup %3709  ;;  %v1785_v5 = vmul.f32 %v3708_v27, %v3702_v63 }
 0x3b9   : > { %v3712_v32 = vpop.eup %3711  ;;  %v1783_v28 = vmul.f32 %v3710_v4, %v4839_v39 }
 0x3ba   : > { %v3714_v10 = vpop.eup %3713  ;;  %v1778_v14 = vadd.f32 1.0, %v3712_v32 }
 0x3bb   : > { %v1787_v58 = vadd.f32 %v1785_v5, %v1783_v28  ;;  %v1786_v2 = vmul.f32 %v3714_v10, %v3706_v61  ;;  %v3716_v12 = vpop.eup %3715  ;;  %v1839_v5 = vld [vmem:[%s5028_s18 + $0x8] sm:$0xff]  ;;  %v1842_v10 = vld [vmem:[%s5028_s18 + $0x20] sm:$0xff] }
 0x3bc   : > { %v1784_v16 = vmul.f32 %v3716_v12, %v4842_v6  ;;  %v3718_v53 = vpop.eup %3717 }
 0x3bd   : > { %3719 = vtanh.f32 %v1787_v58  ;;  %v4970_v35 = vsel %vm1804_vm5, %v1787_v58, %v4839_v39 }
 0x3be   : > { %v1788_v50 = vadd.f32 %v1786_v2, %v1784_v16  ;;  %3721 = vrcp.f32 %v1778_v14  ;;  %v1843_v14 = vld [vmem:[%s5028_s18 + $0x28] sm:$0xff] }
 0x3c0   : > { %3723 = vtanh.f32 %v1788_v50  ;;  %v4973_v51 = vsel %vm1805_vm6, %v1788_v50, %v4842_v6 }
 0x3c7   : > { %v3720_v56 = vpop.eup %3719 }
 0x3c8   : > { %v1791_v57 = vmul.f32 %v3720_v56, %v3718_v53  ;;  %v3722_v59 = vpop.eup %3721 }
 0x3ca   : > { %v3724_v55 = vpop.eup %3723  ;;  %v4979_v39 = vsel %vm1804_vm5, %v1791_v57, %v4848_v60  ;;  %v1816_v63 = vsel %vm1804_vm5, %v1791_v57, 0.0  ;;  %v1838_v60 = vld [vmem:[%s5028_s18] sm:$0xff] }
 0x3cb   : > { %v1792_v62 = vmul.f32 %v3724_v55, %v3722_v59  ;;  %v1841_v59 = vld [vmem:[%s5028_s18 + $0x18] sm:$0xff] }
 0x3cd   : > { %v4982_v40 = vsel %vm1805_vm6, %v1792_v62, %v4854_v8  ;;  %v1817_v3 = vsel %vm1805_vm6, %v1792_v62, 0.0  ;;  %v1840_v62 = vld [vmem:[%s5028_s18 + $0x10] sm:$0xff] }
 0x3ce   : > { %v3421_v6 = vpack.c.bf16 %v1817_v3, %v1816_v63  ;;  %v1848_v61 = vpack.c.bf16 %v4982_v40, %v4979_v39  ;;  %v1845_v3 = vld [vmem:[%s5028_s18 + $0x38] sm:$0xff] }
 0x3d0   : > { %3422 = vst [vmem:[%s1827_s22] sm:$0xff] %v3421_v6   ;;  %1882 = vmatmul.mubr.bf16.vlgmr.msra.gmra.mrb[44].mxu0 %v1848_v61  ;;  %1925 = vmatmul.mubr.bf16.vlgmr.msra.gmra.mrb[44].mxu1 %v1848_v61  ;;  %v1844_v61 = vld [vmem:[%s5028_s18 + $0x30] sm:$0xff]  ;;  %s2227_s22 = scalar_lea.vmem %s4730_s21, %s3327_s20 [#allocation9]  ;;  %s5196_s18 = scalar_lea.vmem [#allocation4], %s3395_s12 }
 0x3d1   : > { %2050 = vmatpush1.bf16.msra.mxu0 %v4744_v41  ;;  %2093 = vmatpush1.bf16.msra.mxu1 %v4748_v42  ;;  %s3405_s12 = sshll.u32 %s2636_s10, 5 }
 0x3d2   : > { %2051 = vmatprep.subr.bf16.mxu0 %v4752_v43  ;;  %2094 = vmatprep.subr.bf16.mxu1 %v4756_v44 }
 0x3d3   : > { %2081 = vmatprep.mubr.bf16.mxu0 %v4069_v0  ;;  %2124 = vmatprep.mubr.bf16.mxu1 %v4069_v0 }
 0x3d5   : > { %2052 = vmatpush1.bf16.msra.mxu0 %v4762_v45  ;;  %2095 = vmatpush1.bf16.msra.mxu1 %v4766_v46 }
 0x3d6   : > { %2053 = vmatprep.subr.bf16.mxu0 %v4770_v47  ;;  %2096 = vmatprep.subr.bf16.mxu1 %v4774_v52 }
 0x3d9   : > { %2054 = vmatpush1.bf16.msra.mxu0 %v4778_v54  ;;  %2097 = vmatpush1.bf16.msra.mxu1 %v4782_v15 }
 0x3da   : > { %2055 = vmatprep.subr.bf16.mxu0 %v4786_v18  ;;  %2098 = vmatprep.subr.bf16.mxu1 %v4873_v31 }
 0x3dd   : > { %2056 = vmatpush1.bf16.msra.mxu0 %v4877_v36  ;;  %2099 = vmatpush1.bf16.msra.mxu1 %v4881_v20 }
 0x3de   : > { %2057 = vmatprep.subr.bf16.mxu0 %v4885_v9  ;;  %2100 = vmatprep.subr.bf16.mxu1 %v4889_v17 }
 0x3e1   : > { %2058 = vmatpush1.bf16.msra.mxu0 %v4893_v19  ;;  %2101 = vmatpush1.bf16.msra.mxu1 %v4897_v21 }
 0x3e2   : > { %2059 = vmatprep.subr.bf16.mxu0 %v4901_v34  ;;  %2102 = vmatprep.subr.bf16.mxu1 %v4905_v22 }
 0x3e5   : > { %2060 = vmatpush1.bf16.msra.mxu0 %v4909_v37  ;;  %2103 = vmatpush1.bf16.msra.mxu1 %v4913_v24 }
 0x3e6   : > { %2061 = vmatprep.subr.bf16.mxu0 %v4917_v25  ;;  %2104 = vmatprep.subr.bf16.mxu1 %v4921_v26 }
 0x3e9   : > { %2062 = vmatpush1.bf16.msra.mxu0 %v4925_v38  ;;  %2105 = vmatpush1.bf16.msra.mxu1 %v4929_v29 }
 0x3ea   : > { %2063 = vmatprep.subr.bf16.mxu0 %v4933_v13  ;;  %2106 = vmatprep.subr.bf16.mxu1 %v4937_v30 }
 0x3ed   : > { %2064 = vmatpush1.bf16.msra.mxu0 %v4941_v1  ;;  %2107 = vmatpush1.bf16.msra.mxu1 %v4945_v23 }
 0x3ee   : > { %2250 = vmatprep.subr.bf16.mxu0 %v4809_v48  ;;  %2293 = vmatprep.subr.bf16.mxu1 %v4813_v49 }
 0x4a3   : > { %v1883_v8 = vpop.f32.mrb[44].mxu0  ;;  %v1926_v27 = vpop.f32.mrb[44].mxu1 }
 0x4a4   : > { %v1935_v4 = vadd.f32 %v1883_v8, %v1838_v60  ;;  %v1885_v7 = vpop.f32.mrb[45].mxu0  ;;  %v1928_v32 = vpop.f32.mrb[45].mxu1  ;;  %v1937_v63 = vadd.f32 %v1926_v27, %v1840_v62 }
 0x4a5   : > { %v1936_v28 = vadd.f32 %v1885_v7, %v1839_v5  ;;  %v1887_v11 = vpop.f32.mrb[46].mxu0  ;;  %v1930_v58 = vpop.f32.mrb[46].mxu1  ;;  %v1938_v55 = vadd.f32 %v1928_v32, %v1841_v59 }
 0x4a6   : > { %v3307_v2 = vmul.f32 -1.442695, %v1935_v4  ;;  %v1939_v12 = vadd.f32 %v1887_v11, %v1842_v10  ;;  %v1889_v16 = vpop.f32.mrb[47].mxu0  ;;  %v1932_v33 = vpop.f32.mrb[47].mxu1  ;;  %v1941_v8 = vadd.f32 %v1930_v58, %v1844_v61 }
 0x4a7   : > { %v3309_v50 = vmul.f32 -1.442695, %v1936_v28  ;;  %v1940_v53 = vadd.f32 %v1889_v16, %v1843_v14  ;;  %v3311_v6 = vmul.f32 -1.442695, %v1938_v55  ;;  %v1942_v60 = vadd.f32 %v1932_v33, %v1845_v3  ;;  %v2000_v55 = vpop.permute.xlu0 %1999 }
 0x4a8   : > { %3725 = vpow2.f32 %v3307_v2  ;;  %v3308_v56 = vmul.f32 -1.442695, %v1939_v12  ;;  %vm2004_vm7 = vcmp.eq.s32.totalorder %v2000_v55, 1 }
 0x4a9   : > { %3727 = vpow2.f32 %v3309_v50  ;;  %v3310_v57 = vmul.f32 -1.442695, %v1940_v53  ;;  %v3312_v28 = vmul.f32 -1.442695, %v1942_v60 }
 0x4aa   : > { %3729 = vpow2.f32 %v3308_v56 }
 0x4ab   : > { %3731 = vpow2.f32 %v3310_v57 }
 0x4ac   : > { %3733 = vtanh.f32 %v1937_v63 }
 0x4ad   : > { %3735 = vpow2.f32 %v3311_v6 }
 0x4ae   : > { %3737 = vtanh.f32 %v1941_v8  ;;  %v2003_v8 = vpop.permute.xlu1 %2002 }
 0x4af   : > { %vm2005_vm8 = vcmp.eq.s32.totalorder %v2003_v8, 1 }
 0x4b2   : > { %v3726_v4 = vpop.eup %3725 }
 0x4b3   : > { %v3728_v5 = vpop.eup %3727  ;;  %v1951_v7 = vadd.f32 1.0, %v3726_v4 }
 0x4b4   : > { %v1963_v10 = vadd.f32 1.0, %v3728_v5  ;;  %v3730_v11 = vpop.eup %3729 }
 0x4b5   : > { %3739 = vrcp.f32 %v1951_v7  ;;  %v1952_v32 = vadd.f32 1.0, %v3730_v11  ;;  %v3732_v2 = vpop.eup %3731 }
 0x4b6   : > { %3741 = vrcp.f32 %v1963_v10  ;;  %v1964_v27 = vadd.f32 1.0, %v3732_v2  ;;  %v3734_v12 = vpop.eup %3733 }
 0x4b7   : > { %3743 = vpow2.f32 %v3312_v28  ;;  %v3736_v14 = vpop.eup %3735 }
 0x4b8   : > { %3745 = vrcp.f32 %v1952_v32  ;;  %v3738_v58 = vpop.eup %3737  ;;  %v1977_v53 = vadd.f32 1.0, %v3736_v14 }
 0x4b9   : > { %3747 = vrcp.f32 %v1964_v27 }
 0x4ba   : > { %3749 = vrcp.f32 %v1977_v53 }
 0x4bf   : > { %v3740_v16 = vpop.eup %3739 }
 0x4c0   : > { %v3742_v33 = vpop.eup %3741  ;;  %v1985_v50 = vmul.f32 %v3740_v16, %v3734_v12 }
 0x4c1   : > { %v3744_v56 = vpop.eup %3743  ;;  %v1983_v57 = vmul.f32 %v3742_v33, %v4970_v35 }
 0x4c2   : > { %v3746_v59 = vpop.eup %3745  ;;  %v1978_v6 = vadd.f32 1.0, %v3744_v56  ;;  %v2043_v56 = vld [vmem:[%s2037_s30 + $0x28] sm:$0xff] }
 0x4c3   : > { %v1987_v62 = vadd.f32 %v1985_v50, %v1983_v57  ;;  %v1986_v63 = vmul.f32 %v3746_v59, %v3738_v58  ;;  %v3748_v3 = vpop.eup %3747  ;;  %v2045_v59 = vld [vmem:[%s2037_s30 + $0x38] sm:$0xff] }
 0x4c4   : > { %v1984_v61 = vmul.f32 %v3748_v3, %v4973_v51  ;;  %v3750_v7 = vpop.eup %3749 }
 0x4c5   : > { %3751 = vtanh.f32 %v1987_v62  ;;  %v5042_v60 = vsel %vm2004_vm7, %v1987_v62, %v4970_v35 }
 0x4c6   : > { %v1988_v4 = vadd.f32 %v1986_v63, %v1984_v61  ;;  %3753 = vrcp.f32 %v1978_v6 }
 0x4c8   : > { %3755 = vtanh.f32 %v1988_v4  ;;  %v5045_v5 = vsel %vm2005_vm8, %v1988_v4, %v4973_v51 }
 0x4cf   : > { %v3752_v28 = vpop.eup %3751 }
 0x4d0   : > { %v1991_v10 = vmul.f32 %v3752_v28, %v3750_v7  ;;  %v3754_v11 = vpop.eup %3753 }
 0x4d2   : > { %v3756_v32 = vpop.eup %3755  ;;  %v5052_v35 = vsel %vm2004_vm7, %v1991_v10, %v4979_v39  ;;  %v2016_v12 = vsel %vm2004_vm7, %v1991_v10, 0.0 }
 0x4d3   : > { %v1992_v2 = vmul.f32 %v3756_v32, %v3754_v11 }
 0x4d5   : > { %v5055_v27 = vsel %vm2005_vm8, %v1992_v2, %v4982_v40  ;;  %v2017_v51 = vsel %vm2005_vm8, %v1992_v2, 0.0  ;;  %v2044_v40 = vld [vmem:[%s2037_s30 + $0x30] sm:$0xff] }
 0x4d6   : > { %v3426_v14 = vpack.c.bf16 %v2017_v51, %v2016_v12  ;;  %v2048_v58 = vpack.c.bf16 %v5055_v27, %v5052_v35 }
 0x4d8   : > { %3427 = vst [vmem:[%s2027_s23] sm:$0xff] %v3426_v14   ;;  %2082 = vmatmul.mubr.bf16.vlgmr.msra.gmra.mrb[48].mxu0 %v2048_v58  ;;  %2125 = vmatmul.mubr.bf16.vlgmr.msra.gmra.mrb[48].mxu1 %v2048_v58  ;;  %s2428_s23 = scalar_lea.vmem %s4730_s21, %s3339_s16 [#allocation9]  ;;  %s3370_s16 = sshll.u32 %s4588_s17, 4 }
 0x4d9   : > { %2251 = vmatpush1.bf16.msra.mxu0 %v4744_v41  ;;  %2294 = vmatpush1.bf16.msra.mxu1 %v4748_v42  ;;  %v2038_v41 = vld [vmem:[%s2037_s30] sm:$0xff]  ;;  %s451_s11 = scalar_lea.vmem %s5383_s7, %s3370_s16 }
 0x4da   : > { %2252 = vmatprep.subr.bf16.mxu0 %v4752_v43  ;;  %2295 = vmatprep.subr.bf16.mxu1 %v4756_v44  ;;  %v2040_v43 = vld [vmem:[%s2037_s30 + $0x10] sm:$0xff] }
 0x4db   : > { %2282 = vmatprep.mubr.bf16.mxu0 %v4069_v0  ;;  %2325 = vmatprep.mubr.bf16.mxu1 %v4069_v0 }
 0x4dd   : > { %2253 = vmatpush1.bf16.msra.mxu0 %v4762_v45  ;;  %2296 = vmatpush1.bf16.msra.mxu1 %v4766_v46 }
 0x4de   : > { %2254 = vmatprep.subr.bf16.mxu0 %v4770_v47  ;;  %2297 = vmatprep.subr.bf16.mxu1 %v4774_v52  ;;  %v2039_v47 = vld [vmem:[%s2037_s30 + $0x8] sm:$0xff] }
 0x4e1   : > { %2255 = vmatpush1.bf16.msra.mxu0 %v4778_v54  ;;  %2298 = vmatpush1.bf16.msra.mxu1 %v4782_v15  ;;  %v2041_v54 = vld [vmem:[%s2037_s30 + $0x18] sm:$0xff] }
 0x4e2   : > { %2256 = vmatprep.subr.bf16.mxu0 %v4786_v18  ;;  %2299 = vmatprep.subr.bf16.mxu1 %v4873_v31 }
 0x4e5   : > { %2257 = vmatpush1.bf16.msra.mxu0 %v4877_v36  ;;  %2300 = vmatpush1.bf16.msra.mxu1 %v4881_v20 }
 0x4e6   : > { %2258 = vmatprep.subr.bf16.mxu0 %v4885_v9  ;;  %2301 = vmatprep.subr.bf16.mxu1 %v4889_v17 }
 0x4e9   : > { %2259 = vmatpush1.bf16.msra.mxu0 %v4893_v19  ;;  %2302 = vmatpush1.bf16.msra.mxu1 %v4897_v21 }
 0x4ea   : > { %2260 = vmatprep.subr.bf16.mxu0 %v4901_v34  ;;  %2303 = vmatprep.subr.bf16.mxu1 %v4905_v22 }
 0x4ed   : > { %2261 = vmatpush1.bf16.msra.mxu0 %v4909_v37  ;;  %2304 = vmatpush1.bf16.msra.mxu1 %v4913_v24 }
 0x4ee   : > { %2262 = vmatprep.subr.bf16.mxu0 %v4917_v25  ;;  %2305 = vmatprep.subr.bf16.mxu1 %v4921_v26 }
 0x4f1   : > { %2263 = vmatpush1.bf16.msra.mxu0 %v4925_v38  ;;  %2306 = vmatpush1.bf16.msra.mxu1 %v4929_v29 }
 0x4f2   : > { %2264 = vmatprep.subr.bf16.mxu0 %v4933_v13  ;;  %2307 = vmatprep.subr.bf16.mxu1 %v4937_v30 }
 0x4f5   : > { %2265 = vmatpush1.bf16.msra.mxu0 %v4941_v1  ;;  %2308 = vmatpush1.bf16.msra.mxu1 %v4945_v23 }
 0x4f6   : > { %2451 = vmatprep.subr.bf16.mxu0 %v4809_v48  ;;  %2494 = vmatprep.subr.bf16.mxu1 %v4813_v49  ;;  %v2042_v49 = vld [vmem:[%s2037_s30 + $0x20] sm:$0xff]  ;;  %s3400_s30 = sshll.u32 %s2435_s24, 5 }
 0x4f7   : > { %s5266_s20 = scalar_lea.vmem [#allocation4], %s3400_s30  ;;  %s446_s30 = scalar_lea.vmem %s5382_s6, %s3370_s16 }
 0x5ab   : > { %v2083_v42 = vpop.f32.mrb[48].mxu0  ;;  %v2126_v44 = vpop.f32.mrb[48].mxu1 }
 0x5ac   : > { %v2135_v45 = vadd.f32 %v2083_v42, %v2038_v41  ;;  %v2137_v46 = vadd.f32 %v2126_v44, %v2040_v43  ;;  %v2085_v52 = vpop.f32.mrb[49].mxu0  ;;  %v2128_v15 = vpop.f32.mrb[49].mxu1 }
 0x5ad   : > { %v2136_v18 = vadd.f32 %v2085_v52, %v2039_v47  ;;  %v2138_v48 = vadd.f32 %v2128_v15, %v2041_v54  ;;  %v2087_v39 = vpop.f32.mrb[50].mxu0  ;;  %v2130_v16 = vpop.f32.mrb[50].mxu1 }
 0x5ae   : > { %v3319_v33 = vmul.f32 -1.442695, %v2135_v45  ;;  %v2139_v50 = vadd.f32 %v2087_v39, %v2042_v49  ;;  %v2141_v53 = vadd.f32 %v2130_v16, %v2044_v40  ;;  %v2089_v57 = vpop.f32.mrb[51].mxu0  ;;  %v2132_v55 = vpop.f32.mrb[51].mxu1 }
 0x5af   : > { %v3321_v62 = vmul.f32 -1.442695, %v2136_v18  ;;  %v2140_v63 = vadd.f32 %v2089_v57, %v2043_v56  ;;  %v2142_v3 = vadd.f32 %v2132_v55, %v2045_v59  ;;  %v3323_v8 = vmul.f32 -1.442695, %v2138_v48  ;;  %v2200_v54 = vpop.permute.xlu0 %2199  ;;  %v2203_v16 = vpop.permute.xlu1 %2202 }
 0x5b0   : > { %3757 = vpow2.f32 %v3319_v33  ;;  %v3320_v6 = vmul.f32 -1.442695, %v2139_v50  ;;  %vm2204_vm9 = vcmp.eq.s32.totalorder %v2200_v54, 1  ;;  %vm2205_vm10 = vcmp.eq.s32.totalorder %v2203_v16, 1 }
 0x5b1   : > { %3759 = vpow2.f32 %v3321_v62  ;;  %v3322_v61 = vmul.f32 -1.442695, %v2140_v63  ;;  %v3324_v10 = vmul.f32 -1.442695, %v2142_v3 }
 0x5b2   : > { %3761 = vpow2.f32 %v3320_v6 }
 0x5b3   : > { %3763 = vpow2.f32 %v3322_v61 }
 0x5b4   : > { %3765 = vtanh.f32 %v2137_v46 }
 0x5b5   : > { %3767 = vpow2.f32 %v3323_v8  ;;  %v5124_v8 = vld [vmem:[%s4279_s15] ss:$16 sps:$4 sm:$0xff]  }
 0x5b6   : > { %3769 = vtanh.f32 %v2141_v53 }
 0x5ba   : > { %v3758_v4 = vpop.eup %3757 }
 0x5bb   : > { %v3760_v7 = vpop.eup %3759  ;;  %v2151_v28 = vadd.f32 1.0, %v3758_v4  ;;  %v5136_v4 = vld [vmem:[%s4279_s15 + $0x2c] ss:$16 sps:$4 sm:$0xff]  }
 0x5bc   : > { %v2163_v11 = vadd.f32 1.0, %v3760_v7  ;;  %v3762_v32 = vpop.eup %3761  ;;  %v5142_v7 = vld [vmem:[%s4279_s15 + $0x20] ss:$16 sps:$4 sm:$0xff]  }
 0x5bd   : > { %3771 = vrcp.f32 %v2151_v28  ;;  %v2152_v2 = vadd.f32 1.0, %v3762_v32  ;;  %v3764_v12 = vpop.eup %3763  ;;  %v5146_v28 = vld [vmem:[%s4279_s15 + $0x28] ss:$16 sps:$4 sm:$0xff]   ;;  %v5158_v32 = vld [vmem:[%s4279_s15 + $0x40] ss:$16 sps:$4 sm:$0xff]  }
 0x5be   : > { %3773 = vrcp.f32 %v2163_v11  ;;  %v2164_v51 = vadd.f32 1.0, %v3764_v12  ;;  %v3766_v14 = vpop.eup %3765  ;;  %v5154_v11 = vld [vmem:[%s4279_s15 + $0x4c] ss:$16 sps:$4 sm:$0xff]   ;;  %v5166_v12 = vld [vmem:[%s4279_s15 + $0x64] ss:$16 sps:$4 sm:$0xff]  }
 0x5bf   : > { %3775 = vpow2.f32 %v3324_v10  ;;  %v3768_v58 = vpop.eup %3767  ;;  %v5150_v10 = vld [vmem:[%s4279_s15 + $0x44] ss:$16 sps:$4 sm:$0xff]  }
 0x5c0   : > { %3777 = vrcp.f32 %v2152_v2  ;;  %v3770_v41 = vpop.eup %3769  ;;  %v2177_v45 = vadd.f32 1.0, %v3768_v58  ;;  %v5162_v2 = vld [vmem:[%s4279_s15 + $0x48] ss:$16 sps:$4 sm:$0xff]  }
 0x5c1   : > { %3779 = vrcp.f32 %v2164_v51 }
 0x5c2   : > { %3781 = vrcp.f32 %v2177_v45  ;;  %v2246_v45 = vld [vmem:[%s5196_s18 + $0x38] sm:$0xff] }
 0x5c7   : > { %v3772_v42 = vpop.eup %3771 }
 0x5c8   : > { %v3774_v43 = vpop.eup %3773  ;;  %v2185_v44 = vmul.f32 %v3772_v42, %v3766_v14 }
 0x5c9   : > { %v3776_v46 = vpop.eup %3775  ;;  %v2183_v47 = vmul.f32 %v3774_v43, %v5042_v60  ;;  %v2241_v43 = vld [vmem:[%s5196_s18 + $0x10] sm:$0xff] }
 0x5ca   : > { %v3778_v52 = vpop.eup %3777  ;;  %v2178_v49 = vadd.f32 1.0, %v3776_v46 }
 0x5cb   : > { %v2187_v15 = vadd.f32 %v2185_v44, %v2183_v47  ;;  %v2186_v18 = vmul.f32 %v3778_v52, %v3770_v41  ;;  %v3780_v48 = vpop.eup %3779  ;;  %v2242_v41 = vld [vmem:[%s5196_s18 + $0x18] sm:$0xff]  ;;  %v2245_v47 = vld [vmem:[%s5196_s18 + $0x30] sm:$0xff] }
 0x5cc   : > { %v2184_v39 = vmul.f32 %v3780_v48, %v5045_v5  ;;  %v3782_v53 = vpop.eup %3781 }
 0x5cd   : > { %3783 = vtanh.f32 %v2187_v15  ;;  %v5105_v40 = vsel %vm2204_vm9, %v2187_v15, %v5042_v60 }
 0x5ce   : > { %v2188_v33 = vadd.f32 %v2186_v18, %v2184_v39  ;;  %3785 = vrcp.f32 %v2178_v49 }
 0x5d0   : > { %3787 = vtanh.f32 %v2188_v33  ;;  %v5108_v50 = vsel %vm2205_vm10, %v2188_v33, %v5045_v5 }
 0x5d7   : > { %v3784_v56 = vpop.eup %3783 }
 0x5d8   : > { %v2191_v57 = vmul.f32 %v3784_v56, %v3782_v53  ;;  %v3786_v59 = vpop.eup %3785 }
 0x5da   : > { %v3788_v55 = vpop.eup %3787  ;;  %v5115_v62 = vsel %vm2204_vm9, %v2191_v57, %v5052_v35  ;;  %v2216_v63 = vsel %vm2204_vm9, %v2191_v57, 0.0  ;;  %v5128_v35 = vld [vmem:[%s4279_s15 + $0x8] ss:$16 sps:$4 sm:$0xff]  }
 0x5db   : > { %v2192_v60 = vmul.f32 %v3788_v55, %v3786_v59 }
 0x5dd   : > { %v5118_v5 = vsel %vm2205_vm10, %v2192_v60, %v5055_v27  ;;  %v2217_v3 = vsel %vm2205_vm10, %v2192_v60, 0.0  ;;  %v5132_v27 = vld [vmem:[%s4279_s15 + $0x24] ss:$16 sps:$4 sm:$0xff]  }
 0x5de   : > { %v3431_v6 = vpack.c.bf16 %v2217_v3, %v2216_v63  ;;  %v2249_v61 = vpack.c.bf16 %v5118_v5, %v5115_v62 }
 0x5e0   : > { %3432 = vst [vmem:[%s2227_s22] sm:$0xff] %v3431_v6   ;;  %2283 = vmatmul.mubr.bf16.vlgmr.msra.gmra.mrb[52].mxu0 %v2249_v61  ;;  %2326 = vmatmul.mubr.bf16.vlgmr.msra.gmra.mrb[52].mxu1 %v2249_v61 }
 0x5e1   : > { %2452 = vmatpush1.bf16.msra.mxu0 %v5124_v8  ;;  %2495 = vmatpush1.bf16.msra.mxu1 %v5128_v35 }
 0x5e2   : > { %2453 = vmatprep.subr.bf16.mxu0 %v5132_v27  ;;  %2496 = vmatprep.subr.bf16.mxu1 %v5136_v4 }
 0x5e3   : > { %2483 = vmatprep.mubr.bf16.mxu0 %v4069_v0  ;;  %2526 = vmatprep.mubr.bf16.mxu1 %v4069_v0 }
 0x5e5   : > { %2454 = vmatpush1.bf16.msra.mxu0 %v5142_v7  ;;  %2497 = vmatpush1.bf16.msra.mxu1 %v5146_v28 }
 0x5e6   : > { %2455 = vmatprep.subr.bf16.mxu0 %v5150_v10  ;;  %2498 = vmatprep.subr.bf16.mxu1 %v5154_v11 }
 0x5e9   : > { %2456 = vmatpush1.bf16.msra.mxu0 %v5158_v32  ;;  %2499 = vmatpush1.bf16.msra.mxu1 %v5162_v2 }
 0x5ea   : > { %2457 = vmatprep.subr.bf16.mxu0 %v5166_v12  ;;  %2500 = vmatprep.subr.bf16.mxu1 %v4873_v31  ;;  %v3928_v31 = vld [vmem:[%s4279_s15 + $0x4] ss:$16 sps:$4 sm:$0xff]  }
 0x5ed   : > { %2458 = vmatpush1.bf16.msra.mxu0 %v4877_v36  ;;  %2501 = vmatpush1.bf16.msra.mxu1 %v4881_v20  ;;  %v3929_v36 = vld [vmem:[%s4279_s15 + $0xc] ss:$16 sps:$4 sm:$0xff]   ;;  %v2239_v20 = vld [vmem:[%s5196_s18] sm:$0xff] }
 0x5ee   : > { %2459 = vmatprep.subr.bf16.mxu0 %v4885_v9  ;;  %2502 = vmatprep.subr.bf16.mxu1 %v4889_v17 }
 0x5f1   : > { %2460 = vmatpush1.bf16.msra.mxu0 %v4893_v19  ;;  %2503 = vmatpush1.bf16.msra.mxu1 %v4897_v21  ;;  %v2240_v21 = vld [vmem:[%s5196_s18 + $0x8] sm:$0xff] }
 0x5f2   : > { %2461 = vmatprep.subr.bf16.mxu0 %v4901_v34  ;;  %2504 = vmatprep.subr.bf16.mxu1 %v4905_v22 }
 0x5f5   : > { %2462 = vmatpush1.bf16.msra.mxu0 %v4909_v37  ;;  %2505 = vmatpush1.bf16.msra.mxu1 %v4913_v24  ;;  %v2243_v24 = vld [vmem:[%s5196_s18 + $0x20] sm:$0xff] }
 0x5f6   : > { %2463 = vmatprep.subr.bf16.mxu0 %v4917_v25  ;;  %2506 = vmatprep.subr.bf16.mxu1 %v4921_v26 }
 0x5f9   : > { %2464 = vmatpush1.bf16.msra.mxu0 %v4925_v38  ;;  %2507 = vmatpush1.bf16.msra.mxu1 %v4929_v29 }
 0x5fa   : > { %2465 = vmatprep.subr.bf16.mxu0 %v4933_v13  ;;  %2508 = vmatprep.subr.bf16.mxu1 %v4937_v30  ;;  %v2244_v13 = vld [vmem:[%s5196_s18 + $0x28] sm:$0xff]  ;;  %s5304_s18 = scalar_lea.vmem [#allocation4], %s3405_s12 }
 0x5fd   : > { %2466 = vmatpush1.bf16.msra.mxu0 %v4941_v1  ;;  %2509 = vmatpush1.bf16.msra.mxu1 %v4945_v23 }
 0x5fe   : > { %2652 = vmatprep.subr.bf16.mxu0 %v3928_v31  ;;  %2695 = vmatprep.subr.bf16.mxu1 %v3929_v36 }
 0x6b3   : > { %v2284_v9 = vpop.f32.mrb[52].mxu0  ;;  %v2327_v17 = vpop.f32.mrb[52].mxu1 }
 0x6b4   : > { %v2336_v19 = vadd.f32 %v2284_v9, %v2239_v20  ;;  %v2286_v34 = vpop.f32.mrb[53].mxu0  ;;  %v2329_v22 = vpop.f32.mrb[53].mxu1  ;;  %v2338_v44 = vadd.f32 %v2327_v17, %v2241_v43  ;;  %v3946_v43 = vld [vmem:[%s4279_s15 + $0xec] ss:$16 sps:$4 sm:$0xff]  }
 0x6b5   : > { %v2337_v37 = vadd.f32 %v2286_v34, %v2240_v21  ;;  %v2288_v25 = vpop.f32.mrb[54].mxu0  ;;  %v2331_v26 = vpop.f32.mrb[54].mxu1  ;;  %v2339_v42 = vadd.f32 %v2329_v22, %v2242_v41  ;;  %v3944_v41 = vld [vmem:[%s4279_s15 + $0xc8] ss:$16 sps:$4 sm:$0xff]  }
 0x6b6   : > { %v3331_v38 = vmul.f32 -1.442695, %v2336_v19  ;;  %v2340_v29 = vadd.f32 %v2288_v25, %v2243_v24  ;;  %v2290_v30 = vpop.f32.mrb[55].mxu0  ;;  %v2333_v1 = vpop.f32.mrb[55].mxu1  ;;  %v2342_v54 = vadd.f32 %v2331_v26, %v2245_v47 }
 0x6b7   : > { %v3333_v23 = vmul.f32 -1.442695, %v2337_v37  ;;  %v2341_v51 = vadd.f32 %v2290_v30, %v2244_v13  ;;  %v3335_v46 = vmul.f32 -1.442695, %v2339_v42  ;;  %v2343_v52 = vadd.f32 %v2333_v1, %v2246_v45  ;;  %v2401_v20 = vpop.permute.xlu0 %2400  ;;  %v2404_v37 = vpop.permute.xlu1 %2403  ;;  %v3945_v42 = vld [vmem:[%s4279_s15 + $0xe4] ss:$16 sps:$4 sm:$0xff]  }
 0x6b8   : > { %3789 = vpow2.f32 %v3331_v38  ;;  %v3332_v14 = vmul.f32 -1.442695, %v2340_v29  ;;  %vm2405_vm11 = vcmp.eq.s32.totalorder %v2401_v20, 1  ;;  %vm2406_vm12 = vcmp.eq.s32.totalorder %v2404_v37, 1  ;;  %v3948_v45 = vld [vmem:[%s4279_s15 + $0xe8] ss:$16 sps:$4 sm:$0xff]  }
 0x6b9   : > { %3791 = vpow2.f32 %v3333_v23  ;;  %v3334_v58 = vmul.f32 -1.442695, %v2341_v51  ;;  %v3336_v49 = vmul.f32 -1.442695, %v2343_v52 }
 0x6ba   : > { %3793 = vpow2.f32 %v3332_v14 }
 0x6bb   : > { %3795 = vpow2.f32 %v3334_v58 }
 0x6bc   : > { %3797 = vtanh.f32 %v2338_v44  ;;  %v3947_v44 = vld [vmem:[%s4279_s15 + $0xe0] ss:$16 sps:$4 sm:$0xff]  }
 0x6bd   : > { %3799 = vpow2.f32 %v3335_v46  ;;  %v2440_v46 = vld [vmem:[%s5266_s20] sm:$0xff] }
 0x6be   : > { %3801 = vtanh.f32 %v2342_v54 }
 0x6c2   : > { %v3790_v15 = vpop.eup %3789 }
 0x6c3   : > { %v3792_v18 = vpop.eup %3791  ;;  %v2352_v48 = vadd.f32 1.0, %v3790_v15  ;;  %v2441_v15 = vld [vmem:[%s5266_s20 + $0x8] sm:$0xff] }
 0x6c4   : > { %v2364_v39 = vadd.f32 1.0, %v3792_v18  ;;  %v3794_v16 = vpop.eup %3793 }
 0x6c5   : > { %3803 = vrcp.f32 %v2352_v48  ;;  %v2353_v33 = vadd.f32 1.0, %v3794_v16  ;;  %v3796_v53 = vpop.eup %3795 }
 0x6c6   : > { %3805 = vrcp.f32 %v2364_v39  ;;  %v2365_v56 = vadd.f32 1.0, %v3796_v53  ;;  %v3798_v57 = vpop.eup %3797  ;;  %v2444_v39 = vld [vmem:[%s5266_s20 + $0x20] sm:$0xff] }
 0x6c7   : > { %3807 = vpow2.f32 %v3336_v49  ;;  %v3800_v59 = vpop.eup %3799 }
 0x6c8   : > { %3809 = vrcp.f32 %v2353_v33  ;;  %v3802_v55 = vpop.eup %3801  ;;  %v2378_v6 = vadd.f32 1.0, %v3800_v59 }
 0x6c9   : > { %3811 = vrcp.f32 %v2365_v56 }
 0x6ca   : > { %3813 = vrcp.f32 %v2378_v6 }
 0x6cf   : > { %v3804_v60 = vpop.eup %3803 }
 0x6d0   : > { %v3806_v63 = vpop.eup %3805  ;;  %v2386_v3 = vmul.f32 %v3804_v60, %v3798_v57  ;;  %v2445_v57 = vld [vmem:[%s5266_s20 + $0x28] sm:$0xff] }
 0x6d1   : > { %v3808_v61 = vpop.eup %3807  ;;  %v2384_v31 = vmul.f32 %v3806_v63, %v5105_v40 }
 0x6d2   : > { %v3810_v36 = vpop.eup %3809  ;;  %v2379_v21 = vadd.f32 1.0, %v3808_v61  ;;  %v2443_v61 = vld [vmem:[%s5266_s20 + $0x18] sm:$0xff] }
 0x6d3   : > { %v2388_v9 = vadd.f32 %v2386_v3, %v2384_v31  ;;  %v2387_v17 = vmul.f32 %v3810_v36, %v3802_v55  ;;  %v3812_v19 = vpop.eup %3811  ;;  %v2442_v36 = vld [vmem:[%s5266_s20 + $0x10] sm:$0xff] }
 0x6d4   : > { %v2385_v34 = vmul.f32 %v3812_v19, %v5108_v50  ;;  %v3814_v26 = vpop.eup %3813  ;;  %v2446_v19 = vld [vmem:[%s5266_s20 + $0x30] sm:$0xff] }
 0x6d5   : > { %3815 = vtanh.f32 %v2388_v9  ;;  %v5210_v22 = vsel %vm2405_vm11, %v2388_v9, %v5105_v40  ;;  %v2447_v9 = vld [vmem:[%s5266_s20 + $0x38] sm:$0xff]  ;;  %s3363_s20 = sshll.u32 %s2636_s10, 2 }
 0x6d6   : > { %v2389_v24 = vadd.f32 %v2387_v17, %v2385_v34  ;;  %3817 = vrcp.f32 %v2379_v21 }
 0x6d8   : > { %3819 = vtanh.f32 %v2389_v24  ;;  %v5213_v25 = vsel %vm2406_vm12, %v2389_v24, %v5108_v50 }
 0x6df   : > { %v3816_v38 = vpop.eup %3815 }
 0x6e0   : > { %v2392_v29 = vmul.f32 %v3816_v38, %v3814_v26  ;;  %v3818_v13 = vpop.eup %3817 }
 0x6e2   : > { %v3820_v30 = vpop.eup %3819  ;;  %v5220_v40 = vsel %vm2405_vm11, %v2392_v29, %v5115_v62  ;;  %v2417_v51 = vsel %vm2405_vm11, %v2392_v29, 0.0  ;;  %v3930_v62 = vld [vmem:[%s4279_s15 + $0x6c] ss:$16 sps:$4 sm:$0xff]  }
 0x6e3   : > { %v2393_v1 = vmul.f32 %v3820_v30, %v3818_v13 }
 0x6e5   : > { %v5223_v23 = vsel %vm2406_vm12, %v2393_v1, %v5118_v5  ;;  %v2418_v50 = vsel %vm2406_vm12, %v2393_v1, 0.0  ;;  %v3932_v5 = vld [vmem:[%s4279_s15 + $0x68] ss:$16 sps:$4 sm:$0xff]  }
 0x6e6   : > { %v3436_v14 = vpack.c.bf16 %v2418_v50, %v2417_v51  ;;  %v2450_v58 = vpack.c.bf16 %v5223_v23, %v5220_v40 }
 0x6e8   : > { %3437 = vst [vmem:[%s2428_s23] sm:$0xff] %v3436_v14   ;;  %2484 = vmatmul.mubr.bf16.vlgmr.msra.gmra.mrb[56].mxu0 %v2450_v58  ;;  %2527 = vmatmul.mubr.bf16.vlgmr.msra.gmra.mrb[56].mxu1 %v2450_v58 }
 0x6e9   : > { %2653 = vmatpush1.bf16.msra.mxu0 %v5124_v8  ;;  %2696 = vmatpush1.bf16.msra.mxu1 %v5128_v35  ;;  %v3933_v8 = vld [vmem:[%s4279_s15 + $0x84] ss:$16 sps:$4 sm:$0xff]   ;;  %v3934_v35 = vld [vmem:[%s4279_s15 + $0x8c] ss:$16 sps:$4 sm:$0xff]  }
 0x6ea   : > { %2654 = vmatprep.subr.bf16.mxu0 %v5132_v27  ;;  %2697 = vmatprep.subr.bf16.mxu1 %v5136_v4  ;;  %v3935_v27 = vld [vmem:[%s4279_s15 + $0x80] ss:$16 sps:$4 sm:$0xff]   ;;  %v3936_v4 = vld [vmem:[%s4279_s15 + $0x88] ss:$16 sps:$4 sm:$0xff]  }
 0x6eb   : > { %2684 = vmatprep.mubr.bf16.mxu0 %v4069_v0  ;;  %2727 = vmatprep.mubr.bf16.mxu1 %v4069_v0  ;;  %v3931_v0 = vld [vmem:[%s4279_s15 + $0x60] ss:$16 sps:$4 sm:$0xff]  }
 0x6ed   : > { %2655 = vmatpush1.bf16.msra.mxu0 %v5142_v7  ;;  %2698 = vmatpush1.bf16.msra.mxu1 %v5146_v28  ;;  %v3937_v7 = vld [vmem:[%s4279_s15 + $0xa4] ss:$16 sps:$4 sm:$0xff]   ;;  %v3938_v28 = vld [vmem:[%s4279_s15 + $0xac] ss:$16 sps:$4 sm:$0xff]  }
 0x6ee   : > { %2656 = vmatprep.subr.bf16.mxu0 %v5150_v10  ;;  %2699 = vmatprep.subr.bf16.mxu1 %v5154_v11  ;;  %v3939_v10 = vld [vmem:[%s4279_s15 + $0xa0] ss:$16 sps:$4 sm:$0xff]   ;;  %v3940_v11 = vld [vmem:[%s4279_s15 + $0xa8] ss:$16 sps:$4 sm:$0xff]  }
 0x6f1   : > { %2657 = vmatpush1.bf16.msra.mxu0 %v5158_v32  ;;  %2700 = vmatpush1.bf16.msra.mxu1 %v5162_v2  ;;  %v3941_v32 = vld [vmem:[%s4279_s15 + $0xc4] ss:$16 sps:$4 sm:$0xff]   ;;  %v3942_v2 = vld [vmem:[%s4279_s15 + $0xcc] ss:$16 sps:$4 sm:$0xff]  }
 0x6f2   : > { %2658 = vmatprep.subr.bf16.mxu0 %v5166_v12  ;;  %2701 = vmatprep.subr.bf16.mxu1 %v3930_v62  ;;  %v3943_v12 = vld [vmem:[%s4279_s15 + $0xc0] ss:$16 sps:$4 sm:$0xff]   ;;  %s3351_s15 = sshll.u32 %s2435_s24, 2 }
 0x6f3   : > { %s2629_s22 = scalar_lea.vmem %s4730_s21, %s3351_s15 [#allocation9]  ;;  %s2830_s15 = scalar_lea.vmem %s4730_s21, %s3363_s20 [#allocation9] }
 0x6f5   : > { %2659 = vmatpush1.bf16.msra.mxu0 %v3931_v0  ;;  %2702 = vmatpush1.bf16.msra.mxu1 %v3932_v5 }
 0x6f6   : > { %2660 = vmatprep.subr.bf16.mxu0 %v3933_v8  ;;  %2703 = vmatprep.subr.bf16.mxu1 %v3934_v35 }
 0x6f9   : > { %2661 = vmatpush1.bf16.msra.mxu0 %v3935_v27  ;;  %2704 = vmatpush1.bf16.msra.mxu1 %v3936_v4 }
 0x6fa   : > { %2662 = vmatprep.subr.bf16.mxu0 %v3937_v7  ;;  %2705 = vmatprep.subr.bf16.mxu1 %v3938_v28  ;;  %v2602_v7 = vpop.permute.xlu0 %2601 }
 0x6fb   : > { %vm2606_vm13 = vcmp.eq.s32.totalorder %v2602_v7, 1 }
 0x6fd   : > { %2663 = vmatpush1.bf16.msra.mxu0 %v3939_v10  ;;  %2706 = vmatpush1.bf16.msra.mxu1 %v3940_v11 }
 0x6fe   : > { %2664 = vmatprep.subr.bf16.mxu0 %v3941_v32  ;;  %2707 = vmatprep.subr.bf16.mxu1 %v3942_v2 }
 0x701   : > { %2665 = vmatpush1.bf16.msra.mxu0 %v3943_v12  ;;  %2708 = vmatpush1.bf16.msra.mxu1 %v3944_v41  ;;  %v2605_v41 = vpop.permute.xlu1 %2604 }
 0x702   : > { %2666 = vmatprep.subr.bf16.mxu0 %v3945_v42  ;;  %2709 = vmatprep.subr.bf16.mxu1 %v3946_v43  ;;  %vm2607_vm14 = vcmp.eq.s32.totalorder %v2605_v41, 1 }
 0x705   : > { %2667 = vmatpush1.bf16.msra.mxu0 %v3947_v44  ;;  %2710 = vmatpush1.bf16.msra.mxu1 %v3948_v45 }
 0x7bb   : > { %v2485_v47 = vpop.f32.mrb[56].mxu0  ;;  %v2528_v52 = vpop.f32.mrb[56].mxu1 }
 0x7bc   : > { %v2537_v54 = vadd.f32 %v2485_v47, %v2440_v46  ;;  %v2487_v18 = vpop.f32.mrb[57].mxu0  ;;  %v2530_v48 = vpop.f32.mrb[57].mxu1  ;;  %v2539_v20 = vadd.f32 %v2528_v52, %v2442_v36 }
 0x7bd   : > { %v2538_v49 = vadd.f32 %v2487_v18, %v2441_v15  ;;  %v2489_v16 = vpop.f32.mrb[58].mxu0  ;;  %v2532_v33 = vpop.f32.mrb[58].mxu1  ;;  %v2540_v31 = vadd.f32 %v2530_v48, %v2443_v61 }
 0x7be   : > { %v3343_v53 = vmul.f32 -1.442695, %v2537_v54  ;;  %v2541_v56 = vadd.f32 %v2489_v16, %v2444_v39  ;;  %v2491_v59 = vpop.f32.mrb[59].mxu0  ;;  %v2534_v55 = vpop.f32.mrb[59].mxu1  ;;  %v2543_v34 = vadd.f32 %v2532_v33, %v2446_v19  ;;  %v2642_v33 = vld [vmem:[%s5304_s18 + $0x8] sm:$0xff]  ;;  %v2644_v19 = vld [vmem:[%s5304_s18 + $0x18] sm:$0xff] }
 0x7bf   : > { %v3345_v60 = vmul.f32 -1.442695, %v2538_v49  ;;  %v2542_v63 = vadd.f32 %v2491_v59, %v2445_v57  ;;  %v3347_v17 = vmul.f32 -1.442695, %v2540_v31  ;;  %v2544_v21 = vadd.f32 %v2534_v55, %v2447_v9  ;;  %v2645_v59 = vld [vmem:[%s5304_s18 + $0x20] sm:$0xff] }
 0x7c0   : > { %3821 = vpow2.f32 %v3343_v53  ;;  %v3344_v3 = vmul.f32 -1.442695, %v2541_v56 }
 0x7c1   : > { %3823 = vpow2.f32 %v3345_v60  ;;  %v3346_v6 = vmul.f32 -1.442695, %v2542_v63  ;;  %v3348_v38 = vmul.f32 -1.442695, %v2544_v21 }
 0x7c2   : > { %3825 = vpow2.f32 %v3344_v3 }
 0x7c3   : > { %3827 = vpow2.f32 %v3346_v6  ;;  %v2646_v6 = vld [vmem:[%s5304_s18 + $0x28] sm:$0xff] }
 0x7c4   : > { %3829 = vtanh.f32 %v2539_v20 }
 0x7c5   : > { %3831 = vpow2.f32 %v3347_v17 }
 0x7c6   : > { %3833 = vtanh.f32 %v2543_v34  ;;  %v2643_v34 = vld [vmem:[%s5304_s18 + $0x10] sm:$0xff] }
 0x7ca   : > { %v3822_v37 = vpop.eup %3821 }
 0x7cb   : > { %v3824_v24 = vpop.eup %3823  ;;  %v2553_v26 = vadd.f32 1.0, %v3822_v37 }
 0x7cc   : > { %v2565_v29 = vadd.f32 1.0, %v3824_v24  ;;  %v3826_v13 = vpop.eup %3825  ;;  %v2648_v24 = vld [vmem:[%s5304_s18 + $0x38] sm:$0xff] }
 0x7cd   : > { %3835 = vrcp.f32 %v2553_v26  ;;  %v2554_v30 = vadd.f32 1.0, %v3826_v13  ;;  %v3828_v1 = vpop.eup %3827 }
 0x7ce   : > { %3837 = vrcp.f32 %v2565_v29  ;;  %v2566_v51 = vadd.f32 1.0, %v3828_v1  ;;  %v3830_v50 = vpop.eup %3829 }
 0x7cf   : > { %3839 = vpow2.f32 %v3348_v38  ;;  %v3832_v14 = vpop.eup %3831  ;;  %v2647_v38 = vld [vmem:[%s5304_s18 + $0x30] sm:$0xff] }
 0x7d0   : > { %3841 = vrcp.f32 %v2554_v30  ;;  %v3834_v58 = vpop.eup %3833  ;;  %v2579_v8 = vadd.f32 1.0, %v3832_v14 }
 0x7d1   : > { %3843 = vrcp.f32 %v2566_v51 }
 0x7d2   : > { %3845 = vrcp.f32 %v2579_v8 }
 0x7d7   : > { %v3836_v62 = vpop.eup %3835 }
 0x7d8   : > { %v3838_v0 = vpop.eup %3837  ;;  %v2587_v5 = vmul.f32 %v3836_v62, %v3830_v50 }
 0x7d9   : > { %v3840_v35 = vpop.eup %3839  ;;  %v2585_v27 = vmul.f32 %v3838_v0, %v5210_v22 }
 0x7da   : > { %v3842_v4 = vpop.eup %3841  ;;  %v2580_v32 = vadd.f32 1.0, %v3840_v35 }
 0x7db   : > { %v2589_v28 = vadd.f32 %v2587_v5, %v2585_v27  ;;  %v2588_v10 = vmul.f32 %v3842_v4, %v3834_v58  ;;  %v3844_v11 = vpop.eup %3843 }
 0x7dc   : > { %v2586_v2 = vmul.f32 %v3844_v11, %v5213_v25  ;;  %v3846_v44 = vpop.eup %3845 }
 0x7dd   : > { %3847 = vtanh.f32 %v2589_v28  ;;  %v5280_v12 = vsel %vm2606_vm13, %v2589_v28, %v5210_v22 }
 0x7de   : > { %v2590_v42 = vadd.f32 %v2588_v10, %v2586_v2  ;;  %3849 = vrcp.f32 %v2580_v32  ;;  %v2803_v32 = vpop.permute.xlu0 %2802 }
 0x7df   : > { %vm2807_vm15 = vcmp.eq.s32.totalorder %v2803_v32, 1 }
 0x7e0   : > { %3851 = vtanh.f32 %v2590_v42  ;;  %v5283_v43 = vsel %vm2607_vm14, %v2590_v42, %v5213_v25 }
 0x7e7   : > { %v3848_v45 = vpop.eup %3847 }
 0x7e8   : > { %v2593_v46 = vmul.f32 %v3848_v45, %v3846_v44  ;;  %v3850_v47 = vpop.eup %3849 }
 0x7ea   : > { %v3852_v52 = vpop.eup %3851  ;;  %v5290_v22 = vsel %vm2606_vm13, %v2593_v46, %v5220_v40  ;;  %v2618_v25 = vsel %vm2606_vm13, %v2593_v46, 0.0  ;;  %v2641_v40 = vld [vmem:[%s5304_s18] sm:$0xff] }
 0x7eb   : > { %v2594_v54 = vmul.f32 %v3852_v52, %v3850_v47  ;;  %v2806_v47 = vpop.permute.xlu1 %2805 }
 0x7ec   : > { %vm2808_vm0 = vcmp.eq.s32.totalorder %v2806_v47, 1 }
 0x7ed   : > { %v5293_v15 = vsel %vm2607_vm14, %v2594_v54, %v5223_v23  ;;  %v2619_v18 = vsel %vm2607_vm14, %v2594_v54, 0.0 }
 0x7ee   : > { %v3441_v48 = vpack.c.bf16 %v2619_v18, %v2618_v25  ;;  %v2651_v49 = vpack.c.bf16 %v5293_v15, %v5290_v22 }
 0x7f0   : > { %3442 = vst [vmem:[%s2629_s22] sm:$0xff] %v3441_v48   ;;  %2685 = vmatmul.mubr.bf16.vlgmr.msra.gmra.mrb[60].mxu0 %v2651_v49  ;;  %2728 = vmatmul.mubr.bf16.vlgmr.msra.gmra.mrb[60].mxu1 %v2651_v49  ;;  %s3365_s22 = sshll.u32 (%p5399_p13), %s4055_s27, 2 }
 0x7f1   : > { %s2869_s10 = scalar_lea.vmem (%p5399_p13), %s5381_s5, %s3365_s22 }
 0x8c3   : > { %v2686_v23 = vpop.f32.mrb[60].mxu0  ;;  %v2729_v39 = vpop.f32.mrb[60].mxu1 }
 0x8c4   : > { %v2738_v16 = vadd.f32 %v2686_v23, %v2641_v40  ;;  %v2688_v53 = vpop.f32.mrb[61].mxu0  ;;  %v2731_v56 = vpop.f32.mrb[61].mxu1  ;;  %v2740_v37 = vadd.f32 %v2729_v39, %v2643_v34 }
 0x8c5   : > { %v2739_v57 = vadd.f32 %v2688_v53, %v2642_v33  ;;  %v2690_v55 = vpop.f32.mrb[62].mxu0  ;;  %v2733_v60 = vpop.f32.mrb[62].mxu1  ;;  %v2741_v21 = vadd.f32 %v2731_v56, %v2644_v19 }
 0x8c6   : > { %v3355_v63 = vmul.f32 -1.442695, %v2738_v16  ;;  %v2742_v3 = vadd.f32 %v2690_v55, %v2645_v59  ;;  %v2692_v61 = vpop.f32.mrb[63].mxu0  ;;  %v2735_v31 = vpop.f32.mrb[63].mxu1  ;;  %v2744_v13 = vadd.f32 %v2733_v60, %v2647_v38 }
 0x8c7   : > { %v3357_v36 = vmul.f32 -1.442695, %v2739_v57  ;;  %v2743_v20 = vadd.f32 %v2692_v61, %v2646_v6  ;;  %v3359_v26 = vmul.f32 -1.442695, %v2741_v21  ;;  %v2745_v29 = vadd.f32 %v2735_v31, %v2648_v24 }
 0x8c8   : > { %3853 = vpow2.f32 %v3355_v63  ;;  %v3356_v9 = vmul.f32 -1.442695, %v2742_v3 }
 0x8c9   : > { %3855 = vpow2.f32 %v3357_v36  ;;  %v3358_v17 = vmul.f32 -1.442695, %v2743_v20  ;;  %v3360_v50 = vmul.f32 -1.442695, %v2745_v29 }
 0x8ca   : > { %3857 = vpow2.f32 %v3356_v9 }
 0x8cb   : > { %3859 = vpow2.f32 %v3358_v17 }
 0x8cc   : > { %3861 = vtanh.f32 %v2740_v37 }
 0x8cd   : > { %3863 = vpow2.f32 %v3359_v26 }
 0x8ce   : > { %3865 = vtanh.f32 %v2744_v13 }
 0x8d2   : > { %v3854_v30 = vpop.eup %3853 }
 0x8d3   : > { %v3856_v1 = vpop.eup %3855  ;;  %v2754_v51 = vadd.f32 1.0, %v3854_v30 }
 0x8d4   : > { %v2766_v14 = vadd.f32 1.0, %v3856_v1  ;;  %v3858_v58 = vpop.eup %3857 }
 0x8d5   : > { %3867 = vrcp.f32 %v2754_v51  ;;  %v2755_v62 = vadd.f32 1.0, %v3858_v58  ;;  %v3860_v0 = vpop.eup %3859 }
 0x8d6   : > { %3869 = vrcp.f32 %v2766_v14  ;;  %v2767_v5 = vadd.f32 1.0, %v3860_v0  ;;  %v3862_v8 = vpop.eup %3861 }
 0x8d7   : > { %3871 = vpow2.f32 %v3360_v50  ;;  %v3864_v35 = vpop.eup %3863 }
 0x8d8   : > { %3873 = vrcp.f32 %v2755_v62  ;;  %v3866_v27 = vpop.eup %3865  ;;  %v2780_v10 = vadd.f32 1.0, %v3864_v35 }
 0x8d9   : > { %3875 = vrcp.f32 %v2767_v5 }
 0x8da   : > { %3877 = vrcp.f32 %v2780_v10 }
 0x8df   : > { %v3868_v4 = vpop.eup %3867 }
 0x8e0   : > { %v3870_v7 = vpop.eup %3869  ;;  %v2788_v28 = vmul.f32 %v3868_v4, %v3862_v8 }
 0x8e1   : > { %v3872_v11 = vpop.eup %3871  ;;  %v2786_v2 = vmul.f32 %v3870_v7, %v5280_v12 }
 0x8e2   : > { %v3874_v41 = vpop.eup %3873  ;;  %v2781_v46 = vadd.f32 1.0, %v3872_v11 }
 0x8e3   : > { %v2790_v42 = vadd.f32 %v2788_v28, %v2786_v2  ;;  %v2789_v44 = vmul.f32 %v3874_v41, %v3866_v27  ;;  %v3876_v45 = vpop.eup %3875 }
 0x8e4   : > { %v2787_v54 = vmul.f32 %v3876_v45, %v5283_v43  ;;  %v3878_v48 = vpop.eup %3877 }
 0x8e5   : > { %3879 = vtanh.f32 %v2790_v42  ;;  %v2815_v52 = vsel %vm2807_vm15, %v2790_v42, %v5280_v12 }
 0x8e6   : > { %2842 = vst [vmem:[%s451_s11] sm:$0xff] %v2815_v52  ;;  %v2791_v25 = vadd.f32 %v2789_v44, %v2787_v54  ;;  %3881 = vrcp.f32 %v2781_v46 }
 0x8e8   : > { %3883 = vtanh.f32 %v2791_v25  ;;  %v2816_v18 = vsel %vm2808_vm0, %v2791_v25, %v5283_v43 }
 0x8e9   : > { %2843 = vst [vmem:[%s451_s11 + $0x8] sm:$0xff] %v2816_v18 }
 0x8ef   : > { %v3880_v49 = vpop.eup %3879 }
 0x8f0   : > { %v2794_v12 = vmul.f32 %v3880_v49, %v3878_v48  ;;  %v3882_v40 = vpop.eup %3881 }
 0x8f2   : > { %v2809_v23 = vsel %vm2807_vm15, %v2794_v12, %v5290_v22  ;;  %v3884_v39 = vpop.eup %3883  ;;  %v2819_v43 = vsel %vm2807_vm15, %v2794_v12, 0.0  ;;  %2860 = sbr.rel (!%p5399_p13) target bundleno = 2314 (0x90a), region = 60 }
 0x8f3   : > { %2838 = vst [vmem:[%s446_s30] sm:$0xff] %v2809_v23  ;;  %v2795_v16 = vmul.f32 %v3884_v39, %v3882_v40 }
 0x8f5   : > { %v2810_v33 = vsel %vm2808_vm0, %v2795_v16, %v5293_v15  ;;  %v2820_v53 = vsel %vm2808_vm0, %v2795_v16, 0.0 }
 0x8f6   : > { %v3446_v56 = vpack.c.bf16 %v2820_v53, %v2819_v43  ;;  %2839 = vst [vmem:[%s446_s30 + $0x8] sm:$0xff] %v2810_v33 }
 0x8f8   : > { %3447 = vst [vmem:[%s2830_s15] sm:$0xff] %v3446_v56  }
 0x8ff   : > { %v2885_v22 = vld [vmem:[%s4730_s21] sm:$0xf]  ;;  %v2887_v15 = vld [vmem:[%s4730_s21 + $0x4] sm:$0xf]  ;;  %v2889_v57 = vld [vmem:[%s4730_s21 + $0x8] sm:$0xf] }
 0x900   : > { %v2891_v59 = vld [vmem:[%s4730_s21 + $0xc] sm:$0xf]  ;;  %v2893_v55 = vld [vmem:[%s4730_s21 + $0x10] sm:$0xf]  ;;  %2886 = vst [vmem:[%s2869_s10] sm:$0xf] %v2885_v22 }
 0x901   : > { %2888 = vst [vmem:[%s2869_s10 + $0x8] sm:$0xf] %v2887_v15  ;;  %2890 = vst [vmem:[%s2869_s10 + $0x10] sm:$0xf] %v2889_v57  ;;  %v2895_v60 = vld [vmem:[%s4730_s21 + $0x14] sm:$0xf] }
 0x902   : > { %2892 = vst [vmem:[%s2869_s10 + $0x18] sm:$0xf] %v2891_v59  ;;  %2894 = vst [vmem:[%s2869_s10 + $0x20] sm:$0xf] %v2893_v55  ;;  %v2897_v63 = vld [vmem:[%s4730_s21 + $0x18] sm:$0xf] }
 0x903   : > { %v2899_v3 = vld [vmem:[%s4730_s21 + $0x1c] sm:$0xf]  ;;  %2896 = vst [vmem:[%s2869_s10 + $0x28] sm:$0xf] %v2895_v60  ;;  %2898 = vst [vmem:[%s2869_s10 + $0x30] sm:$0xf] %v2897_v63 }
 0x904   : > { %2900 = vst [vmem:[%s2869_s10 + $0x38] sm:$0xf] %v2899_v3  ;;  %v2901_v6 = vld [vmem:[%s4730_s21 + $0x20] sm:$0xf]  ;;  %v2903_v61 = vld [vmem:[%s4730_s21 + $0x24] sm:$0xf] }
 0x905   : > { %v2905_v31 = vld [vmem:[%s4730_s21 + $0x28] sm:$0xf]  ;;  %2902 = vst [vmem:[%s2869_s10 + $0x40] sm:$0xf] %v2901_v6  ;;  %2904 = vst [vmem:[%s2869_s10 + $0x48] sm:$0xf] %v2903_v61 }
 0x906   : > { %2906 = vst [vmem:[%s2869_s10 + $0x50] sm:$0xf] %v2905_v31  ;;  %v2907_v36 = vld [vmem:[%s4730_s21 + $0x2c] sm:$0xf]  ;;  %v2909_v20 = vld [vmem:[%s4730_s21 + $0x30] sm:$0xf] }
 0x907   : > { %v2911_v9 = vld [vmem:[%s4730_s21 + $0x34] sm:$0xf]  ;;  %2908 = vst [vmem:[%s2869_s10 + $0x58] sm:$0xf] %v2907_v36  ;;  %2910 = vst [vmem:[%s2869_s10 + $0x60] sm:$0xf] %v2909_v20 }
 0x908   : > { %2912 = vst [vmem:[%s2869_s10 + $0x68] sm:$0xf] %v2911_v9  ;;  %v2913_v17 = vld [vmem:[%s4730_s21 + $0x38] sm:$0xf]  ;;  %v2915_v19 = vld [vmem:[%s4730_s21 + $0x3c] sm:$0xf] }
 0x909   : > { %2914 = vst [vmem:[%s2869_s10 + $0x70] sm:$0xf] %v2913_v17  ;;  %2916 = vst [vmem:[%s2869_s10 + $0x78] sm:$0xf] %v2915_v19 }
 0x90a PF: > { %s24_s29 = sadd.s32 1, %s4063_s29   ;;  %s5400_s24 = smov %s4047_s25 }
 0x90b   : > { %p21_p5 = scmp.ge.s32.totalorder %s24_s29, 4   ;;  %s5401_s25 = smov %s4051_s26 }
 0x90c   : > { %s5402_s26 = smov %s4159_s13  ;;  %s5403_s27 = smov %s4059_s28 }
 0x90d   : > { %s5404_s28 = smov %s5406_s8  ;;  %23 = sbr.rel (!%p21_p5) target bundleno = 8 (0x8), region = 188 }
 0x914   :  { %3003 = vsyncpa [#allocation6], 1 }
 0x915   :  { %3005 = vsyncpa [#allocation6 + $0x1], 1 }
 0x916   :  { %3006 = vsyncpa [#allocation8], 1 }
 0x917   :  { %3008 = vsyncpa [#allocation8 + $0x1], 1 }

// kernel: seq2seq_forward.6
= control target key start
LH: loop header
LB: loop body
LE: loop exit
PB: predicated region body
PF: predicated region fallthrough
CT: control target
= control target key end

     0   :  { %13 = vsyncpa [#allocation6], 0  ;;  %s5452_s0 = inlined_call_operand.vmem [shape: s32[16,1], index: 0, kind: input, shape index: {}]   ;;  %s5453_s1 = inlined_call_operand.vmem [shape: bf16[128,256], index: 1, kind: input, shape index: {}]   ;;  %s5454_s2 = inlined_call_operand.vmem [shape: bf16[2,256,512], index: 2, kind: input, shape index: {}]   ;;  %s5455_s3 = inlined_call_operand.vmem [shape: bf16[2,128,512], index: 3, kind: input, shape index: {}]   ;;  %s5456_s4 = inlined_call_operand.vmem [shape: f32[2,1,512], index: 4, kind: input, shape index: {}]   ;;  %s5457_s5 = inlined_call_operand.hbm [shape: bf16[128,256], index: 5, kind: output, shape index: {0}]   ;;  %s5458_s6 = inlined_call_operand.vmem [shape: f32[2,16,128], index: 6, kind: output, shape index: {1}]   ;;  %s5459_s7 = inlined_call_operand.vmem [shape: f32[2,16,128], index: 7, kind: output, shape index: {2}]  }
   0x1   :  { %15 = vsyncpa [#allocation6 + $0x1], 0  ;;  %s4256_s24 = smov 0   ;;  %s4258_s25 = smov 0  }
   0x2   :  { %s4260_s26 = smov 0   ;;  %s4262_s27 = smov 0  }
   0x3   :  { %s4264_s28 = smov 0   ;;  %s4266_s29 = smov 0  }
   0x4 LB: > { %s3262_s30 = sadd.s32 4294967295, %s4208_s29   ;;  %s3263_s8 = sadd.s32 4294967294, %s4208_s29   ;;  %s4208_s29 = sphi %s4266_s29, %s21_s29   ;;  %s4204_s28 = sphi %s4264_s28, %s5470_s28   ;;  %s4200_s27 = sphi %s4262_s27, %s5469_s27   ;;  %s4196_s26 = sphi %s4260_s26, %s5468_s26   ;;  %s4192_s25 = sphi %s4258_s25, %s5467_s25   ;;  %s4188_s24 = sphi %s4256_s24, %s5466_s24  }
   0x5   : > { %s33_s9 = sadd.s32 1, %s4204_s28  ;;  %s183_s10 = sadd.s32 1, %s4196_s26 }
   0x6   : > { %p35_p0 = scmp.ge.s32.totalorder %s33_s9, 2  ;;  %p193_p1 = scmp.ne.s32.totalorder %s4196_s26, %s4192_s25 }
   0x7   : > { %p194_p2 = scmp.eq.s32.totalorder %s3262_s30, 1  ;;  %p199_p3 = scmp.ne.s32.totalorder %s4192_s25, %s4188_s24 }
   0x8   : > { %s5472_s9 = smov (%p35_p0, %s33_s9), 0  ;;  %p200_p5 = scmp.eq.s32.totalorder %s3263_s8, 1 }
   0x9   : > { %p4296_p4 = por %p194_p2, %p193_p1  ;;  %s179_s12 = ssub.s32 %s4204_s28, %s5472_s9 }
   0xa   : > { %p3267_p6 = scmp.ge.s32.totalorder %s4208_s29, 1  ;;  %p181_p7 = scmp.eq.s32.totalorder %s179_s12, 0 }
   0xb   : > { %p4303_p8 = por %p200_p5, %p199_p3  ;;  %p314_p9 = scmp.lt.s32.totalorder %s4208_s29, 3 }
   0xc   : > { %s4309_s14 = scalar_select %p181_p7, %s4196_s26, %s183_s10  }
   0xd   : > { %p315_p10 = pnand %p3267_p6, %p314_p9 }
   0xe   : > { %p390_p11 = scmp.lt.s32.totalorder (!%p315_p10), %s4200_s27, 1  ;;  %v3740_v0 = vld [vmem:[%s5453_s1 + $0x4] ss:$8 sps:$4 sm:$0xff] (!%p315_p10)   ;;  %v4210_v1 = vmov (!%p315_p10), 0   ;;  %s1259_s10 = smul.u32 (!%p315_p10), 7, %s4200_s27 }
   0xf   : > { %318 = sbr.rel (%p315_p10) target bundleno = 2286 (0x8ee), region = 40  ;;  %3640 = vset.pattern.permute.xlu0 (!%p315_p10), %v4210_v1  ;;  %3641 = vset.pattern.permute.xlu1 (!%p315_p10), %v4210_v1  ;;  %s2221_s15 = ssub.s32 (!%p315_p10), 4, %s4200_s27 }
  0x10   : > { %962 = vmatprep.mubr.bf16.mxu0 (!%p315_p10), %v3740_v0  ;;  %1075 = vmatprep.mubr.bf16.mxu1 (!%p315_p10), %v3740_v0  ;;  %s2622_s20 = smul.u32 (!%p315_p10), 4294967291, %s4200_s27 }
  0x11   : > { %s2823_s12 = smul.u32 (!%p315_p10), 4294967289, %s4200_s27 }
  0x16   : > { %s4316_s17 = scalar_select %p390_p11, %s4200_s27, 1 }
  0x18   : > { %s3489_s18 = sshll.u32 %s4316_s17, 9  ;;  %s3490_s22 = sshll.u32 %s4316_s17, 8 }
  0x19   : > { %s4324_s21 = scalar_lea.vmem %s5454_s2, %s3489_s18  ;;  %s4376_s8 = scalar_lea.vmem %s5455_s3, %s3490_s22 }
  0x1a   : > { %v3642_v2 = vld [vmem:[%s4324_s21 + $0x4] ss:$16 sps:$4 sm:$0xff]   ;;  %v3644_v3 = vld [vmem:[%s4324_s21 + $0xc] ss:$16 sps:$4 sm:$0xff]   ;;  %v3646_v4 = vld [vmem:[%s4324_s21] ss:$16 sps:$4 sm:$0xff]  }
  0x1b   : > { %930 = vmatprep.subr.bf16.mxu0 %v3642_v2  ;;  %v3647_v5 = vld [vmem:[%s4324_s21 + $0x8] ss:$16 sps:$4 sm:$0xff]   ;;  %1043 = vmatprep.subr.bf16.mxu1 %v3644_v3  ;;  %v3648_v6 = vld [vmem:[%s4324_s21 + $0x24] ss:$16 sps:$4 sm:$0xff]   ;;  %v3650_v7 = vld [vmem:[%s4324_s21 + $0x2c] ss:$16 sps:$4 sm:$0xff]  }
  0x1c   : > { %931 = vmatpush1.bf16.msra.mxu0 %v3646_v4  ;;  %1044 = vmatpush1.bf16.msra.mxu1 %v3647_v5  ;;  %v3652_v8 = vld [vmem:[%s4324_s21 + $0x20] ss:$16 sps:$4 sm:$0xff]   ;;  %v3653_v9 = vld [vmem:[%s4324_s21 + $0x28] ss:$16 sps:$4 sm:$0xff]   ;;  %v3654_v10 = vld [vmem:[%s4324_s21 + $0x44] ss:$16 sps:$4 sm:$0xff]  }
  0x1d   : > { %932 = vmatprep.subr.bf16.mxu0 %v3648_v6  ;;  %1045 = vmatprep.subr.bf16.mxu1 %v3650_v7  ;;  %v3656_v11 = vld [vmem:[%s4324_s21 + $0x4c] ss:$16 sps:$4 sm:$0xff]   ;;  %v3658_v12 = vld [vmem:[%s4324_s21 + $0x40] ss:$16 sps:$4 sm:$0xff]   ;;  %v3659_v13 = vld [vmem:[%s4324_s21 + $0x48] ss:$16 sps:$4 sm:$0xff]  }
  0x1e   : > { %v3660_v14 = vld [vmem:[%s4324_s21 + $0x64] ss:$16 sps:$4 sm:$0xff]   ;;  %v3662_v15 = vld [vmem:[%s4324_s21 + $0x6c] ss:$16 sps:$4 sm:$0xff]   ;;  %v3664_v16 = vld [vmem:[%s4324_s21 + $0x60] ss:$16 sps:$4 sm:$0xff]  }
  0x1f   : > { %v3665_v17 = vld [vmem:[%s4324_s21 + $0x68] ss:$16 sps:$4 sm:$0xff]   ;;  %v3666_v18 = vld [vmem:[%s4324_s21 + $0x84] ss:$16 sps:$4 sm:$0xff]   ;;  %v3668_v19 = vld [vmem:[%s4324_s21 + $0x8c] ss:$16 sps:$4 sm:$0xff]  }
  0x20   : > { %933 = vmatpush1.bf16.msra.mxu0 %v3652_v8  ;;  %1046 = vmatpush1.bf16.msra.mxu1 %v3653_v9  ;;  %v3670_v20 = vld [vmem:[%s4324_s21 + $0x80] ss:$16 sps:$4 sm:$0xff]   ;;  %v3671_v21 = vld [vmem:[%s4324_s21 + $0x88] ss:$16 sps:$4 sm:$0xff]   ;;  %v3672_v22 = vld [vmem:[%s4324_s21 + $0xa4] ss:$16 sps:$4 sm:$0xff]  }
  0x21   : > { %934 = vmatprep.subr.bf16.mxu0 %v3654_v10  ;;  %1047 = vmatprep.subr.bf16.mxu1 %v3656_v11  ;;  %v3674_v23 = vld [vmem:[%s4324_s21 + $0xac] ss:$16 sps:$4 sm:$0xff]   ;;  %v3676_v24 = vld [vmem:[%s4324_s21 + $0xa0] ss:$16 sps:$4 sm:$0xff]   ;;  %v3677_v25 = vld [vmem:[%s4324_s21 + $0xa8] ss:$16 sps:$4 sm:$0xff]   ;;  %v1582_v10 = vstv %s1259_s10 }
  0x22   : > { %v3678_v26 = vld [vmem:[%s4324_s21 + $0xc4] ss:$16 sps:$4 sm:$0xff]   ;;  %v3680_v27 = vld [vmem:[%s4324_s21 + $0xcc] ss:$16 sps:$4 sm:$0xff]   ;;  %v3682_v28 = vld [vmem:[%s4324_s21 + $0xc0] ss:$16 sps:$4 sm:$0xff]  }
  0x23   : > { %v3683_v29 = vld [vmem:[%s4324_s21 + $0xc8] ss:$16 sps:$4 sm:$0xff]   ;;  %v3684_v30 = vld [vmem:[%s4324_s21 + $0xe4] ss:$16 sps:$4 sm:$0xff]   ;;  %v3686_v31 = vld [vmem:[%s4324_s21 + $0xec] ss:$16 sps:$4 sm:$0xff]  }
  0x24   : > { %935 = vmatpush1.bf16.msra.mxu0 %v3658_v12  ;;  %1048 = vmatpush1.bf16.msra.mxu1 %v3659_v13  ;;  %v3688_v32 = vld [vmem:[%s4324_s21 + $0xe0] ss:$16 sps:$4 sm:$0xff]   ;;  %v3689_v33 = vld [vmem:[%s4324_s21 + $0xe8] ss:$16 sps:$4 sm:$0xff]   ;;  %v3690_v34 = vld [vmem:[%s4324_s21 + $0x104] ss:$16 sps:$4 sm:$0xff]  }
  0x25   : > { %936 = vmatprep.subr.bf16.mxu0 %v3660_v14  ;;  %1049 = vmatprep.subr.bf16.mxu1 %v3662_v15  ;;  %v3692_v35 = vld [vmem:[%s4324_s21 + $0x10c] ss:$16 sps:$4 sm:$0xff]   ;;  %v3694_v36 = vld [vmem:[%s4324_s21 + $0x100] ss:$16 sps:$4 sm:$0xff]   ;;  %v3695_v37 = vld [vmem:[%s4324_s21 + $0x108] ss:$16 sps:$4 sm:$0xff]  }
  0x26   : > { %v3696_v38 = vld [vmem:[%s4324_s21 + $0x124] ss:$16 sps:$4 sm:$0xff]   ;;  %v3698_v39 = vld [vmem:[%s4324_s21 + $0x12c] ss:$16 sps:$4 sm:$0xff]   ;;  %v3700_v40 = vld [vmem:[%s4324_s21 + $0x120] ss:$16 sps:$4 sm:$0xff]  }
  0x27   : > { %v3701_v41 = vld [vmem:[%s4324_s21 + $0x128] ss:$16 sps:$4 sm:$0xff]   ;;  %v3702_v42 = vld [vmem:[%s4324_s21 + $0x144] ss:$16 sps:$4 sm:$0xff]   ;;  %v3704_v43 = vld [vmem:[%s4324_s21 + $0x14c] ss:$16 sps:$4 sm:$0xff]  }
  0x28   : > { %937 = vmatpush1.bf16.msra.mxu0 %v3664_v16  ;;  %1050 = vmatpush1.bf16.msra.mxu1 %v3665_v17  ;;  %v3706_v44 = vld [vmem:[%s4324_s21 + $0x140] ss:$16 sps:$4 sm:$0xff]   ;;  %v3707_v45 = vld [vmem:[%s4324_s21 + $0x148] ss:$16 sps:$4 sm:$0xff]   ;;  %v3708_v46 = vld [vmem:[%s4324_s21 + $0x164] ss:$16 sps:$4 sm:$0xff]  }
  0x29   : > { %938 = vmatprep.subr.bf16.mxu0 %v3666_v18  ;;  %1051 = vmatprep.subr.bf16.mxu1 %v3668_v19  ;;  %v3710_v47 = vld [vmem:[%s4324_s21 + $0x16c] ss:$16 sps:$4 sm:$0xff]   ;;  %v3712_v48 = vld [vmem:[%s4324_s21 + $0x160] ss:$16 sps:$4 sm:$0xff]   ;;  %v3713_v49 = vld [vmem:[%s4324_s21 + $0x168] ss:$16 sps:$4 sm:$0xff]  }
  0x2a   : > { %v3714_v50 = vld [vmem:[%s4324_s21 + $0x184] ss:$16 sps:$4 sm:$0xff]   ;;  %v3716_v51 = vld [vmem:[%s4324_s21 + $0x18c] ss:$16 sps:$4 sm:$0xff]   ;;  %v3718_v52 = vld [vmem:[%s4324_s21 + $0x180] ss:$16 sps:$4 sm:$0xff]  }
  0x2b   : > { %v3719_v53 = vld [vmem:[%s4324_s21 + $0x188] ss:$16 sps:$4 sm:$0xff]   ;;  %v3720_v54 = vld [vmem:[%s4324_s21 + $0x1a4] ss:$16 sps:$4 sm:$0xff]   ;;  %v3722_v55 = vld [vmem:[%s4324_s21 + $0x1ac] ss:$16 sps:$4 sm:$0xff]  }
  0x2c   : > { %939 = vmatpush1.bf16.msra.mxu0 %v3670_v20  ;;  %1052 = vmatpush1.bf16.msra.mxu1 %v3671_v21  ;;  %v3724_v56 = vld [vmem:[%s4324_s21 + $0x1a0] ss:$16 sps:$4 sm:$0xff]   ;;  %v3725_v57 = vld [vmem:[%s4324_s21 + $0x1a8] ss:$16 sps:$4 sm:$0xff]   ;;  %v3726_v58 = vld [vmem:[%s4324_s21 + $0x1c4] ss:$16 sps:$4 sm:$0xff]  }
  0x2d   : > { %940 = vmatprep.subr.bf16.mxu0 %v3672_v22  ;;  %1053 = vmatprep.subr.bf16.mxu1 %v3674_v23  ;;  %v3728_v59 = vld [vmem:[%s4324_s21 + $0x1cc] ss:$16 sps:$4 sm:$0xff]   ;;  %v3730_v60 = vld [vmem:[%s4324_s21 + $0x1c0] ss:$16 sps:$4 sm:$0xff]   ;;  %v3731_v61 = vld [vmem:[%s4324_s21 + $0x1c8] ss:$16 sps:$4 sm:$0xff]  }
  0x2e   : > { %v3732_v62 = vld [vmem:[%s4324_s21 + $0x1e4] ss:$16 sps:$4 sm:$0xff]   ;;  %v3734_v63 = vld [vmem:[%s4324_s21 + $0x1ec] ss:$16 sps:$4 sm:$0xff]   ;;  %v3736_v0 = vld [vmem:[%s4324_s21 + $0x1e0] ss:$16 sps:$4 sm:$0xff]  }
  0x2f   : > { %v3737_v2 = vld [vmem:[%s4324_s21 + $0x1e8] ss:$16 sps:$4 sm:$0xff]   ;;  %v4397_v3 = vld [vmem:[%s4376_s8 + $0x4] ss:$16 sps:$4 sm:$0xff]   ;;  %v4400_v4 = vld [vmem:[%s4376_s8 + $0xc] ss:$16 sps:$4 sm:$0xff]  }
  0x30   : > { %941 = vmatpush1.bf16.msra.mxu0 %v3676_v24  ;;  %1054 = vmatpush1.bf16.msra.mxu1 %v3677_v25  ;;  %v3738_v5 = vld [vmem:[%s5453_s1] ss:$8 sps:$4 sm:$0xff]   ;;  %v3744_v7 = vld [vmem:[%s5453_s1 + $0x14] ss:$8 sps:$4 sm:$0xff]   ;;  %v3746_v18 = vld [vmem:[%s5453_s1 + $0x10] ss:$8 sps:$4 sm:$0xff]  }
  0x31   : > { %942 = vmatprep.subr.bf16.mxu0 %v3678_v26  ;;  %1055 = vmatprep.subr.bf16.mxu1 %v3680_v27  ;;  %v4407_v6 = vld [vmem:[%s4376_s8] ss:$16 sps:$4 sm:$0xff]   ;;  %v4414_v8 = vld [vmem:[%s4376_s8 + $0x24] ss:$16 sps:$4 sm:$0xff]   ;;  %v4418_v9 = vld [vmem:[%s4376_s8 + $0x8] ss:$16 sps:$4 sm:$0xff]  }
  0x32   : > { %v4421_v11 = vld [vmem:[%s4376_s8 + $0x2c] ss:$16 sps:$4 sm:$0xff]   ;;  %v4425_v12 = vld [vmem:[%s4376_s8 + $0x20] ss:$16 sps:$4 sm:$0xff]   ;;  %v4434_v14 = vld [vmem:[%s4376_s8 + $0x44] ss:$16 sps:$4 sm:$0xff]  }
  0x33   : > { %v4430_v13 = vld [vmem:[%s5452_s0] sm:$0xff]  ;;  %v4439_v15 = vld [vmem:[%s4376_s8 + $0x28] ss:$16 sps:$4 sm:$0xff]   ;;  %s1820_s10 = smul.u32 3, %s4200_s27  ;;  %v4461_v21 = vld [vmem:[%s4376_s8 + $0x4c] ss:$16 sps:$4 sm:$0xff]  }
  0x34   : > { %943 = vmatpush1.bf16.msra.mxu0 %v3682_v28  ;;  %1056 = vmatpush1.bf16.msra.mxu1 %v3683_v29  ;;  %vm1583_vm0 = vcmp.lt.s32.totalorder %v1582_v10, %v4430_v13  ;;  %v4445_v17 = vld [vmem:[%s5452_s0 + $0x8] sm:$0xff]  ;;  %v4458_v20 = vld [vmem:[%s4376_s8 + $0x40] ss:$16 sps:$4 sm:$0xff]   ;;  %v4465_v22 = vld [vmem:[%s4376_s8 + $0x64] ss:$16 sps:$4 sm:$0xff]   ;;  %s2021_s22 = sadd.s32 3, %s4200_s27 }
  0x35   : > { %944 = vmatprep.subr.bf16.mxu0 %v3684_v30  ;;  %1057 = vmatprep.subr.bf16.mxu1 %v3686_v31  ;;  %v1585_v16 = vsel %vm1583_vm0, 1, %v4210_v1  ;;  %v3750_v19 = vld [vmem:[%s5453_s1 + $0x24] ss:$8 sps:$4 sm:$0xff]   ;;  %vm1584_vm1 = vcmp.lt.s32.totalorder %v1582_v10, %v4445_v17  ;;  %v4469_v23 = vld [vmem:[%s4376_s8 + $0x48] ss:$16 sps:$4 sm:$0xff]   ;;  %s4474_s16 = sadd.s32 2, %s1820_s10 }
  0x36   : > { %1588 = vperm.xlu0 %3640, %v1585_v16   ;;  %v4472_v24 = vld [vmem:[%s4376_s8 + $0x6c] ss:$16 sps:$4 sm:$0xff]   ;;  %v1586_v25 = vsel %vm1584_vm1, 1, %v4210_v1  ;;  %v4479_v26 = vld [vmem:[%s4376_s8 + $0x60] ss:$16 sps:$4 sm:$0xff]   ;;  %v1984_v29 = vstv %s4474_s16  ;;  %s2421_s18 = smul.u32 4294967293, %s4200_s27 }
  0x37   : > { %v4484_v27 = vld [vmem:[%s4376_s8 + $0x84] ss:$16 sps:$4 sm:$0xff]   ;;  %v4488_v28 = vld [vmem:[%s4376_s8 + $0x68] ss:$16 sps:$4 sm:$0xff]   ;;  %vm1985_vm2 = vcmp.lt.s32.totalorder %v1984_v29, %v4430_v13  ;;  %s4594_s10 = sadd.s32 6, %s2622_s20  ;;  %s3273_s30 = sshll.u32 %s4316_s17, 2  ;;  %vm4690_vm10 = vcmp.lt.s32.totalorder %v1984_v29, %v4445_v17 }
  0x38   : > { %945 = vmatpush1.bf16.msra.mxu0 %v3688_v32  ;;  %1058 = vmatpush1.bf16.msra.mxu1 %v3689_v33  ;;  %v3752_v30 = vld [vmem:[%s5453_s1 + $0x20] ss:$8 sps:$4 sm:$0xff]   ;;  %v3759_v31 = vld [vmem:[%s5453_s1 + $0x34] ss:$8 sps:$4 sm:$0xff]   ;;  %s4575_s19 = sadd.s32 5, %s2421_s18  ;;  %s4604_s18 = sadd.s32 7, %s2823_s12 }
  0x39   : > { %946 = vmatprep.subr.bf16.mxu0 %v3690_v34  ;;  %1059 = vmatprep.subr.bf16.mxu1 %v3692_v35  ;;  %v4500_v32 = vld [vmem:[%s4376_s8 + $0x80] ss:$16 sps:$4 sm:$0xff]   ;;  %v4503_v33 = vld [vmem:[%s4376_s8 + $0x8c] ss:$16 sps:$4 sm:$0xff]   ;;  %v4510_v34 = vld [vmem:[%s4376_s8 + $0xa4] ss:$16 sps:$4 sm:$0xff]   ;;  %s403_s21 = scalar_lea.vmem %s5456_s4, %s3273_s30 }
  0x3a   : > { %1591 = vperm.xlu0 %3640, %v1586_v25   ;;  %v4514_v35 = vld [vmem:[%s4376_s8 + $0x88] ss:$16 sps:$4 sm:$0xff]   ;;  %s1261_s16 = smul.u32 112, %s4200_s27  ;;  %s358_s30 = sand.u32 1, %s4192_s25  }
  0x3b   : > { %s3268_s12 = sshll.u32 %s358_s30, 6 }
  0x3c   : > { %947 = vmatpush1.bf16.msra.mxu0 %v3694_v36  ;;  %1060 = vmatpush1.bf16.msra.mxu1 %v3695_v37  ;;  %v4517_v36 = vld [vmem:[%s4376_s8 + $0xac] ss:$16 sps:$4 sm:$0xff]   ;;  %v1987_v37 = vsel %vm1985_vm2, 1, %v4210_v1 }
  0x3d   : > { %948 = vmatprep.subr.bf16.mxu0 %v3696_v38  ;;  %1061 = vmatprep.subr.bf16.mxu1 %v3698_v39  ;;  %v4523_v38 = vld [vmem:[%s4376_s8 + $0xa0] ss:$16 sps:$4 sm:$0xff]   ;;  %v4528_v39 = vld [vmem:[%s4376_s8 + $0xc4] ss:$16 sps:$4 sm:$0xff]  }
  0x3e   : > { %1990 = vperm.xlu0 %3640, %v1987_v37  }
  0x40   : > { %949 = vmatpush1.bf16.msra.mxu0 %v3700_v40  ;;  %1062 = vmatpush1.bf16.msra.mxu1 %v3701_v41  ;;  %v4532_v40 = vld [vmem:[%s4376_s8 + $0xa8] ss:$16 sps:$4 sm:$0xff]   ;;  %v4534_v41 = vstv %s2021_s22  ;;  %s1619_s22 = smul.u32 5, %s4200_s27 }
  0x41   : > { %950 = vmatprep.subr.bf16.mxu0 %v3702_v42  ;;  %1063 = vmatprep.subr.bf16.mxu1 %v3704_v43  ;;  %v3761_v42 = vld [vmem:[%s5453_s1 + $0x30] ss:$8 sps:$4 sm:$0xff]   ;;  %v3768_v43 = vld [vmem:[%s5453_s1 + $0x44] ss:$8 sps:$4 sm:$0xff]   ;;  %vm2185_vm3 = vcmp.lt.s32.totalorder %v4534_v41, %v4430_v13  ;;  %vm2186_vm11 = vcmp.lt.s32.totalorder %v4534_v41, %v4445_v17 }
  0x42   : > { %s1620_s23 = sadd.s32 1, %s1619_s22 }
  0x44   : > { %951 = vmatpush1.bf16.msra.mxu0 %v3706_v44  ;;  %1064 = vmatpush1.bf16.msra.mxu1 %v3707_v45  ;;  %v4545_v44 = vld [vmem:[%s4376_s8 + $0xc0] ss:$16 sps:$4 sm:$0xff]   ;;  %v4548_v45 = vld [vmem:[%s4376_s8 + $0xcc] ss:$16 sps:$4 sm:$0xff]  }
  0x45   : > { %952 = vmatprep.subr.bf16.mxu0 %v3708_v46  ;;  %1065 = vmatprep.subr.bf16.mxu1 %v3710_v47  ;;  %v4557_v46 = vld [vmem:[%s4376_s8 + $0xe4] ss:$16 sps:$4 sm:$0xff]   ;;  %v4560_v47 = vld [vmem:[%s4376_s8 + $0xc8] ss:$16 sps:$4 sm:$0xff]  }
  0x48   : > { %953 = vmatpush1.bf16.msra.mxu0 %v3712_v48  ;;  %1066 = vmatpush1.bf16.msra.mxu1 %v3713_v49  ;;  %v4563_v48 = vld [vmem:[%s4376_s8 + $0xec] ss:$16 sps:$4 sm:$0xff]   ;;  %v2187_v49 = vsel %vm2185_vm3, 1, %v4210_v1 }
  0x49   : > { %954 = vmatprep.subr.bf16.mxu0 %v3714_v50  ;;  %1067 = vmatprep.subr.bf16.mxu1 %v3716_v51  ;;  %v4568_v50 = vstv %s2221_s15  ;;  %v4572_v51 = vld [vmem:[%s4376_s8 + $0xe0] ss:$16 sps:$4 sm:$0xff]  }
  0x4a   : > { %2190 = vperm.xlu0 %3640, %v2187_v49   ;;  %vm2385_vm4 = vcmp.lt.s32.totalorder %v4568_v50, %v4430_v13  ;;  %vm2386_vm12 = vcmp.lt.s32.totalorder %v4568_v50, %v4445_v17 }
  0x4c   : > { %955 = vmatpush1.bf16.msra.mxu0 %v3718_v52  ;;  %1068 = vmatpush1.bf16.msra.mxu1 %v3719_v53  ;;  %v4581_v52 = vld [vmem:[%s4376_s8 + $0xe8] ss:$16 sps:$4 sm:$0xff]  }
  0x4d   : > { %956 = vmatprep.subr.bf16.mxu0 %v3720_v54  ;;  %1069 = vmatprep.subr.bf16.mxu1 %v3722_v55  ;;  %v3770_v53 = vld [vmem:[%s5453_s1 + $0x40] ss:$8 sps:$4 sm:$0xff]   ;;  %v3777_v54 = vld [vmem:[%s5453_s1 + $0x54] ss:$8 sps:$4 sm:$0xff]   ;;  %v2585_v55 = vstv %s4575_s19  ;;  %s4787_s19 = sshra.s32 %s1261_s16, 3 }
  0x4e   : > { %vm2586_vm5 = vcmp.lt.s32.totalorder %v2585_v55, %v4430_v13  ;;  %vm2587_vm13 = vcmp.lt.s32.totalorder %v2585_v55, %v4445_v17  ;;  %s3400_s20 = sshll.u32 %s4787_s19, 2 }
  0x50   : > { %957 = vmatpush1.bf16.msra.mxu0 %v3724_v56  ;;  %1070 = vmatpush1.bf16.msra.mxu1 %v3725_v57  ;;  %v2387_v56 = vsel %vm2385_vm4, 1, %v4210_v1  ;;  %v2786_v57 = vstv %s4594_s10  ;;  %s3493_s10 = sshll.u32 %s4787_s19, 5 }
  0x51   : > { %958 = vmatprep.subr.bf16.mxu0 %v3726_v58  ;;  %1071 = vmatprep.subr.bf16.mxu1 %v3728_v59  ;;  %v2588_v58 = vsel %vm2586_vm5, 1, %v4210_v1  ;;  %v3779_v59 = vld [vmem:[%s5453_s1 + $0x50] ss:$8 sps:$4 sm:$0xff]   ;;  %vm2787_vm6 = vcmp.lt.s32.totalorder %v2786_v57, %v4430_v13  ;;  %vm4729_vm14 = vcmp.lt.s32.totalorder %v2786_v57, %v4445_v17 }
  0x52   : > { %2390 = vperm.xlu0 %3640, %v2387_v56  }
  0x54   : > { %959 = vmatpush1.bf16.msra.mxu0 %v3730_v60  ;;  %1072 = vmatpush1.bf16.msra.mxu1 %v3731_v61  ;;  %v3786_v60 = vld [vmem:[%s5453_s1 + $0x64] ss:$8 sps:$4 sm:$0xff]   ;;  %v2987_v61 = vstv %s4604_s18  ;;  %s1266_s18 = scalar_lea.vmem [#allocation4], %s3493_s10 }
  0x55   : > { %960 = vmatprep.subr.bf16.mxu0 %v3732_v62  ;;  %1073 = vmatprep.subr.bf16.mxu1 %v3734_v63  ;;  %v2789_v62 = vsel %vm2787_vm6, 1, %v4210_v1  ;;  %vm2988_vm7 = vcmp.lt.s32.totalorder %v2987_v61, %v4430_v13  ;;  %vm2989_vm15 = vcmp.lt.s32.totalorder %v2987_v61, %v4445_v17 }
  0x56   : > { %2591 = vperm.xlu0 %3640, %v2588_v58   ;;  %v2990_v63 = vsel %vm2988_vm7, 1, %v4210_v1 }
  0x58   : > { %961 = vmatpush1.bf16.msra.mxu0 %v3736_v0  ;;  %1074 = vmatpush1.bf16.msra.mxu1 %v3737_v2  ;;  %v3788_v0 = vld [vmem:[%s5453_s1 + $0x60] ss:$8 sps:$4 sm:$0xff]   ;;  %v3797_v2 = vld [vmem:[%s5453_s1 + $0x74] ss:$8 sps:$4 sm:$0xff]  }
  0x59   : > { %1438 = vmatprep.subr.bf16.mxu0 %v4397_v3  ;;  %1481 = vmatprep.subr.bf16.mxu1 %v4400_v4 }
  0x5a   : > { %2792 = vperm.xlu0 %3640, %v2789_v62  }
  0x5b   : > { %963 = vmatmul.mubr.bf16.vlgmr.msra.gmra.mrb[0].mxu0 %v3738_v5  ;;  %1076 = vmatmul.mubr.bf16.vlgmr.msra.gmra.mrb[0].mxu1 %v3738_v5  ;;  %v3800_v5 = vld [vmem:[%s5453_s1 + $0x70] ss:$8 sps:$4 sm:$0xff]  }
  0x5c   : > { %1439 = vmatpush1.bf16.msra.mxu0 %v4407_v6  ;;  %972 = vmatprep.mubr.bf16.mxu0 %v3744_v7 }
  0x5d   : > { %1085 = vmatprep.mubr.bf16.mxu1 %v3744_v7  ;;  %1440 = vmatprep.subr.bf16.mxu0 %v4414_v8  ;;  %v4211_v7 = vmov 0.0|0.0  }
  0x5e   : > { %1482 = vmatpush1.bf16.msra.mxu1 %v4418_v9  ;;  %2993 = vperm.xlu0 %3640, %v2990_v63  }
  0x5f   : > { %1483 = vmatprep.subr.bf16.mxu1 %v4421_v11 }
  0x60   : > { %1441 = vmatpush1.bf16.msra.mxu0 %v4425_v12 }
  0x61   : > { %1442 = vmatprep.subr.bf16.mxu0 %v4434_v14 }
  0x62   : > { %1484 = vmatpush1.bf16.msra.mxu1 %v4439_v15 }
  0x63   : > { %973 = vmatmul.mubr.bf16.gmra.mrb[4].mxu0 %v3746_v18  ;;  %1086 = vmatmul.mubr.bf16.gmra.mrb[4].mxu1 %v3746_v18  ;;  %v1783_v18 = vstv %s1620_s23  ;;  %s3569_s23 = smul.u32 80, %s4200_s27 }
  0x64   : > { %982 = vmatprep.mubr.bf16.mxu0 %v3750_v19  ;;  %1095 = vmatprep.mubr.bf16.mxu1 %v3750_v19  ;;  %vm1784_vm8 = vcmp.lt.s32.totalorder %v1783_v18, %v4430_v13  ;;  %vm1785_vm9 = vcmp.lt.s32.totalorder %v1783_v18, %v4445_v17  ;;  %v2388_v13 = vsel %vm2386_vm12, 1, %v4210_v1 }
  0x65   : > { %1443 = vmatpush1.bf16.msra.mxu0 %v4458_v20  ;;  %1485 = vmatprep.subr.bf16.mxu1 %v4461_v21  ;;  %s4879_s16 = sadd.s32 16, %s3569_s23 }
  0x66   : > { %1444 = vmatprep.subr.bf16.mxu0 %v4465_v22  ;;  %1486 = vmatpush1.bf16.msra.mxu1 %v4469_v23  ;;  %s1623_s19 = sshra.s32 %s4879_s16, 3 }
  0x67   : > { %1487 = vmatprep.subr.bf16.mxu1 %v4472_v24  ;;  %s3498_s10 = sshll.u32 %s1623_s19, 5 }
  0x69   : > { %1445 = vmatpush1.bf16.msra.mxu0 %v4479_v26 }
  0x6a   : > { %1446 = vmatprep.subr.bf16.mxu0 %v4484_v27  ;;  %1488 = vmatpush1.bf16.msra.mxu1 %v4488_v28 }
  0x6b   : > { %983 = vmatmul.mubr.bf16.gmra.mrb[8].mxu0 %v3752_v30  ;;  %1096 = vmatmul.mubr.bf16.gmra.mrb[8].mxu1 %v3752_v30  ;;  %v1786_v30 = vsel %vm1784_vm8, 1, %v4210_v1 }
  0x6c   : > { %992 = vmatprep.mubr.bf16.mxu0 %v3759_v31  ;;  %1105 = vmatprep.mubr.bf16.mxu1 %v3759_v31 }
  0x6d   : > { %1447 = vmatpush1.bf16.msra.mxu0 %v4500_v32  ;;  %1489 = vmatprep.subr.bf16.mxu1 %v4503_v33 }
  0x6e   : > { %1448 = vmatprep.subr.bf16.mxu0 %v4510_v34  ;;  %1490 = vmatpush1.bf16.msra.mxu1 %v4514_v35 }
  0x6f   : > { %1491 = vmatprep.subr.bf16.mxu1 %v4517_v36  ;;  %1789 = vperm.xlu1 %3641, %v1786_v30  }
  0x71   : > { %1449 = vmatpush1.bf16.msra.mxu0 %v4523_v38 }
  0x72   : > { %1450 = vmatprep.subr.bf16.mxu0 %v4528_v39  ;;  %1492 = vmatpush1.bf16.msra.mxu1 %v4532_v40 }
  0x73   : > { %993 = vmatmul.mubr.bf16.gmra.mrb[12].mxu0 %v3761_v42  ;;  %1106 = vmatmul.mubr.bf16.gmra.mrb[12].mxu1 %v3761_v42  ;;  %v1787_v42 = vsel %vm1785_vm9, 1, %v4210_v1 }
  0x74   : > { %1002 = vmatprep.mubr.bf16.mxu0 %v3768_v43  ;;  %1115 = vmatprep.mubr.bf16.mxu1 %v3768_v43 }
  0x75   : > { %1451 = vmatpush1.bf16.msra.mxu0 %v4545_v44  ;;  %1493 = vmatprep.subr.bf16.mxu1 %v4548_v45 }
  0x76   : > { %1452 = vmatprep.subr.bf16.mxu0 %v4557_v46  ;;  %1494 = vmatpush1.bf16.msra.mxu1 %v4560_v47 }
  0x77   : > { %1495 = vmatprep.subr.bf16.mxu1 %v4563_v48  ;;  %1792 = vperm.xlu1 %3641, %v1787_v42  }
  0x79   : > { %1453 = vmatpush1.bf16.msra.mxu0 %v4572_v51 }
  0x7a   : > { %1496 = vmatpush1.bf16.msra.mxu1 %v4581_v52  ;;  %1639 = vmatprep.subr.bf16.mxu0 %v4397_v3 }
  0x7b   : > { %1003 = vmatmul.mubr.bf16.gmra.mrb[16].mxu0 %v3770_v53  ;;  %1116 = vmatmul.mubr.bf16.gmra.mrb[16].mxu1 %v3770_v53 }
  0x7c   : > { %1012 = vmatprep.mubr.bf16.mxu0 %v3777_v54  ;;  %1125 = vmatprep.mubr.bf16.mxu1 %v3777_v54 }
  0x7d   : > { %1682 = vmatprep.subr.bf16.mxu1 %v4400_v4 }
  0x83   : > { %1013 = vmatmul.mubr.bf16.gmra.mrb[20].mxu0 %v3779_v59  ;;  %1126 = vmatmul.mubr.bf16.gmra.mrb[20].mxu1 %v3779_v59 }
  0x84   : > { %1022 = vmatprep.mubr.bf16.mxu0 %v3786_v60  ;;  %1135 = vmatprep.mubr.bf16.mxu1 %v3786_v60 }
  0x8b   : > { %1023 = vmatmul.mubr.bf16.gmra.mrb[24].mxu0 %v3788_v0  ;;  %1136 = vmatmul.mubr.bf16.gmra.mrb[24].mxu1 %v3788_v0 }
  0x8c   : > { %1032 = vmatprep.mubr.bf16.mxu0 %v3797_v2  ;;  %1145 = vmatprep.mubr.bf16.mxu1 %v3797_v2 }
  0x93   : > { %1033 = vmatmul.mubr.bf16.gmra.mrb[28].mxu0 %v3800_v5  ;;  %1146 = vmatmul.mubr.bf16.gmra.mrb[28].mxu1 %v3800_v5 }
  0x94   : > { %1470 = vmatprep.mubr.bf16.mxu0 %v4210_v1  ;;  %1513 = vmatprep.mubr.bf16.mxu1 %v4210_v1 }
  0x9b   : > { %1471 = vmatmul.mubr.bf16.vlgmr.msra.gmra.mrb[32].mxu0 %v4211_v7  ;;  %1514 = vmatmul.mubr.bf16.vlgmr.msra.gmra.mrb[32].mxu1 %v4211_v7  ;;  %v1988_v7 = vsel %vm4690_vm10, 1, %v4210_v1 }
  0x9c   : > { %1640 = vmatpush1.bf16.msra.mxu0 %v4407_v6  ;;  %1683 = vmatpush1.bf16.msra.mxu1 %v4418_v9  ;;  %v510_v6 = vlaneseq }
  0x9d   : > { %1641 = vmatprep.subr.bf16.mxu0 %v4414_v8  ;;  %1684 = vmatprep.subr.bf16.mxu1 %v4421_v11  ;;  %v508_v11 = vld [vmem:[%s403_s21] sm:$0xf]  ;;  %s4814_s21 = scalar_lea.vmem [#allocation5], %s3268_s12  ;;  %s3412_s12 = sshll.u32 %s1623_s19, 2 }
  0x9e   : > { %1671 = vmatprep.mubr.bf16.mxu0 %v4210_v1  ;;  %1714 = vmatprep.mubr.bf16.mxu1 %v4210_v1  ;;  %v511_v8 = vshrl.u32 %v510_v6, 7  ;;  %s1616_s22 = scalar_lea.vmem %s4814_s21, %s3400_s20 [#allocation5]  ;;  %s1817_s20 = scalar_lea.vmem %s4814_s21, %s3412_s12 [#allocation5] }
  0x9f   : > { %1993 = vperm.xlu1 %3641, %v1988_v7  }
  0xa0   : > { %1642 = vmatpush1.bf16.msra.mxu0 %v4425_v12  ;;  %1685 = vmatpush1.bf16.msra.mxu1 %v4439_v15  ;;  %v512_v9 = vsub.s32 0, %v511_v8  ;;  %v520_v10 = vsub.s32 2, %v511_v8  ;;  %v516_v12 = vsub.s32 1, %v511_v8  ;;  %v524_v16 = vsub.s32 3, %v511_v8 }
  0xa1   : > { %1643 = vmatprep.subr.bf16.mxu0 %v4434_v14  ;;  %1686 = vmatprep.subr.bf16.mxu1 %v4461_v21 }
  0xa2   : > { %v4673_v19 = vrot.slane %v508_v11, %v512_v9  ;;  %v4681_v25 = vrot.slane %v508_v11, %v524_v16  ;;  %v2188_v9 = vsel %vm2186_vm11, 1, %v4210_v1 }
  0xa3   : > { %2193 = vperm.xlu1 %3641, %v2188_v9  }
  0xa4   : > { %1644 = vmatpush1.bf16.msra.mxu0 %v4458_v20  ;;  %1687 = vmatpush1.bf16.msra.mxu1 %v4469_v23 }
  0xa5   : > { %1645 = vmatprep.subr.bf16.mxu0 %v4465_v22  ;;  %1688 = vmatprep.subr.bf16.mxu1 %v4472_v24 }
  0xa7   : > { %2393 = vperm.xlu1 %3641, %v2388_v13  }
  0xa8   : > { %1646 = vmatpush1.bf16.msra.mxu0 %v4479_v26  ;;  %1689 = vmatpush1.bf16.msra.mxu1 %v4488_v28 }
  0xa9   : > { %1647 = vmatprep.subr.bf16.mxu0 %v4484_v27  ;;  %1690 = vmatprep.subr.bf16.mxu1 %v4503_v33 }
  0xac   : > { %1648 = vmatpush1.bf16.msra.mxu0 %v4500_v32  ;;  %1691 = vmatpush1.bf16.msra.mxu1 %v4514_v35 }
  0xad   : > { %1649 = vmatprep.subr.bf16.mxu0 %v4510_v34  ;;  %1692 = vmatprep.subr.bf16.mxu1 %v4517_v36 }
  0xb0   : > { %1650 = vmatpush1.bf16.msra.mxu0 %v4523_v38  ;;  %1693 = vmatpush1.bf16.msra.mxu1 %v4532_v40 }
  0xb1   : > { %1651 = vmatprep.subr.bf16.mxu0 %v4528_v39  ;;  %1694 = vmatprep.subr.bf16.mxu1 %v4548_v45 }
  0xb4   : > { %1652 = vmatpush1.bf16.msra.mxu0 %v4545_v44  ;;  %1695 = vmatpush1.bf16.msra.mxu1 %v4560_v47 }
  0xb5   : > { %1653 = vmatprep.subr.bf16.mxu0 %v4557_v46  ;;  %1696 = vmatprep.subr.bf16.mxu1 %v4563_v48 }
  0xb8   : > { %1654 = vmatpush1.bf16.msra.mxu0 %v4572_v51  ;;  %1697 = vmatpush1.bf16.msra.mxu1 %v4581_v52 }
  0xb9   : > { %1840 = vmatprep.subr.bf16.mxu0 %v4397_v3  ;;  %1883 = vmatprep.subr.bf16.mxu1 %v4400_v4  ;;  %v4675_v3 = vrot.slane %v508_v11, %v520_v10  ;;  %v4679_v4 = vrot.slane %v508_v11, %v516_v12 }
 0x12e   : > { %v964_v31 = vpop.f32.mrb[0].mxu0  ;;  %v1077_v37 = vpop.f32.mrb[0].mxu1 }
 0x12f   : > { %v965_v43 = vadd.f32 %v964_v31, %v4673_v19  ;;  %v1078_v49 = vadd.f32 %v1077_v37, %v4675_v3  ;;  %v966_v53 = vpop.f32.mrb[1].mxu0  ;;  %v1079_v54 = vpop.f32.mrb[1].mxu1 }
 0x130   : > { %v967_v56 = vadd.f32 %v966_v53, %v4679_v4  ;;  %v1080_v58 = vadd.f32 %v1079_v54, %v4681_v25  ;;  %v968_v59 = vpop.f32.mrb[2].mxu0  ;;  %v1081_v60 = vpop.f32.mrb[2].mxu1 }
 0x131   : > { %1156 = vst [vmem:[#allocation4] sm:$0xff] %v965_v43  ;;  %1158 = vst [vmem:[#allocation4 + $0x10] sm:$0xff] %v1078_v49  ;;  %v969_v62 = vadd.f32 %v968_v59, %v4673_v19  ;;  %v1082_v63 = vadd.f32 %v1081_v60, %v4675_v3  ;;  %v970_v0 = vpop.f32.mrb[3].mxu0  ;;  %v1083_v2 = vpop.f32.mrb[3].mxu1  ;;  %v2589_v59 = vsel %vm2587_vm13, 1, %v4210_v1 }
 0x132   : > { %1157 = vst [vmem:[#allocation4 + $0x8] sm:$0xff] %v967_v56  ;;  %1159 = vst [vmem:[#allocation4 + $0x18] sm:$0xff] %v1080_v58  ;;  %v971_v29 = vadd.f32 %v970_v0, %v4679_v4  ;;  %v1084_v5 = vadd.f32 %v1083_v2, %v4681_v25  ;;  %2594 = vperm.xlu1 %3641, %v2589_v59  }
 0x133   : > { %1160 = vst [vmem:[#allocation4 + $0x20] sm:$0xff] %v969_v62  ;;  %1162 = vst [vmem:[#allocation4 + $0x30] sm:$0xff] %v1082_v63 }
 0x134   : > { %1161 = vst [vmem:[#allocation4 + $0x28] sm:$0xff] %v971_v29  ;;  %1163 = vst [vmem:[#allocation4 + $0x38] sm:$0xff] %v1084_v5 }
 0x136   : > { %v974_v6 = vpop.f32.mrb[4].mxu0  ;;  %v1087_v8 = vpop.f32.mrb[4].mxu1 }
 0x137   : > { %v975_v10 = vadd.f32 %v974_v6, %v4673_v19  ;;  %v1088_v11 = vadd.f32 %v1087_v8, %v4675_v3  ;;  %v976_v12 = vpop.f32.mrb[5].mxu0  ;;  %v1089_v16 = vpop.f32.mrb[5].mxu1 }
 0x138   : > { %v977_v18 = vadd.f32 %v976_v12, %v4679_v4  ;;  %v1090_v41 = vadd.f32 %v1089_v16, %v4681_v25  ;;  %v978_v30 = vpop.f32.mrb[6].mxu0  ;;  %v1091_v31 = vpop.f32.mrb[6].mxu1 }
 0x139   : > { %1164 = vst [vmem:[#allocation4 + $0x40] sm:$0xff] %v975_v10  ;;  %1166 = vst [vmem:[#allocation4 + $0x50] sm:$0xff] %v1088_v11  ;;  %v979_v37 = vadd.f32 %v978_v30, %v4673_v19  ;;  %v1092_v42 = vadd.f32 %v1091_v31, %v4675_v3  ;;  %v980_v43 = vpop.f32.mrb[7].mxu0  ;;  %v1093_v49 = vpop.f32.mrb[7].mxu1  ;;  %v2790_v11 = vsel %vm4729_vm14, 1, %v4210_v1 }
 0x13a   : > { %1165 = vst [vmem:[#allocation4 + $0x48] sm:$0xff] %v977_v18  ;;  %1167 = vst [vmem:[#allocation4 + $0x58] sm:$0xff] %v1090_v41  ;;  %v981_v53 = vadd.f32 %v980_v43, %v4679_v4  ;;  %v1094_v54 = vadd.f32 %v1093_v49, %v4681_v25  ;;  %2795 = vperm.xlu1 %3641, %v2790_v11   ;;  %v2991_v18 = vsel %vm2989_vm15, 1, %v4210_v1 }
 0x13b   : > { %1168 = vst [vmem:[#allocation4 + $0x60] sm:$0xff] %v979_v37  ;;  %1170 = vst [vmem:[#allocation4 + $0x70] sm:$0xff] %v1092_v42 }
 0x13c   : > { %1169 = vst [vmem:[#allocation4 + $0x68] sm:$0xff] %v981_v53  ;;  %1171 = vst [vmem:[#allocation4 + $0x78] sm:$0xff] %v1094_v54 }
 0x13e   : > { %v984_v56 = vpop.f32.mrb[8].mxu0  ;;  %v1097_v58 = vpop.f32.mrb[8].mxu1  ;;  %2996 = vperm.xlu1 %3641, %v2991_v18  }
 0x13f   : > { %v985_v60 = vadd.f32 %v984_v56, %v4673_v19  ;;  %v1098_v62 = vadd.f32 %v1097_v58, %v4675_v3  ;;  %v986_v63 = vpop.f32.mrb[9].mxu0  ;;  %v1099_v0 = vpop.f32.mrb[9].mxu1 }
 0x140   : > { %v987_v55 = vadd.f32 %v986_v63, %v4679_v4  ;;  %v1100_v2 = vadd.f32 %v1099_v0, %v4681_v25  ;;  %v988_v29 = vpop.f32.mrb[10].mxu0  ;;  %v1101_v5 = vpop.f32.mrb[10].mxu1 }
 0x141   : > { %1172 = vst [vmem:[#allocation4 + $0x80] sm:$0xff] %v985_v60  ;;  %1174 = vst [vmem:[#allocation4 + $0x90] sm:$0xff] %v1098_v62  ;;  %v989_v7 = vadd.f32 %v988_v29, %v4673_v19  ;;  %v1102_v6 = vadd.f32 %v1101_v5, %v4675_v3  ;;  %v990_v8 = vpop.f32.mrb[11].mxu0  ;;  %v1103_v9 = vpop.f32.mrb[11].mxu1 }
 0x142   : > { %1173 = vst [vmem:[#allocation4 + $0x88] sm:$0xff] %v987_v55  ;;  %1175 = vst [vmem:[#allocation4 + $0x98] sm:$0xff] %v1100_v2  ;;  %v991_v57 = vadd.f32 %v990_v8, %v4679_v4  ;;  %v1104_v10 = vadd.f32 %v1103_v9, %v4681_v25 }
 0x143   : > { %1176 = vst [vmem:[#allocation4 + $0xa0] sm:$0xff] %v989_v7  ;;  %1178 = vst [vmem:[#allocation4 + $0xb0] sm:$0xff] %v1102_v6 }
 0x144   : > { %1177 = vst [vmem:[#allocation4 + $0xa8] sm:$0xff] %v991_v57  ;;  %1179 = vst [vmem:[#allocation4 + $0xb8] sm:$0xff] %v1104_v10 }
 0x146   : > { %v994_v12 = vpop.f32.mrb[12].mxu0  ;;  %v1107_v16 = vpop.f32.mrb[12].mxu1 }
 0x147   : > { %v995_v41 = vadd.f32 %v994_v12, %v4673_v19  ;;  %v1108_v30 = vadd.f32 %v1107_v16, %v4675_v3  ;;  %v996_v31 = vpop.f32.mrb[13].mxu0  ;;  %v1109_v37 = vpop.f32.mrb[13].mxu1 }
 0x148   : > { %v997_v42 = vadd.f32 %v996_v31, %v4679_v4  ;;  %v1110_v43 = vadd.f32 %v1109_v37, %v4681_v25  ;;  %v998_v49 = vpop.f32.mrb[14].mxu0  ;;  %v1111_v53 = vpop.f32.mrb[14].mxu1 }
 0x149   : > { %1180 = vst [vmem:[#allocation4 + $0xc0] sm:$0xff] %v995_v41  ;;  %1182 = vst [vmem:[#allocation4 + $0xd0] sm:$0xff] %v1108_v30  ;;  %v999_v17 = vadd.f32 %v998_v49, %v4673_v19  ;;  %v1112_v61 = vadd.f32 %v1111_v53, %v4675_v3  ;;  %v1000_v54 = vpop.f32.mrb[15].mxu0  ;;  %v1113_v13 = vpop.f32.mrb[15].mxu1 }
 0x14a   : > { %1181 = vst [vmem:[#allocation4 + $0xc8] sm:$0xff] %v997_v42  ;;  %1183 = vst [vmem:[#allocation4 + $0xd8] sm:$0xff] %v1110_v43  ;;  %v1001_v56 = vadd.f32 %v1000_v54, %v4679_v4  ;;  %v1114_v58 = vadd.f32 %v1113_v13, %v4681_v25 }
 0x14b   : > { %1184 = vst [vmem:[#allocation4 + $0xe0] sm:$0xff] %v999_v17  ;;  %1186 = vst [vmem:[#allocation4 + $0xf0] sm:$0xff] %v1112_v61 }
 0x14c   : > { %1185 = vst [vmem:[#allocation4 + $0xe8] sm:$0xff] %v1001_v56  ;;  %1187 = vst [vmem:[#allocation4 + $0xf8] sm:$0xff] %v1114_v58 }
 0x14e   : > { %v1004_v59 = vpop.f32.mrb[16].mxu0  ;;  %v1117_v60 = vpop.f32.mrb[16].mxu1 }
 0x14f   : > { %v1005_v62 = vadd.f32 %v1004_v59, %v4673_v19  ;;  %v1118_v63 = vadd.f32 %v1117_v60, %v4675_v3  ;;  %v1006_v0 = vpop.f32.mrb[17].mxu0  ;;  %v1119_v50 = vpop.f32.mrb[17].mxu1 }
 0x150   : > { %v1007_v55 = vadd.f32 %v1006_v0, %v4679_v4  ;;  %v1120_v2 = vadd.f32 %v1119_v50, %v4681_v25  ;;  %v1008_v29 = vpop.f32.mrb[18].mxu0  ;;  %v1121_v5 = vpop.f32.mrb[18].mxu1 }
 0x151   : > { %1188 = vst [vmem:[#allocation4 + $0x100] sm:$0xff] %v1005_v62  ;;  %1190 = vst [vmem:[#allocation4 + $0x110] sm:$0xff] %v1118_v63  ;;  %v1009_v7 = vadd.f32 %v1008_v29, %v4673_v19  ;;  %v1122_v6 = vadd.f32 %v1121_v5, %v4675_v3  ;;  %v1010_v8 = vpop.f32.mrb[19].mxu0  ;;  %v1123_v9 = vpop.f32.mrb[19].mxu1 }
 0x152   : > { %1189 = vst [vmem:[#allocation4 + $0x108] sm:$0xff] %v1007_v55  ;;  %1191 = vst [vmem:[#allocation4 + $0x118] sm:$0xff] %v1120_v2  ;;  %v1011_v57 = vadd.f32 %v1010_v8, %v4679_v4  ;;  %v1124_v10 = vadd.f32 %v1123_v9, %v4681_v25 }
 0x153   : > { %1192 = vst [vmem:[#allocation4 + $0x120] sm:$0xff] %v1009_v7  ;;  %1194 = vst [vmem:[#allocation4 + $0x130] sm:$0xff] %v1122_v6 }
 0x154   : > { %1193 = vst [vmem:[#allocation4 + $0x128] sm:$0xff] %v1011_v57  ;;  %1195 = vst [vmem:[#allocation4 + $0x138] sm:$0xff] %v1124_v10 }
 0x156   : > { %v1014_v11 = vpop.f32.mrb[20].mxu0  ;;  %v1127_v12 = vpop.f32.mrb[20].mxu1 }
 0x157   : > { %v1015_v16 = vadd.f32 %v1014_v11, %v4673_v19  ;;  %v1128_v18 = vadd.f32 %v1127_v12, %v4675_v3  ;;  %v1016_v41 = vpop.f32.mrb[21].mxu0  ;;  %v1129_v30 = vpop.f32.mrb[21].mxu1 }
 0x158   : > { %v1017_v31 = vadd.f32 %v1016_v41, %v4679_v4  ;;  %v1130_v37 = vadd.f32 %v1129_v30, %v4681_v25  ;;  %v1018_v42 = vpop.f32.mrb[22].mxu0  ;;  %v1131_v43 = vpop.f32.mrb[22].mxu1 }
 0x159   : > { %1196 = vst [vmem:[#allocation4 + $0x140] sm:$0xff] %v1015_v16  ;;  %1198 = vst [vmem:[#allocation4 + $0x150] sm:$0xff] %v1128_v18  ;;  %v1019_v49 = vadd.f32 %v1018_v42, %v4673_v19  ;;  %v1132_v53 = vadd.f32 %v1131_v43, %v4675_v3  ;;  %v1020_v17 = vpop.f32.mrb[23].mxu0  ;;  %v1133_v61 = vpop.f32.mrb[23].mxu1 }
 0x15a   : > { %1197 = vst [vmem:[#allocation4 + $0x148] sm:$0xff] %v1017_v31  ;;  %1199 = vst [vmem:[#allocation4 + $0x158] sm:$0xff] %v1130_v37  ;;  %v1021_v54 = vadd.f32 %v1020_v17, %v4679_v4  ;;  %v1134_v13 = vadd.f32 %v1133_v61, %v4681_v25 }
 0x15b   : > { %1200 = vst [vmem:[#allocation4 + $0x160] sm:$0xff] %v1019_v49  ;;  %1202 = vst [vmem:[#allocation4 + $0x170] sm:$0xff] %v1132_v53 }
 0x15c   : > { %1201 = vst [vmem:[#allocation4 + $0x168] sm:$0xff] %v1021_v54  ;;  %1203 = vst [vmem:[#allocation4 + $0x178] sm:$0xff] %v1134_v13 }
 0x15e   : > { %v1024_v56 = vpop.f32.mrb[24].mxu0  ;;  %v1137_v58 = vpop.f32.mrb[24].mxu1 }
 0x15f   : > { %v1025_v59 = vadd.f32 %v1024_v56, %v4673_v19  ;;  %v1138_v60 = vadd.f32 %v1137_v58, %v4675_v3  ;;  %v1026_v62 = vpop.f32.mrb[25].mxu0  ;;  %v1139_v63 = vpop.f32.mrb[25].mxu1 }
 0x160   : > { %v1027_v0 = vadd.f32 %v1026_v62, %v4679_v4  ;;  %v1140_v50 = vadd.f32 %v1139_v63, %v4681_v25  ;;  %v1028_v55 = vpop.f32.mrb[26].mxu0  ;;  %v1141_v2 = vpop.f32.mrb[26].mxu1 }
 0x161   : > { %1204 = vst [vmem:[#allocation4 + $0x180] sm:$0xff] %v1025_v59  ;;  %1206 = vst [vmem:[#allocation4 + $0x190] sm:$0xff] %v1138_v60  ;;  %v1029_v29 = vadd.f32 %v1028_v55, %v4673_v19  ;;  %v1142_v5 = vadd.f32 %v1141_v2, %v4675_v3  ;;  %v1030_v7 = vpop.f32.mrb[27].mxu0  ;;  %v1143_v6 = vpop.f32.mrb[27].mxu1 }
 0x162   : > { %1205 = vst [vmem:[#allocation4 + $0x188] sm:$0xff] %v1027_v0  ;;  %1207 = vst [vmem:[#allocation4 + $0x198] sm:$0xff] %v1140_v50  ;;  %v1031_v8 = vadd.f32 %v1030_v7, %v4679_v4  ;;  %v1144_v9 = vadd.f32 %v1143_v6, %v4681_v25 }
 0x163   : > { %1208 = vst [vmem:[#allocation4 + $0x1a0] sm:$0xff] %v1029_v29  ;;  %1210 = vst [vmem:[#allocation4 + $0x1b0] sm:$0xff] %v1142_v5 }
 0x164   : > { %1209 = vst [vmem:[#allocation4 + $0x1a8] sm:$0xff] %v1031_v8  ;;  %1211 = vst [vmem:[#allocation4 + $0x1b8] sm:$0xff] %v1144_v9 }
 0x166   : > { %v1034_v57 = vpop.f32.mrb[28].mxu0  ;;  %v1147_v10 = vpop.f32.mrb[28].mxu1 }
 0x167   : > { %v1035_v11 = vadd.f32 %v1034_v57, %v4673_v19  ;;  %v1148_v12 = vadd.f32 %v1147_v10, %v4675_v3  ;;  %v1036_v16 = vpop.f32.mrb[29].mxu0  ;;  %v1149_v18 = vpop.f32.mrb[29].mxu1 }
 0x168   : > { %v1037_v41 = vadd.f32 %v1036_v16, %v4679_v4  ;;  %v1150_v30 = vadd.f32 %v1149_v18, %v4681_v25  ;;  %v1038_v31 = vpop.f32.mrb[30].mxu0  ;;  %v1151_v37 = vpop.f32.mrb[30].mxu1 }
 0x169   : > { %1212 = vst [vmem:[#allocation4 + $0x1c0] sm:$0xff] %v1035_v11  ;;  %1214 = vst [vmem:[#allocation4 + $0x1d0] sm:$0xff] %v1148_v12  ;;  %v1039_v42 = vadd.f32 %v1038_v31, %v4673_v19  ;;  %v1152_v43 = vadd.f32 %v1151_v37, %v4675_v3  ;;  %v1040_v49 = vpop.f32.mrb[31].mxu0  ;;  %v1153_v53 = vpop.f32.mrb[31].mxu1 }
 0x16a   : > { %1213 = vst [vmem:[#allocation4 + $0x1c8] sm:$0xff] %v1037_v41  ;;  %1215 = vst [vmem:[#allocation4 + $0x1d8] sm:$0xff] %v1150_v30  ;;  %v1041_v17 = vadd.f32 %v1040_v49, %v4679_v4  ;;  %v1154_v61 = vadd.f32 %v1153_v53, %v4681_v25 }
 0x16b   : > { %1216 = vst [vmem:[#allocation4 + $0x1e0] sm:$0xff] %v1039_v42  ;;  %1218 = vst [vmem:[#allocation4 + $0x1f0] sm:$0xff] %v1152_v43 }
 0x16c   : > { %1217 = vst [vmem:[#allocation4 + $0x1e8] sm:$0xff] %v1041_v17  ;;  %1219 = vst [vmem:[#allocation4 + $0x1f8] sm:$0xff] %v1154_v61 }
 0x16e   : > { %v1472_v54 = vpop.f32.mrb[32].mxu0  ;;  %v1515_v19 = vpop.f32.mrb[32].mxu1 }
 0x16f   : > { %v1474_v13 = vpop.f32.mrb[33].mxu0  ;;  %v1517_v3 = vpop.f32.mrb[33].mxu1 }
 0x170   : > { %v1476_v56 = vpop.f32.mrb[34].mxu0  ;;  %v1519_v58 = vpop.f32.mrb[34].mxu1 }
 0x171   : > { %v1478_v59 = vpop.f32.mrb[35].mxu0  ;;  %v1521_v60 = vpop.f32.mrb[35].mxu1 }
 0x173   : > { %v1267_v4 = vld [vmem:[%s1266_s18] sm:$0xff]  ;;  %v1268_v62 = vld [vmem:[%s1266_s18 + $0x8] sm:$0xff]  ;;  %v1270_v8 = vld [vmem:[%s1266_s18 + $0x18] sm:$0xff] }
 0x174   : > { %v1271_v25 = vld [vmem:[%s1266_s18 + $0x20] sm:$0xff]  ;;  %v1524_v63 = vadd.f32 %v1472_v54, %v1267_v4  ;;  %v1525_v0 = vadd.f32 %v1474_v13, %v1268_v62  ;;  %v1272_v55 = vld [vmem:[%s1266_s18 + $0x28] sm:$0xff]  ;;  %v1274_v9 = vld [vmem:[%s1266_s18 + $0x38] sm:$0xff]  ;;  %v1527_v10 = vadd.f32 %v1517_v3, %v1270_v8 }
 0x175   : > { %v1528_v50 = vadd.f32 %v1476_v56, %v1271_v25  ;;  %v1529_v2 = vadd.f32 %v1478_v59, %v1272_v55  ;;  %v1269_v57 = vld [vmem:[%s1266_s18 + $0x10] sm:$0xff]  ;;  %v1531_v12 = vadd.f32 %v1521_v60, %v1274_v9 }
 0x176   : > { %v3392_v29 = vmul.f32 -1.442695, %v1524_v63  ;;  %v3394_v5 = vmul.f32 -1.442695, %v1525_v0  ;;  %v1273_v11 = vld [vmem:[%s1266_s18 + $0x30] sm:$0xff]  ;;  %v1526_v16 = vadd.f32 %v1515_v19, %v1269_v57  ;;  %s4884_s18 = scalar_lea.vmem [#allocation4], %s3498_s10 }
 0x177   : > { %v3393_v7 = vmul.f32 -1.442695, %v1528_v50  ;;  %v3395_v6 = vmul.f32 -1.442695, %v1529_v2  ;;  %v3396_v18 = vmul.f32 -1.442695, %v1527_v10  ;;  %v1530_v41 = vadd.f32 %v1519_v58, %v1273_v11 }
 0x178   : > { %3810 = vpow2.f32 %v3392_v29  ;;  %v3397_v30 = vmul.f32 -1.442695, %v1531_v12  ;;  %v4797_v29 = vpop.permute.xlu0 %1588 }
 0x179   : > { %3812 = vpow2.f32 %v3394_v5  ;;  %vm1593_vm0 = vcmp.eq.s32.totalorder %v4797_v29, 1 }
 0x17a   : > { %3814 = vpow2.f32 %v3393_v7 }
 0x17b   : > { %3816 = vpow2.f32 %v3395_v6 }
 0x17c   : > { %3818 = vtanh.f32 %v1526_v16  ;;  %v4807_v10 = vpop.permute.xlu0 %1591 }
 0x17d   : > { %3820 = vpow2.f32 %v3396_v18  ;;  %vm1594_vm1 = vcmp.eq.s32.totalorder %v4807_v10, 1 }
 0x17e   : > { %3822 = vtanh.f32 %v1530_v41  ;;  %vm3574_vm2 = vmpackc.low %vm1594_vm1, %vm1593_vm0  ;;  %v4824_v41 = vld [vmem:[%s4376_s8] ss:$16 sps:$4 sm:$0xff]  }
 0x17f   : > { %3824 = vpow2.f32 %v3397_v30  ;;  %v4828_v30 = vld [vmem:[%s4376_s8 + $0x8] ss:$16 sps:$4 sm:$0xff]  }
 0x182   : > { %v3811_v31 = vpop.eup %3810 }
 0x183   : > { %v3813_v37 = vpop.eup %3812  ;;  %v1540_v42 = vadd.f32 1.0, %v3811_v31  ;;  %v4832_v31 = vld [vmem:[%s4376_s8 + $0x24] ss:$16 sps:$4 sm:$0xff]  }
 0x184   : > { %v3815_v43 = vpop.eup %3814  ;;  %v1552_v49 = vadd.f32 1.0, %v3813_v37  ;;  %v4836_v37 = vld [vmem:[%s4376_s8 + $0x2c] ss:$16 sps:$4 sm:$0xff]  }
 0x185   : > { %v3817_v53 = vpop.eup %3816  ;;  %3826 = vrcp.f32 %v1540_v42  ;;  %v1541_v17 = vadd.f32 1.0, %v3815_v43  ;;  %v4842_v42 = vld [vmem:[%s4376_s8 + $0x20] ss:$16 sps:$4 sm:$0xff]  }
 0x186   : > { %3828 = vrcp.f32 %v1552_v49  ;;  %v1553_v61 = vadd.f32 1.0, %v3817_v53  ;;  %v3819_v54 = vpop.eup %3818  ;;  %v1635_v49 = vld [vmem:[%s4884_s18 + $0x38] sm:$0xff] }
 0x187   : > { %3830 = vrcp.f32 %v1541_v17  ;;  %v3821_v19 = vpop.eup %3820  ;;  %v1634_v17 = vld [vmem:[%s4884_s18 + $0x30] sm:$0xff] }
 0x188   : > { %3832 = vrcp.f32 %v1553_v61  ;;  %v3823_v13 = vpop.eup %3822  ;;  %v1566_v59 = vadd.f32 1.0, %v3821_v19 }
 0x189   : > { %v3825_v3 = vpop.eup %3824 }
 0x18a   : > { %v1567_v63 = vadd.f32 1.0, %v3825_v3  ;;  %3834 = vrcp.f32 %v1566_v59 }
 0x18f   : > { %v3827_v56 = vpop.eup %3826 }
 0x190   : > { %v3829_v58 = vpop.eup %3828  ;;  %v1574_v60 = vmul.f32 %v3827_v56, %v3819_v54 }
 0x191   : > { %v3831_v4 = vpop.eup %3830  ;;  %v1572_v62 = vmul.f32 0.0, %v3829_v58 }
 0x192   : > { %v3833_v25 = vpop.eup %3832  ;;  %v1575_v0 = vmul.f32 %v3831_v4, %v3823_v13 }
 0x193   : > { %v4790_v50 = vadd.f32 %v1574_v60, %v1572_v62  ;;  %v1573_v55 = vmul.f32 0.0, %v3833_v25 }
 0x194   : > { %v3835_v5 = vpop.eup %3834 }
 0x195   : > { %3836 = vtanh.f32 %v4790_v50  ;;  %v4793_v2 = vadd.f32 %v1575_v0, %v1573_v55 }
 0x196   : > { %3838 = vrcp.f32 %v1567_v63 }
 0x197   : > { %3840 = vtanh.f32 %v4793_v2 }
 0x19f   : > { %v3837_v7 = vpop.eup %3836 }
 0x1a0   : > { %v3839_v6 = vpop.eup %3838  ;;  %v1580_v8 = vmul.f32 %v3837_v7, %v3835_v5  ;;  %v1790_v5 = vpop.permute.xlu1 %1789 }
 0x1a1   : > { %v3841_v9 = vpop.eup %3840  ;;  %vm1794_vm3 = vcmp.eq.s32.totalorder %v1790_v5, 1 }
 0x1a2   : > { %v4805_v57 = vsel %vm1593_vm0, %v1580_v8, 0.0  ;;  %v1581_v11 = vmul.f32 %v3841_v9, %v3839_v6  ;;  %v1601_v6 = vsel %vm1593_vm0, %v4790_v50, 0.0 }
 0x1a4   : > { %v4812_v12 = vsel %vm1594_vm1, %v1581_v11, 0.0  ;;  %v3575_v16 = vpack.c.bf16 %v1581_v11, %v1580_v8  ;;  %v1793_v50 = vpop.permute.xlu1 %1792 }
 0x1a5   : > { %v3532_v18 = vpack.c.bf16 %v4812_v12, %v4805_v57  ;;  %vm1795_vm4 = vcmp.eq.s32.totalorder %v1793_v50, 1 }
 0x1a6   : > { %3576 = vmatmul.mubr.msk.bf16.vlgmr.msra.gmra.mrb[36].mxu0 %vm3574_vm2, %v3575_v16  ;;  %3579 = vmatmul.mubr.msk.bf16.vlgmr.msra.gmra.mrb[36].mxu1 %vm3574_vm2, %v3575_v16 }
 0x1a7   : > { %3533 = vst [vmem:[%s1616_s22] sm:$0xff] %v3532_v18   ;;  %1841 = vmatpush1.bf16.msra.mxu0 %v4824_v41  ;;  %1884 = vmatpush1.bf16.msra.mxu1 %v4828_v30  ;;  %s3570_s22 = smul.u32 48, %s4200_s27 }
 0x1a8   : > { %1842 = vmatprep.subr.bf16.mxu0 %v4832_v31  ;;  %1885 = vmatprep.subr.bf16.mxu1 %v4836_v37 }
 0x1a9   : > { %1872 = vmatprep.mubr.bf16.mxu0 %v4210_v1  ;;  %1915 = vmatprep.mubr.bf16.mxu1 %v4210_v1  ;;  %s5028_s23 = sadd.s32 32, %s3570_s22 }
 0x1aa   : > { %s1824_s16 = sshra.s32 %s5028_s23, 3 }
 0x1ab   : > { %1843 = vmatpush1.bf16.msra.mxu0 %v4842_v42  ;;  %1886 = vmatpush1.bf16.msra.mxu1 %v4439_v15  ;;  %v4875_v15 = vld [vmem:[%s4376_s8 + $0xc] ss:$16 sps:$4 sm:$0xff]   ;;  %s3503_s19 = sshll.u32 %s1824_s16, 5 }
 0x1ac   : > { %1844 = vmatprep.subr.bf16.mxu0 %v4434_v14  ;;  %1887 = vmatprep.subr.bf16.mxu1 %v4461_v21  ;;  %v4871_v14 = vld [vmem:[%s4376_s8 + $0x4] ss:$16 sps:$4 sm:$0xff]   ;;  %s5033_s10 = scalar_lea.vmem [#allocation4], %s3503_s19 }
 0x1af   : > { %1845 = vmatpush1.bf16.msra.mxu0 %v4458_v20  ;;  %1888 = vmatpush1.bf16.msra.mxu1 %v4469_v23  ;;  %v1628_v20 = vld [vmem:[%s4884_s18] sm:$0xff] }
 0x1b0   : > { %1846 = vmatprep.subr.bf16.mxu0 %v4465_v22  ;;  %1889 = vmatprep.subr.bf16.mxu1 %v4472_v24  ;;  %v1629_v24 = vld [vmem:[%s4884_s18 + $0x8] sm:$0xff] }
 0x1b3   : > { %1847 = vmatpush1.bf16.msra.mxu0 %v4479_v26  ;;  %1890 = vmatpush1.bf16.msra.mxu1 %v4488_v28 }
 0x1b4   : > { %1848 = vmatprep.subr.bf16.mxu0 %v4484_v27  ;;  %1891 = vmatprep.subr.bf16.mxu1 %v4503_v33 }
 0x1b7   : > { %1849 = vmatpush1.bf16.msra.mxu0 %v4500_v32  ;;  %1892 = vmatpush1.bf16.msra.mxu1 %v4514_v35  ;;  %v1632_v32 = vld [vmem:[%s4884_s18 + $0x20] sm:$0xff] }
 0x1b8   : > { %1850 = vmatprep.subr.bf16.mxu0 %v4510_v34  ;;  %1893 = vmatprep.subr.bf16.mxu1 %v4517_v36 }
 0x1bb   : > { %1851 = vmatpush1.bf16.msra.mxu0 %v4523_v38  ;;  %1894 = vmatpush1.bf16.msra.mxu1 %v4532_v40  ;;  %v1633_v38 = vld [vmem:[%s4884_s18 + $0x28] sm:$0xff] }
 0x1bc   : > { %1852 = vmatprep.subr.bf16.mxu0 %v4528_v39  ;;  %1895 = vmatprep.subr.bf16.mxu1 %v4548_v45 }
 0x1bf   : > { %1853 = vmatpush1.bf16.msra.mxu0 %v4545_v44  ;;  %1896 = vmatpush1.bf16.msra.mxu1 %v4560_v47 }
 0x1c0   : > { %1854 = vmatprep.subr.bf16.mxu0 %v4557_v46  ;;  %1897 = vmatprep.subr.bf16.mxu1 %v4563_v48  ;;  %v1631_v48 = vld [vmem:[%s4884_s18 + $0x18] sm:$0xff] }
 0x1c3   : > { %1855 = vmatpush1.bf16.msra.mxu0 %v4572_v51  ;;  %1898 = vmatpush1.bf16.msra.mxu1 %v4581_v52  ;;  %v1630_v52 = vld [vmem:[%s4884_s18 + $0x10] sm:$0xff]  ;;  %s3424_s18 = sshll.u32 %s1824_s16, 2 }
 0x1c4   : > { %2040 = vmatprep.subr.bf16.mxu0 %v4871_v14  ;;  %2083 = vmatprep.subr.bf16.mxu1 %v4875_v15  ;;  %s2018_s12 = scalar_lea.vmem %s4814_s21, %s3424_s18 [#allocation5] }
 0x279   : > { %v1673_v21 = vpop.f32.mrb[36].mxu0  ;;  %v1716_v22 = vpop.f32.mrb[36].mxu1 }
 0x27a   : > { %v1725_v23 = vadd.f32 %v1673_v21, %v1628_v20  ;;  %v1675_v26 = vpop.f32.mrb[37].mxu0  ;;  %v1718_v27 = vpop.f32.mrb[37].mxu1  ;;  %v1727_v43 = vadd.f32 %v1716_v22, %v1630_v52  ;;  %v4950_v52 = vld [vmem:[%s4376_s8 + $0x6c] ss:$16 sps:$4 sm:$0xff]  }
 0x27b   : > { %v1726_v28 = vadd.f32 %v1675_v26, %v1629_v24  ;;  %v1677_v33 = vpop.f32.mrb[38].mxu0  ;;  %v1720_v34 = vpop.f32.mrb[38].mxu1  ;;  %v1728_v51 = vadd.f32 %v1718_v27, %v1631_v48  ;;  %v4942_v48 = vld [vmem:[%s4376_s8 + $0x48] ss:$16 sps:$4 sm:$0xff]  }
 0x27c   : > { %v3404_v35 = vmul.f32 -1.442695, %v1725_v23  ;;  %v1729_v36 = vadd.f32 %v1677_v33, %v1632_v32  ;;  %v1679_v39 = vpop.f32.mrb[39].mxu0  ;;  %v1722_v40 = vpop.f32.mrb[39].mxu1  ;;  %v1731_v54 = vadd.f32 %v1720_v34, %v1634_v17  ;;  %v1602_v23 = vsel %vm1594_vm1, %v4793_v2, 0.0 }
 0x27d   : > { %v3406_v44 = vmul.f32 -1.442695, %v1726_v28  ;;  %v1730_v45 = vadd.f32 %v1679_v39, %v1633_v38  ;;  %v3408_v53 = vmul.f32 -1.442695, %v1728_v51  ;;  %v1732_v61 = vadd.f32 %v1722_v40, %v1635_v49  ;;  %v4946_v51 = vld [vmem:[%s4376_s8 + $0x64] ss:$16 sps:$4 sm:$0xff]  }
 0x27e   : > { %3842 = vpow2.f32 %v3404_v35  ;;  %v3405_v46 = vmul.f32 -1.442695, %v1729_v36  ;;  %v4958_v49 = vld [vmem:[%s4376_s8 + $0x68] ss:$16 sps:$4 sm:$0xff]   ;;  %v4966_v17 = vld [vmem:[%s4376_s8 + $0x8c] ss:$16 sps:$4 sm:$0xff]  }
 0x27f   : > { %3844 = vpow2.f32 %v3406_v44  ;;  %v3407_v47 = vmul.f32 -1.442695, %v1730_v45  ;;  %v3409_v56 = vmul.f32 -1.442695, %v1732_v61  ;;  %v4970_v61 = vld [vmem:[%s4376_s8 + $0x80] ss:$16 sps:$4 sm:$0xff]  }
 0x280   : > { %3846 = vpow2.f32 %v3405_v46  ;;  %v4934_v46 = vld [vmem:[%s4376_s8 + $0x4c] ss:$16 sps:$4 sm:$0xff]  }
 0x281   : > { %3848 = vpow2.f32 %v3407_v47  ;;  %v4938_v47 = vld [vmem:[%s4376_s8 + $0x40] ss:$16 sps:$4 sm:$0xff]  }
 0x282   : > { %3850 = vtanh.f32 %v1727_v43  ;;  %v4954_v43 = vld [vmem:[%s4376_s8 + $0x60] ss:$16 sps:$4 sm:$0xff]  }
 0x283   : > { %3852 = vpow2.f32 %v3408_v53  ;;  %v4962_v53 = vld [vmem:[%s4376_s8 + $0x84] ss:$16 sps:$4 sm:$0xff]  }
 0x284   : > { %3854 = vtanh.f32 %v1731_v54  ;;  %v4974_v54 = vld [vmem:[%s4376_s8 + $0x88] ss:$16 sps:$4 sm:$0xff]  }
 0x288   : > { %v3843_v19 = vpop.eup %3842 }
 0x289   : > { %v3845_v13 = vpop.eup %3844  ;;  %v1741_v3 = vadd.f32 1.0, %v3843_v19  ;;  %v4978_v19 = vld [vmem:[%s4376_s8 + $0xa4] ss:$16 sps:$4 sm:$0xff]  }
 0x28a   : > { %v1753_v58 = vadd.f32 1.0, %v3845_v13  ;;  %v3847_v59 = vpop.eup %3846  ;;  %v4982_v13 = vld [vmem:[%s4376_s8 + $0xac] ss:$16 sps:$4 sm:$0xff]  }
 0x28b   : > { %3856 = vrcp.f32 %v1741_v3  ;;  %v1742_v60 = vadd.f32 1.0, %v3847_v59  ;;  %v3849_v4 = vpop.eup %3848  ;;  %v4986_v3 = vld [vmem:[%s4376_s8 + $0xa0] ss:$16 sps:$4 sm:$0xff]   ;;  %v4998_v59 = vld [vmem:[%s4376_s8 + $0xcc] ss:$16 sps:$4 sm:$0xff]  }
 0x28c   : > { %3858 = vrcp.f32 %v1753_v58  ;;  %v1754_v62 = vadd.f32 1.0, %v3849_v4  ;;  %v3851_v25 = vpop.eup %3850  ;;  %v4994_v58 = vld [vmem:[%s4376_s8 + $0xc4] ss:$16 sps:$4 sm:$0xff]   ;;  %v5006_v4 = vld [vmem:[%s4376_s8 + $0xc8] ss:$16 sps:$4 sm:$0xff]  }
 0x28d   : > { %3860 = vpow2.f32 %v3409_v56  ;;  %v3853_v63 = vpop.eup %3852  ;;  %v4990_v56 = vld [vmem:[%s4376_s8 + $0xa8] ss:$16 sps:$4 sm:$0xff]  }
 0x28e   : > { %3862 = vrcp.f32 %v1742_v60  ;;  %v3855_v0 = vpop.eup %3854  ;;  %v1767_v8 = vadd.f32 1.0, %v3853_v63  ;;  %v5002_v60 = vld [vmem:[%s4376_s8 + $0xc0] ss:$16 sps:$4 sm:$0xff]  }
 0x28f   : > { %3864 = vrcp.f32 %v1754_v62  ;;  %v5010_v62 = vld [vmem:[%s4376_s8 + $0xe4] ss:$16 sps:$4 sm:$0xff]   ;;  %v5018_v63 = vld [vmem:[%s4376_s8 + $0xe0] ss:$16 sps:$4 sm:$0xff]  }
 0x290   : > { %3866 = vrcp.f32 %v1767_v8  ;;  %v1830_v8 = vld [vmem:[%s5033_s10 + $0x8] sm:$0xff] }
 0x295   : > { %v3857_v55 = vpop.eup %3856 }
 0x296   : > { %v3859_v7 = vpop.eup %3858  ;;  %v1775_v9 = vmul.f32 %v3857_v55, %v3851_v25  ;;  %v5014_v25 = vld [vmem:[%s4376_s8 + $0xec] ss:$16 sps:$4 sm:$0xff]   ;;  %v1829_v55 = vld [vmem:[%s5033_s10] sm:$0xff] }
 0x297   : > { %v3861_v11 = vpop.eup %3860  ;;  %v1773_v16 = vmul.f32 %v3859_v7, %v1601_v6 }
 0x298   : > { %v3863_v18 = vpop.eup %3862  ;;  %v1768_v24 = vadd.f32 1.0, %v3861_v11 }
 0x299   : > { %v1777_v20 = vadd.f32 %v1775_v9, %v1773_v16  ;;  %v1776_v21 = vmul.f32 %v3863_v18, %v3855_v0  ;;  %v3865_v22 = vpop.eup %3864  ;;  %v5022_v0 = vld [vmem:[%s4376_s8 + $0xe8] ss:$16 sps:$4 sm:$0xff]   ;;  %v1833_v18 = vld [vmem:[%s5033_s10 + $0x20] sm:$0xff] }
 0x29a   : > { %v1774_v26 = vmul.f32 %v3865_v22, %v1602_v23  ;;  %v3867_v32 = vpop.eup %3866 }
 0x29b   : > { %3868 = vtanh.f32 %v1777_v20  ;;  %v4901_v29 = vsel %vm1794_vm3, %v1777_v20, %v1601_v6 }
 0x29c   : > { %v1778_v27 = vadd.f32 %v1776_v21, %v1774_v26  ;;  %3870 = vrcp.f32 %v1768_v24  ;;  %v1834_v24 = vld [vmem:[%s5033_s10 + $0x28] sm:$0xff] }
 0x29e   : > { %3872 = vtanh.f32 %v1778_v27  ;;  %v4903_v28 = vsel %vm1795_vm4, %v1778_v27, %v1602_v23 }
 0x2a5   : > { %v3869_v33 = vpop.eup %3868 }
 0x2a6   : > { %v1781_v10 = vmul.f32 %v3869_v33, %v3867_v32  ;;  %v3871_v2 = vpop.eup %3870 }
 0x2a8   : > { %v3873_v34 = vpop.eup %3872  ;;  %v4909_v36 = vsel %vm1794_vm3, %v1781_v10, %v4805_v57  ;;  %v1806_v38 = vsel %vm1794_vm3, %v1781_v10, 0.0  ;;  %v4926_v57 = vld [vmem:[%s4376_s8 + $0x28] ss:$16 sps:$4 sm:$0xff]  }
 0x2a9   : > { %v1782_v35 = vmul.f32 %v3873_v34, %v3871_v2  ;;  %v1832_v2 = vld [vmem:[%s5033_s10 + $0x18] sm:$0xff] }
 0x2ab   : > { %v4913_v39 = vsel %vm1795_vm4, %v1782_v35, %v4812_v12  ;;  %v1807_v40 = vsel %vm1795_vm4, %v1782_v35, 0.0  ;;  %v4930_v12 = vld [vmem:[%s4376_s8 + $0x44] ss:$16 sps:$4 sm:$0xff]  }
 0x2ac   : > { %v3537_v44 = vpack.c.bf16 %v1807_v40, %v1806_v38  ;;  %v1839_v45 = vpack.c.bf16 %v4913_v39, %v4909_v36  ;;  %v1831_v35 = vld [vmem:[%s5033_s10 + $0x10] sm:$0xff]  ;;  %v1836_v40 = vld [vmem:[%s5033_s10 + $0x38] sm:$0xff] }
 0x2ae   : > { %3538 = vst [vmem:[%s1817_s20] sm:$0xff] %v3537_v44   ;;  %1873 = vmatmul.mubr.bf16.vlgmr.msra.gmra.mrb[40].mxu0 %v1839_v45  ;;  %1916 = vmatmul.mubr.bf16.vlgmr.msra.gmra.mrb[40].mxu1 %v1839_v45  ;;  %v1835_v45 = vld [vmem:[%s5033_s10 + $0x30] sm:$0xff]  ;;  %s3506_s20 = sshll.u32 %s4200_s27, 4 }
 0x2af   : > { %2041 = vmatpush1.bf16.msra.mxu0 %v4824_v41  ;;  %2084 = vmatpush1.bf16.msra.mxu1 %v4828_v30  ;;  %s5100_s22 = sadd.s32 48, %s3506_s20 }
 0x2b0   : > { %2042 = vmatprep.subr.bf16.mxu0 %v4832_v31  ;;  %2085 = vmatprep.subr.bf16.mxu1 %v4836_v37  ;;  %s2024_s23 = sshra.s32 %s5100_s22, 3 }
 0x2b1   : > { %2072 = vmatprep.mubr.bf16.mxu0 %v4210_v1  ;;  %2115 = vmatprep.mubr.bf16.mxu1 %v4210_v1  ;;  %s3508_s16 = sshll.u32 %s2024_s23, 5  ;;  %s3436_s10 = sshll.u32 %s2024_s23, 2 }
 0x2b2   : > { %s5105_s19 = scalar_lea.vmem [#allocation4], %s3508_s16  ;;  %s2218_s18 = scalar_lea.vmem %s4814_s21, %s3436_s10 [#allocation5] }
 0x2b3   : > { %2043 = vmatpush1.bf16.msra.mxu0 %v4842_v42  ;;  %2086 = vmatpush1.bf16.msra.mxu1 %v4926_v57 }
 0x2b4   : > { %2044 = vmatprep.subr.bf16.mxu0 %v4930_v12  ;;  %2087 = vmatprep.subr.bf16.mxu1 %v4934_v46 }
 0x2b7   : > { %2045 = vmatpush1.bf16.msra.mxu0 %v4938_v47  ;;  %2088 = vmatpush1.bf16.msra.mxu1 %v4942_v48 }
 0x2b8   : > { %2046 = vmatprep.subr.bf16.mxu0 %v4946_v51  ;;  %2089 = vmatprep.subr.bf16.mxu1 %v4950_v52 }
 0x2bb   : > { %2047 = vmatpush1.bf16.msra.mxu0 %v4954_v43  ;;  %2090 = vmatpush1.bf16.msra.mxu1 %v4958_v49 }
 0x2bc   : > { %2048 = vmatprep.subr.bf16.mxu0 %v4962_v53  ;;  %2091 = vmatprep.subr.bf16.mxu1 %v4966_v17 }
 0x2bf   : > { %2049 = vmatpush1.bf16.msra.mxu0 %v4970_v61  ;;  %2092 = vmatpush1.bf16.msra.mxu1 %v4974_v54 }
 0x2c0   : > { %2050 = vmatprep.subr.bf16.mxu0 %v4978_v19  ;;  %2093 = vmatprep.subr.bf16.mxu1 %v4982_v13 }
 0x2c3   : > { %2051 = vmatpush1.bf16.msra.mxu0 %v4986_v3  ;;  %2094 = vmatpush1.bf16.msra.mxu1 %v4990_v56 }
 0x2c4   : > { %2052 = vmatprep.subr.bf16.mxu0 %v4994_v58  ;;  %2095 = vmatprep.subr.bf16.mxu1 %v4998_v59 }
 0x2c7   : > { %2053 = vmatpush1.bf16.msra.mxu0 %v5002_v60  ;;  %2096 = vmatpush1.bf16.msra.mxu1 %v5006_v4 }
 0x2c8   : > { %2054 = vmatprep.subr.bf16.mxu0 %v5010_v62  ;;  %2097 = vmatprep.subr.bf16.mxu1 %v5014_v25 }
 0x2cb   : > { %2055 = vmatpush1.bf16.msra.mxu0 %v5018_v63  ;;  %2098 = vmatpush1.bf16.msra.mxu1 %v5022_v0 }
 0x2cc   : > { %2240 = vmatprep.subr.bf16.mxu0 %v4871_v14  ;;  %2283 = vmatprep.subr.bf16.mxu1 %v4875_v15 }
 0x381   : > { %v1874_v5 = vpop.f32.mrb[40].mxu0  ;;  %v1917_v7 = vpop.f32.mrb[40].mxu1 }
 0x382   : > { %v1926_v6 = vadd.f32 %v1874_v5, %v1829_v55  ;;  %v1876_v9 = vpop.f32.mrb[41].mxu0  ;;  %v1919_v11 = vpop.f32.mrb[41].mxu1  ;;  %v1928_v38 = vadd.f32 %v1917_v7, %v1831_v35 }
 0x383   : > { %v1927_v16 = vadd.f32 %v1876_v9, %v1830_v8  ;;  %v1878_v20 = vpop.f32.mrb[42].mxu0  ;;  %v1921_v21 = vpop.f32.mrb[42].mxu1  ;;  %v1929_v34 = vadd.f32 %v1919_v11, %v1832_v2 }
 0x384   : > { %v3416_v22 = vmul.f32 -1.442695, %v1926_v6  ;;  %v1930_v23 = vadd.f32 %v1878_v20, %v1833_v18  ;;  %v1880_v50 = vpop.f32.mrb[43].mxu0  ;;  %v1923_v26 = vpop.f32.mrb[43].mxu1  ;;  %v1932_v5 = vadd.f32 %v1921_v21, %v1835_v45 }
 0x385   : > { %v3418_v27 = vmul.f32 -1.442695, %v1927_v16  ;;  %v1931_v32 = vadd.f32 %v1880_v50, %v1834_v24  ;;  %v3420_v44 = vmul.f32 -1.442695, %v1929_v34  ;;  %v1933_v55 = vadd.f32 %v1923_v26, %v1836_v40  ;;  %v1991_v34 = vpop.permute.xlu0 %1990 }
 0x386   : > { %3874 = vpow2.f32 %v3416_v22  ;;  %v3417_v33 = vmul.f32 -1.442695, %v1930_v23  ;;  %vm1995_vm5 = vcmp.eq.s32.totalorder %v1991_v34, 1 }
 0x387   : > { %3876 = vpow2.f32 %v3418_v27  ;;  %v3419_v10 = vmul.f32 -1.442695, %v1931_v32  ;;  %v3421_v16 = vmul.f32 -1.442695, %v1933_v55 }
 0x388   : > { %3878 = vpow2.f32 %v3417_v33 }
 0x389   : > { %3880 = vpow2.f32 %v3419_v10 }
 0x38a   : > { %3882 = vtanh.f32 %v1928_v38 }
 0x38b   : > { %3884 = vpow2.f32 %v3420_v44 }
 0x38c   : > { %3886 = vtanh.f32 %v1932_v5  ;;  %v1994_v5 = vpop.permute.xlu1 %1993 }
 0x38d   : > { %vm1996_vm6 = vcmp.eq.s32.totalorder %v1994_v5, 1 }
 0x390   : > { %v3875_v6 = vpop.eup %3874 }
 0x391   : > { %v3877_v8 = vpop.eup %3876  ;;  %v1942_v9 = vadd.f32 1.0, %v3875_v6 }
 0x392   : > { %v1954_v18 = vadd.f32 1.0, %v3877_v8  ;;  %v3879_v20 = vpop.eup %3878 }
 0x393   : > { %3888 = vrcp.f32 %v1942_v9  ;;  %v1943_v11 = vadd.f32 1.0, %v3879_v20  ;;  %v3881_v22 = vpop.eup %3880 }
 0x394   : > { %3890 = vrcp.f32 %v1954_v18  ;;  %v1955_v7 = vadd.f32 1.0, %v3881_v22  ;;  %v3883_v23 = vpop.eup %3882 }
 0x395   : > { %3892 = vpow2.f32 %v3421_v16  ;;  %v3885_v24 = vpop.eup %3884 }
 0x396   : > { %3894 = vrcp.f32 %v1943_v11  ;;  %v3887_v21 = vpop.eup %3886  ;;  %v1968_v32 = vadd.f32 1.0, %v3885_v24 }
 0x397   : > { %3896 = vrcp.f32 %v1955_v7 }
 0x398   : > { %3898 = vrcp.f32 %v1968_v32 }
 0x39d   : > { %v3889_v50 = vpop.eup %3888 }
 0x39e   : > { %v3891_v26 = vpop.eup %3890  ;;  %v1976_v27 = vmul.f32 %v3889_v50, %v3883_v23 }
 0x39f   : > { %v3893_v33 = vpop.eup %3892  ;;  %v1974_v10 = vmul.f32 %v3891_v26, %v4901_v29 }
 0x3a0   : > { %v3895_v2 = vpop.eup %3894  ;;  %v1969_v44 = vadd.f32 1.0, %v3893_v33 }
 0x3a1   : > { %v1978_v35 = vadd.f32 %v1976_v27, %v1974_v10  ;;  %v1977_v38 = vmul.f32 %v3895_v2, %v3887_v21  ;;  %v3897_v40 = vpop.eup %3896  ;;  %v2030_v27 = vld [vmem:[%s5105_s19 + $0x8] sm:$0xff]  ;;  %v2033_v2 = vld [vmem:[%s5105_s19 + $0x20] sm:$0xff] }
 0x3a2   : > { %v1975_v45 = vmul.f32 %v3897_v40, %v4903_v28  ;;  %v3899_v9 = vpop.eup %3898 }
 0x3a3   : > { %3900 = vtanh.f32 %v1978_v35  ;;  %v5047_v55 = vsel %vm1995_vm5, %v1978_v35, %v4901_v29 }
 0x3a4   : > { %v1979_v6 = vadd.f32 %v1977_v38, %v1975_v45  ;;  %3902 = vrcp.f32 %v1969_v44  ;;  %v2034_v44 = vld [vmem:[%s5105_s19 + $0x28] sm:$0xff] }
 0x3a6   : > { %3904 = vtanh.f32 %v1979_v6  ;;  %v5050_v8 = vsel %vm1996_vm6, %v1979_v6, %v4903_v28 }
 0x3ad   : > { %v3901_v16 = vpop.eup %3900 }
 0x3ae   : > { %v1982_v18 = vmul.f32 %v3901_v16, %v3899_v9  ;;  %v3903_v20 = vpop.eup %3902 }
 0x3b0   : > { %v3905_v11 = vpop.eup %3904  ;;  %v5056_v29 = vsel %vm1995_vm5, %v1982_v18, %v4909_v36  ;;  %v2007_v23 = vsel %vm1995_vm5, %v1982_v18, 0.0  ;;  %v2029_v36 = vld [vmem:[%s5105_s19] sm:$0xff] }
 0x3b1   : > { %v1983_v22 = vmul.f32 %v3905_v11, %v3903_v20  ;;  %v2032_v20 = vld [vmem:[%s5105_s19 + $0x18] sm:$0xff] }
 0x3b3   : > { %v5059_v7 = vsel %vm1996_vm6, %v1983_v22, %v4913_v39  ;;  %v2008_v24 = vsel %vm1996_vm6, %v1983_v22, 0.0  ;;  %v2031_v22 = vld [vmem:[%s5105_s19 + $0x10] sm:$0xff] }
 0x3b4   : > { %v3542_v28 = vpack.c.bf16 %v2008_v24, %v2007_v23  ;;  %v2039_v21 = vpack.c.bf16 %v5059_v7, %v5056_v29  ;;  %v2036_v24 = vld [vmem:[%s5105_s19 + $0x38] sm:$0xff] }
 0x3b6   : > { %3543 = vst [vmem:[%s2018_s12] sm:$0xff] %v3542_v28   ;;  %2073 = vmatmul.mubr.bf16.vlgmr.msra.gmra.mrb[44].mxu0 %v2039_v21  ;;  %2116 = vmatmul.mubr.bf16.vlgmr.msra.gmra.mrb[44].mxu1 %v2039_v21  ;;  %v2035_v21 = vld [vmem:[%s5105_s19 + $0x30] sm:$0xff]  ;;  %s5173_s12 = sshll.u32 %s2221_s15, 4  ;;  %s3571_s19 = smul.u32 4294967248, %s4200_s27 }
 0x3b7   : > { %2241 = vmatpush1.bf16.msra.mxu0 %v4824_v41  ;;  %2284 = vmatpush1.bf16.msra.mxu1 %v4828_v30  ;;  %s2224_s20 = sshra.s32 %s5173_s12, 3 }
 0x3b8   : > { %2242 = vmatprep.subr.bf16.mxu0 %v4832_v31  ;;  %2285 = vmatprep.subr.bf16.mxu1 %v4836_v37  ;;  %s3511_s22 = sshll.u32 %s2224_s20, 5  ;;  %s3448_s15 = sshll.u32 %s2224_s20, 2 }
 0x3b9   : > { %2272 = vmatprep.mubr.bf16.mxu0 %v4210_v1  ;;  %2315 = vmatprep.mubr.bf16.mxu1 %v4210_v1  ;;  %s2228_s23 = scalar_lea.vmem [#allocation4], %s3511_s22  ;;  %s2418_s16 = scalar_lea.vmem %s4814_s21, %s3448_s15 [#allocation5] }
 0x3ba   : > { %s5250_s10 = sadd.s32 80, %s3571_s19  ;;  %s3572_s15 = smul.u32 4294967216, %s4200_s27 }
 0x3bb   : > { %2243 = vmatpush1.bf16.msra.mxu0 %v4842_v42  ;;  %2286 = vmatpush1.bf16.msra.mxu1 %v4926_v57 }
 0x3bc   : > { %2244 = vmatprep.subr.bf16.mxu0 %v4930_v12  ;;  %2287 = vmatprep.subr.bf16.mxu1 %v4934_v46 }
 0x3bf   : > { %2245 = vmatpush1.bf16.msra.mxu0 %v4938_v47  ;;  %2288 = vmatpush1.bf16.msra.mxu1 %v4942_v48 }
 0x3c0   : > { %2246 = vmatprep.subr.bf16.mxu0 %v4946_v51  ;;  %2289 = vmatprep.subr.bf16.mxu1 %v4950_v52 }
 0x3c3   : > { %2247 = vmatpush1.bf16.msra.mxu0 %v4954_v43  ;;  %2290 = vmatpush1.bf16.msra.mxu1 %v4958_v49 }
 0x3c4   : > { %2248 = vmatprep.subr.bf16.mxu0 %v4962_v53  ;;  %2291 = vmatprep.subr.bf16.mxu1 %v4966_v17 }
 0x3c7   : > { %2249 = vmatpush1.bf16.msra.mxu0 %v4970_v61  ;;  %2292 = vmatpush1.bf16.msra.mxu1 %v4974_v54 }
 0x3c8   : > { %2250 = vmatprep.subr.bf16.mxu0 %v4978_v19  ;;  %2293 = vmatprep.subr.bf16.mxu1 %v4982_v13 }
 0x3cb   : > { %2251 = vmatpush1.bf16.msra.mxu0 %v4986_v3  ;;  %2294 = vmatpush1.bf16.msra.mxu1 %v4990_v56 }
 0x3cc   : > { %2252 = vmatprep.subr.bf16.mxu0 %v4994_v58  ;;  %2295 = vmatprep.subr.bf16.mxu1 %v4998_v59 }
 0x3cf   : > { %2253 = vmatpush1.bf16.msra.mxu0 %v5002_v60  ;;  %2296 = vmatpush1.bf16.msra.mxu1 %v5006_v4 }
 0x3d0   : > { %2254 = vmatprep.subr.bf16.mxu0 %v5010_v62  ;;  %2297 = vmatprep.subr.bf16.mxu1 %v5014_v25 }
 0x3d3   : > { %2255 = vmatpush1.bf16.msra.mxu0 %v5018_v63  ;;  %2298 = vmatpush1.bf16.msra.mxu1 %v5022_v0 }
 0x3d4   : > { %2441 = vmatprep.subr.bf16.mxu0 %v4871_v14  ;;  %2484 = vmatprep.subr.bf16.mxu1 %v4875_v15 }
 0x489   : > { %v2074_v39 = vpop.f32.mrb[44].mxu0  ;;  %v2117_v50 = vpop.f32.mrb[44].mxu1 }
 0x48a   : > { %v2126_v26 = vadd.f32 %v2074_v39, %v2029_v36  ;;  %v2076_v32 = vpop.f32.mrb[45].mxu0  ;;  %v2119_v33 = vpop.f32.mrb[45].mxu1  ;;  %v2128_v23 = vadd.f32 %v2117_v50, %v2031_v22 }
 0x48b   : > { %v2127_v10 = vadd.f32 %v2076_v32, %v2030_v27  ;;  %v2078_v34 = vpop.f32.mrb[46].mxu0  ;;  %v2121_v35 = vpop.f32.mrb[46].mxu1  ;;  %v2129_v11 = vadd.f32 %v2119_v33, %v2032_v20 }
 0x48c   : > { %v3428_v38 = vmul.f32 -1.442695, %v2126_v26  ;;  %v2130_v40 = vadd.f32 %v2078_v34, %v2033_v2  ;;  %v2080_v45 = vpop.f32.mrb[47].mxu0  ;;  %v2123_v5 = vpop.f32.mrb[47].mxu1  ;;  %v2132_v39 = vadd.f32 %v2121_v35, %v2035_v21 }
 0x48d   : > { %v3430_v6 = vmul.f32 -1.442695, %v2127_v10  ;;  %v2131_v9 = vadd.f32 %v2080_v45, %v2034_v44  ;;  %v3432_v28 = vmul.f32 -1.442695, %v2129_v11  ;;  %v2133_v36 = vadd.f32 %v2123_v5, %v2036_v24  ;;  %v2191_v11 = vpop.permute.xlu0 %2190 }
 0x48e   : > { %3906 = vpow2.f32 %v3428_v38  ;;  %v3429_v16 = vmul.f32 -1.442695, %v2130_v40  ;;  %vm2195_vm7 = vcmp.eq.s32.totalorder %v2191_v11, 1 }
 0x48f   : > { %3908 = vpow2.f32 %v3430_v6  ;;  %v3431_v18 = vmul.f32 -1.442695, %v2131_v9  ;;  %v3433_v10 = vmul.f32 -1.442695, %v2133_v36 }
 0x490   : > { %3910 = vpow2.f32 %v3429_v16 }
 0x491   : > { %3912 = vpow2.f32 %v3431_v18 }
 0x492   : > { %3914 = vtanh.f32 %v2128_v23 }
 0x493   : > { %3916 = vpow2.f32 %v3432_v28 }
 0x494   : > { %3918 = vtanh.f32 %v2132_v39  ;;  %v2194_v39 = vpop.permute.xlu1 %2193 }
 0x495   : > { %vm2196_vm8 = vcmp.eq.s32.totalorder %v2194_v39, 1 }
 0x498   : > { %v3907_v26 = vpop.eup %3906 }
 0x499   : > { %v3909_v27 = vpop.eup %3908  ;;  %v2142_v32 = vadd.f32 1.0, %v3907_v26 }
 0x49a   : > { %v2154_v2 = vadd.f32 1.0, %v3909_v27  ;;  %v3911_v34 = vpop.eup %3910 }
 0x49b   : > { %3920 = vrcp.f32 %v2142_v32  ;;  %v2143_v33 = vadd.f32 1.0, %v3911_v34  ;;  %v3913_v38 = vpop.eup %3912 }
 0x49c   : > { %3922 = vrcp.f32 %v2154_v2  ;;  %v2155_v50 = vadd.f32 1.0, %v3913_v38  ;;  %v3915_v40 = vpop.eup %3914 }
 0x49d   : > { %3924 = vpow2.f32 %v3433_v10  ;;  %v3917_v44 = vpop.eup %3916 }
 0x49e   : > { %3926 = vrcp.f32 %v2143_v33  ;;  %v3919_v35 = vpop.eup %3918  ;;  %v2168_v9 = vadd.f32 1.0, %v3917_v44 }
 0x49f   : > { %3928 = vrcp.f32 %v2155_v50 }
 0x4a0   : > { %3930 = vrcp.f32 %v2168_v9  ;;  %v2233_v9 = vld [vmem:[%s2228_s23 + $0x20] sm:$0xff] }
 0x4a5   : > { %v3921_v45 = vpop.eup %3920 }
 0x4a6   : > { %v3923_v5 = vpop.eup %3922  ;;  %v2176_v6 = vmul.f32 %v3921_v45, %v3915_v40 }
 0x4a7   : > { %v3925_v16 = vpop.eup %3924  ;;  %v2174_v18 = vmul.f32 %v3923_v5, %v5047_v55 }
 0x4a8   : > { %v3927_v20 = vpop.eup %3926  ;;  %v2169_v28 = vadd.f32 1.0, %v3925_v16 }
 0x4a9   : > { %v2178_v22 = vadd.f32 %v2176_v6, %v2174_v18  ;;  %v2177_v23 = vmul.f32 %v3927_v20, %v3919_v35  ;;  %v3929_v24 = vpop.eup %3928  ;;  %v2235_v18 = vld [vmem:[%s2228_s23 + $0x30] sm:$0xff] }
 0x4aa   : > { %v2175_v21 = vmul.f32 %v3929_v24, %v5050_v8  ;;  %v3931_v32 = vpop.eup %3930  ;;  %v2234_v24 = vld [vmem:[%s2228_s23 + $0x28] sm:$0xff] }
 0x4ab   : > { %3932 = vtanh.f32 %v2178_v22  ;;  %v5119_v36 = vsel %vm2195_vm7, %v2178_v22, %v5047_v55 }
 0x4ac   : > { %v2179_v26 = vadd.f32 %v2177_v23, %v2175_v21  ;;  %3934 = vrcp.f32 %v2169_v28  ;;  %v2236_v21 = vld [vmem:[%s2228_s23 + $0x38] sm:$0xff] }
 0x4ae   : > { %3936 = vtanh.f32 %v2179_v26  ;;  %v5122_v27 = vsel %vm2196_vm8, %v2179_v26, %v5050_v8 }
 0x4b5   : > { %v3933_v10 = vpop.eup %3932 }
 0x4b6   : > { %v2182_v2 = vmul.f32 %v3933_v10, %v3931_v32  ;;  %v3935_v34 = vpop.eup %3934 }
 0x4b8   : > { %v3937_v33 = vpop.eup %3936  ;;  %v5128_v55 = vsel %vm2195_vm7, %v2182_v2, %v5056_v29  ;;  %v2207_v40 = vsel %vm2195_vm7, %v2182_v2, 0.0 }
 0x4b9   : > { %v2183_v38 = vmul.f32 %v3937_v33, %v3935_v34 }
 0x4bb   : > { %v5131_v50 = vsel %vm2196_vm8, %v2183_v38, %v5059_v7  ;;  %v2208_v44 = vsel %vm2196_vm8, %v2183_v38, 0.0  ;;  %v2230_v7 = vld [vmem:[%s2228_s23 + $0x8] sm:$0xff] }
 0x4bc   : > { %v3547_v8 = vpack.c.bf16 %v2208_v44, %v2207_v40  ;;  %v2239_v35 = vpack.c.bf16 %v5131_v50, %v5128_v55 }
 0x4be   : > { %3548 = vst [vmem:[%s2218_s18] sm:$0xff] %v3547_v8   ;;  %2273 = vmatmul.mubr.bf16.vlgmr.msra.gmra.mrb[48].mxu0 %v2239_v35  ;;  %2316 = vmatmul.mubr.bf16.vlgmr.msra.gmra.mrb[48].mxu1 %v2239_v35  ;;  %s2425_s18 = sshra.s32 %s5250_s10, 3 }
 0x4bf   : > { %2442 = vmatpush1.bf16.msra.mxu0 %v4824_v41  ;;  %2485 = vmatpush1.bf16.msra.mxu1 %v4828_v30  ;;  %v2229_v41 = vld [vmem:[%s2228_s23] sm:$0xff]  ;;  %s3516_s12 = sshll.u32 %s2425_s18, 5  ;;  %s3460_s22 = sshll.u32 %s2425_s18, 2 }
 0x4c0   : > { %2443 = vmatprep.subr.bf16.mxu0 %v4832_v31  ;;  %2486 = vmatprep.subr.bf16.mxu1 %v4836_v37  ;;  %v2231_v31 = vld [vmem:[%s2228_s23 + $0x10] sm:$0xff]  ;;  %s5255_s20 = scalar_lea.vmem [#allocation4], %s3516_s12 }
 0x4c1   : > { %2473 = vmatprep.mubr.bf16.mxu0 %v4210_v1  ;;  %2516 = vmatprep.mubr.bf16.mxu1 %v4210_v1 }
 0x4c3   : > { %2444 = vmatpush1.bf16.msra.mxu0 %v4842_v42  ;;  %2487 = vmatpush1.bf16.msra.mxu1 %v4926_v57 }
 0x4c4   : > { %2445 = vmatprep.subr.bf16.mxu0 %v4930_v12  ;;  %2488 = vmatprep.subr.bf16.mxu1 %v4934_v46 }
 0x4c7   : > { %2446 = vmatpush1.bf16.msra.mxu0 %v4938_v47  ;;  %2489 = vmatpush1.bf16.msra.mxu1 %v4942_v48 }
 0x4c8   : > { %2447 = vmatprep.subr.bf16.mxu0 %v4946_v51  ;;  %2490 = vmatprep.subr.bf16.mxu1 %v4950_v52 }
 0x4cb   : > { %2448 = vmatpush1.bf16.msra.mxu0 %v4954_v43  ;;  %2491 = vmatpush1.bf16.msra.mxu1 %v4958_v49 }
 0x4cc   : > { %2449 = vmatprep.subr.bf16.mxu0 %v4962_v53  ;;  %2492 = vmatprep.subr.bf16.mxu1 %v4966_v17 }
 0x4cf   : > { %2450 = vmatpush1.bf16.msra.mxu0 %v4970_v61  ;;  %2493 = vmatpush1.bf16.msra.mxu1 %v4974_v54 }
 0x4d0   : > { %2451 = vmatprep.subr.bf16.mxu0 %v4978_v19  ;;  %2494 = vmatprep.subr.bf16.mxu1 %v4982_v13 }
 0x4d3   : > { %2452 = vmatpush1.bf16.msra.mxu0 %v4986_v3  ;;  %2495 = vmatpush1.bf16.msra.mxu1 %v4990_v56 }
 0x4d4   : > { %2453 = vmatprep.subr.bf16.mxu0 %v4994_v58  ;;  %2496 = vmatprep.subr.bf16.mxu1 %v4998_v59 }
 0x4d7   : > { %2454 = vmatpush1.bf16.msra.mxu0 %v5002_v60  ;;  %2497 = vmatpush1.bf16.msra.mxu1 %v5006_v4 }
 0x4d8   : > { %2455 = vmatprep.subr.bf16.mxu0 %v5010_v62  ;;  %2498 = vmatprep.subr.bf16.mxu1 %v5014_v25 }
 0x4db   : > { %2456 = vmatpush1.bf16.msra.mxu0 %v5018_v63  ;;  %2499 = vmatpush1.bf16.msra.mxu1 %v5022_v0 }
 0x4dc   : > { %2642 = vmatprep.subr.bf16.mxu0 %v4871_v14  ;;  %2685 = vmatprep.subr.bf16.mxu1 %v4875_v15  ;;  %v2232_v14 = vld [vmem:[%s2228_s23 + $0x18] sm:$0xff]  ;;  %s2619_s23 = scalar_lea.vmem %s4814_s21, %s3460_s22 [#allocation5] }
 0x591   : > { %v2274_v30 = vpop.f32.mrb[48].mxu0  ;;  %v2317_v37 = vpop.f32.mrb[48].mxu1 }
 0x592   : > { %v2326_v42 = vadd.f32 %v2274_v30, %v2229_v41  ;;  %v2328_v29 = vadd.f32 %v2317_v37, %v2231_v31  ;;  %v2276_v45 = vpop.f32.mrb[49].mxu0  ;;  %v2319_v5 = vpop.f32.mrb[49].mxu1 }
 0x593   : > { %v2327_v15 = vadd.f32 %v2276_v45, %v2230_v7  ;;  %v2329_v6 = vadd.f32 %v2319_v5, %v2232_v14  ;;  %v2278_v16 = vpop.f32.mrb[50].mxu0  ;;  %v2321_v20 = vpop.f32.mrb[50].mxu1 }
 0x594   : > { %v3440_v11 = vmul.f32 -1.442695, %v2326_v42  ;;  %v2330_v22 = vadd.f32 %v2278_v16, %v2233_v9  ;;  %v2332_v23 = vadd.f32 %v2321_v20, %v2235_v18  ;;  %v2280_v28 = vpop.f32.mrb[51].mxu0  ;;  %v2323_v39 = vpop.f32.mrb[51].mxu1 }
 0x595   : > { %v3442_v26 = vmul.f32 -1.442695, %v2327_v15  ;;  %v2331_v32 = vadd.f32 %v2280_v28, %v2234_v24  ;;  %v2333_v10 = vadd.f32 %v2323_v39, %v2236_v21  ;;  %v3444_v33 = vmul.f32 -1.442695, %v2329_v6  ;;  %v2391_v18 = vpop.permute.xlu0 %2390  ;;  %v2394_v21 = vpop.permute.xlu1 %2393 }
 0x596   : > { %3938 = vpow2.f32 %v3440_v11  ;;  %v3441_v2 = vmul.f32 -1.442695, %v2330_v22  ;;  %vm2395_vm9 = vcmp.eq.s32.totalorder %v2391_v18, 1  ;;  %vm2396_vm10 = vcmp.eq.s32.totalorder %v2394_v21, 1 }
 0x597   : > { %3940 = vpow2.f32 %v3442_v26  ;;  %v3443_v34 = vmul.f32 -1.442695, %v2331_v32  ;;  %v3445_v8 = vmul.f32 -1.442695, %v2333_v10 }
 0x598   : > { %3942 = vpow2.f32 %v3441_v2 }
 0x599   : > { %3944 = vpow2.f32 %v3443_v34 }
 0x59a   : > { %3946 = vtanh.f32 %v2328_v29 }
 0x59b   : > { %3948 = vpow2.f32 %v3444_v33 }
 0x59c   : > { %3950 = vtanh.f32 %v2332_v23 }
 0x5a0   : > { %v3939_v38 = vpop.eup %3938 }
 0x5a1   : > { %v3941_v40 = vpop.eup %3940  ;;  %v2342_v44 = vadd.f32 1.0, %v3939_v38 }
 0x5a2   : > { %v2354_v35 = vadd.f32 1.0, %v3941_v40  ;;  %v3943_v41 = vpop.eup %3942 }
 0x5a3   : > { %3952 = vrcp.f32 %v2342_v44  ;;  %v2343_v30 = vadd.f32 1.0, %v3943_v41  ;;  %v3945_v31 = vpop.eup %3944  ;;  %v5201_v41 = vld [vmem:[%s4376_s8] ss:$16 sps:$4 sm:$0xff]  }
 0x5a4   : > { %3954 = vrcp.f32 %v2354_v35  ;;  %v2355_v37 = vadd.f32 1.0, %v3945_v31  ;;  %v3947_v42 = vpop.eup %3946  ;;  %v5219_v31 = vld [vmem:[%s4376_s8 + $0x20] ss:$16 sps:$4 sm:$0xff]  }
 0x5a5   : > { %3956 = vpow2.f32 %v3445_v8  ;;  %v3949_v7 = vpop.eup %3948 }
 0x5a6   : > { %3958 = vrcp.f32 %v2343_v30  ;;  %v3951_v45 = vpop.eup %3950  ;;  %v2368_v15 = vadd.f32 1.0, %v3949_v7  ;;  %v5213_v30 = vld [vmem:[%s4376_s8 + $0x2c] ss:$16 sps:$4 sm:$0xff]  }
 0x5a7   : > { %3960 = vrcp.f32 %v2355_v37 }
 0x5a8   : > { %3962 = vrcp.f32 %v2368_v15 }
 0x5ad   : > { %v3953_v14 = vpop.eup %3952 }
 0x5ae   : > { %v3955_v29 = vpop.eup %3954  ;;  %v2376_v5 = vmul.f32 %v3953_v14, %v3947_v42  ;;  %v2437_v42 = vld [vmem:[%s5255_s20 + $0x38] sm:$0xff] }
 0x5af   : > { %v3957_v6 = vpop.eup %3956  ;;  %v2374_v9 = vmul.f32 %v3955_v29, %v5119_v36 }
 0x5b0   : > { %v3959_v16 = vpop.eup %3958  ;;  %v2369_v23 = vadd.f32 1.0, %v3957_v6 }
 0x5b1   : > { %v2378_v20 = vadd.f32 %v2376_v5, %v2374_v9  ;;  %v2377_v11 = vmul.f32 %v3959_v16, %v3951_v45  ;;  %v3961_v22 = vpop.eup %3960  ;;  %v2436_v45 = vld [vmem:[%s5255_s20 + $0x30] sm:$0xff] }
 0x5b2   : > { %v2375_v24 = vmul.f32 %v3961_v22, %v5122_v27  ;;  %v3963_v32 = vpop.eup %3962 }
 0x5b3   : > { %3964 = vtanh.f32 %v2378_v20  ;;  %v5182_v28 = vsel %vm2395_vm9, %v2378_v20, %v5119_v36 }
 0x5b4   : > { %v2379_v39 = vadd.f32 %v2377_v11, %v2375_v24  ;;  %3966 = vrcp.f32 %v2369_v23 }
 0x5b6   : > { %3968 = vtanh.f32 %v2379_v39  ;;  %v5185_v26 = vsel %vm2396_vm10, %v2379_v39, %v5122_v27 }
 0x5bd   : > { %v3965_v10 = vpop.eup %3964 }
 0x5be   : > { %v2382_v2 = vmul.f32 %v3965_v10, %v3963_v32  ;;  %v3967_v34 = vpop.eup %3966 }
 0x5c0   : > { %v3969_v33 = vpop.eup %3968  ;;  %v5192_v38 = vsel %vm2395_vm9, %v2382_v2, %v5128_v55  ;;  %v2407_v40 = vsel %vm2395_vm9, %v2382_v2, 0.0  ;;  %v5205_v55 = vld [vmem:[%s4376_s8 + $0x8] ss:$16 sps:$4 sm:$0xff]  }
 0x5c1   : > { %v2383_v36 = vmul.f32 %v3969_v33, %v3967_v34 }
 0x5c3   : > { %v5195_v27 = vsel %vm2396_vm10, %v2383_v36, %v5131_v50  ;;  %v2408_v44 = vsel %vm2396_vm10, %v2383_v36, 0.0  ;;  %v5209_v50 = vld [vmem:[%s4376_s8 + $0x24] ss:$16 sps:$4 sm:$0xff]  }
 0x5c4   : > { %v3552_v8 = vpack.c.bf16 %v2408_v44, %v2407_v40  ;;  %v2440_v35 = vpack.c.bf16 %v5195_v27, %v5192_v38  ;;  %v2592_v40 = vpop.permute.xlu0 %2591 }
 0x5c5   : > { %vm2596_vm11 = vcmp.eq.s32.totalorder %v2592_v40, 1 }
 0x5c6   : > { %3553 = vst [vmem:[%s2418_s16] sm:$0xff] %v3552_v8   ;;  %2474 = vmatmul.mubr.bf16.vlgmr.msra.gmra.mrb[52].mxu0 %v2440_v35  ;;  %2517 = vmatmul.mubr.bf16.vlgmr.msra.gmra.mrb[52].mxu1 %v2440_v35  ;;  %s5320_s16 = sadd.s32 96, %s3572_s15 }
 0x5c7   : > { %2643 = vmatpush1.bf16.msra.mxu0 %v5201_v41  ;;  %2686 = vmatpush1.bf16.msra.mxu1 %v5205_v55  ;;  %s2626_s19 = sshra.s32 %s5320_s16, 3 }
 0x5c8   : > { %2644 = vmatprep.subr.bf16.mxu0 %v5209_v50  ;;  %2687 = vmatprep.subr.bf16.mxu1 %v5213_v30  ;;  %s3521_s10 = sshll.u32 %s2626_s19, 5 }
 0x5c9   : > { %2674 = vmatprep.mubr.bf16.mxu0 %v4210_v1  ;;  %2717 = vmatprep.mubr.bf16.mxu1 %v4210_v1  ;;  %s5325_s18 = scalar_lea.vmem [#allocation4], %s3521_s10  ;;  %s3486_s10 = sshll.u32 %s4200_s27, 6 }
 0x5cb   : > { %2645 = vmatpush1.bf16.msra.mxu0 %v5219_v31  ;;  %2688 = vmatpush1.bf16.msra.mxu1 %v4926_v57  ;;  %v4103_v57 = vld [vmem:[%s4376_s8 + $0x4] ss:$16 sps:$4 sm:$0xff]  }
 0x5cc   : > { %2646 = vmatprep.subr.bf16.mxu0 %v4930_v12  ;;  %2689 = vmatprep.subr.bf16.mxu1 %v4934_v46  ;;  %v4104_v12 = vld [vmem:[%s4376_s8 + $0xc] ss:$16 sps:$4 sm:$0xff]   ;;  %v2430_v46 = vld [vmem:[%s5255_s20] sm:$0xff] }
 0x5cf   : > { %2647 = vmatpush1.bf16.msra.mxu0 %v4938_v47  ;;  %2690 = vmatpush1.bf16.msra.mxu1 %v4942_v48 }
 0x5d0   : > { %2648 = vmatprep.subr.bf16.mxu0 %v4946_v51  ;;  %2691 = vmatprep.subr.bf16.mxu1 %v4950_v52  ;;  %v2431_v52 = vld [vmem:[%s5255_s20 + $0x8] sm:$0xff] }
 0x5d3   : > { %2649 = vmatpush1.bf16.msra.mxu0 %v4954_v43  ;;  %2692 = vmatpush1.bf16.msra.mxu1 %v4958_v49 }
 0x5d4   : > { %2650 = vmatprep.subr.bf16.mxu0 %v4962_v53  ;;  %2693 = vmatprep.subr.bf16.mxu1 %v4966_v17  ;;  %v2434_v17 = vld [vmem:[%s5255_s20 + $0x20] sm:$0xff] }
 0x5d7   : > { %2651 = vmatpush1.bf16.msra.mxu0 %v4970_v61  ;;  %2694 = vmatpush1.bf16.msra.mxu1 %v4974_v54 }
 0x5d8   : > { %2652 = vmatprep.subr.bf16.mxu0 %v4978_v19  ;;  %2695 = vmatprep.subr.bf16.mxu1 %v4982_v13 }
 0x5db   : > { %2653 = vmatpush1.bf16.msra.mxu0 %v4986_v3  ;;  %2696 = vmatpush1.bf16.msra.mxu1 %v4990_v56  ;;  %v2435_v3 = vld [vmem:[%s5255_s20 + $0x28] sm:$0xff] }
 0x5dc   : > { %2654 = vmatprep.subr.bf16.mxu0 %v4994_v58  ;;  %2697 = vmatprep.subr.bf16.mxu1 %v4998_v59 }
 0x5df   : > { %2655 = vmatpush1.bf16.msra.mxu0 %v5002_v60  ;;  %2698 = vmatpush1.bf16.msra.mxu1 %v5006_v4 }
 0x5e0   : > { %2656 = vmatprep.subr.bf16.mxu0 %v5010_v62  ;;  %2699 = vmatprep.subr.bf16.mxu1 %v5014_v25  ;;  %v2433_v25 = vld [vmem:[%s5255_s20 + $0x18] sm:$0xff] }
 0x5e3   : > { %2657 = vmatpush1.bf16.msra.mxu0 %v5018_v63  ;;  %2700 = vmatpush1.bf16.msra.mxu1 %v5022_v0  ;;  %v2432_v0 = vld [vmem:[%s5255_s20 + $0x10] sm:$0xff]  ;;  %s3573_s20 = smul.u32 4294967184, %s4200_s27  ;;  %s5406_s27 = scalar_lea.sflag [#allocation6], %s358_s30 }
 0x5e4   : > { %2843 = vmatprep.subr.bf16.mxu0 %v4103_v57  ;;  %2886 = vmatprep.subr.bf16.mxu1 %v4104_v12 }
 0x5e5   : > { %s5358_s22 = sadd.s32 112, %s3573_s20 }
 0x699   : > { %v2475_v47 = vpop.f32.mrb[52].mxu0  ;;  %v2518_v48 = vpop.f32.mrb[52].mxu1 }
 0x69a   : > { %v2527_v51 = vadd.f32 %v2475_v47, %v2430_v46  ;;  %v2477_v43 = vpop.f32.mrb[53].mxu0  ;;  %v2520_v49 = vpop.f32.mrb[53].mxu1  ;;  %v2529_v37 = vadd.f32 %v2518_v48, %v2432_v0  ;;  %v4121_v0 = vld [vmem:[%s4376_s8 + $0xa8] ss:$16 sps:$4 sm:$0xff]  }
 0x69b   : > { %v2528_v53 = vadd.f32 %v2477_v43, %v2431_v52  ;;  %v2479_v61 = vpop.f32.mrb[54].mxu0  ;;  %v2522_v54 = vpop.f32.mrb[54].mxu1  ;;  %v2530_v63 = vadd.f32 %v2520_v49, %v2433_v25  ;;  %v4119_v25 = vld [vmem:[%s4376_s8 + $0xac] ss:$16 sps:$4 sm:$0xff]  }
 0x69c   : > { %v3452_v19 = vmul.f32 -1.442695, %v2527_v51  ;;  %v2531_v13 = vadd.f32 %v2479_v61, %v2434_v17  ;;  %v2481_v56 = vpop.f32.mrb[55].mxu0  ;;  %v2524_v58 = vpop.f32.mrb[55].mxu1  ;;  %v2533_v29 = vadd.f32 %v2522_v54, %v2436_v45  ;;  %v4125_v45 = vld [vmem:[%s4376_s8 + $0xc8] ss:$16 sps:$4 sm:$0xff]  }
 0x69d   : > { %v3454_v59 = vmul.f32 -1.442695, %v2528_v53  ;;  %v2532_v60 = vadd.f32 %v2481_v56, %v2435_v3  ;;  %v3456_v7 = vmul.f32 -1.442695, %v2530_v63  ;;  %v2534_v14 = vadd.f32 %v2524_v58, %v2437_v42  ;;  %v2595_v47 = vpop.permute.xlu1 %2594  ;;  %v4113_v56 = vld [vmem:[%s4376_s8 + $0x68] ss:$16 sps:$4 sm:$0xff]  }
 0x69e   : > { %3970 = vpow2.f32 %v3452_v19  ;;  %v3453_v4 = vmul.f32 -1.442695, %v2531_v13  ;;  %vm2597_vm12 = vcmp.eq.s32.totalorder %v2595_v47, 1  ;;  %v4114_v58 = vld [vmem:[%s4376_s8 + $0x84] ss:$16 sps:$4 sm:$0xff]  }
 0x69f   : > { %3972 = vpow2.f32 %v3454_v59  ;;  %v3455_v62 = vmul.f32 -1.442695, %v2532_v60  ;;  %v3457_v9 = vmul.f32 -1.442695, %v2534_v14  ;;  %v4115_v59 = vld [vmem:[%s4376_s8 + $0x8c] ss:$16 sps:$4 sm:$0xff]  }
 0x6a0   : > { %3974 = vpow2.f32 %v3453_v4  ;;  %v4116_v60 = vld [vmem:[%s4376_s8 + $0x80] ss:$16 sps:$4 sm:$0xff]   ;;  %v4117_v4 = vld [vmem:[%s4376_s8 + $0x88] ss:$16 sps:$4 sm:$0xff]   ;;  %v4123_v42 = vld [vmem:[%s4376_s8 + $0xcc] ss:$16 sps:$4 sm:$0xff]  }
 0x6a1   : > { %3976 = vpow2.f32 %v3455_v62  ;;  %v4118_v62 = vld [vmem:[%s4376_s8 + $0xa4] ss:$16 sps:$4 sm:$0xff]   ;;  %v4120_v63 = vld [vmem:[%s4376_s8 + $0xa0] ss:$16 sps:$4 sm:$0xff]  }
 0x6a2   : > { %3978 = vtanh.f32 %v2529_v37  ;;  %v4122_v37 = vld [vmem:[%s4376_s8 + $0xc4] ss:$16 sps:$4 sm:$0xff]  }
 0x6a3   : > { %3980 = vpow2.f32 %v3456_v7  ;;  %v4124_v7 = vld [vmem:[%s4376_s8 + $0xc0] ss:$16 sps:$4 sm:$0xff]   ;;  %v4126_v14 = vld [vmem:[%s4376_s8 + $0xe4] ss:$16 sps:$4 sm:$0xff]  }
 0x6a4   : > { %3982 = vtanh.f32 %v2533_v29  ;;  %v4127_v29 = vld [vmem:[%s4376_s8 + $0xec] ss:$16 sps:$4 sm:$0xff]  }
 0x6a8   : > { %v3971_v5 = vpop.eup %3970 }
 0x6a9   : > { %v3973_v15 = vpop.eup %3972  ;;  %v2543_v6 = vadd.f32 1.0, %v3971_v5  ;;  %v4128_v5 = vld [vmem:[%s4376_s8 + $0xe0] ss:$16 sps:$4 sm:$0xff]  }
 0x6aa   : > { %v2555_v16 = vadd.f32 1.0, %v3973_v15  ;;  %v3975_v18 = vpop.eup %3974  ;;  %v4129_v15 = vld [vmem:[%s4376_s8 + $0xe8] ss:$16 sps:$4 sm:$0xff]  }
 0x6ab   : > { %3984 = vrcp.f32 %v2543_v6  ;;  %v2544_v20 = vadd.f32 1.0, %v3975_v18  ;;  %v3977_v11 = vpop.eup %3976  ;;  %v2631_v6 = vld [vmem:[%s5325_s18] sm:$0xff] }
 0x6ac   : > { %3986 = vrcp.f32 %v2555_v16  ;;  %v2556_v22 = vadd.f32 1.0, %v3977_v11  ;;  %v3979_v23 = vpop.eup %3978 }
 0x6ad   : > { %3988 = vpow2.f32 %v3457_v9  ;;  %v3981_v24 = vpop.eup %3980 }
 0x6ae   : > { %3990 = vrcp.f32 %v2544_v20  ;;  %v3983_v21 = vpop.eup %3982  ;;  %v2569_v2 = vadd.f32 1.0, %v3981_v24  ;;  %v2632_v20 = vld [vmem:[%s5325_s18 + $0x8] sm:$0xff]  ;;  %v2635_v24 = vld [vmem:[%s5325_s18 + $0x20] sm:$0xff] }
 0x6af   : > { %3992 = vrcp.f32 %v2556_v22 }
 0x6b0   : > { %3994 = vrcp.f32 %v2569_v2  ;;  %v2636_v2 = vld [vmem:[%s5325_s18 + $0x28] sm:$0xff] }
 0x6b5   : > { %v3985_v39 = vpop.eup %3984 }
 0x6b6   : > { %v3987_v32 = vpop.eup %3986  ;;  %v2577_v10 = vmul.f32 %v3985_v39, %v3979_v23 }
 0x6b7   : > { %v3989_v34 = vpop.eup %3988  ;;  %v2575_v33 = vmul.f32 %v3987_v32, %v5182_v28 }
 0x6b8   : > { %v3991_v36 = vpop.eup %3990  ;;  %v2570_v57 = vadd.f32 1.0, %v3989_v34 }
 0x6b9   : > { %v2579_v44 = vadd.f32 %v2577_v10, %v2575_v33  ;;  %v2578_v8 = vmul.f32 %v3991_v36, %v3983_v21  ;;  %v3993_v35 = vpop.eup %3992 }
 0x6ba   : > { %v2576_v12 = vmul.f32 %v3993_v35, %v5185_v26  ;;  %v3995_v52 = vpop.eup %3994  ;;  %v2634_v35 = vld [vmem:[%s5325_s18 + $0x18] sm:$0xff] }
 0x6bb   : > { %3996 = vtanh.f32 %v2579_v44  ;;  %v5269_v46 = vsel %vm2596_vm11, %v2579_v44, %v5182_v28 }
 0x6bc   : > { %v2580_v48 = vadd.f32 %v2578_v8, %v2576_v12  ;;  %3998 = vrcp.f32 %v2570_v57  ;;  %v2633_v12 = vld [vmem:[%s5325_s18 + $0x10] sm:$0xff] }
 0x6be   : > { %4000 = vtanh.f32 %v2580_v48  ;;  %v5272_v51 = vsel %vm2597_vm12, %v2580_v48, %v5185_v26  ;;  %v2638_v48 = vld [vmem:[%s5325_s18 + $0x38] sm:$0xff] }
 0x6c5   : > { %v3997_v43 = vpop.eup %3996 }
 0x6c6   : > { %v2583_v49 = vmul.f32 %v3997_v43, %v3995_v52  ;;  %v3999_v53 = vpop.eup %3998  ;;  %v2637_v43 = vld [vmem:[%s5325_s18 + $0x30] sm:$0xff] }
 0x6c8   : > { %v4001_v17 = vpop.eup %4000  ;;  %v5279_v28 = vsel %vm2596_vm11, %v2583_v49, %v5192_v38  ;;  %v2608_v26 = vsel %vm2596_vm11, %v2583_v49, 0.0  ;;  %v4105_v38 = vld [vmem:[%s4376_s8 + $0x28] ss:$16 sps:$4 sm:$0xff]  }
 0x6c9   : > { %v2584_v61 = vmul.f32 %v4001_v17, %v3999_v53 }
 0x6cb   : > { %v5282_v54 = vsel %vm2597_vm12, %v2584_v61, %v5195_v27  ;;  %v2609_v19 = vsel %vm2597_vm12, %v2584_v61, 0.0  ;;  %v4106_v27 = vld [vmem:[%s4376_s8 + $0x44] ss:$16 sps:$4 sm:$0xff]  }
 0x6cc   : > { %v3557_v13 = vpack.c.bf16 %v2609_v19, %v2608_v26  ;;  %v2641_v3 = vpack.c.bf16 %v5282_v54, %v5279_v28 }
 0x6ce   : > { %3558 = vst [vmem:[%s2619_s23] sm:$0xff] %v3557_v13   ;;  %2675 = vmatmul.mubr.bf16.vlgmr.msra.gmra.mrb[56].mxu0 %v2641_v3  ;;  %2718 = vmatmul.mubr.bf16.vlgmr.msra.gmra.mrb[56].mxu1 %v2641_v3  ;;  %s2827_s23 = sshra.s32 %s5358_s22, 3 }
 0x6cf   : > { %2844 = vmatpush1.bf16.msra.mxu0 %v5201_v41  ;;  %2887 = vmatpush1.bf16.msra.mxu1 %v5205_v55  ;;  %v4107_v41 = vld [vmem:[%s4376_s8 + $0x4c] ss:$16 sps:$4 sm:$0xff]   ;;  %v4108_v55 = vld [vmem:[%s4376_s8 + $0x40] ss:$16 sps:$4 sm:$0xff]   ;;  %s3526_s15 = sshll.u32 %s2827_s23, 5 }
 0x6d0   : > { %2845 = vmatprep.subr.bf16.mxu0 %v5209_v50  ;;  %2888 = vmatprep.subr.bf16.mxu1 %v5213_v30  ;;  %v4109_v50 = vld [vmem:[%s4376_s8 + $0x48] ss:$16 sps:$4 sm:$0xff]   ;;  %v4110_v30 = vld [vmem:[%s4376_s8 + $0x64] ss:$16 sps:$4 sm:$0xff]   ;;  %s5363_s16 = scalar_lea.vmem [#allocation4], %s3526_s15  ;;  %s3484_s15 = sshll.u32 %s2827_s23, 2 }
 0x6d1   : > { %2875 = vmatprep.mubr.bf16.mxu0 %v4210_v1  ;;  %2918 = vmatprep.mubr.bf16.mxu1 %v4210_v1  ;;  %v4111_v1 = vld [vmem:[%s4376_s8 + $0x6c] ss:$16 sps:$4 sm:$0xff]   ;;  %s3021_s18 = scalar_lea.vmem %s4814_s21, %s3484_s15 [#allocation5] }
 0x6d3   : > { %2846 = vmatpush1.bf16.msra.mxu0 %v5219_v31  ;;  %2889 = vmatpush1.bf16.msra.mxu1 %v4105_v38  ;;  %v4112_v31 = vld [vmem:[%s4376_s8 + $0x60] ss:$16 sps:$4 sm:$0xff]   ;;  %s3472_s8 = sshll.u32 %s2626_s19, 2  ;;  %s3491_s19 = sshll.u32 %s4316_s17, 4 }
 0x6d4   : > { %2847 = vmatprep.subr.bf16.mxu0 %v4106_v27  ;;  %2890 = vmatprep.subr.bf16.mxu1 %v4107_v41  ;;  %s2820_s12 = scalar_lea.vmem %s4814_s21, %s3472_s8 [#allocation5]  ;;  %s418_s8 = scalar_lea.vmem %s5459_s7, %s3491_s19 }
 0x6d5   : > { %s413_s20 = scalar_lea.vmem %s5458_s6, %s3491_s19  ;;  %s5402_s19 = scalar_lea.hbm %s5457_s5, %s3486_s10 }
 0x6d7   : > { %2848 = vmatpush1.bf16.msra.mxu0 %v4108_v55  ;;  %2891 = vmatpush1.bf16.msra.mxu1 %v4109_v50 }
 0x6d8   : > { %2849 = vmatprep.subr.bf16.mxu0 %v4110_v30  ;;  %2892 = vmatprep.subr.bf16.mxu1 %v4111_v1 }
 0x6db   : > { %2850 = vmatpush1.bf16.msra.mxu0 %v4112_v31  ;;  %2893 = vmatpush1.bf16.msra.mxu1 %v4113_v56 }
 0x6dc   : > { %2851 = vmatprep.subr.bf16.mxu0 %v4114_v58  ;;  %2894 = vmatprep.subr.bf16.mxu1 %v4115_v59 }
 0x6df   : > { %2852 = vmatpush1.bf16.msra.mxu0 %v4116_v60  ;;  %2895 = vmatpush1.bf16.msra.mxu1 %v4117_v4 }
 0x6e0   : > { %2853 = vmatprep.subr.bf16.mxu0 %v4118_v62  ;;  %2896 = vmatprep.subr.bf16.mxu1 %v4119_v25  ;;  %v2793_v62 = vpop.permute.xlu0 %2792 }
 0x6e1   : > { %vm2797_vm13 = vcmp.eq.s32.totalorder %v2793_v62, 1 }
 0x6e3   : > { %2854 = vmatpush1.bf16.msra.mxu0 %v4120_v63  ;;  %2897 = vmatpush1.bf16.msra.mxu1 %v4121_v0 }
 0x6e4   : > { %2855 = vmatprep.subr.bf16.mxu0 %v4122_v37  ;;  %2898 = vmatprep.subr.bf16.mxu1 %v4123_v42 }
 0x6e7   : > { %2856 = vmatpush1.bf16.msra.mxu0 %v4124_v7  ;;  %2899 = vmatpush1.bf16.msra.mxu1 %v4125_v45  ;;  %v2796_v45 = vpop.permute.xlu1 %2795 }
 0x6e8   : > { %2857 = vmatprep.subr.bf16.mxu0 %v4126_v14  ;;  %2900 = vmatprep.subr.bf16.mxu1 %v4127_v29  ;;  %vm2798_vm14 = vcmp.eq.s32.totalorder %v2796_v45, 1 }
 0x6eb   : > { %2858 = vmatpush1.bf16.msra.mxu0 %v4128_v5  ;;  %2901 = vmatpush1.bf16.msra.mxu1 %v4129_v15 }
 0x7a1   : > { %v2676_v9 = vpop.f32.mrb[56].mxu0  ;;  %v2719_v16 = vpop.f32.mrb[56].mxu1 }
 0x7a2   : > { %v2728_v18 = vadd.f32 %v2676_v9, %v2631_v6  ;;  %v2678_v11 = vpop.f32.mrb[57].mxu0  ;;  %v2721_v22 = vpop.f32.mrb[57].mxu1  ;;  %v2730_v47 = vadd.f32 %v2719_v16, %v2633_v12 }
 0x7a3   : > { %v2729_v23 = vadd.f32 %v2678_v11, %v2632_v20  ;;  %v2680_v21 = vpop.f32.mrb[58].mxu0  ;;  %v2723_v39 = vpop.f32.mrb[58].mxu1  ;;  %v2731_v57 = vadd.f32 %v2721_v22, %v2634_v35 }
 0x7a4   : > { %v3464_v32 = vmul.f32 -1.442695, %v2728_v18  ;;  %v2732_v10 = vadd.f32 %v2680_v21, %v2635_v24  ;;  %v2682_v34 = vpop.f32.mrb[59].mxu0  ;;  %v2725_v33 = vpop.f32.mrb[59].mxu1  ;;  %v2734_v53 = vadd.f32 %v2723_v39, %v2637_v43  ;;  %v2833_v39 = vld [vmem:[%s5363_s16 + $0x8] sm:$0xff]  ;;  %v2835_v43 = vld [vmem:[%s5363_s16 + $0x18] sm:$0xff] }
 0x7a5   : > { %v3466_v36 = vmul.f32 -1.442695, %v2729_v23  ;;  %v2733_v40 = vadd.f32 %v2682_v34, %v2636_v2  ;;  %v3468_v52 = vmul.f32 -1.442695, %v2731_v57  ;;  %v2735_v49 = vadd.f32 %v2725_v33, %v2638_v48  ;;  %v2836_v34 = vld [vmem:[%s5363_s16 + $0x20] sm:$0xff] }
 0x7a6   : > { %4002 = vpow2.f32 %v3464_v32  ;;  %v3465_v44 = vmul.f32 -1.442695, %v2732_v10 }
 0x7a7   : > { %4004 = vpow2.f32 %v3466_v36  ;;  %v3467_v8 = vmul.f32 -1.442695, %v2733_v40  ;;  %v3469_v19 = vmul.f32 -1.442695, %v2735_v49 }
 0x7a8   : > { %4006 = vpow2.f32 %v3465_v44 }
 0x7a9   : > { %4008 = vpow2.f32 %v3467_v8  ;;  %v2837_v8 = vld [vmem:[%s5363_s16 + $0x28] sm:$0xff] }
 0x7aa   : > { %4010 = vtanh.f32 %v2730_v47 }
 0x7ab   : > { %4012 = vpow2.f32 %v3468_v52 }
 0x7ac   : > { %4014 = vtanh.f32 %v2734_v53  ;;  %v2834_v53 = vld [vmem:[%s5363_s16 + $0x10] sm:$0xff] }
 0x7b0   : > { %v4003_v17 = vpop.eup %4002 }
 0x7b1   : > { %v4005_v61 = vpop.eup %4004  ;;  %v2744_v26 = vadd.f32 1.0, %v4003_v17 }
 0x7b2   : > { %v2756_v13 = vadd.f32 1.0, %v4005_v61  ;;  %v4007_v3 = vpop.eup %4006  ;;  %v2839_v61 = vld [vmem:[%s5363_s16 + $0x38] sm:$0xff] }
 0x7b3   : > { %4016 = vrcp.f32 %v2744_v26  ;;  %v2745_v38 = vadd.f32 1.0, %v4007_v3  ;;  %v4009_v27 = vpop.eup %4008 }
 0x7b4   : > { %4018 = vrcp.f32 %v2756_v13  ;;  %v2757_v41 = vadd.f32 1.0, %v4009_v27  ;;  %v4011_v55 = vpop.eup %4010 }
 0x7b5   : > { %4020 = vpow2.f32 %v3469_v19  ;;  %v4013_v50 = vpop.eup %4012  ;;  %v2838_v19 = vld [vmem:[%s5363_s16 + $0x30] sm:$0xff] }
 0x7b6   : > { %4022 = vrcp.f32 %v2745_v38  ;;  %v4015_v30 = vpop.eup %4014  ;;  %v2770_v58 = vadd.f32 1.0, %v4013_v50 }
 0x7b7   : > { %4024 = vrcp.f32 %v2757_v41 }
 0x7b8   : > { %4026 = vrcp.f32 %v2770_v58 }
 0x7bd   : > { %v4017_v1 = vpop.eup %4016 }
 0x7be   : > { %v4019_v31 = vpop.eup %4018  ;;  %v2778_v56 = vmul.f32 %v4017_v1, %v4011_v55 }
 0x7bf   : > { %v4021_v59 = vpop.eup %4020  ;;  %v2776_v60 = vmul.f32 %v4019_v31, %v5269_v46 }
 0x7c0   : > { %v4023_v4 = vpop.eup %4022  ;;  %v2771_v37 = vadd.f32 1.0, %v4021_v59 }
 0x7c1   : > { %v2780_v25 = vadd.f32 %v2778_v56, %v2776_v60  ;;  %v2779_v63 = vmul.f32 %v4023_v4, %v4015_v30  ;;  %v4025_v0 = vpop.eup %4024 }
 0x7c2   : > { %v2777_v42 = vmul.f32 %v4025_v0, %v5272_v51  ;;  %v4027_v5 = vpop.eup %4026 }
 0x7c3   : > { %4028 = vtanh.f32 %v2780_v25  ;;  %v5339_v7 = vsel %vm2797_vm13, %v2780_v25, %v5269_v46 }
 0x7c4   : > { %v2781_v14 = vadd.f32 %v2779_v63, %v2777_v42  ;;  %4030 = vrcp.f32 %v2771_v37  ;;  %v2994_v37 = vpop.permute.xlu0 %2993 }
 0x7c5   : > { %vm2998_vm15 = vcmp.eq.s32.totalorder %v2994_v37, 1 }
 0x7c6   : > { %4032 = vtanh.f32 %v2781_v14  ;;  %v5342_v29 = vsel %vm2798_vm14, %v2781_v14, %v5272_v51 }
 0x7cd   : > { %v4029_v15 = vpop.eup %4028 }
 0x7ce   : > { %v2784_v6 = vmul.f32 %v4029_v15, %v4027_v5  ;;  %v4031_v9 = vpop.eup %4030 }
 0x7d0   : > { %v4033_v16 = vpop.eup %4032  ;;  %v5349_v46 = vsel %vm2797_vm13, %v2784_v6, %v5279_v28  ;;  %v2809_v51 = vsel %vm2797_vm13, %v2784_v6, 0.0  ;;  %v2832_v28 = vld [vmem:[%s5363_s16] sm:$0xff]  ;;  %s3065_s16 = sshll.u32 %s4814_s21, 4  ;;  %s5393_s16 = int_to_ptr.vmem [resolvable:$true] %s3065_s16 }
 0x7d1   : > { %v2785_v18 = vmul.f32 %v4033_v16, %v4031_v9  ;;  %v2997_v9 = vpop.permute.xlu1 %2996  ;;  %s4130_s21 = scalar_lea.vmem %s5393_s16, 1024 }
 0x7d2   : > { %vm2999_vm0 = vcmp.eq.s32.totalorder %v2997_v9, 1  ;;  %p4131_p12 = scmp.ne.s32.totalorder %s5393_s16, %s4130_s21 }
 0x7d3   : > { %v5352_v20 = vsel %vm2798_vm14, %v2785_v18, %v5282_v54  ;;  %v2810_v11 = vsel %vm2798_vm14, %v2785_v18, 0.0 }
 0x7d4   : > { %v3562_v22 = vpack.c.bf16 %v2810_v11, %v2809_v51  ;;  %v2842_v23 = vpack.c.bf16 %v5352_v20, %v5349_v46  ;;  %p4132_p13 = pnand %p4131_p12, %p4296_p4 }
 0x7d6   : > { %3563 = vst [vmem:[%s2820_s12] sm:$0xff] %v3562_v22   ;;  %2876 = vmatmul.mubr.bf16.vlgmr.msra.gmra.mrb[60].mxu0 %v2842_v23  ;;  %2919 = vmatmul.mubr.bf16.vlgmr.msra.gmra.mrb[60].mxu1 %v2842_v23  ;;  %p4133_p0 = pneg %p4132_p13 }
 0x8a9   : > { %v2877_v54 = vpop.f32.mrb[60].mxu0  ;;  %v2920_v24 = vpop.f32.mrb[60].mxu1 }
 0x8aa   : > { %v2929_v21 = vadd.f32 %v2877_v54, %v2832_v28  ;;  %v2879_v32 = vpop.f32.mrb[61].mxu0  ;;  %v2922_v10 = vpop.f32.mrb[61].mxu1  ;;  %v2931_v17 = vadd.f32 %v2920_v24, %v2834_v53 }
 0x8ab   : > { %v2930_v2 = vadd.f32 %v2879_v32, %v2833_v39  ;;  %v2881_v33 = vpop.f32.mrb[62].mxu0  ;;  %v2924_v36 = vpop.f32.mrb[62].mxu1  ;;  %v2932_v49 = vadd.f32 %v2922_v10, %v2835_v43 }
 0x8ac   : > { %v3476_v40 = vmul.f32 -1.442695, %v2929_v21  ;;  %v2933_v44 = vadd.f32 %v2881_v33, %v2836_v34  ;;  %v2883_v35 = vpop.f32.mrb[63].mxu0  ;;  %v2926_v57 = vpop.f32.mrb[63].mxu1  ;;  %v2935_v3 = vadd.f32 %v2924_v36, %v2838_v19 }
 0x8ad   : > { %v3478_v12 = vmul.f32 -1.442695, %v2930_v2  ;;  %v2934_v47 = vadd.f32 %v2883_v35, %v2837_v8  ;;  %v3480_v26 = vmul.f32 -1.442695, %v2932_v49  ;;  %v2936_v13 = vadd.f32 %v2926_v57, %v2839_v61 }
 0x8ae   : > { %4034 = vpow2.f32 %v3476_v40  ;;  %v3477_v48 = vmul.f32 -1.442695, %v2933_v44 }
 0x8af   : > { %4036 = vpow2.f32 %v3478_v12  ;;  %v3479_v52 = vmul.f32 -1.442695, %v2934_v47  ;;  %v3481_v55 = vmul.f32 -1.442695, %v2936_v13 }
 0x8b0   : > { %4038 = vpow2.f32 %v3477_v48 }
 0x8b1   : > { %4040 = vpow2.f32 %v3479_v52 }
 0x8b2   : > { %4042 = vtanh.f32 %v2931_v17 }
 0x8b3   : > { %4044 = vpow2.f32 %v3480_v26 }
 0x8b4   : > { %4046 = vtanh.f32 %v2935_v3 }
 0x8b8   : > { %v4035_v38 = vpop.eup %4034 }
 0x8b9   : > { %v4037_v27 = vpop.eup %4036  ;;  %v2945_v41 = vadd.f32 1.0, %v4035_v38 }
 0x8ba   : > { %v2957_v50 = vadd.f32 1.0, %v4037_v27  ;;  %v4039_v30 = vpop.eup %4038 }
 0x8bb   : > { %4048 = vrcp.f32 %v2945_v41  ;;  %v2946_v1 = vadd.f32 1.0, %v4039_v30  ;;  %v4041_v31 = vpop.eup %4040 }
 0x8bc   : > { %4050 = vrcp.f32 %v2957_v50  ;;  %v2958_v56 = vadd.f32 1.0, %v4041_v31  ;;  %v4043_v58 = vpop.eup %4042 }
 0x8bd   : > { %4052 = vpow2.f32 %v3481_v55  ;;  %v4045_v59 = vpop.eup %4044 }
 0x8be   : > { %4054 = vrcp.f32 %v2946_v1  ;;  %v4047_v60 = vpop.eup %4046  ;;  %v2971_v63 = vadd.f32 1.0, %v4045_v59 }
 0x8bf   : > { %4056 = vrcp.f32 %v2958_v56 }
 0x8c0   : > { %4058 = vrcp.f32 %v2971_v63 }
 0x8c5   : > { %v4049_v4 = vpop.eup %4048 }
 0x8c6   : > { %v4051_v62 = vpop.eup %4050  ;;  %v2979_v25 = vmul.f32 %v4049_v4, %v4043_v58 }
 0x8c7   : > { %v4053_v0 = vpop.eup %4052  ;;  %v2977_v42 = vmul.f32 %v4051_v62, %v5339_v7 }
 0x8c8   : > { %v4055_v45 = vpop.eup %4054  ;;  %v2972_v6 = vadd.f32 1.0, %v4053_v0 }
 0x8c9   : > { %v2981_v14 = vadd.f32 %v2979_v25, %v2977_v42  ;;  %v2980_v5 = vmul.f32 %v4055_v45, %v4047_v60  ;;  %v4057_v15 = vpop.eup %4056 }
 0x8ca   : > { %v2978_v18 = vmul.f32 %v4057_v15, %v5342_v29  ;;  %v4059_v22 = vpop.eup %4058 }
 0x8cb   : > { %4060 = vtanh.f32 %v2981_v14  ;;  %v3006_v16 = vsel %vm2998_vm15, %v2981_v14, %v5339_v7 }
 0x8cc   : > { %3033 = vst [vmem:[%s418_s8] sm:$0xff] %v3006_v16  ;;  %v2982_v51 = vadd.f32 %v2980_v5, %v2978_v18  ;;  %4062 = vrcp.f32 %v2972_v6 }
 0x8ce   : > { %4064 = vtanh.f32 %v2982_v51  ;;  %v3007_v11 = vsel %vm2999_vm0, %v2982_v51, %v5342_v29 }
 0x8cf   : > { %3034 = vst [vmem:[%s418_s8 + $0x8] sm:$0xff] %v3007_v11  ;;  %s4212_s8 = smov [#allocation5]  }
 0x8d0   : > { %s4134_s17 = sshll.u32 %s4212_s8, 4  ;;  %s4135_s17 = int_to_ptr.vmem [resolvable:$false] %s4134_s17 }
 0x8d1   : > { %s4136_s12 = scalar_lea.vmem %s4135_s17, 2048  ;;  %p4137_p1 = scmp.lt.s32.totalorder %s5393_s16, %s4135_s17 }
 0x8d2   : > { %p4138_p2 = scmp.lt.s32.totalorder %s4136_s12, %s4130_s21 }
 0x8d4   : > { %p4139_p3 = por %p4138_p2, %p4137_p1 }
 0x8d5   : > { %v4061_v23 = vpop.eup %4060 }
 0x8d6   : > { %v2985_v7 = vmul.f32 %v4061_v23, %v4059_v22  ;;  %v4063_v28 = vpop.eup %4062  ;;  %p4140_p5 = pnand %p4139_p3, %p4133_p0 }
 0x8d8   : > { %v3000_v54 = vsel %vm2998_vm15, %v2985_v7, %v5349_v46  ;;  %v4065_v24 = vpop.eup %4064  ;;  %v3010_v21 = vsel %vm2998_vm15, %v2985_v7, 0.0 }
 0x8d9   : > { %3029 = vst [vmem:[%s413_s20] sm:$0xff] %v3000_v54  ;;  %v2986_v29 = vmul.f32 %v4065_v24, %v4063_v28 }
 0x8db   : > { %v3001_v39 = vsel %vm2999_vm0, %v2986_v29, %v5352_v20  ;;  %v3011_v32 = vsel %vm2999_vm0, %v2986_v29, 0.0 }
 0x8dc   : > { %v3567_v46 = vpack.c.bf16 %v3011_v32, %v3010_v21  ;;  %3030 = vst [vmem:[%s413_s20 + $0x8] sm:$0xff] %v3001_v39 }
 0x8de   : > { %3568 = vst [vmem:[%s3021_s18] sm:$0xff] %v3567_v46  }
 0x8df   : > { %4143 = shalt.err (!%p4140_p5)
}
 0x8e0   : > { %s4144_s30 = scalar_lea.hbm %s5402_s19, 1024  ;;  %s4148_s10 = scalar_lea.hbm %s5457_s5, 2048 }
 0x8e1   : > { %p4145_p6 = scmp.ne.s32.totalorder %s5402_s19, %s4144_s30  ;;  %p4149_p10 = scmp.lt.u32.totalorder %s5402_s19, %s5457_s5 }
 0x8e2   : > { %p4150_p11 = scmp.lt.u32.totalorder %s4148_s10, %s4144_s30  ;;  %p4152_p13 = scmp.lt.u32.totalorder %s4144_s30, %s5402_s19 }
 0x8e3   : > { %p4146_p7 = pnand %p4145_p6, %p4296_p4 }
 0x8e4   : > { %p4151_p12 = por %p4150_p11, %p4149_p10 }
 0x8e5   : > { %p4147_p9 = pneg %p4146_p7 }
 0x8e6   : > { %p4153_p0 = por %p4152_p13, %p4151_p12 }
 0x8e8   : > { %p4154_p1 = pnand %p4153_p0, %p4147_p9 }
 0x8ea   : > { %4157 = shalt.err (!%p4154_p1)
}
 0x8eb   : > { %s4213_s23 = smov 64   ;;  %s4214_s21 = smov 128  }
 0x8ec   : > { %s4215_s8 = smov 4  }
 0x8ed   : > { %3580 = dma.vmem_to_hbm [thread:$0]  (%p4296_p4), %s5393_s16, 1024, %s5402_s19, %s5406_s27, %s4213_s23, %s4214_s21, %s4215_s8  }
 0x8ee PF: > { %p3586_p2 = scmp.ge.s32.totalorder %s4208_s29, 2  ;;  %s3086_s17 = sand.u32 1, %s4188_s24  }
 0x8ef   : > { %s3087_s12 = scalar_lea.sflag [#allocation6], %s3086_s17 }
 0x8f0   : > { %p3583_p3 = pnand %p3586_p2, %p4303_p8 }
 0x8f2   : > { %4183 = dma.done.wait (!%p3583_p3), %s3087_s12, 1024  }
 0x8f3   : > { %4185 = vsyncadd (!%p3583_p3), %s3087_s12, 4294966272  ;;  %s21_s29 = sadd.s32 1, %s4208_s29   ;;  %s5466_s24 = smov %s4192_s25 }
 0x8f4   : > { %p18_p5 = scmp.ge.s32.totalorder %s21_s29, 4   ;;  %s5467_s25 = smov %s4196_s26 }
 0x8f5   : > { %s5468_s26 = smov %s4309_s14  ;;  %s5469_s27 = smov %s4204_s28 }
 0x8f6   : > { %s5470_s28 = smov %s5472_s9  ;;  %20 = sbr.rel (!%p18_p5) target bundleno = 4 (0x4), region = 132 }
 0x8fd   :  { %3108 = vsyncpa [#allocation6], 1 }
 0x8fe   :  { %3110 = vsyncpa [#allocation6 + $0x1], 1 }

</bundles_post_ra>
